<compile_context>
chip_gen: v7x
topology: tpu7x:2x2x1
jax: 0.10.0
libtpu: 0.0.40
codegen_flags: <defaults>
</compile_context>

<pallas_src>
import functools

import jax
import jax.numpy as jnp
from jax import lax
from jax.experimental import pallas as pl
from jax.experimental.pallas import tpu as pltpu

_BN_EPS = 1e-5


def _resblock_kernel(x_ref, w1_ref, gamma1_ref, beta1_ref,
                     w2_ref, gamma2_ref, beta2_ref, out_ref,
                     *, N, C, H, W, K):
    HW = H * W
    kc = (K - 1) // 2
    inv_cnt = 1.0 / float(N * HW)

    # ---------------- lane-position helpers (flattened p = h*W + w) ----------
    pos = lax.broadcasted_iota(jnp.int32, (1, HW), 1)
    wpos = (pos & (W - 1)) if (W & (W - 1)) == 0 else (pos % W)

    def tap_mask(dh, dw):
        """True where the input pixel (h+dh, w+dw) lies inside the image."""
        m = None

        def _and(a, b):
            return b if a is None else (a & b)

        if dh < 0:
            m = _and(m, pos >= (-dh) * W)
        elif dh > 0:
            m = _and(m, pos < (H - dh) * W)
        if dw < 0:
            m = _and(m, wpos >= -dw)
        elif dw > 0:
            m = _and(m, wpos < (W - dw))
        return m  # None => central column/row, no masking needed

    taps = [(kh, kw, (kh - kc) * W + (kw - kc))
            for kh in range(K) for kw in range(K)]
    masks = {(kh, kw): tap_mask(kh - kc, kw - kc) for kh, kw, _ in taps}

    # -------- pltpu.roll direction probe (independent of sign convention) ----
    rolled_iota = pltpu.roll(pos.astype(jnp.float32), 1, axis=1)
    probe = jnp.sum(jnp.where(pos == 0, rolled_iota, 0.0),
                    axis=1, keepdims=True)          # (1, 1)
    np_convention = probe > 1.5                      # True if roll == jnp.roll

    def shifted(rolls, s):
        """Array t with t[:, p] = v[:, (p + s) % HW], whichever convention."""
        if s % HW == 0:
            return rolls[s]
        return jnp.where(np_convention, rolls[s], rolls[-s])

    # ------- 3x3 conv on the VPU: lane rolls + masks + scalar-weight madds ---
    def conv(in_ch, w_ref_):
        # Pre-roll each (channel, shift) once; the symmetric +/-s set already
        # contains both convention candidates.
        rolls = []
        for cin in range(C):
            d = {}
            for _, _, s in taps:
                amt = (-s) % HW
                d[s] = in_ch[cin] if amt == 0 else pltpu.roll(in_ch[cin], amt, axis=1)
            rolls.append(d)

        acc = [jnp.zeros((N, HW), jnp.float32) for _ in range(C)]
        for kh, kw, s in taps:
            m = masks[(kh, kw)]
            base = (kh * K + kw) * C * C            # HWIO row-major flat index
            slabs = []
            for cin in range(C):
                t = shifted(rolls[cin], s)
                if m is not None:
                    t = jnp.where(m, t, 0.0)        # zero-padding semantics
                slabs.append(t)
            for cout in range(C):
                a = acc[cout]
                for cin in range(C):
                    a = a + w_ref_[base + cin * C + cout] * slabs[cin]
                acc[cout] = a
        return acc

    # ------------- training-mode BatchNorm with one-pass f32 stats -----------
    def bn(v, gamma, beta):
        s1 = jnp.sum(jnp.sum(v, axis=1, keepdims=True), axis=0, keepdims=True)
        s2 = jnp.sum(jnp.sum(v * v, axis=1, keepdims=True), axis=0, keepdims=True)
        mean = s1 * inv_cnt
        var = s2 * inv_cnt - mean * mean            # biased variance
        return gamma * (v - mean) * lax.rsqrt(var + _BN_EPS) + beta

    # ---------------------------- fused ResBlock -----------------------------
    x_ch = [x_ref[:, c, :] for c in range(C)]       # conv1 input + residual

    y = conv(x_ch, w1_ref)                          # conv1 (bias absorbed by BN)
    y = [jnp.maximum(bn(y[c], gamma1_ref[c], beta1_ref[c]), 0.0)
         for c in range(C)]                         # bn1 + relu (stays in VMEM)

    y = conv(y, w2_ref)                             # conv2
    for c in range(C):
        out_c = bn(y[c], gamma2_ref[c], beta2_ref[c]) + x_ch[c]   # bn2 + residual
        out_ref[:, c, :] = jnp.maximum(out_c, 0.0)                # relu, lane-dense


def resblock_forward(x_nchw, params):
    """ResBlock forward.  params = (w1, b1, g1, be1, w2, b2, g2, be2);
    conv weights in HWIO layout (K, K, Cin, Cout).  Conv biases are accepted but
    not passed to the kernel: a bias immediately before training-mode BatchNorm
    is exactly cancelled by the batch mean (variance unchanged)."""
    w1, b1, g1, be1, w2, b2, g2, be2 = params
    del b1, b2
    N, C, H, W = x_nchw.shape
    K = w1.shape[0]
    HW = H * W

    x_flat = x_nchw.reshape(N, C, HW).astype(jnp.float32)   # free reshape, lane-dense

    kernel = functools.partial(_resblock_kernel, N=N, C=C, H=H, W=W, K=K)
    vmem = pl.BlockSpec(memory_space=pltpu.MemorySpace.VMEM)
    smem = pl.BlockSpec(memory_space=pltpu.MemorySpace.SMEM)

    out_flat = pl.pallas_call(
        kernel,
        out_shape=jax.ShapeDtypeStruct((N, C, HW), jnp.float32),
        in_specs=[vmem,          # x, whole array in VMEM
                  smem, smem, smem,   # w1 (flat), gamma1, beta1  (scalars in SMEM)
                  smem, smem, smem],  # w2 (flat), gamma2, beta2
        out_specs=vmem,
    )(x_flat,
      w1.reshape(-1).astype(jnp.float32),
      g1.astype(jnp.float32), be1.astype(jnp.float32),
      w2.reshape(-1).astype(jnp.float32),
      g2.astype(jnp.float32), be2.astype(jnp.float32))
    return out_flat.reshape(N, C, H, W)


# ----------------------------- pure-JAX reference ----------------------------
def _ref_conv(x_nhwc, w_hwio, b):
    y = lax.conv_general_dilated(x_nhwc, w_hwio, (1, 1), "SAME",
                                 dimension_numbers=("NHWC", "HWIO", "NHWC"))
    return y + b.reshape(1, 1, 1, -1)


def _ref_bn(y, g, be):
    mean = jnp.mean(y, axis=(0, 1, 2), keepdims=True)
    var = jnp.mean((y - mean) ** 2, axis=(0, 1, 2), keepdims=True)
    return (g.reshape(1, 1, 1, -1) * (y - mean) * lax.rsqrt(var + _BN_EPS)
            + be.reshape(1, 1, 1, -1))


def resblock_reference(x_nchw, params):
    w1, b1, g1, be1, w2, b2, g2, be2 = params
    x = jnp.transpose(x_nchw, (0, 2, 3, 1))
    y = jnp.maximum(_ref_bn(_ref_conv(x, w1, b1), g1, be1), 0.0)
    y = _ref_bn(_ref_conv(y, w2, b2), g2, be2) + x
    y = jnp.maximum(y, 0.0)
    return jnp.transpose(y, (0, 3, 1, 2))


# -----------------------------------------------------------------------------
if __name__ == "__main__":
    N, C, H, W = 2, 4, 16, 16
    K = 3

    key = jax.random.PRNGKey(0)
    kx, kw1, kb1, kg1, kbe1, kw2, kb2, kg2, kbe2 = jax.random.split(key, 9)

    x = jax.random.normal(kx, (N, C, H, W), jnp.float32)
    w1 = 0.1 * jax.random.normal(kw1, (K, K, C, C), jnp.float32)
    b1 = 0.1 * jax.random.normal(kb1, (C,), jnp.float32)
    g1 = 1.0 + 0.1 * jax.random.normal(kg1, (C,), jnp.float32)
    be1 = 0.1 * jax.random.normal(kbe1, (C,), jnp.float32)
    w2 = 0.1 * jax.random.normal(kw2, (K, K, C, C), jnp.float32)
    b2 = 0.1 * jax.random.normal(kb2, (C,), jnp.float32)
    g2 = 1.0 + 0.1 * jax.random.normal(kg2, (C,), jnp.float32)
    be2 = 0.1 * jax.random.normal(kbe2, (C,), jnp.float32)

    params = (w1, b1, g1, be1, w2, b2, g2, be2)

    out = jax.block_until_ready(resblock_forward(x, params))
    ref = jax.block_until_ready(resblock_reference(x, params))

    assert out.shape == (N, C, H, W), out.shape
    max_diff = float(jnp.max(jnp.abs(out - ref)))
    assert bool(jnp.allclose(out, ref, atol=2e-3, rtol=2e-3)), (
        f"max abs diff = {max_diff}")

    print("KERNEL_OK")
</pallas_src>

<mosaic_0001>
module attributes {stable_mosaic.version = 11 : i64} {
  func.func @_resblock_kernel(%arg0: memref<2x4x256xf32, #tpu.memory_space<vmem>>, %arg1: memref<144xf32, #tpu.memory_space<smem>>, %arg2: memref<4xf32, #tpu.memory_space<smem>>, %arg3: memref<4xf32, #tpu.memory_space<smem>>, %arg4: memref<144xf32, #tpu.memory_space<smem>>, %arg5: memref<4xf32, #tpu.memory_space<smem>>, %arg6: memref<4xf32, #tpu.memory_space<smem>>, %arg7: memref<2x4x256xf32, #tpu.memory_space<vmem>>) attributes {dimension_semantics = [], scalar_prefetch = 0 : i64, scratch_operands = 0 : i64, tpu.core_type = #tpu.core_type<tc>} {
    %0 = tpu.iota {dimensions = array<i32: 1>} : vector<1x256xi32>
    %c15_i32 = arith.constant 15 : i32
    %1 = vector.broadcast %c15_i32 : i32 to vector<1x256xi32>
    %2 = arith.andi %0, %1 : vector<1x256xi32>
    %c16_i32 = arith.constant 16 : i32
    %3 = vector.broadcast %c16_i32 : i32 to vector<1x256xi32>
    %4 = arith.cmpi sge, %0, %3 : vector<1x256xi32>
    %c1_i32 = arith.constant 1 : i32
    %5 = vector.broadcast %c1_i32 : i32 to vector<1x256xi32>
    %6 = arith.cmpi sge, %2, %5 : vector<1x256xi32>
    %7 = arith.andi %4, %6 : vector<1x256xi1>
    %c16_i32_0 = arith.constant 16 : i32
    %8 = vector.broadcast %c16_i32_0 : i32 to vector<1x256xi32>
    %9 = arith.cmpi sge, %0, %8 : vector<1x256xi32>
    %c16_i32_1 = arith.constant 16 : i32
    %10 = vector.broadcast %c16_i32_1 : i32 to vector<1x256xi32>
    %11 = arith.cmpi sge, %0, %10 : vector<1x256xi32>
    %c15_i32_2 = arith.constant 15 : i32
    %12 = vector.broadcast %c15_i32_2 : i32 to vector<1x256xi32>
    %13 = arith.cmpi slt, %2, %12 : vector<1x256xi32>
    %14 = arith.andi %11, %13 : vector<1x256xi1>
    %c1_i32_3 = arith.constant 1 : i32
    %15 = vector.broadcast %c1_i32_3 : i32 to vector<1x256xi32>
    %16 = arith.cmpi sge, %2, %15 : vector<1x256xi32>
    %c15_i32_4 = arith.constant 15 : i32
    %17 = vector.broadcast %c15_i32_4 : i32 to vector<1x256xi32>
    %18 = arith.cmpi slt, %2, %17 : vector<1x256xi32>
    %c240_i32 = arith.constant 240 : i32
    %19 = vector.broadcast %c240_i32 : i32 to vector<1x256xi32>
    %20 = arith.cmpi slt, %0, %19 : vector<1x256xi32>
    %c1_i32_5 = arith.constant 1 : i32
    %21 = vector.broadcast %c1_i32_5 : i32 to vector<1x256xi32>
    %22 = arith.cmpi sge, %2, %21 : vector<1x256xi32>
    %23 = arith.andi %20, %22 : vector<1x256xi1>
    %c240_i32_6 = arith.constant 240 : i32
    %24 = vector.broadcast %c240_i32_6 : i32 to vector<1x256xi32>
    %25 = arith.cmpi slt, %0, %24 : vector<1x256xi32>
    %c240_i32_7 = arith.constant 240 : i32
    %26 = vector.broadcast %c240_i32_7 : i32 to vector<1x256xi32>
    %27 = arith.cmpi slt, %0, %26 : vector<1x256xi32>
    %c15_i32_8 = arith.constant 15 : i32
    %28 = vector.broadcast %c15_i32_8 : i32 to vector<1x256xi32>
    %29 = arith.cmpi slt, %2, %28 : vector<1x256xi32>
    %30 = arith.andi %27, %29 : vector<1x256xi1>
    %31 = arith.sitofp %0 : vector<1x256xi32> to vector<1x256xf32>
    %c1_i32_9 = arith.constant 1 : i32
    %32 = tpu.dynamic_rotate %31 by %c1_i32_9 dim 1 : vector<1x256xf32>, i32 -> vector<1x256xf32>
    %c0_i32 = arith.constant 0 : i32
    %33 = vector.broadcast %c0_i32 : i32 to vector<1x256xi32>
    %34 = arith.cmpi eq, %0, %33 : vector<1x256xi32>
    %cst = arith.constant 0.000000e+00 : f32
    %35 = vector.broadcast %cst : f32 to vector<1x256xf32>
    %36 = arith.select %34, %32, %35 : vector<1x256xi1>, vector<1x256xf32>
    %cst_10 = arith.constant dense<0.000000e+00> : vector<1xf32>
    %37 = vector.multi_reduction <add>, %36, %cst_10 [1] : vector<1x256xf32> to vector<1xf32>
    %38 = vector.shape_cast %37 : vector<1xf32> to vector<1x1xf32>
    %cst_11 = arith.constant 1.500000e+00 : f32
    %39 = vector.broadcast %cst_11 : f32 to vector<1x1xf32>
    %40 = arith.cmpf ogt, %38, %39 : vector<1x1xf32>
    %c0 = arith.constant 0 : index
    %c0_12 = arith.constant 0 : index
    %c0_13 = arith.constant 0 : index
    %41 = vector.load %arg0[%c0, %c0_12, %c0_13] : memref<2x4x256xf32, #tpu.memory_space<vmem>>, vector<2x1x256xf32>
    %42 = vector.shape_cast %41 : vector<2x1x256xf32> to vector<2x256xf32>
    %c0_14 = arith.constant 0 : index
    %c1 = arith.constant 1 : index
    %c0_15 = arith.constant 0 : index
    %43 = vector.load %arg0[%c0_14, %c1, %c0_15] : memref<2x4x256xf32, #tpu.memory_space<vmem>>, vector<2x1x256xf32>
    %44 = vector.shape_cast %43 : vector<2x1x256xf32> to vector<2x256xf32>
    %c0_16 = arith.constant 0 : index
    %c2 = arith.constant 2 : index
    %c0_17 = arith.constant 0 : index
    %45 = vector.load %arg0[%c0_16, %c2, %c0_17] : memref<2x4x256xf32, #tpu.memory_space<vmem>>, vector<2x1x256xf32>
    %46 = vector.shape_cast %45 : vector<2x1x256xf32> to vector<2x256xf32>
    %c0_18 = arith.constant 0 : index
    %c3 = arith.constant 3 : index
    %c0_19 = arith.constant 0 : index
    %47 = vector.load %arg0[%c0_18, %c3, %c0_19] : memref<2x4x256xf32, #tpu.memory_space<vmem>>, vector<2x1x256xf32>
    %48 = vector.shape_cast %47 : vector<2x1x256xf32> to vector<2x256xf32>
    %c17_i32 = arith.constant 17 : i32
    %49 = tpu.dynamic_rotate %42 by %c17_i32 dim 1 : vector<2x256xf32>, i32 -> vector<2x256xf32>
    %c16_i32_20 = arith.constant 16 : i32
    %50 = tpu.dynamic_rotate %42 by %c16_i32_20 dim 1 : vector<2x256xf32>, i32 -> vector<2x256xf32>
    %c15_i32_21 = arith.constant 15 : i32
    %51 = tpu.dynamic_rotate %42 by %c15_i32_21 dim 1 : vector<2x256xf32>, i32 -> vector<2x256xf32>
    %c1_i32_22 = arith.constant 1 : i32
    %52 = tpu.dynamic_rotate %42 by %c1_i32_22 dim 1 : vector<2x256xf32>, i32 -> vector<2x256xf32>
    %c255_i32 = arith.constant 255 : i32
    %53 = tpu.dynamic_rotate %42 by %c255_i32 dim 1 : vector<2x256xf32>, i32 -> vector<2x256xf32>
    %c241_i32 = arith.constant 241 : i32
    %54 = tpu.dynamic_rotate %42 by %c241_i32 dim 1 : vector<2x256xf32>, i32 -> vector<2x256xf32>
    %c240_i32_23 = arith.constant 240 : i32
    %55 = tpu.dynamic_rotate %42 by %c240_i32_23 dim 1 : vector<2x256xf32>, i32 -> vector<2x256xf32>
    %c239_i32 = arith.constant 239 : i32
    %56 = tpu.dynamic_rotate %42 by %c239_i32 dim 1 : vector<2x256xf32>, i32 -> vector<2x256xf32>
    %c17_i32_24 = arith.constant 17 : i32
    %57 = tpu.dynamic_rotate %44 by %c17_i32_24 dim 1 : vector<2x256xf32>, i32 -> vector<2x256xf32>
    %c16_i32_25 = arith.constant 16 : i32
    %58 = tpu.dynamic_rotate %44 by %c16_i32_25 dim 1 : vector<2x256xf32>, i32 -> vector<2x256xf32>
    %c15_i32_26 = arith.constant 15 : i32
    %59 = tpu.dynamic_rotate %44 by %c15_i32_26 dim 1 : vector<2x256xf32>, i32 -> vector<2x256xf32>
    %c1_i32_27 = arith.constant 1 : i32
    %60 = tpu.dynamic_rotate %44 by %c1_i32_27 dim 1 : vector<2x256xf32>, i32 -> vector<2x256xf32>
    %c255_i32_28 = arith.constant 255 : i32
    %61 = tpu.dynamic_rotate %44 by %c255_i32_28 dim 1 : vector<2x256xf32>, i32 -> vector<2x256xf32>
    %c241_i32_29 = arith.constant 241 : i32
    %62 = tpu.dynamic_rotate %44 by %c241_i32_29 dim 1 : vector<2x256xf32>, i32 -> vector<2x256xf32>
    %c240_i32_30 = arith.constant 240 : i32
    %63 = tpu.dynamic_rotate %44 by %c240_i32_30 dim 1 : vector<2x256xf32>, i32 -> vector<2x256xf32>
    %c239_i32_31 = arith.constant 239 : i32
    %64 = tpu.dynamic_rotate %44 by %c239_i32_31 dim 1 : vector<2x256xf32>, i32 -> vector<2x256xf32>
    %c17_i32_32 = arith.constant 17 : i32
    %65 = tpu.dynamic_rotate %46 by %c17_i32_32 dim 1 : vector<2x256xf32>, i32 -> vector<2x256xf32>
    %c16_i32_33 = arith.constant 16 : i32
    %66 = tpu.dynamic_rotate %46 by %c16_i32_33 dim 1 : vector<2x256xf32>, i32 -> vector<2x256xf32>
    %c15_i32_34 = arith.constant 15 : i32
    %67 = tpu.dynamic_rotate %46 by %c15_i32_34 dim 1 : vector<2x256xf32>, i32 -> vector<2x256xf32>
    %c1_i32_35 = arith.constant 1 : i32
    %68 = tpu.dynamic_rotate %46 by %c1_i32_35 dim 1 : vector<2x256xf32>, i32 -> vector<2x256xf32>
    %c255_i32_36 = arith.constant 255 : i32
    %69 = tpu.dynamic_rotate %46 by %c255_i32_36 dim 1 : vector<2x256xf32>, i32 -> vector<2x256xf32>
    %c241_i32_37 = arith.constant 241 : i32
    %70 = tpu.dynamic_rotate %46 by %c241_i32_37 dim 1 : vector<2x256xf32>, i32 -> vector<2x256xf32>
    %c240_i32_38 = arith.constant 240 : i32
    %71 = tpu.dynamic_rotate %46 by %c240_i32_38 dim 1 : vector<2x256xf32>, i32 -> vector<2x256xf32>
    %c239_i32_39 = arith.constant 239 : i32
    %72 = tpu.dynamic_rotate %46 by %c239_i32_39 dim 1 : vector<2x256xf32>, i32 -> vector<2x256xf32>
    %c17_i32_40 = arith.constant 17 : i32
    %73 = tpu.dynamic_rotate %48 by %c17_i32_40 dim 1 : vector<2x256xf32>, i32 -> vector<2x256xf32>
    %c16_i32_41 = arith.constant 16 : i32
    %74 = tpu.dynamic_rotate %48 by %c16_i32_41 dim 1 : vector<2x256xf32>, i32 -> vector<2x256xf32>
    %c15_i32_42 = arith.constant 15 : i32
    %75 = tpu.dynamic_rotate %48 by %c15_i32_42 dim 1 : vector<2x256xf32>, i32 -> vector<2x256xf32>
    %c1_i32_43 = arith.constant 1 : i32
    %76 = tpu.dynamic_rotate %48 by %c1_i32_43 dim 1 : vector<2x256xf32>, i32 -> vector<2x256xf32>
    %c255_i32_44 = arith.constant 255 : i32
    %77 = tpu.dynamic_rotate %48 by %c255_i32_44 dim 1 : vector<2x256xf32>, i32 -> vector<2x256xf32>
    %c241_i32_45 = arith.constant 241 : i32
    %78 = tpu.dynamic_rotate %48 by %c241_i32_45 dim 1 : vector<2x256xf32>, i32 -> vector<2x256xf32>
    %c240_i32_46 = arith.constant 240 : i32
    %79 = tpu.dynamic_rotate %48 by %c240_i32_46 dim 1 : vector<2x256xf32>, i32 -> vector<2x256xf32>
    %c239_i32_47 = arith.constant 239 : i32
    %80 = tpu.dynamic_rotate %48 by %c239_i32_47 dim 1 : vector<2x256xf32>, i32 -> vector<2x256xf32>
    %cst_48 = arith.constant 0.000000e+00 : f32
    %81 = vector.broadcast %cst_48 : f32 to vector<2x256xf32>
    %cst_49 = arith.constant 0.000000e+00 : f32
    %82 = vector.broadcast %cst_49 : f32 to vector<2x256xf32>
    %cst_50 = arith.constant 0.000000e+00 : f32
    %83 = vector.broadcast %cst_50 : f32 to vector<2x256xf32>
    %cst_51 = arith.constant 0.000000e+00 : f32
    %84 = vector.broadcast %cst_51 : f32 to vector<2x256xf32>
    %85 = vector.shape_cast %40 : vector<1x1xi1> to vector<1x1xi1>
    %86 = vector.broadcast %85 : vector<1x1xi1> to vector<2x256xi1>
    %87 = arith.select %86, %49, %56 : vector<2x256xi1>, vector<2x256xf32>
    %cst_52 = arith.constant 0.000000e+00 : f32
    %88 = vector.shape_cast %7 : vector<1x256xi1> to vector<1x256xi1>
    %89 = vector.broadcast %88 : vector<1x256xi1> to vector<2x256xi1>
    %90 = vector.broadcast %cst_52 : f32 to vector<2x256xf32>
    %91 = arith.select %89, %87, %90 : vector<2x256xi1>, vector<2x256xf32>
    %92 = vector.shape_cast %40 : vector<1x1xi1> to vector<1x1xi1>
    %93 = vector.broadcast %92 : vector<1x1xi1> to vector<2x256xi1>
    %94 = arith.select %93, %57, %64 : vector<2x256xi1>, vector<2x256xf32>
    %cst_53 = arith.constant 0.000000e+00 : f32
    %95 = vector.shape_cast %7 : vector<1x256xi1> to vector<1x256xi1>
    %96 = vector.broadcast %95 : vector<1x256xi1> to vector<2x256xi1>
    %97 = vector.broadcast %cst_53 : f32 to vector<2x256xf32>
    %98 = arith.select %96, %94, %97 : vector<2x256xi1>, vector<2x256xf32>
    %99 = vector.shape_cast %40 : vector<1x1xi1> to vector<1x1xi1>
    %100 = vector.broadcast %99 : vector<1x1xi1> to vector<2x256xi1>
    %101 = arith.select %100, %65, %72 : vector<2x256xi1>, vector<2x256xf32>
    %cst_54 = arith.constant 0.000000e+00 : f32
    %102 = vector.shape_cast %7 : vector<1x256xi1> to vector<1x256xi1>
    %103 = vector.broadcast %102 : vector<1x256xi1> to vector<2x256xi1>
    %104 = vector.broadcast %cst_54 : f32 to vector<2x256xf32>
    %105 = arith.select %103, %101, %104 : vector<2x256xi1>, vector<2x256xf32>
    %106 = vector.shape_cast %40 : vector<1x1xi1> to vector<1x1xi1>
    %107 = vector.broadcast %106 : vector<1x1xi1> to vector<2x256xi1>
    %108 = arith.select %107, %73, %80 : vector<2x256xi1>, vector<2x256xf32>
    %cst_55 = arith.constant 0.000000e+00 : f32
    %109 = vector.shape_cast %7 : vector<1x256xi1> to vector<1x256xi1>
    %110 = vector.broadcast %109 : vector<1x256xi1> to vector<2x256xi1>
    %111 = vector.broadcast %cst_55 : f32 to vector<2x256xf32>
    %112 = arith.select %110, %108, %111 : vector<2x256xi1>, vector<2x256xf32>
    %c0_56 = arith.constant 0 : index
    %113 = memref.load %arg1[%c0_56] : memref<144xf32, #tpu.memory_space<smem>>
    %114 = vector.broadcast %113 : f32 to vector<2x256xf32>
    %115 = arith.mulf %114, %91 : vector<2x256xf32>
    %116 = arith.addf %81, %115 : vector<2x256xf32>
    %c4 = arith.constant 4 : index
    %117 = memref.load %arg1[%c4] : memref<144xf32, #tpu.memory_space<smem>>
    %118 = vector.broadcast %117 : f32 to vector<2x256xf32>
    %119 = arith.mulf %118, %98 : vector<2x256xf32>
    %120 = arith.addf %116, %119 : vector<2x256xf32>
    %c8 = arith.constant 8 : index
    %121 = memref.load %arg1[%c8] : memref<144xf32, #tpu.memory_space<smem>>
    %122 = vector.broadcast %121 : f32 to vector<2x256xf32>
    %123 = arith.mulf %122, %105 : vector<2x256xf32>
    %124 = arith.addf %120, %123 : vector<2x256xf32>
    %c12 = arith.constant 12 : index
    %125 = memref.load %arg1[%c12] : memref<144xf32, #tpu.memory_space<smem>>
    %126 = vector.broadcast %125 : f32 to vector<2x256xf32>
    %127 = arith.mulf %126, %112 : vector<2x256xf32>
    %128 = arith.addf %124, %127 : vector<2x256xf32>
    %c1_57 = arith.constant 1 : index
    %129 = memref.load %arg1[%c1_57] : memref<144xf32, #tpu.memory_space<smem>>
    %130 = vector.broadcast %129 : f32 to vector<2x256xf32>
    %131 = arith.mulf %130, %91 : vector<2x256xf32>
    %132 = arith.addf %82, %131 : vector<2x256xf32>
    %c5 = arith.constant 5 : index
    %133 = memref.load %arg1[%c5] : memref<144xf32, #tpu.memory_space<smem>>
    %134 = vector.broadcast %133 : f32 to vector<2x256xf32>
    %135 = arith.mulf %134, %98 : vector<2x256xf32>
    %136 = arith.addf %132, %135 : vector<2x256xf32>
    %c9 = arith.constant 9 : index
    %137 = memref.load %arg1[%c9] : memref<144xf32, #tpu.memory_space<smem>>
    %138 = vector.broadcast %137 : f32 to vector<2x256xf32>
    %139 = arith.mulf %138, %105 : vector<2x256xf32>
    %140 = arith.addf %136, %139 : vector<2x256xf32>
    %c13 = arith.constant 13 : index
    %141 = memref.load %arg1[%c13] : memref<144xf32, #tpu.memory_space<smem>>
    %142 = vector.broadcast %141 : f32 to vector<2x256xf32>
    %143 = arith.mulf %142, %112 : vector<2x256xf32>
    %144 = arith.addf %140, %143 : vector<2x256xf32>
    %c2_58 = arith.constant 2 : index
    %145 = memref.load %arg1[%c2_58] : memref<144xf32, #tpu.memory_space<smem>>
    %146 = vector.broadcast %145 : f32 to vector<2x256xf32>
    %147 = arith.mulf %146, %91 : vector<2x256xf32>
    %148 = arith.addf %83, %147 : vector<2x256xf32>
    %c6 = arith.constant 6 : index
    %149 = memref.load %arg1[%c6] : memref<144xf32, #tpu.memory_space<smem>>
    %150 = vector.broadcast %149 : f32 to vector<2x256xf32>
    %151 = arith.mulf %150, %98 : vector<2x256xf32>
    %152 = arith.addf %148, %151 : vector<2x256xf32>
    %c10 = arith.constant 10 : index
    %153 = memref.load %arg1[%c10] : memref<144xf32, #tpu.memory_space<smem>>
    %154 = vector.broadcast %153 : f32 to vector<2x256xf32>
    %155 = arith.mulf %154, %105 : vector<2x256xf32>
    %156 = arith.addf %152, %155 : vector<2x256xf32>
    %c14 = arith.constant 14 : index
    %157 = memref.load %arg1[%c14] : memref<144xf32, #tpu.memory_space<smem>>
    %158 = vector.broadcast %157 : f32 to vector<2x256xf32>
    %159 = arith.mulf %158, %112 : vector<2x256xf32>
    %160 = arith.addf %156, %159 : vector<2x256xf32>
    %c3_59 = arith.constant 3 : index
    %161 = memref.load %arg1[%c3_59] : memref<144xf32, #tpu.memory_space<smem>>
    %162 = vector.broadcast %161 : f32 to vector<2x256xf32>
    %163 = arith.mulf %162, %91 : vector<2x256xf32>
    %164 = arith.addf %84, %163 : vector<2x256xf32>
    %c7 = arith.constant 7 : index
    %165 = memref.load %arg1[%c7] : memref<144xf32, #tpu.memory_space<smem>>
    %166 = vector.broadcast %165 : f32 to vector<2x256xf32>
    %167 = arith.mulf %166, %98 : vector<2x256xf32>
    %168 = arith.addf %164, %167 : vector<2x256xf32>
    %c11 = arith.constant 11 : index
    %169 = memref.load %arg1[%c11] : memref<144xf32, #tpu.memory_space<smem>>
    %170 = vector.broadcast %169 : f32 to vector<2x256xf32>
    %171 = arith.mulf %170, %105 : vector<2x256xf32>
    %172 = arith.addf %168, %171 : vector<2x256xf32>
    %c15 = arith.constant 15 : index
    %173 = memref.load %arg1[%c15] : memref<144xf32, #tpu.memory_space<smem>>
    %174 = vector.broadcast %173 : f32 to vector<2x256xf32>
    %175 = arith.mulf %174, %112 : vector<2x256xf32>
    %176 = arith.addf %172, %175 : vector<2x256xf32>
    %177 = vector.shape_cast %40 : vector<1x1xi1> to vector<1x1xi1>
    %178 = vector.broadcast %177 : vector<1x1xi1> to vector<2x256xi1>
    %179 = arith.select %178, %50, %55 : vector<2x256xi1>, vector<2x256xf32>
    %cst_60 = arith.constant 0.000000e+00 : f32
    %180 = vector.shape_cast %9 : vector<1x256xi1> to vector<1x256xi1>
    %181 = vector.broadcast %180 : vector<1x256xi1> to vector<2x256xi1>
    %182 = vector.broadcast %cst_60 : f32 to vector<2x256xf32>
    %183 = arith.select %181, %179, %182 : vector<2x256xi1>, vector<2x256xf32>
    %184 = vector.shape_cast %40 : vector<1x1xi1> to vector<1x1xi1>
    %185 = vector.broadcast %184 : vector<1x1xi1> to vector<2x256xi1>
    %186 = arith.select %185, %58, %63 : vector<2x256xi1>, vector<2x256xf32>
    %cst_61 = arith.constant 0.000000e+00 : f32
    %187 = vector.shape_cast %9 : vector<1x256xi1> to vector<1x256xi1>
    %188 = vector.broadcast %187 : vector<1x256xi1> to vector<2x256xi1>
    %189 = vector.broadcast %cst_61 : f32 to vector<2x256xf32>
    %190 = arith.select %188, %186, %189 : vector<2x256xi1>, vector<2x256xf32>
    %191 = vector.shape_cast %40 : vector<1x1xi1> to vector<1x1xi1>
    %192 = vector.broadcast %191 : vector<1x1xi1> to vector<2x256xi1>
    %193 = arith.select %192, %66, %71 : vector<2x256xi1>, vector<2x256xf32>
    %cst_62 = arith.constant 0.000000e+00 : f32
    %194 = vector.shape_cast %9 : vector<1x256xi1> to vector<1x256xi1>
    %195 = vector.broadcast %194 : vector<1x256xi1> to vector<2x256xi1>
    %196 = vector.broadcast %cst_62 : f32 to vector<2x256xf32>
    %197 = arith.select %195, %193, %196 : vector<2x256xi1>, vector<2x256xf32>
    %198 = vector.shape_cast %40 : vector<1x1xi1> to vector<1x1xi1>
    %199 = vector.broadcast %198 : vector<1x1xi1> to vector<2x256xi1>
    %200 = arith.select %199, %74, %79 : vector<2x256xi1>, vector<2x256xf32>
    %cst_63 = arith.constant 0.000000e+00 : f32
    %201 = vector.shape_cast %9 : vector<1x256xi1> to vector<1x256xi1>
    %202 = vector.broadcast %201 : vector<1x256xi1> to vector<2x256xi1>
    %203 = vector.broadcast %cst_63 : f32 to vector<2x256xf32>
    %204 = arith.select %202, %200, %203 : vector<2x256xi1>, vector<2x256xf32>
    %c16 = arith.constant 16 : index
    %205 = memref.load %arg1[%c16] : memref<144xf32, #tpu.memory_space<smem>>
    %206 = vector.broadcast %205 : f32 to vector<2x256xf32>
    %207 = arith.mulf %206, %183 : vector<2x256xf32>
    %208 = arith.addf %128, %207 : vector<2x256xf32>
    %c20 = arith.constant 20 : index
    %209 = memref.load %arg1[%c20] : memref<144xf32, #tpu.memory_space<smem>>
    %210 = vector.broadcast %209 : f32 to vector<2x256xf32>
    %211 = arith.mulf %210, %190 : vector<2x256xf32>
    %212 = arith.addf %208, %211 : vector<2x256xf32>
    %c24 = arith.constant 24 : index
    %213 = memref.load %arg1[%c24] : memref<144xf32, #tpu.memory_space<smem>>
    %214 = vector.broadcast %213 : f32 to vector<2x256xf32>
    %215 = arith.mulf %214, %197 : vector<2x256xf32>
    %216 = arith.addf %212, %215 : vector<2x256xf32>
    %c28 = arith.constant 28 : index
    %217 = memref.load %arg1[%c28] : memref<144xf32, #tpu.memory_space<smem>>
    %218 = vector.broadcast %217 : f32 to vector<2x256xf32>
    %219 = arith.mulf %218, %204 : vector<2x256xf32>
    %220 = arith.addf %216, %219 : vector<2x256xf32>
    %c17 = arith.constant 17 : index
    %221 = memref.load %arg1[%c17] : memref<144xf32, #tpu.memory_space<smem>>
    %222 = vector.broadcast %221 : f32 to vector<2x256xf32>
    %223 = arith.mulf %222, %183 : vector<2x256xf32>
    %224 = arith.addf %144, %223 : vector<2x256xf32>
    %c21 = arith.constant 21 : index
    %225 = memref.load %arg1[%c21] : memref<144xf32, #tpu.memory_space<smem>>
    %226 = vector.broadcast %225 : f32 to vector<2x256xf32>
    %227 = arith.mulf %226, %190 : vector<2x256xf32>
    %228 = arith.addf %224, %227 : vector<2x256xf32>
    %c25 = arith.constant 25 : index
    %229 = memref.load %arg1[%c25] : memref<144xf32, #tpu.memory_space<smem>>
    %230 = vector.broadcast %229 : f32 to vector<2x256xf32>
    %231 = arith.mulf %230, %197 : vector<2x256xf32>
    %232 = arith.addf %228, %231 : vector<2x256xf32>
    %c29 = arith.constant 29 : index
    %233 = memref.load %arg1[%c29] : memref<144xf32, #tpu.memory_space<smem>>
    %234 = vector.broadcast %233 : f32 to vector<2x256xf32>
    %235 = arith.mulf %234, %204 : vector<2x256xf32>
    %236 = arith.addf %232, %235 : vector<2x256xf32>
    %c18 = arith.constant 18 : index
    %237 = memref.load %arg1[%c18] : memref<144xf32, #tpu.memory_space<smem>>
    %238 = vector.broadcast %237 : f32 to vector<2x256xf32>
    %239 = arith.mulf %238, %183 : vector<2x256xf32>
    %240 = arith.addf %160, %239 : vector<2x256xf32>
    %c22 = arith.constant 22 : index
    %241 = memref.load %arg1[%c22] : memref<144xf32, #tpu.memory_space<smem>>
    %242 = vector.broadcast %241 : f32 to vector<2x256xf32>
    %243 = arith.mulf %242, %190 : vector<2x256xf32>
    %244 = arith.addf %240, %243 : vector<2x256xf32>
    %c26 = arith.constant 26 : index
    %245 = memref.load %arg1[%c26] : memref<144xf32, #tpu.memory_space<smem>>
    %246 = vector.broadcast %245 : f32 to vector<2x256xf32>
    %247 = arith.mulf %246, %197 : vector<2x256xf32>
    %248 = arith.addf %244, %247 : vector<2x256xf32>
    %c30 = arith.constant 30 : index
    %249 = memref.load %arg1[%c30] : memref<144xf32, #tpu.memory_space<smem>>
    %250 = vector.broadcast %249 : f32 to vector<2x256xf32>
    %251 = arith.mulf %250, %204 : vector<2x256xf32>
    %252 = arith.addf %248, %251 : vector<2x256xf32>
    %c19 = arith.constant 19 : index
    %253 = memref.load %arg1[%c19] : memref<144xf32, #tpu.memory_space<smem>>
    %254 = vector.broadcast %253 : f32 to vector<2x256xf32>
    %255 = arith.mulf %254, %183 : vector<2x256xf32>
    %256 = arith.addf %176, %255 : vector<2x256xf32>
    %c23 = arith.constant 23 : index
    %257 = memref.load %arg1[%c23] : memref<144xf32, #tpu.memory_space<smem>>
    %258 = vector.broadcast %257 : f32 to vector<2x256xf32>
    %259 = arith.mulf %258, %190 : vector<2x256xf32>
    %260 = arith.addf %256, %259 : vector<2x256xf32>
    %c27 = arith.constant 27 : index
    %261 = memref.load %arg1[%c27] : memref<144xf32, #tpu.memory_space<smem>>
    %262 = vector.broadcast %261 : f32 to vector<2x256xf32>
    %263 = arith.mulf %262, %197 : vector<2x256xf32>
    %264 = arith.addf %260, %263 : vector<2x256xf32>
    %c31 = arith.constant 31 : index
    %265 = memref.load %arg1[%c31] : memref<144xf32, #tpu.memory_space<smem>>
    %266 = vector.broadcast %265 : f32 to vector<2x256xf32>
    %267 = arith.mulf %266, %204 : vector<2x256xf32>
    %268 = arith.addf %264, %267 : vector<2x256xf32>
    %269 = vector.shape_cast %40 : vector<1x1xi1> to vector<1x1xi1>
    %270 = vector.broadcast %269 : vector<1x1xi1> to vector<2x256xi1>
    %271 = arith.select %270, %51, %54 : vector<2x256xi1>, vector<2x256xf32>
    %cst_64 = arith.constant 0.000000e+00 : f32
    %272 = vector.shape_cast %14 : vector<1x256xi1> to vector<1x256xi1>
    %273 = vector.broadcast %272 : vector<1x256xi1> to vector<2x256xi1>
    %274 = vector.broadcast %cst_64 : f32 to vector<2x256xf32>
    %275 = arith.select %273, %271, %274 : vector<2x256xi1>, vector<2x256xf32>
    %276 = vector.shape_cast %40 : vector<1x1xi1> to vector<1x1xi1>
    %277 = vector.broadcast %276 : vector<1x1xi1> to vector<2x256xi1>
    %278 = arith.select %277, %59, %62 : vector<2x256xi1>, vector<2x256xf32>
    %cst_65 = arith.constant 0.000000e+00 : f32
    %279 = vector.shape_cast %14 : vector<1x256xi1> to vector<1x256xi1>
    %280 = vector.broadcast %279 : vector<1x256xi1> to vector<2x256xi1>
    %281 = vector.broadcast %cst_65 : f32 to vector<2x256xf32>
    %282 = arith.select %280, %278, %281 : vector<2x256xi1>, vector<2x256xf32>
    %283 = vector.shape_cast %40 : vector<1x1xi1> to vector<1x1xi1>
    %284 = vector.broadcast %283 : vector<1x1xi1> to vector<2x256xi1>
    %285 = arith.select %284, %67, %70 : vector<2x256xi1>, vector<2x256xf32>
    %cst_66 = arith.constant 0.000000e+00 : f32
    %286 = vector.shape_cast %14 : vector<1x256xi1> to vector<1x256xi1>
    %287 = vector.broadcast %286 : vector<1x256xi1> to vector<2x256xi1>
    %288 = vector.broadcast %cst_66 : f32 to vector<2x256xf32>
    %289 = arith.select %287, %285, %288 : vector<2x256xi1>, vector<2x256xf32>
    %290 = vector.shape_cast %40 : vector<1x1xi1> to vector<1x1xi1>
    %291 = vector.broadcast %290 : vector<1x1xi1> to vector<2x256xi1>
    %292 = arith.select %291, %75, %78 : vector<2x256xi1>, vector<2x256xf32>
    %cst_67 = arith.constant 0.000000e+00 : f32
    %293 = vector.shape_cast %14 : vector<1x256xi1> to vector<1x256xi1>
    %294 = vector.broadcast %293 : vector<1x256xi1> to vector<2x256xi1>
    %295 = vector.broadcast %cst_67 : f32 to vector<2x256xf32>
    %296 = arith.select %294, %292, %295 : vector<2x256xi1>, vector<2x256xf32>
    %c32 = arith.constant 32 : index
    %297 = memref.load %arg1[%c32] : memref<144xf32, #tpu.memory_space<smem>>
    %298 = vector.broadcast %297 : f32 to vector<2x256xf32>
    %299 = arith.mulf %298, %275 : vector<2x256xf32>
    %300 = arith.addf %220, %299 : vector<2x256xf32>
    %c36 = arith.constant 36 : index
    %301 = memref.load %arg1[%c36] : memref<144xf32, #tpu.memory_space<smem>>
    %302 = vector.broadcast %301 : f32 to vector<2x256xf32>
    %303 = arith.mulf %302, %282 : vector<2x256xf32>
    %304 = arith.addf %300, %303 : vector<2x256xf32>
    %c40 = arith.constant 40 : index
    %305 = memref.load %arg1[%c40] : memref<144xf32, #tpu.memory_space<smem>>
    %306 = vector.broadcast %305 : f32 to vector<2x256xf32>
    %307 = arith.mulf %306, %289 : vector<2x256xf32>
    %308 = arith.addf %304, %307 : vector<2x256xf32>
    %c44 = arith.constant 44 : index
    %309 = memref.load %arg1[%c44] : memref<144xf32, #tpu.memory_space<smem>>
    %310 = vector.broadcast %309 : f32 to vector<2x256xf32>
    %311 = arith.mulf %310, %296 : vector<2x256xf32>
    %312 = arith.addf %308, %311 : vector<2x256xf32>
    %c33 = arith.constant 33 : index
    %313 = memref.load %arg1[%c33] : memref<144xf32, #tpu.memory_space<smem>>
    %314 = vector.broadcast %313 : f32 to vector<2x256xf32>
    %315 = arith.mulf %314, %275 : vector<2x256xf32>
    %316 = arith.addf %236, %315 : vector<2x256xf32>
    %c37 = arith.constant 37 : index
    %317 = memref.load %arg1[%c37] : memref<144xf32, #tpu.memory_space<smem>>
    %318 = vector.broadcast %317 : f32 to vector<2x256xf32>
    %319 = arith.mulf %318, %282 : vector<2x256xf32>
    %320 = arith.addf %316, %319 : vector<2x256xf32>
    %c41 = arith.constant 41 : index
    %321 = memref.load %arg1[%c41] : memref<144xf32, #tpu.memory_space<smem>>
    %322 = vector.broadcast %321 : f32 to vector<2x256xf32>
    %323 = arith.mulf %322, %289 : vector<2x256xf32>
    %324 = arith.addf %320, %323 : vector<2x256xf32>
    %c45 = arith.constant 45 : index
    %325 = memref.load %arg1[%c45] : memref<144xf32, #tpu.memory_space<smem>>
    %326 = vector.broadcast %325 : f32 to vector<2x256xf32>
    %327 = arith.mulf %326, %296 : vector<2x256xf32>
    %328 = arith.addf %324, %327 : vector<2x256xf32>
    %c34 = arith.constant 34 : index
    %329 = memref.load %arg1[%c34] : memref<144xf32, #tpu.memory_space<smem>>
    %330 = vector.broadcast %329 : f32 to vector<2x256xf32>
    %331 = arith.mulf %330, %275 : vector<2x256xf32>
    %332 = arith.addf %252, %331 : vector<2x256xf32>
    %c38 = arith.constant 38 : index
    %333 = memref.load %arg1[%c38] : memref<144xf32, #tpu.memory_space<smem>>
    %334 = vector.broadcast %333 : f32 to vector<2x256xf32>
    %335 = arith.mulf %334, %282 : vector<2x256xf32>
    %336 = arith.addf %332, %335 : vector<2x256xf32>
    %c42 = arith.constant 42 : index
    %337 = memref.load %arg1[%c42] : memref<144xf32, #tpu.memory_space<smem>>
    %338 = vector.broadcast %337 : f32 to vector<2x256xf32>
    %339 = arith.mulf %338, %289 : vector<2x256xf32>
    %340 = arith.addf %336, %339 : vector<2x256xf32>
    %c46 = arith.constant 46 : index
    %341 = memref.load %arg1[%c46] : memref<144xf32, #tpu.memory_space<smem>>
    %342 = vector.broadcast %341 : f32 to vector<2x256xf32>
    %343 = arith.mulf %342, %296 : vector<2x256xf32>
    %344 = arith.addf %340, %343 : vector<2x256xf32>
    %c35 = arith.constant 35 : index
    %345 = memref.load %arg1[%c35] : memref<144xf32, #tpu.memory_space<smem>>
    %346 = vector.broadcast %345 : f32 to vector<2x256xf32>
    %347 = arith.mulf %346, %275 : vector<2x256xf32>
    %348 = arith.addf %268, %347 : vector<2x256xf32>
    %c39 = arith.constant 39 : index
    %349 = memref.load %arg1[%c39] : memref<144xf32, #tpu.memory_space<smem>>
    %350 = vector.broadcast %349 : f32 to vector<2x256xf32>
    %351 = arith.mulf %350, %282 : vector<2x256xf32>
    %352 = arith.addf %348, %351 : vector<2x256xf32>
    %c43 = arith.constant 43 : index
    %353 = memref.load %arg1[%c43] : memref<144xf32, #tpu.memory_space<smem>>
    %354 = vector.broadcast %353 : f32 to vector<2x256xf32>
    %355 = arith.mulf %354, %289 : vector<2x256xf32>
    %356 = arith.addf %352, %355 : vector<2x256xf32>
    %c47 = arith.constant 47 : index
    %357 = memref.load %arg1[%c47] : memref<144xf32, #tpu.memory_space<smem>>
    %358 = vector.broadcast %357 : f32 to vector<2x256xf32>
    %359 = arith.mulf %358, %296 : vector<2x256xf32>
    %360 = arith.addf %356, %359 : vector<2x256xf32>
    %361 = vector.shape_cast %40 : vector<1x1xi1> to vector<1x1xi1>
    %362 = vector.broadcast %361 : vector<1x1xi1> to vector<2x256xi1>
    %363 = arith.select %362, %52, %53 : vector<2x256xi1>, vector<2x256xf32>
    %cst_68 = arith.constant 0.000000e+00 : f32
    %364 = vector.shape_cast %16 : vector<1x256xi1> to vector<1x256xi1>
    %365 = vector.broadcast %364 : vector<1x256xi1> to vector<2x256xi1>
    %366 = vector.broadcast %cst_68 : f32 to vector<2x256xf32>
    %367 = arith.select %365, %363, %366 : vector<2x256xi1>, vector<2x256xf32>
    %368 = vector.shape_cast %40 : vector<1x1xi1> to vector<1x1xi1>
    %369 = vector.broadcast %368 : vector<1x1xi1> to vector<2x256xi1>
    %370 = arith.select %369, %60, %61 : vector<2x256xi1>, vector<2x256xf32>
    %cst_69 = arith.constant 0.000000e+00 : f32
    %371 = vector.shape_cast %16 : vector<1x256xi1> to vector<1x256xi1>
    %372 = vector.broadcast %371 : vector<1x256xi1> to vector<2x256xi1>
    %373 = vector.broadcast %cst_69 : f32 to vector<2x256xf32>
    %374 = arith.select %372, %370, %373 : vector<2x256xi1>, vector<2x256xf32>
    %375 = vector.shape_cast %40 : vector<1x1xi1> to vector<1x1xi1>
    %376 = vector.broadcast %375 : vector<1x1xi1> to vector<2x256xi1>
    %377 = arith.select %376, %68, %69 : vector<2x256xi1>, vector<2x256xf32>
    %cst_70 = arith.constant 0.000000e+00 : f32
    %378 = vector.shape_cast %16 : vector<1x256xi1> to vector<1x256xi1>
    %379 = vector.broadcast %378 : vector<1x256xi1> to vector<2x256xi1>
    %380 = vector.broadcast %cst_70 : f32 to vector<2x256xf32>
    %381 = arith.select %379, %377, %380 : vector<2x256xi1>, vector<2x256xf32>
    %382 = vector.shape_cast %40 : vector<1x1xi1> to vector<1x1xi1>
    %383 = vector.broadcast %382 : vector<1x1xi1> to vector<2x256xi1>
    %384 = arith.select %383, %76, %77 : vector<2x256xi1>, vector<2x256xf32>
    %cst_71 = arith.constant 0.000000e+00 : f32
    %385 = vector.shape_cast %16 : vector<1x256xi1> to vector<1x256xi1>
    %386 = vector.broadcast %385 : vector<1x256xi1> to vector<2x256xi1>
    %387 = vector.broadcast %cst_71 : f32 to vector<2x256xf32>
    %388 = arith.select %386, %384, %387 : vector<2x256xi1>, vector<2x256xf32>
    %c48 = arith.constant 48 : index
    %389 = memref.load %arg1[%c48] : memref<144xf32, #tpu.memory_space<smem>>
    %390 = vector.broadcast %389 : f32 to vector<2x256xf32>
    %391 = arith.mulf %390, %367 : vector<2x256xf32>
    %392 = arith.addf %312, %391 : vector<2x256xf32>
    %c52 = arith.constant 52 : index
    %393 = memref.load %arg1[%c52] : memref<144xf32, #tpu.memory_space<smem>>
    %394 = vector.broadcast %393 : f32 to vector<2x256xf32>
    %395 = arith.mulf %394, %374 : vector<2x256xf32>
    %396 = arith.addf %392, %395 : vector<2x256xf32>
    %c56 = arith.constant 56 : index
    %397 = memref.load %arg1[%c56] : memref<144xf32, #tpu.memory_space<smem>>
    %398 = vector.broadcast %397 : f32 to vector<2x256xf32>
    %399 = arith.mulf %398, %381 : vector<2x256xf32>
    %400 = arith.addf %396, %399 : vector<2x256xf32>
    %c60 = arith.constant 60 : index
    %401 = memref.load %arg1[%c60] : memref<144xf32, #tpu.memory_space<smem>>
    %402 = vector.broadcast %401 : f32 to vector<2x256xf32>
    %403 = arith.mulf %402, %388 : vector<2x256xf32>
    %404 = arith.addf %400, %403 : vector<2x256xf32>
    %c49 = arith.constant 49 : index
    %405 = memref.load %arg1[%c49] : memref<144xf32, #tpu.memory_space<smem>>
    %406 = vector.broadcast %405 : f32 to vector<2x256xf32>
    %407 = arith.mulf %406, %367 : vector<2x256xf32>
    %408 = arith.addf %328, %407 : vector<2x256xf32>
    %c53 = arith.constant 53 : index
    %409 = memref.load %arg1[%c53] : memref<144xf32, #tpu.memory_space<smem>>
    %410 = vector.broadcast %409 : f32 to vector<2x256xf32>
    %411 = arith.mulf %410, %374 : vector<2x256xf32>
    %412 = arith.addf %408, %411 : vector<2x256xf32>
    %c57 = arith.constant 57 : index
    %413 = memref.load %arg1[%c57] : memref<144xf32, #tpu.memory_space<smem>>
    %414 = vector.broadcast %413 : f32 to vector<2x256xf32>
    %415 = arith.mulf %414, %381 : vector<2x256xf32>
    %416 = arith.addf %412, %415 : vector<2x256xf32>
    %c61 = arith.constant 61 : index
    %417 = memref.load %arg1[%c61] : memref<144xf32, #tpu.memory_space<smem>>
    %418 = vector.broadcast %417 : f32 to vector<2x256xf32>
    %419 = arith.mulf %418, %388 : vector<2x256xf32>
    %420 = arith.addf %416, %419 : vector<2x256xf32>
    %c50 = arith.constant 50 : index
    %421 = memref.load %arg1[%c50] : memref<144xf32, #tpu.memory_space<smem>>
    %422 = vector.broadcast %421 : f32 to vector<2x256xf32>
    %423 = arith.mulf %422, %367 : vector<2x256xf32>
    %424 = arith.addf %344, %423 : vector<2x256xf32>
    %c54 = arith.constant 54 : index
    %425 = memref.load %arg1[%c54] : memref<144xf32, #tpu.memory_space<smem>>
    %426 = vector.broadcast %425 : f32 to vector<2x256xf32>
    %427 = arith.mulf %426, %374 : vector<2x256xf32>
    %428 = arith.addf %424, %427 : vector<2x256xf32>
    %c58 = arith.constant 58 : index
    %429 = memref.load %arg1[%c58] : memref<144xf32, #tpu.memory_space<smem>>
    %430 = vector.broadcast %429 : f32 to vector<2x256xf32>
    %431 = arith.mulf %430, %381 : vector<2x256xf32>
    %432 = arith.addf %428, %431 : vector<2x256xf32>
    %c62 = arith.constant 62 : index
    %433 = memref.load %arg1[%c62] : memref<144xf32, #tpu.memory_space<smem>>
    %434 = vector.broadcast %433 : f32 to vector<2x256xf32>
    %435 = arith.mulf %434, %388 : vector<2x256xf32>
    %436 = arith.addf %432, %435 : vector<2x256xf32>
    %c51 = arith.constant 51 : index
    %437 = memref.load %arg1[%c51] : memref<144xf32, #tpu.memory_space<smem>>
    %438 = vector.broadcast %437 : f32 to vector<2x256xf32>
    %439 = arith.mulf %438, %367 : vector<2x256xf32>
    %440 = arith.addf %360, %439 : vector<2x256xf32>
    %c55 = arith.constant 55 : index
    %441 = memref.load %arg1[%c55] : memref<144xf32, #tpu.memory_space<smem>>
    %442 = vector.broadcast %441 : f32 to vector<2x256xf32>
    %443 = arith.mulf %442, %374 : vector<2x256xf32>
    %444 = arith.addf %440, %443 : vector<2x256xf32>
    %c59 = arith.constant 59 : index
    %445 = memref.load %arg1[%c59] : memref<144xf32, #tpu.memory_space<smem>>
    %446 = vector.broadcast %445 : f32 to vector<2x256xf32>
    %447 = arith.mulf %446, %381 : vector<2x256xf32>
    %448 = arith.addf %444, %447 : vector<2x256xf32>
    %c63 = arith.constant 63 : index
    %449 = memref.load %arg1[%c63] : memref<144xf32, #tpu.memory_space<smem>>
    %450 = vector.broadcast %449 : f32 to vector<2x256xf32>
    %451 = arith.mulf %450, %388 : vector<2x256xf32>
    %452 = arith.addf %448, %451 : vector<2x256xf32>
    %c64 = arith.constant 64 : index
    %453 = memref.load %arg1[%c64] : memref<144xf32, #tpu.memory_space<smem>>
    %454 = vector.broadcast %453 : f32 to vector<2x256xf32>
    %455 = arith.mulf %454, %42 : vector<2x256xf32>
    %456 = arith.addf %404, %455 : vector<2x256xf32>
    %c68 = arith.constant 68 : index
    %457 = memref.load %arg1[%c68] : memref<144xf32, #tpu.memory_space<smem>>
    %458 = vector.broadcast %457 : f32 to vector<2x256xf32>
    %459 = arith.mulf %458, %44 : vector<2x256xf32>
    %460 = arith.addf %456, %459 : vector<2x256xf32>
    %c72 = arith.constant 72 : index
    %461 = memref.load %arg1[%c72] : memref<144xf32, #tpu.memory_space<smem>>
    %462 = vector.broadcast %461 : f32 to vector<2x256xf32>
    %463 = arith.mulf %462, %46 : vector<2x256xf32>
    %464 = arith.addf %460, %463 : vector<2x256xf32>
    %c76 = arith.constant 76 : index
    %465 = memref.load %arg1[%c76] : memref<144xf32, #tpu.memory_space<smem>>
    %466 = vector.broadcast %465 : f32 to vector<2x256xf32>
    %467 = arith.mulf %466, %48 : vector<2x256xf32>
    %468 = arith.addf %464, %467 : vector<2x256xf32>
    %c65 = arith.constant 65 : index
    %469 = memref.load %arg1[%c65] : memref<144xf32, #tpu.memory_space<smem>>
    %470 = vector.broadcast %469 : f32 to vector<2x256xf32>
    %471 = arith.mulf %470, %42 : vector<2x256xf32>
    %472 = arith.addf %420, %471 : vector<2x256xf32>
    %c69 = arith.constant 69 : index
    %473 = memref.load %arg1[%c69] : memref<144xf32, #tpu.memory_space<smem>>
    %474 = vector.broadcast %473 : f32 to vector<2x256xf32>
    %475 = arith.mulf %474, %44 : vector<2x256xf32>
    %476 = arith.addf %472, %475 : vector<2x256xf32>
    %c73 = arith.constant 73 : index
    %477 = memref.load %arg1[%c73] : memref<144xf32, #tpu.memory_space<smem>>
    %478 = vector.broadcast %477 : f32 to vector<2x256xf32>
    %479 = arith.mulf %478, %46 : vector<2x256xf32>
    %480 = arith.addf %476, %479 : vector<2x256xf32>
    %c77 = arith.constant 77 : index
    %481 = memref.load %arg1[%c77] : memref<144xf32, #tpu.memory_space<smem>>
    %482 = vector.broadcast %481 : f32 to vector<2x256xf32>
    %483 = arith.mulf %482, %48 : vector<2x256xf32>
    %484 = arith.addf %480, %483 : vector<2x256xf32>
    %c66 = arith.constant 66 : index
    %485 = memref.load %arg1[%c66] : memref<144xf32, #tpu.memory_space<smem>>
    %486 = vector.broadcast %485 : f32 to vector<2x256xf32>
    %487 = arith.mulf %486, %42 : vector<2x256xf32>
    %488 = arith.addf %436, %487 : vector<2x256xf32>
    %c70 = arith.constant 70 : index
    %489 = memref.load %arg1[%c70] : memref<144xf32, #tpu.memory_space<smem>>
    %490 = vector.broadcast %489 : f32 to vector<2x256xf32>
    %491 = arith.mulf %490, %44 : vector<2x256xf32>
    %492 = arith.addf %488, %491 : vector<2x256xf32>
    %c74 = arith.constant 74 : index
    %493 = memref.load %arg1[%c74] : memref<144xf32, #tpu.memory_space<smem>>
    %494 = vector.broadcast %493 : f32 to vector<2x256xf32>
    %495 = arith.mulf %494, %46 : vector<2x256xf32>
    %496 = arith.addf %492, %495 : vector<2x256xf32>
    %c78 = arith.constant 78 : index
    %497 = memref.load %arg1[%c78] : memref<144xf32, #tpu.memory_space<smem>>
    %498 = vector.broadcast %497 : f32 to vector<2x256xf32>
    %499 = arith.mulf %498, %48 : vector<2x256xf32>
    %500 = arith.addf %496, %499 : vector<2x256xf32>
    %c67 = arith.constant 67 : index
    %501 = memref.load %arg1[%c67] : memref<144xf32, #tpu.memory_space<smem>>
    %502 = vector.broadcast %501 : f32 to vector<2x256xf32>
    %503 = arith.mulf %502, %42 : vector<2x256xf32>
    %504 = arith.addf %452, %503 : vector<2x256xf32>
    %c71 = arith.constant 71 : index
    %505 = memref.load %arg1[%c71] : memref<144xf32, #tpu.memory_space<smem>>
    %506 = vector.broadcast %505 : f32 to vector<2x256xf32>
    %507 = arith.mulf %506, %44 : vector<2x256xf32>
    %508 = arith.addf %504, %507 : vector<2x256xf32>
    %c75 = arith.constant 75 : index
    %509 = memref.load %arg1[%c75] : memref<144xf32, #tpu.memory_space<smem>>
    %510 = vector.broadcast %509 : f32 to vector<2x256xf32>
    %511 = arith.mulf %510, %46 : vector<2x256xf32>
    %512 = arith.addf %508, %511 : vector<2x256xf32>
    %c79 = arith.constant 79 : index
    %513 = memref.load %arg1[%c79] : memref<144xf32, #tpu.memory_space<smem>>
    %514 = vector.broadcast %513 : f32 to vector<2x256xf32>
    %515 = arith.mulf %514, %48 : vector<2x256xf32>
    %516 = arith.addf %512, %515 : vector<2x256xf32>
    %517 = vector.shape_cast %40 : vector<1x1xi1> to vector<1x1xi1>
    %518 = vector.broadcast %517 : vector<1x1xi1> to vector<2x256xi1>
    %519 = arith.select %518, %53, %52 : vector<2x256xi1>, vector<2x256xf32>
    %cst_72 = arith.constant 0.000000e+00 : f32
    %520 = vector.shape_cast %18 : vector<1x256xi1> to vector<1x256xi1>
    %521 = vector.broadcast %520 : vector<1x256xi1> to vector<2x256xi1>
    %522 = vector.broadcast %cst_72 : f32 to vector<2x256xf32>
    %523 = arith.select %521, %519, %522 : vector<2x256xi1>, vector<2x256xf32>
    %524 = vector.shape_cast %40 : vector<1x1xi1> to vector<1x1xi1>
    %525 = vector.broadcast %524 : vector<1x1xi1> to vector<2x256xi1>
    %526 = arith.select %525, %61, %60 : vector<2x256xi1>, vector<2x256xf32>
    %cst_73 = arith.constant 0.000000e+00 : f32
    %527 = vector.shape_cast %18 : vector<1x256xi1> to vector<1x256xi1>
    %528 = vector.broadcast %527 : vector<1x256xi1> to vector<2x256xi1>
    %529 = vector.broadcast %cst_73 : f32 to vector<2x256xf32>
    %530 = arith.select %528, %526, %529 : vector<2x256xi1>, vector<2x256xf32>
    %531 = vector.shape_cast %40 : vector<1x1xi1> to vector<1x1xi1>
    %532 = vector.broadcast %531 : vector<1x1xi1> to vector<2x256xi1>
    %533 = arith.select %532, %69, %68 : vector<2x256xi1>, vector<2x256xf32>
    %cst_74 = arith.constant 0.000000e+00 : f32
    %534 = vector.shape_cast %18 : vector<1x256xi1> to vector<1x256xi1>
    %535 = vector.broadcast %534 : vector<1x256xi1> to vector<2x256xi1>
    %536 = vector.broadcast %cst_74 : f32 to vector<2x256xf32>
    %537 = arith.select %535, %533, %536 : vector<2x256xi1>, vector<2x256xf32>
    %538 = vector.shape_cast %40 : vector<1x1xi1> to vector<1x1xi1>
    %539 = vector.broadcast %538 : vector<1x1xi1> to vector<2x256xi1>
    %540 = arith.select %539, %77, %76 : vector<2x256xi1>, vector<2x256xf32>
    %cst_75 = arith.constant 0.000000e+00 : f32
    %541 = vector.shape_cast %18 : vector<1x256xi1> to vector<1x256xi1>
    %542 = vector.broadcast %541 : vector<1x256xi1> to vector<2x256xi1>
    %543 = vector.broadcast %cst_75 : f32 to vector<2x256xf32>
    %544 = arith.select %542, %540, %543 : vector<2x256xi1>, vector<2x256xf32>
    %c80 = arith.constant 80 : index
    %545 = memref.load %arg1[%c80] : memref<144xf32, #tpu.memory_space<smem>>
    %546 = vector.broadcast %545 : f32 to vector<2x256xf32>
    %547 = arith.mulf %546, %523 : vector<2x256xf32>
    %548 = arith.addf %468, %547 : vector<2x256xf32>
    %c84 = arith.constant 84 : index
    %549 = memref.load %arg1[%c84] : memref<144xf32, #tpu.memory_space<smem>>
    %550 = vector.broadcast %549 : f32 to vector<2x256xf32>
    %551 = arith.mulf %550, %530 : vector<2x256xf32>
    %552 = arith.addf %548, %551 : vector<2x256xf32>
    %c88 = arith.constant 88 : index
    %553 = memref.load %arg1[%c88] : memref<144xf32, #tpu.memory_space<smem>>
    %554 = vector.broadcast %553 : f32 to vector<2x256xf32>
    %555 = arith.mulf %554, %537 : vector<2x256xf32>
    %556 = arith.addf %552, %555 : vector<2x256xf32>
    %c92 = arith.constant 92 : index
    %557 = memref.load %arg1[%c92] : memref<144xf32, #tpu.memory_space<smem>>
    %558 = vector.broadcast %557 : f32 to vector<2x256xf32>
    %559 = arith.mulf %558, %544 : vector<2x256xf32>
    %560 = arith.addf %556, %559 : vector<2x256xf32>
    %c81 = arith.constant 81 : index
    %561 = memref.load %arg1[%c81] : memref<144xf32, #tpu.memory_space<smem>>
    %562 = vector.broadcast %561 : f32 to vector<2x256xf32>
    %563 = arith.mulf %562, %523 : vector<2x256xf32>
    %564 = arith.addf %484, %563 : vector<2x256xf32>
    %c85 = arith.constant 85 : index
    %565 = memref.load %arg1[%c85] : memref<144xf32, #tpu.memory_space<smem>>
    %566 = vector.broadcast %565 : f32 to vector<2x256xf32>
    %567 = arith.mulf %566, %530 : vector<2x256xf32>
    %568 = arith.addf %564, %567 : vector<2x256xf32>
    %c89 = arith.constant 89 : index
    %569 = memref.load %arg1[%c89] : memref<144xf32, #tpu.memory_space<smem>>
    %570 = vector.broadcast %569 : f32 to vector<2x256xf32>
    %571 = arith.mulf %570, %537 : vector<2x256xf32>
    %572 = arith.addf %568, %571 : vector<2x256xf32>
    %c93 = arith.constant 93 : index
    %573 = memref.load %arg1[%c93] : memref<144xf32, #tpu.memory_space<smem>>
    %574 = vector.broadcast %573 : f32 to vector<2x256xf32>
    %575 = arith.mulf %574, %544 : vector<2x256xf32>
    %576 = arith.addf %572, %575 : vector<2x256xf32>
    %c82 = arith.constant 82 : index
    %577 = memref.load %arg1[%c82] : memref<144xf32, #tpu.memory_space<smem>>
    %578 = vector.broadcast %577 : f32 to vector<2x256xf32>
    %579 = arith.mulf %578, %523 : vector<2x256xf32>
    %580 = arith.addf %500, %579 : vector<2x256xf32>
    %c86 = arith.constant 86 : index
    %581 = memref.load %arg1[%c86] : memref<144xf32, #tpu.memory_space<smem>>
    %582 = vector.broadcast %581 : f32 to vector<2x256xf32>
    %583 = arith.mulf %582, %530 : vector<2x256xf32>
    %584 = arith.addf %580, %583 : vector<2x256xf32>
    %c90 = arith.constant 90 : index
    %585 = memref.load %arg1[%c90] : memref<144xf32, #tpu.memory_space<smem>>
    %586 = vector.broadcast %585 : f32 to vector<2x256xf32>
    %587 = arith.mulf %586, %537 : vector<2x256xf32>
    %588 = arith.addf %584, %587 : vector<2x256xf32>
    %c94 = arith.constant 94 : index
    %589 = memref.load %arg1[%c94] : memref<144xf32, #tpu.memory_space<smem>>
    %590 = vector.broadcast %589 : f32 to vector<2x256xf32>
    %591 = arith.mulf %590, %544 : vector<2x256xf32>
    %592 = arith.addf %588, %591 : vector<2x256xf32>
    %c83 = arith.constant 83 : index
    %593 = memref.load %arg1[%c83] : memref<144xf32, #tpu.memory_space<smem>>
    %594 = vector.broadcast %593 : f32 to vector<2x256xf32>
    %595 = arith.mulf %594, %523 : vector<2x256xf32>
    %596 = arith.addf %516, %595 : vector<2x256xf32>
    %c87 = arith.constant 87 : index
    %597 = memref.load %arg1[%c87] : memref<144xf32, #tpu.memory_space<smem>>
    %598 = vector.broadcast %597 : f32 to vector<2x256xf32>
    %599 = arith.mulf %598, %530 : vector<2x256xf32>
    %600 = arith.addf %596, %599 : vector<2x256xf32>
    %c91 = arith.constant 91 : index
    %601 = memref.load %arg1[%c91] : memref<144xf32, #tpu.memory_space<smem>>
    %602 = vector.broadcast %601 : f32 to vector<2x256xf32>
    %603 = arith.mulf %602, %537 : vector<2x256xf32>
    %604 = arith.addf %600, %603 : vector<2x256xf32>
    %c95 = arith.constant 95 : index
    %605 = memref.load %arg1[%c95] : memref<144xf32, #tpu.memory_space<smem>>
    %606 = vector.broadcast %605 : f32 to vector<2x256xf32>
    %607 = arith.mulf %606, %544 : vector<2x256xf32>
    %608 = arith.addf %604, %607 : vector<2x256xf32>
    %609 = vector.shape_cast %40 : vector<1x1xi1> to vector<1x1xi1>
    %610 = vector.broadcast %609 : vector<1x1xi1> to vector<2x256xi1>
    %611 = arith.select %610, %54, %51 : vector<2x256xi1>, vector<2x256xf32>
    %cst_76 = arith.constant 0.000000e+00 : f32
    %612 = vector.shape_cast %23 : vector<1x256xi1> to vector<1x256xi1>
    %613 = vector.broadcast %612 : vector<1x256xi1> to vector<2x256xi1>
    %614 = vector.broadcast %cst_76 : f32 to vector<2x256xf32>
    %615 = arith.select %613, %611, %614 : vector<2x256xi1>, vector<2x256xf32>
    %616 = vector.shape_cast %40 : vector<1x1xi1> to vector<1x1xi1>
    %617 = vector.broadcast %616 : vector<1x1xi1> to vector<2x256xi1>
    %618 = arith.select %617, %62, %59 : vector<2x256xi1>, vector<2x256xf32>
    %cst_77 = arith.constant 0.000000e+00 : f32
    %619 = vector.shape_cast %23 : vector<1x256xi1> to vector<1x256xi1>
    %620 = vector.broadcast %619 : vector<1x256xi1> to vector<2x256xi1>
    %621 = vector.broadcast %cst_77 : f32 to vector<2x256xf32>
    %622 = arith.select %620, %618, %621 : vector<2x256xi1>, vector<2x256xf32>
    %623 = vector.shape_cast %40 : vector<1x1xi1> to vector<1x1xi1>
    %624 = vector.broadcast %623 : vector<1x1xi1> to vector<2x256xi1>
    %625 = arith.select %624, %70, %67 : vector<2x256xi1>, vector<2x256xf32>
    %cst_78 = arith.constant 0.000000e+00 : f32
    %626 = vector.shape_cast %23 : vector<1x256xi1> to vector<1x256xi1>
    %627 = vector.broadcast %626 : vector<1x256xi1> to vector<2x256xi1>
    %628 = vector.broadcast %cst_78 : f32 to vector<2x256xf32>
    %629 = arith.select %627, %625, %628 : vector<2x256xi1>, vector<2x256xf32>
    %630 = vector.shape_cast %40 : vector<1x1xi1> to vector<1x1xi1>
    %631 = vector.broadcast %630 : vector<1x1xi1> to vector<2x256xi1>
    %632 = arith.select %631, %78, %75 : vector<2x256xi1>, vector<2x256xf32>
    %cst_79 = arith.constant 0.000000e+00 : f32
    %633 = vector.shape_cast %23 : vector<1x256xi1> to vector<1x256xi1>
    %634 = vector.broadcast %633 : vector<1x256xi1> to vector<2x256xi1>
    %635 = vector.broadcast %cst_79 : f32 to vector<2x256xf32>
    %636 = arith.select %634, %632, %635 : vector<2x256xi1>, vector<2x256xf32>
    %c96 = arith.constant 96 : index
    %637 = memref.load %arg1[%c96] : memref<144xf32, #tpu.memory_space<smem>>
    %638 = vector.broadcast %637 : f32 to vector<2x256xf32>
    %639 = arith.mulf %638, %615 : vector<2x256xf32>
    %640 = arith.addf %560, %639 : vector<2x256xf32>
    %c100 = arith.constant 100 : index
    %641 = memref.load %arg1[%c100] : memref<144xf32, #tpu.memory_space<smem>>
    %642 = vector.broadcast %641 : f32 to vector<2x256xf32>
    %643 = arith.mulf %642, %622 : vector<2x256xf32>
    %644 = arith.addf %640, %643 : vector<2x256xf32>
    %c104 = arith.constant 104 : index
    %645 = memref.load %arg1[%c104] : memref<144xf32, #tpu.memory_space<smem>>
    %646 = vector.broadcast %645 : f32 to vector<2x256xf32>
    %647 = arith.mulf %646, %629 : vector<2x256xf32>
    %648 = arith.addf %644, %647 : vector<2x256xf32>
    %c108 = arith.constant 108 : index
    %649 = memref.load %arg1[%c108] : memref<144xf32, #tpu.memory_space<smem>>
    %650 = vector.broadcast %649 : f32 to vector<2x256xf32>
    %651 = arith.mulf %650, %636 : vector<2x256xf32>
    %652 = arith.addf %648, %651 : vector<2x256xf32>
    %c97 = arith.constant 97 : index
    %653 = memref.load %arg1[%c97] : memref<144xf32, #tpu.memory_space<smem>>
    %654 = vector.broadcast %653 : f32 to vector<2x256xf32>
    %655 = arith.mulf %654, %615 : vector<2x256xf32>
    %656 = arith.addf %576, %655 : vector<2x256xf32>
    %c101 = arith.constant 101 : index
    %657 = memref.load %arg1[%c101] : memref<144xf32, #tpu.memory_space<smem>>
    %658 = vector.broadcast %657 : f32 to vector<2x256xf32>
    %659 = arith.mulf %658, %622 : vector<2x256xf32>
    %660 = arith.addf %656, %659 : vector<2x256xf32>
    %c105 = arith.constant 105 : index
    %661 = memref.load %arg1[%c105] : memref<144xf32, #tpu.memory_space<smem>>
    %662 = vector.broadcast %661 : f32 to vector<2x256xf32>
    %663 = arith.mulf %662, %629 : vector<2x256xf32>
    %664 = arith.addf %660, %663 : vector<2x256xf32>
    %c109 = arith.constant 109 : index
    %665 = memref.load %arg1[%c109] : memref<144xf32, #tpu.memory_space<smem>>
    %666 = vector.broadcast %665 : f32 to vector<2x256xf32>
    %667 = arith.mulf %666, %636 : vector<2x256xf32>
    %668 = arith.addf %664, %667 : vector<2x256xf32>
    %c98 = arith.constant 98 : index
    %669 = memref.load %arg1[%c98] : memref<144xf32, #tpu.memory_space<smem>>
    %670 = vector.broadcast %669 : f32 to vector<2x256xf32>
    %671 = arith.mulf %670, %615 : vector<2x256xf32>
    %672 = arith.addf %592, %671 : vector<2x256xf32>
    %c102 = arith.constant 102 : index
    %673 = memref.load %arg1[%c102] : memref<144xf32, #tpu.memory_space<smem>>
    %674 = vector.broadcast %673 : f32 to vector<2x256xf32>
    %675 = arith.mulf %674, %622 : vector<2x256xf32>
    %676 = arith.addf %672, %675 : vector<2x256xf32>
    %c106 = arith.constant 106 : index
    %677 = memref.load %arg1[%c106] : memref<144xf32, #tpu.memory_space<smem>>
    %678 = vector.broadcast %677 : f32 to vector<2x256xf32>
    %679 = arith.mulf %678, %629 : vector<2x256xf32>
    %680 = arith.addf %676, %679 : vector<2x256xf32>
    %c110 = arith.constant 110 : index
    %681 = memref.load %arg1[%c110] : memref<144xf32, #tpu.memory_space<smem>>
    %682 = vector.broadcast %681 : f32 to vector<2x256xf32>
    %683 = arith.mulf %682, %636 : vector<2x256xf32>
    %684 = arith.addf %680, %683 : vector<2x256xf32>
    %c99 = arith.constant 99 : index
    %685 = memref.load %arg1[%c99] : memref<144xf32, #tpu.memory_space<smem>>
    %686 = vector.broadcast %685 : f32 to vector<2x256xf32>
    %687 = arith.mulf %686, %615 : vector<2x256xf32>
    %688 = arith.addf %608, %687 : vector<2x256xf32>
    %c103 = arith.constant 103 : index
    %689 = memref.load %arg1[%c103] : memref<144xf32, #tpu.memory_space<smem>>
    %690 = vector.broadcast %689 : f32 to vector<2x256xf32>
    %691 = arith.mulf %690, %622 : vector<2x256xf32>
    %692 = arith.addf %688, %691 : vector<2x256xf32>
    %c107 = arith.constant 107 : index
    %693 = memref.load %arg1[%c107] : memref<144xf32, #tpu.memory_space<smem>>
    %694 = vector.broadcast %693 : f32 to vector<2x256xf32>
    %695 = arith.mulf %694, %629 : vector<2x256xf32>
    %696 = arith.addf %692, %695 : vector<2x256xf32>
    %c111 = arith.constant 111 : index
    %697 = memref.load %arg1[%c111] : memref<144xf32, #tpu.memory_space<smem>>
    %698 = vector.broadcast %697 : f32 to vector<2x256xf32>
    %699 = arith.mulf %698, %636 : vector<2x256xf32>
    %700 = arith.addf %696, %699 : vector<2x256xf32>
    %701 = vector.shape_cast %40 : vector<1x1xi1> to vector<1x1xi1>
    %702 = vector.broadcast %701 : vector<1x1xi1> to vector<2x256xi1>
    %703 = arith.select %702, %55, %50 : vector<2x256xi1>, vector<2x256xf32>
    %cst_80 = arith.constant 0.000000e+00 : f32
    %704 = vector.shape_cast %25 : vector<1x256xi1> to vector<1x256xi1>
    %705 = vector.broadcast %704 : vector<1x256xi1> to vector<2x256xi1>
    %706 = vector.broadcast %cst_80 : f32 to vector<2x256xf32>
    %707 = arith.select %705, %703, %706 : vector<2x256xi1>, vector<2x256xf32>
    %708 = vector.shape_cast %40 : vector<1x1xi1> to vector<1x1xi1>
    %709 = vector.broadcast %708 : vector<1x1xi1> to vector<2x256xi1>
    %710 = arith.select %709, %63, %58 : vector<2x256xi1>, vector<2x256xf32>
    %cst_81 = arith.constant 0.000000e+00 : f32
    %711 = vector.shape_cast %25 : vector<1x256xi1> to vector<1x256xi1>
    %712 = vector.broadcast %711 : vector<1x256xi1> to vector<2x256xi1>
    %713 = vector.broadcast %cst_81 : f32 to vector<2x256xf32>
    %714 = arith.select %712, %710, %713 : vector<2x256xi1>, vector<2x256xf32>
    %715 = vector.shape_cast %40 : vector<1x1xi1> to vector<1x1xi1>
    %716 = vector.broadcast %715 : vector<1x1xi1> to vector<2x256xi1>
    %717 = arith.select %716, %71, %66 : vector<2x256xi1>, vector<2x256xf32>
    %cst_82 = arith.constant 0.000000e+00 : f32
    %718 = vector.shape_cast %25 : vector<1x256xi1> to vector<1x256xi1>
    %719 = vector.broadcast %718 : vector<1x256xi1> to vector<2x256xi1>
    %720 = vector.broadcast %cst_82 : f32 to vector<2x256xf32>
    %721 = arith.select %719, %717, %720 : vector<2x256xi1>, vector<2x256xf32>
    %722 = vector.shape_cast %40 : vector<1x1xi1> to vector<1x1xi1>
    %723 = vector.broadcast %722 : vector<1x1xi1> to vector<2x256xi1>
    %724 = arith.select %723, %79, %74 : vector<2x256xi1>, vector<2x256xf32>
    %cst_83 = arith.constant 0.000000e+00 : f32
    %725 = vector.shape_cast %25 : vector<1x256xi1> to vector<1x256xi1>
    %726 = vector.broadcast %725 : vector<1x256xi1> to vector<2x256xi1>
    %727 = vector.broadcast %cst_83 : f32 to vector<2x256xf32>
    %728 = arith.select %726, %724, %727 : vector<2x256xi1>, vector<2x256xf32>
    %c112 = arith.constant 112 : index
    %729 = memref.load %arg1[%c112] : memref<144xf32, #tpu.memory_space<smem>>
    %730 = vector.broadcast %729 : f32 to vector<2x256xf32>
    %731 = arith.mulf %730, %707 : vector<2x256xf32>
    %732 = arith.addf %652, %731 : vector<2x256xf32>
    %c116 = arith.constant 116 : index
    %733 = memref.load %arg1[%c116] : memref<144xf32, #tpu.memory_space<smem>>
    %734 = vector.broadcast %733 : f32 to vector<2x256xf32>
    %735 = arith.mulf %734, %714 : vector<2x256xf32>
    %736 = arith.addf %732, %735 : vector<2x256xf32>
    %c120 = arith.constant 120 : index
    %737 = memref.load %arg1[%c120] : memref<144xf32, #tpu.memory_space<smem>>
    %738 = vector.broadcast %737 : f32 to vector<2x256xf32>
    %739 = arith.mulf %738, %721 : vector<2x256xf32>
    %740 = arith.addf %736, %739 : vector<2x256xf32>
    %c124 = arith.constant 124 : index
    %741 = memref.load %arg1[%c124] : memref<144xf32, #tpu.memory_space<smem>>
    %742 = vector.broadcast %741 : f32 to vector<2x256xf32>
    %743 = arith.mulf %742, %728 : vector<2x256xf32>
    %744 = arith.addf %740, %743 : vector<2x256xf32>
    %c113 = arith.constant 113 : index
    %745 = memref.load %arg1[%c113] : memref<144xf32, #tpu.memory_space<smem>>
    %746 = vector.broadcast %745 : f32 to vector<2x256xf32>
    %747 = arith.mulf %746, %707 : vector<2x256xf32>
    %748 = arith.addf %668, %747 : vector<2x256xf32>
    %c117 = arith.constant 117 : index
    %749 = memref.load %arg1[%c117] : memref<144xf32, #tpu.memory_space<smem>>
    %750 = vector.broadcast %749 : f32 to vector<2x256xf32>
    %751 = arith.mulf %750, %714 : vector<2x256xf32>
    %752 = arith.addf %748, %751 : vector<2x256xf32>
    %c121 = arith.constant 121 : index
    %753 = memref.load %arg1[%c121] : memref<144xf32, #tpu.memory_space<smem>>
    %754 = vector.broadcast %753 : f32 to vector<2x256xf32>
    %755 = arith.mulf %754, %721 : vector<2x256xf32>
    %756 = arith.addf %752, %755 : vector<2x256xf32>
    %c125 = arith.constant 125 : index
    %757 = memref.load %arg1[%c125] : memref<144xf32, #tpu.memory_space<smem>>
    %758 = vector.broadcast %757 : f32 to vector<2x256xf32>
    %759 = arith.mulf %758, %728 : vector<2x256xf32>
    %760 = arith.addf %756, %759 : vector<2x256xf32>
    %c114 = arith.constant 114 : index
    %761 = memref.load %arg1[%c114] : memref<144xf32, #tpu.memory_space<smem>>
    %762 = vector.broadcast %761 : f32 to vector<2x256xf32>
    %763 = arith.mulf %762, %707 : vector<2x256xf32>
    %764 = arith.addf %684, %763 : vector<2x256xf32>
    %c118 = arith.constant 118 : index
    %765 = memref.load %arg1[%c118] : memref<144xf32, #tpu.memory_space<smem>>
    %766 = vector.broadcast %765 : f32 to vector<2x256xf32>
    %767 = arith.mulf %766, %714 : vector<2x256xf32>
    %768 = arith.addf %764, %767 : vector<2x256xf32>
    %c122 = arith.constant 122 : index
    %769 = memref.load %arg1[%c122] : memref<144xf32, #tpu.memory_space<smem>>
    %770 = vector.broadcast %769 : f32 to vector<2x256xf32>
    %771 = arith.mulf %770, %721 : vector<2x256xf32>
    %772 = arith.addf %768, %771 : vector<2x256xf32>
    %c126 = arith.constant 126 : index
    %773 = memref.load %arg1[%c126] : memref<144xf32, #tpu.memory_space<smem>>
    %774 = vector.broadcast %773 : f32 to vector<2x256xf32>
    %775 = arith.mulf %774, %728 : vector<2x256xf32>
    %776 = arith.addf %772, %775 : vector<2x256xf32>
    %c115 = arith.constant 115 : index
    %777 = memref.load %arg1[%c115] : memref<144xf32, #tpu.memory_space<smem>>
    %778 = vector.broadcast %777 : f32 to vector<2x256xf32>
    %779 = arith.mulf %778, %707 : vector<2x256xf32>
    %780 = arith.addf %700, %779 : vector<2x256xf32>
    %c119 = arith.constant 119 : index
    %781 = memref.load %arg1[%c119] : memref<144xf32, #tpu.memory_space<smem>>
    %782 = vector.broadcast %781 : f32 to vector<2x256xf32>
    %783 = arith.mulf %782, %714 : vector<2x256xf32>
    %784 = arith.addf %780, %783 : vector<2x256xf32>
    %c123 = arith.constant 123 : index
    %785 = memref.load %arg1[%c123] : memref<144xf32, #tpu.memory_space<smem>>
    %786 = vector.broadcast %785 : f32 to vector<2x256xf32>
    %787 = arith.mulf %786, %721 : vector<2x256xf32>
    %788 = arith.addf %784, %787 : vector<2x256xf32>
    %c127 = arith.constant 127 : index
    %789 = memref.load %arg1[%c127] : memref<144xf32, #tpu.memory_space<smem>>
    %790 = vector.broadcast %789 : f32 to vector<2x256xf32>
    %791 = arith.mulf %790, %728 : vector<2x256xf32>
    %792 = arith.addf %788, %791 : vector<2x256xf32>
    %793 = vector.shape_cast %40 : vector<1x1xi1> to vector<1x1xi1>
    %794 = vector.broadcast %793 : vector<1x1xi1> to vector<2x256xi1>
    %795 = arith.select %794, %56, %49 : vector<2x256xi1>, vector<2x256xf32>
    %cst_84 = arith.constant 0.000000e+00 : f32
    %796 = vector.shape_cast %30 : vector<1x256xi1> to vector<1x256xi1>
    %797 = vector.broadcast %796 : vector<1x256xi1> to vector<2x256xi1>
    %798 = vector.broadcast %cst_84 : f32 to vector<2x256xf32>
    %799 = arith.select %797, %795, %798 : vector<2x256xi1>, vector<2x256xf32>
    %800 = vector.shape_cast %40 : vector<1x1xi1> to vector<1x1xi1>
    %801 = vector.broadcast %800 : vector<1x1xi1> to vector<2x256xi1>
    %802 = arith.select %801, %64, %57 : vector<2x256xi1>, vector<2x256xf32>
    %cst_85 = arith.constant 0.000000e+00 : f32
    %803 = vector.shape_cast %30 : vector<1x256xi1> to vector<1x256xi1>
    %804 = vector.broadcast %803 : vector<1x256xi1> to vector<2x256xi1>
    %805 = vector.broadcast %cst_85 : f32 to vector<2x256xf32>
    %806 = arith.select %804, %802, %805 : vector<2x256xi1>, vector<2x256xf32>
    %807 = vector.shape_cast %40 : vector<1x1xi1> to vector<1x1xi1>
    %808 = vector.broadcast %807 : vector<1x1xi1> to vector<2x256xi1>
    %809 = arith.select %808, %72, %65 : vector<2x256xi1>, vector<2x256xf32>
    %cst_86 = arith.constant 0.000000e+00 : f32
    %810 = vector.shape_cast %30 : vector<1x256xi1> to vector<1x256xi1>
    %811 = vector.broadcast %810 : vector<1x256xi1> to vector<2x256xi1>
    %812 = vector.broadcast %cst_86 : f32 to vector<2x256xf32>
    %813 = arith.select %811, %809, %812 : vector<2x256xi1>, vector<2x256xf32>
    %814 = vector.shape_cast %40 : vector<1x1xi1> to vector<1x1xi1>
    %815 = vector.broadcast %814 : vector<1x1xi1> to vector<2x256xi1>
    %816 = arith.select %815, %80, %73 : vector<2x256xi1>, vector<2x256xf32>
    %cst_87 = arith.constant 0.000000e+00 : f32
    %817 = vector.shape_cast %30 : vector<1x256xi1> to vector<1x256xi1>
    %818 = vector.broadcast %817 : vector<1x256xi1> to vector<2x256xi1>
    %819 = vector.broadcast %cst_87 : f32 to vector<2x256xf32>
    %820 = arith.select %818, %816, %819 : vector<2x256xi1>, vector<2x256xf32>
    %c128 = arith.constant 128 : index
    %821 = memref.load %arg1[%c128] : memref<144xf32, #tpu.memory_space<smem>>
    %822 = vector.broadcast %821 : f32 to vector<2x256xf32>
    %823 = arith.mulf %822, %799 : vector<2x256xf32>
    %824 = arith.addf %744, %823 : vector<2x256xf32>
    %c132 = arith.constant 132 : index
    %825 = memref.load %arg1[%c132] : memref<144xf32, #tpu.memory_space<smem>>
    %826 = vector.broadcast %825 : f32 to vector<2x256xf32>
    %827 = arith.mulf %826, %806 : vector<2x256xf32>
    %828 = arith.addf %824, %827 : vector<2x256xf32>
    %c136 = arith.constant 136 : index
    %829 = memref.load %arg1[%c136] : memref<144xf32, #tpu.memory_space<smem>>
    %830 = vector.broadcast %829 : f32 to vector<2x256xf32>
    %831 = arith.mulf %830, %813 : vector<2x256xf32>
    %832 = arith.addf %828, %831 : vector<2x256xf32>
    %c140 = arith.constant 140 : index
    %833 = memref.load %arg1[%c140] : memref<144xf32, #tpu.memory_space<smem>>
    %834 = vector.broadcast %833 : f32 to vector<2x256xf32>
    %835 = arith.mulf %834, %820 : vector<2x256xf32>
    %836 = arith.addf %832, %835 : vector<2x256xf32>
    %c129 = arith.constant 129 : index
    %837 = memref.load %arg1[%c129] : memref<144xf32, #tpu.memory_space<smem>>
    %838 = vector.broadcast %837 : f32 to vector<2x256xf32>
    %839 = arith.mulf %838, %799 : vector<2x256xf32>
    %840 = arith.addf %760, %839 : vector<2x256xf32>
    %c133 = arith.constant 133 : index
    %841 = memref.load %arg1[%c133] : memref<144xf32, #tpu.memory_space<smem>>
    %842 = vector.broadcast %841 : f32 to vector<2x256xf32>
    %843 = arith.mulf %842, %806 : vector<2x256xf32>
    %844 = arith.addf %840, %843 : vector<2x256xf32>
    %c137 = arith.constant 137 : index
    %845 = memref.load %arg1[%c137] : memref<144xf32, #tpu.memory_space<smem>>
    %846 = vector.broadcast %845 : f32 to vector<2x256xf32>
    %847 = arith.mulf %846, %813 : vector<2x256xf32>
    %848 = arith.addf %844, %847 : vector<2x256xf32>
    %c141 = arith.constant 141 : index
    %849 = memref.load %arg1[%c141] : memref<144xf32, #tpu.memory_space<smem>>
    %850 = vector.broadcast %849 : f32 to vector<2x256xf32>
    %851 = arith.mulf %850, %820 : vector<2x256xf32>
    %852 = arith.addf %848, %851 : vector<2x256xf32>
    %c130 = arith.constant 130 : index
    %853 = memref.load %arg1[%c130] : memref<144xf32, #tpu.memory_space<smem>>
    %854 = vector.broadcast %853 : f32 to vector<2x256xf32>
    %855 = arith.mulf %854, %799 : vector<2x256xf32>
    %856 = arith.addf %776, %855 : vector<2x256xf32>
    %c134 = arith.constant 134 : index
    %857 = memref.load %arg1[%c134] : memref<144xf32, #tpu.memory_space<smem>>
    %858 = vector.broadcast %857 : f32 to vector<2x256xf32>
    %859 = arith.mulf %858, %806 : vector<2x256xf32>
    %860 = arith.addf %856, %859 : vector<2x256xf32>
    %c138 = arith.constant 138 : index
    %861 = memref.load %arg1[%c138] : memref<144xf32, #tpu.memory_space<smem>>
    %862 = vector.broadcast %861 : f32 to vector<2x256xf32>
    %863 = arith.mulf %862, %813 : vector<2x256xf32>
    %864 = arith.addf %860, %863 : vector<2x256xf32>
    %c142 = arith.constant 142 : index
    %865 = memref.load %arg1[%c142] : memref<144xf32, #tpu.memory_space<smem>>
    %866 = vector.broadcast %865 : f32 to vector<2x256xf32>
    %867 = arith.mulf %866, %820 : vector<2x256xf32>
    %868 = arith.addf %864, %867 : vector<2x256xf32>
    %c131 = arith.constant 131 : index
    %869 = memref.load %arg1[%c131] : memref<144xf32, #tpu.memory_space<smem>>
    %870 = vector.broadcast %869 : f32 to vector<2x256xf32>
    %871 = arith.mulf %870, %799 : vector<2x256xf32>
    %872 = arith.addf %792, %871 : vector<2x256xf32>
    %c135 = arith.constant 135 : index
    %873 = memref.load %arg1[%c135] : memref<144xf32, #tpu.memory_space<smem>>
    %874 = vector.broadcast %873 : f32 to vector<2x256xf32>
    %875 = arith.mulf %874, %806 : vector<2x256xf32>
    %876 = arith.addf %872, %875 : vector<2x256xf32>
    %c139 = arith.constant 139 : index
    %877 = memref.load %arg1[%c139] : memref<144xf32, #tpu.memory_space<smem>>
    %878 = vector.broadcast %877 : f32 to vector<2x256xf32>
    %879 = arith.mulf %878, %813 : vector<2x256xf32>
    %880 = arith.addf %876, %879 : vector<2x256xf32>
    %c143 = arith.constant 143 : index
    %881 = memref.load %arg1[%c143] : memref<144xf32, #tpu.memory_space<smem>>
    %882 = vector.broadcast %881 : f32 to vector<2x256xf32>
    %883 = arith.mulf %882, %820 : vector<2x256xf32>
    %884 = arith.addf %880, %883 : vector<2x256xf32>
    %c0_88 = arith.constant 0 : index
    %885 = memref.load %arg2[%c0_88] : memref<4xf32, #tpu.memory_space<smem>>
    %c0_89 = arith.constant 0 : index
    %886 = memref.load %arg3[%c0_89] : memref<4xf32, #tpu.memory_space<smem>>
    %cst_90 = arith.constant dense<0.000000e+00> : vector<2xf32>
    %887 = vector.multi_reduction <add>, %836, %cst_90 [1] : vector<2x256xf32> to vector<2xf32>
    %888 = vector.shape_cast %887 : vector<2xf32> to vector<2x1xf32>
    %cst_91 = arith.constant dense<0.000000e+00> : vector<1xf32>
    %889 = vector.multi_reduction <add>, %888, %cst_91 [0] : vector<2x1xf32> to vector<1xf32>
    %890 = vector.shape_cast %889 : vector<1xf32> to vector<1x1xf32>
    %891 = arith.mulf %836, %836 : vector<2x256xf32>
    %cst_92 = arith.constant dense<0.000000e+00> : vector<2xf32>
    %892 = vector.multi_reduction <add>, %891, %cst_92 [1] : vector<2x256xf32> to vector<2xf32>
    %893 = vector.shape_cast %892 : vector<2xf32> to vector<2x1xf32>
    %cst_93 = arith.constant dense<0.000000e+00> : vector<1xf32>
    %894 = vector.multi_reduction <add>, %893, %cst_93 [0] : vector<2x1xf32> to vector<1xf32>
    %895 = vector.shape_cast %894 : vector<1xf32> to vector<1x1xf32>
    %cst_94 = arith.constant 0.001953125 : f32
    %896 = vector.broadcast %cst_94 : f32 to vector<1x1xf32>
    %897 = arith.mulf %890, %896 : vector<1x1xf32>
    %cst_95 = arith.constant 0.001953125 : f32
    %898 = vector.broadcast %cst_95 : f32 to vector<1x1xf32>
    %899 = arith.mulf %895, %898 : vector<1x1xf32>
    %900 = arith.mulf %897, %897 : vector<1x1xf32>
    %901 = arith.subf %899, %900 : vector<1x1xf32>
    %902 = vector.broadcast %897 : vector<1x1xf32> to vector<2x256xf32>
    %903 = arith.subf %836, %902 : vector<2x256xf32>
    %904 = vector.broadcast %885 : f32 to vector<2x256xf32>
    %905 = arith.mulf %904, %903 : vector<2x256xf32>
    %cst_96 = arith.constant 9.99999974E-6 : f32
    %906 = vector.broadcast %cst_96 : f32 to vector<1x1xf32>
    %907 = arith.addf %901, %906 : vector<1x1xf32>
    %908 = math.rsqrt %907 : vector<1x1xf32>
    %909 = vector.broadcast %908 : vector<1x1xf32> to vector<2x256xf32>
    %910 = arith.mulf %905, %909 : vector<2x256xf32>
    %911 = vector.broadcast %886 : f32 to vector<2x256xf32>
    %912 = arith.addf %910, %911 : vector<2x256xf32>
    %cst_97 = arith.constant 0.000000e+00 : f32
    %913 = vector.broadcast %cst_97 : f32 to vector<2x256xf32>
    %914 = arith.maximumf %912, %913 : vector<2x256xf32>
    %c1_98 = arith.constant 1 : index
    %915 = memref.load %arg2[%c1_98] : memref<4xf32, #tpu.memory_space<smem>>
    %c1_99 = arith.constant 1 : index
    %916 = memref.load %arg3[%c1_99] : memref<4xf32, #tpu.memory_space<smem>>
    %cst_100 = arith.constant dense<0.000000e+00> : vector<2xf32>
    %917 = vector.multi_reduction <add>, %852, %cst_100 [1] : vector<2x256xf32> to vector<2xf32>
    %918 = vector.shape_cast %917 : vector<2xf32> to vector<2x1xf32>
    %cst_101 = arith.constant dense<0.000000e+00> : vector<1xf32>
    %919 = vector.multi_reduction <add>, %918, %cst_101 [0] : vector<2x1xf32> to vector<1xf32>
    %920 = vector.shape_cast %919 : vector<1xf32> to vector<1x1xf32>
    %921 = arith.mulf %852, %852 : vector<2x256xf32>
    %cst_102 = arith.constant dense<0.000000e+00> : vector<2xf32>
    %922 = vector.multi_reduction <add>, %921, %cst_102 [1] : vector<2x256xf32> to vector<2xf32>
    %923 = vector.shape_cast %922 : vector<2xf32> to vector<2x1xf32>
    %cst_103 = arith.constant dense<0.000000e+00> : vector<1xf32>
    %924 = vector.multi_reduction <add>, %923, %cst_103 [0] : vector<2x1xf32> to vector<1xf32>
    %925 = vector.shape_cast %924 : vector<1xf32> to vector<1x1xf32>
    %cst_104 = arith.constant 0.001953125 : f32
    %926 = vector.broadcast %cst_104 : f32 to vector<1x1xf32>
    %927 = arith.mulf %920, %926 : vector<1x1xf32>
    %cst_105 = arith.constant 0.001953125 : f32
    %928 = vector.broadcast %cst_105 : f32 to vector<1x1xf32>
    %929 = arith.mulf %925, %928 : vector<1x1xf32>
    %930 = arith.mulf %927, %927 : vector<1x1xf32>
    %931 = arith.subf %929, %930 : vector<1x1xf32>
    %932 = vector.broadcast %927 : vector<1x1xf32> to vector<2x256xf32>
    %933 = arith.subf %852, %932 : vector<2x256xf32>
    %934 = vector.broadcast %915 : f32 to vector<2x256xf32>
    %935 = arith.mulf %934, %933 : vector<2x256xf32>
    %cst_106 = arith.constant 9.99999974E-6 : f32
    %936 = vector.broadcast %cst_106 : f32 to vector<1x1xf32>
    %937 = arith.addf %931, %936 : vector<1x1xf32>
    %938 = math.rsqrt %937 : vector<1x1xf32>
    %939 = vector.broadcast %938 : vector<1x1xf32> to vector<2x256xf32>
    %940 = arith.mulf %935, %939 : vector<2x256xf32>
    %941 = vector.broadcast %916 : f32 to vector<2x256xf32>
    %942 = arith.addf %940, %941 : vector<2x256xf32>
    %cst_107 = arith.constant 0.000000e+00 : f32
    %943 = vector.broadcast %cst_107 : f32 to vector<2x256xf32>
    %944 = arith.maximumf %942, %943 : vector<2x256xf32>
    %c2_108 = arith.constant 2 : index
    %945 = memref.load %arg2[%c2_108] : memref<4xf32, #tpu.memory_space<smem>>
    %c2_109 = arith.constant 2 : index
    %946 = memref.load %arg3[%c2_109] : memref<4xf32, #tpu.memory_space<smem>>
    %cst_110 = arith.constant dense<0.000000e+00> : vector<2xf32>
    %947 = vector.multi_reduction <add>, %868, %cst_110 [1] : vector<2x256xf32> to vector<2xf32>
    %948 = vector.shape_cast %947 : vector<2xf32> to vector<2x1xf32>
    %cst_111 = arith.constant dense<0.000000e+00> : vector<1xf32>
    %949 = vector.multi_reduction <add>, %948, %cst_111 [0] : vector<2x1xf32> to vector<1xf32>
    %950 = vector.shape_cast %949 : vector<1xf32> to vector<1x1xf32>
    %951 = arith.mulf %868, %868 : vector<2x256xf32>
    %cst_112 = arith.constant dense<0.000000e+00> : vector<2xf32>
    %952 = vector.multi_reduction <add>, %951, %cst_112 [1] : vector<2x256xf32> to vector<2xf32>
    %953 = vector.shape_cast %952 : vector<2xf32> to vector<2x1xf32>
    %cst_113 = arith.constant dense<0.000000e+00> : vector<1xf32>
    %954 = vector.multi_reduction <add>, %953, %cst_113 [0] : vector<2x1xf32> to vector<1xf32>
    %955 = vector.shape_cast %954 : vector<1xf32> to vector<1x1xf32>
    %cst_114 = arith.constant 0.001953125 : f32
    %956 = vector.broadcast %cst_114 : f32 to vector<1x1xf32>
    %957 = arith.mulf %950, %956 : vector<1x1xf32>
    %cst_115 = arith.constant 0.001953125 : f32
    %958 = vector.broadcast %cst_115 : f32 to vector<1x1xf32>
    %959 = arith.mulf %955, %958 : vector<1x1xf32>
    %960 = arith.mulf %957, %957 : vector<1x1xf32>
    %961 = arith.subf %959, %960 : vector<1x1xf32>
    %962 = vector.broadcast %957 : vector<1x1xf32> to vector<2x256xf32>
    %963 = arith.subf %868, %962 : vector<2x256xf32>
    %964 = vector.broadcast %945 : f32 to vector<2x256xf32>
    %965 = arith.mulf %964, %963 : vector<2x256xf32>
    %cst_116 = arith.constant 9.99999974E-6 : f32
    %966 = vector.broadcast %cst_116 : f32 to vector<1x1xf32>
    %967 = arith.addf %961, %966 : vector<1x1xf32>
    %968 = math.rsqrt %967 : vector<1x1xf32>
    %969 = vector.broadcast %968 : vector<1x1xf32> to vector<2x256xf32>
    %970 = arith.mulf %965, %969 : vector<2x256xf32>
    %971 = vector.broadcast %946 : f32 to vector<2x256xf32>
    %972 = arith.addf %970, %971 : vector<2x256xf32>
    %cst_117 = arith.constant 0.000000e+00 : f32
    %973 = vector.broadcast %cst_117 : f32 to vector<2x256xf32>
    %974 = arith.maximumf %972, %973 : vector<2x256xf32>
    %c3_118 = arith.constant 3 : index
    %975 = memref.load %arg2[%c3_118] : memref<4xf32, #tpu.memory_space<smem>>
    %c3_119 = arith.constant 3 : index
    %976 = memref.load %arg3[%c3_119] : memref<4xf32, #tpu.memory_space<smem>>
    %cst_120 = arith.constant dense<0.000000e+00> : vector<2xf32>
    %977 = vector.multi_reduction <add>, %884, %cst_120 [1] : vector<2x256xf32> to vector<2xf32>
    %978 = vector.shape_cast %977 : vector<2xf32> to vector<2x1xf32>
    %cst_121 = arith.constant dense<0.000000e+00> : vector<1xf32>
    %979 = vector.multi_reduction <add>, %978, %cst_121 [0] : vector<2x1xf32> to vector<1xf32>
    %980 = vector.shape_cast %979 : vector<1xf32> to vector<1x1xf32>
    %981 = arith.mulf %884, %884 : vector<2x256xf32>
    %cst_122 = arith.constant dense<0.000000e+00> : vector<2xf32>
    %982 = vector.multi_reduction <add>, %981, %cst_122 [1] : vector<2x256xf32> to vector<2xf32>
    %983 = vector.shape_cast %982 : vector<2xf32> to vector<2x1xf32>
    %cst_123 = arith.constant dense<0.000000e+00> : vector<1xf32>
    %984 = vector.multi_reduction <add>, %983, %cst_123 [0] : vector<2x1xf32> to vector<1xf32>
    %985 = vector.shape_cast %984 : vector<1xf32> to vector<1x1xf32>
    %cst_124 = arith.constant 0.001953125 : f32
    %986 = vector.broadcast %cst_124 : f32 to vector<1x1xf32>
    %987 = arith.mulf %980, %986 : vector<1x1xf32>
    %cst_125 = arith.constant 0.001953125 : f32
    %988 = vector.broadcast %cst_125 : f32 to vector<1x1xf32>
    %989 = arith.mulf %985, %988 : vector<1x1xf32>
    %990 = arith.mulf %987, %987 : vector<1x1xf32>
    %991 = arith.subf %989, %990 : vector<1x1xf32>
    %992 = vector.broadcast %987 : vector<1x1xf32> to vector<2x256xf32>
    %993 = arith.subf %884, %992 : vector<2x256xf32>
    %994 = vector.broadcast %975 : f32 to vector<2x256xf32>
    %995 = arith.mulf %994, %993 : vector<2x256xf32>
    %cst_126 = arith.constant 9.99999974E-6 : f32
    %996 = vector.broadcast %cst_126 : f32 to vector<1x1xf32>
    %997 = arith.addf %991, %996 : vector<1x1xf32>
    %998 = math.rsqrt %997 : vector<1x1xf32>
    %999 = vector.broadcast %998 : vector<1x1xf32> to vector<2x256xf32>
    %1000 = arith.mulf %995, %999 : vector<2x256xf32>
    %1001 = vector.broadcast %976 : f32 to vector<2x256xf32>
    %1002 = arith.addf %1000, %1001 : vector<2x256xf32>
    %cst_127 = arith.constant 0.000000e+00 : f32
    %1003 = vector.broadcast %cst_127 : f32 to vector<2x256xf32>
    %1004 = arith.maximumf %1002, %1003 : vector<2x256xf32>
    %c17_i32_128 = arith.constant 17 : i32
    %1005 = tpu.dynamic_rotate %914 by %c17_i32_128 dim 1 : vector<2x256xf32>, i32 -> vector<2x256xf32>
    %c16_i32_129 = arith.constant 16 : i32
    %1006 = tpu.dynamic_rotate %914 by %c16_i32_129 dim 1 : vector<2x256xf32>, i32 -> vector<2x256xf32>
    %c15_i32_130 = arith.constant 15 : i32
    %1007 = tpu.dynamic_rotate %914 by %c15_i32_130 dim 1 : vector<2x256xf32>, i32 -> vector<2x256xf32>
    %c1_i32_131 = arith.constant 1 : i32
    %1008 = tpu.dynamic_rotate %914 by %c1_i32_131 dim 1 : vector<2x256xf32>, i32 -> vector<2x256xf32>
    %c255_i32_132 = arith.constant 255 : i32
    %1009 = tpu.dynamic_rotate %914 by %c255_i32_132 dim 1 : vector<2x256xf32>, i32 -> vector<2x256xf32>
    %c241_i32_133 = arith.constant 241 : i32
    %1010 = tpu.dynamic_rotate %914 by %c241_i32_133 dim 1 : vector<2x256xf32>, i32 -> vector<2x256xf32>
    %c240_i32_134 = arith.constant 240 : i32
    %1011 = tpu.dynamic_rotate %914 by %c240_i32_134 dim 1 : vector<2x256xf32>, i32 -> vector<2x256xf32>
    %c239_i32_135 = arith.constant 239 : i32
    %1012 = tpu.dynamic_rotate %914 by %c239_i32_135 dim 1 : vector<2x256xf32>, i32 -> vector<2x256xf32>
    %c17_i32_136 = arith.constant 17 : i32
    %1013 = tpu.dynamic_rotate %944 by %c17_i32_136 dim 1 : vector<2x256xf32>, i32 -> vector<2x256xf32>
    %c16_i32_137 = arith.constant 16 : i32
    %1014 = tpu.dynamic_rotate %944 by %c16_i32_137 dim 1 : vector<2x256xf32>, i32 -> vector<2x256xf32>
    %c15_i32_138 = arith.constant 15 : i32
    %1015 = tpu.dynamic_rotate %944 by %c15_i32_138 dim 1 : vector<2x256xf32>, i32 -> vector<2x256xf32>
    %c1_i32_139 = arith.constant 1 : i32
    %1016 = tpu.dynamic_rotate %944 by %c1_i32_139 dim 1 : vector<2x256xf32>, i32 -> vector<2x256xf32>
    %c255_i32_140 = arith.constant 255 : i32
    %1017 = tpu.dynamic_rotate %944 by %c255_i32_140 dim 1 : vector<2x256xf32>, i32 -> vector<2x256xf32>
    %c241_i32_141 = arith.constant 241 : i32
    %1018 = tpu.dynamic_rotate %944 by %c241_i32_141 dim 1 : vector<2x256xf32>, i32 -> vector<2x256xf32>
    %c240_i32_142 = arith.constant 240 : i32
    %1019 = tpu.dynamic_rotate %944 by %c240_i32_142 dim 1 : vector<2x256xf32>, i32 -> vector<2x256xf32>
    %c239_i32_143 = arith.constant 239 : i32
    %1020 = tpu.dynamic_rotate %944 by %c239_i32_143 dim 1 : vector<2x256xf32>, i32 -> vector<2x256xf32>
    %c17_i32_144 = arith.constant 17 : i32
    %1021 = tpu.dynamic_rotate %974 by %c17_i32_144 dim 1 : vector<2x256xf32>, i32 -> vector<2x256xf32>
    %c16_i32_145 = arith.constant 16 : i32
    %1022 = tpu.dynamic_rotate %974 by %c16_i32_145 dim 1 : vector<2x256xf32>, i32 -> vector<2x256xf32>
    %c15_i32_146 = arith.constant 15 : i32
    %1023 = tpu.dynamic_rotate %974 by %c15_i32_146 dim 1 : vector<2x256xf32>, i32 -> vector<2x256xf32>
    %c1_i32_147 = arith.constant 1 : i32
    %1024 = tpu.dynamic_rotate %974 by %c1_i32_147 dim 1 : vector<2x256xf32>, i32 -> vector<2x256xf32>
    %c255_i32_148 = arith.constant 255 : i32
    %1025 = tpu.dynamic_rotate %974 by %c255_i32_148 dim 1 : vector<2x256xf32>, i32 -> vector<2x256xf32>
    %c241_i32_149 = arith.constant 241 : i32
    %1026 = tpu.dynamic_rotate %974 by %c241_i32_149 dim 1 : vector<2x256xf32>, i32 -> vector<2x256xf32>
    %c240_i32_150 = arith.constant 240 : i32
    %1027 = tpu.dynamic_rotate %974 by %c240_i32_150 dim 1 : vector<2x256xf32>, i32 -> vector<2x256xf32>
    %c239_i32_151 = arith.constant 239 : i32
    %1028 = tpu.dynamic_rotate %974 by %c239_i32_151 dim 1 : vector<2x256xf32>, i32 -> vector<2x256xf32>
    %c17_i32_152 = arith.constant 17 : i32
    %1029 = tpu.dynamic_rotate %1004 by %c17_i32_152 dim 1 : vector<2x256xf32>, i32 -> vector<2x256xf32>
    %c16_i32_153 = arith.constant 16 : i32
    %1030 = tpu.dynamic_rotate %1004 by %c16_i32_153 dim 1 : vector<2x256xf32>, i32 -> vector<2x256xf32>
    %c15_i32_154 = arith.constant 15 : i32
    %1031 = tpu.dynamic_rotate %1004 by %c15_i32_154 dim 1 : vector<2x256xf32>, i32 -> vector<2x256xf32>
    %c1_i32_155 = arith.constant 1 : i32
    %1032 = tpu.dynamic_rotate %1004 by %c1_i32_155 dim 1 : vector<2x256xf32>, i32 -> vector<2x256xf32>
    %c255_i32_156 = arith.constant 255 : i32
    %1033 = tpu.dynamic_rotate %1004 by %c255_i32_156 dim 1 : vector<2x256xf32>, i32 -> vector<2x256xf32>
    %c241_i32_157 = arith.constant 241 : i32
    %1034 = tpu.dynamic_rotate %1004 by %c241_i32_157 dim 1 : vector<2x256xf32>, i32 -> vector<2x256xf32>
    %c240_i32_158 = arith.constant 240 : i32
    %1035 = tpu.dynamic_rotate %1004 by %c240_i32_158 dim 1 : vector<2x256xf32>, i32 -> vector<2x256xf32>
    %c239_i32_159 = arith.constant 239 : i32
    %1036 = tpu.dynamic_rotate %1004 by %c239_i32_159 dim 1 : vector<2x256xf32>, i32 -> vector<2x256xf32>
    %cst_160 = arith.constant 0.000000e+00 : f32
    %1037 = vector.broadcast %cst_160 : f32 to vector<2x256xf32>
    %cst_161 = arith.constant 0.000000e+00 : f32
    %1038 = vector.broadcast %cst_161 : f32 to vector<2x256xf32>
    %cst_162 = arith.constant 0.000000e+00 : f32
    %1039 = vector.broadcast %cst_162 : f32 to vector<2x256xf32>
    %cst_163 = arith.constant 0.000000e+00 : f32
    %1040 = vector.broadcast %cst_163 : f32 to vector<2x256xf32>
    %1041 = vector.shape_cast %40 : vector<1x1xi1> to vector<1x1xi1>
    %1042 = vector.broadcast %1041 : vector<1x1xi1> to vector<2x256xi1>
    %1043 = arith.select %1042, %1005, %1012 : vector<2x256xi1>, vector<2x256xf32>
    %cst_164 = arith.constant 0.000000e+00 : f32
    %1044 = vector.shape_cast %7 : vector<1x256xi1> to vector<1x256xi1>
    %1045 = vector.broadcast %1044 : vector<1x256xi1> to vector<2x256xi1>
    %1046 = vector.broadcast %cst_164 : f32 to vector<2x256xf32>
    %1047 = arith.select %1045, %1043, %1046 : vector<2x256xi1>, vector<2x256xf32>
    %1048 = vector.shape_cast %40 : vector<1x1xi1> to vector<1x1xi1>
    %1049 = vector.broadcast %1048 : vector<1x1xi1> to vector<2x256xi1>
    %1050 = arith.select %1049, %1013, %1020 : vector<2x256xi1>, vector<2x256xf32>
    %cst_165 = arith.constant 0.000000e+00 : f32
    %1051 = vector.shape_cast %7 : vector<1x256xi1> to vector<1x256xi1>
    %1052 = vector.broadcast %1051 : vector<1x256xi1> to vector<2x256xi1>
    %1053 = vector.broadcast %cst_165 : f32 to vector<2x256xf32>
    %1054 = arith.select %1052, %1050, %1053 : vector<2x256xi1>, vector<2x256xf32>
    %1055 = vector.shape_cast %40 : vector<1x1xi1> to vector<1x1xi1>
    %1056 = vector.broadcast %1055 : vector<1x1xi1> to vector<2x256xi1>
    %1057 = arith.select %1056, %1021, %1028 : vector<2x256xi1>, vector<2x256xf32>
    %cst_166 = arith.constant 0.000000e+00 : f32
    %1058 = vector.shape_cast %7 : vector<1x256xi1> to vector<1x256xi1>
    %1059 = vector.broadcast %1058 : vector<1x256xi1> to vector<2x256xi1>
    %1060 = vector.broadcast %cst_166 : f32 to vector<2x256xf32>
    %1061 = arith.select %1059, %1057, %1060 : vector<2x256xi1>, vector<2x256xf32>
    %1062 = vector.shape_cast %40 : vector<1x1xi1> to vector<1x1xi1>
    %1063 = vector.broadcast %1062 : vector<1x1xi1> to vector<2x256xi1>
    %1064 = arith.select %1063, %1029, %1036 : vector<2x256xi1>, vector<2x256xf32>
    %cst_167 = arith.constant 0.000000e+00 : f32
    %1065 = vector.shape_cast %7 : vector<1x256xi1> to vector<1x256xi1>
    %1066 = vector.broadcast %1065 : vector<1x256xi1> to vector<2x256xi1>
    %1067 = vector.broadcast %cst_167 : f32 to vector<2x256xf32>
    %1068 = arith.select %1066, %1064, %1067 : vector<2x256xi1>, vector<2x256xf32>
    %c0_168 = arith.constant 0 : index
    %1069 = memref.load %arg4[%c0_168] : memref<144xf32, #tpu.memory_space<smem>>
    %1070 = vector.broadcast %1069 : f32 to vector<2x256xf32>
    %1071 = arith.mulf %1070, %1047 : vector<2x256xf32>
    %1072 = arith.addf %1037, %1071 : vector<2x256xf32>
    %c4_169 = arith.constant 4 : index
    %1073 = memref.load %arg4[%c4_169] : memref<144xf32, #tpu.memory_space<smem>>
    %1074 = vector.broadcast %1073 : f32 to vector<2x256xf32>
    %1075 = arith.mulf %1074, %1054 : vector<2x256xf32>
    %1076 = arith.addf %1072, %1075 : vector<2x256xf32>
    %c8_170 = arith.constant 8 : index
    %1077 = memref.load %arg4[%c8_170] : memref<144xf32, #tpu.memory_space<smem>>
    %1078 = vector.broadcast %1077 : f32 to vector<2x256xf32>
    %1079 = arith.mulf %1078, %1061 : vector<2x256xf32>
    %1080 = arith.addf %1076, %1079 : vector<2x256xf32>
    %c12_171 = arith.constant 12 : index
    %1081 = memref.load %arg4[%c12_171] : memref<144xf32, #tpu.memory_space<smem>>
    %1082 = vector.broadcast %1081 : f32 to vector<2x256xf32>
    %1083 = arith.mulf %1082, %1068 : vector<2x256xf32>
    %1084 = arith.addf %1080, %1083 : vector<2x256xf32>
    %c1_172 = arith.constant 1 : index
    %1085 = memref.load %arg4[%c1_172] : memref<144xf32, #tpu.memory_space<smem>>
    %1086 = vector.broadcast %1085 : f32 to vector<2x256xf32>
    %1087 = arith.mulf %1086, %1047 : vector<2x256xf32>
    %1088 = arith.addf %1038, %1087 : vector<2x256xf32>
    %c5_173 = arith.constant 5 : index
    %1089 = memref.load %arg4[%c5_173] : memref<144xf32, #tpu.memory_space<smem>>
    %1090 = vector.broadcast %1089 : f32 to vector<2x256xf32>
    %1091 = arith.mulf %1090, %1054 : vector<2x256xf32>
    %1092 = arith.addf %1088, %1091 : vector<2x256xf32>
    %c9_174 = arith.constant 9 : index
    %1093 = memref.load %arg4[%c9_174] : memref<144xf32, #tpu.memory_space<smem>>
    %1094 = vector.broadcast %1093 : f32 to vector<2x256xf32>
    %1095 = arith.mulf %1094, %1061 : vector<2x256xf32>
    %1096 = arith.addf %1092, %1095 : vector<2x256xf32>
    %c13_175 = arith.constant 13 : index
    %1097 = memref.load %arg4[%c13_175] : memref<144xf32, #tpu.memory_space<smem>>
    %1098 = vector.broadcast %1097 : f32 to vector<2x256xf32>
    %1099 = arith.mulf %1098, %1068 : vector<2x256xf32>
    %1100 = arith.addf %1096, %1099 : vector<2x256xf32>
    %c2_176 = arith.constant 2 : index
    %1101 = memref.load %arg4[%c2_176] : memref<144xf32, #tpu.memory_space<smem>>
    %1102 = vector.broadcast %1101 : f32 to vector<2x256xf32>
    %1103 = arith.mulf %1102, %1047 : vector<2x256xf32>
    %1104 = arith.addf %1039, %1103 : vector<2x256xf32>
    %c6_177 = arith.constant 6 : index
    %1105 = memref.load %arg4[%c6_177] : memref<144xf32, #tpu.memory_space<smem>>
    %1106 = vector.broadcast %1105 : f32 to vector<2x256xf32>
    %1107 = arith.mulf %1106, %1054 : vector<2x256xf32>
    %1108 = arith.addf %1104, %1107 : vector<2x256xf32>
    %c10_178 = arith.constant 10 : index
    %1109 = memref.load %arg4[%c10_178] : memref<144xf32, #tpu.memory_space<smem>>
    %1110 = vector.broadcast %1109 : f32 to vector<2x256xf32>
    %1111 = arith.mulf %1110, %1061 : vector<2x256xf32>
    %1112 = arith.addf %1108, %1111 : vector<2x256xf32>
    %c14_179 = arith.constant 14 : index
    %1113 = memref.load %arg4[%c14_179] : memref<144xf32, #tpu.memory_space<smem>>
    %1114 = vector.broadcast %1113 : f32 to vector<2x256xf32>
    %1115 = arith.mulf %1114, %1068 : vector<2x256xf32>
    %1116 = arith.addf %1112, %1115 : vector<2x256xf32>
    %c3_180 = arith.constant 3 : index
    %1117 = memref.load %arg4[%c3_180] : memref<144xf32, #tpu.memory_space<smem>>
    %1118 = vector.broadcast %1117 : f32 to vector<2x256xf32>
    %1119 = arith.mulf %1118, %1047 : vector<2x256xf32>
    %1120 = arith.addf %1040, %1119 : vector<2x256xf32>
    %c7_181 = arith.constant 7 : index
    %1121 = memref.load %arg4[%c7_181] : memref<144xf32, #tpu.memory_space<smem>>
    %1122 = vector.broadcast %1121 : f32 to vector<2x256xf32>
    %1123 = arith.mulf %1122, %1054 : vector<2x256xf32>
    %1124 = arith.addf %1120, %1123 : vector<2x256xf32>
    %c11_182 = arith.constant 11 : index
    %1125 = memref.load %arg4[%c11_182] : memref<144xf32, #tpu.memory_space<smem>>
    %1126 = vector.broadcast %1125 : f32 to vector<2x256xf32>
    %1127 = arith.mulf %1126, %1061 : vector<2x256xf32>
    %1128 = arith.addf %1124, %1127 : vector<2x256xf32>
    %c15_183 = arith.constant 15 : index
    %1129 = memref.load %arg4[%c15_183] : memref<144xf32, #tpu.memory_space<smem>>
    %1130 = vector.broadcast %1129 : f32 to vector<2x256xf32>
    %1131 = arith.mulf %1130, %1068 : vector<2x256xf32>
    %1132 = arith.addf %1128, %1131 : vector<2x256xf32>
    %1133 = vector.shape_cast %40 : vector<1x1xi1> to vector<1x1xi1>
    %1134 = vector.broadcast %1133 : vector<1x1xi1> to vector<2x256xi1>
    %1135 = arith.select %1134, %1006, %1011 : vector<2x256xi1>, vector<2x256xf32>
    %cst_184 = arith.constant 0.000000e+00 : f32
    %1136 = vector.shape_cast %9 : vector<1x256xi1> to vector<1x256xi1>
    %1137 = vector.broadcast %1136 : vector<1x256xi1> to vector<2x256xi1>
    %1138 = vector.broadcast %cst_184 : f32 to vector<2x256xf32>
    %1139 = arith.select %1137, %1135, %1138 : vector<2x256xi1>, vector<2x256xf32>
    %1140 = vector.shape_cast %40 : vector<1x1xi1> to vector<1x1xi1>
    %1141 = vector.broadcast %1140 : vector<1x1xi1> to vector<2x256xi1>
    %1142 = arith.select %1141, %1014, %1019 : vector<2x256xi1>, vector<2x256xf32>
    %cst_185 = arith.constant 0.000000e+00 : f32
    %1143 = vector.shape_cast %9 : vector<1x256xi1> to vector<1x256xi1>
    %1144 = vector.broadcast %1143 : vector<1x256xi1> to vector<2x256xi1>
    %1145 = vector.broadcast %cst_185 : f32 to vector<2x256xf32>
    %1146 = arith.select %1144, %1142, %1145 : vector<2x256xi1>, vector<2x256xf32>
    %1147 = vector.shape_cast %40 : vector<1x1xi1> to vector<1x1xi1>
    %1148 = vector.broadcast %1147 : vector<1x1xi1> to vector<2x256xi1>
    %1149 = arith.select %1148, %1022, %1027 : vector<2x256xi1>, vector<2x256xf32>
    %cst_186 = arith.constant 0.000000e+00 : f32
    %1150 = vector.shape_cast %9 : vector<1x256xi1> to vector<1x256xi1>
    %1151 = vector.broadcast %1150 : vector<1x256xi1> to vector<2x256xi1>
    %1152 = vector.broadcast %cst_186 : f32 to vector<2x256xf32>
    %1153 = arith.select %1151, %1149, %1152 : vector<2x256xi1>, vector<2x256xf32>
    %1154 = vector.shape_cast %40 : vector<1x1xi1> to vector<1x1xi1>
    %1155 = vector.broadcast %1154 : vector<1x1xi1> to vector<2x256xi1>
    %1156 = arith.select %1155, %1030, %1035 : vector<2x256xi1>, vector<2x256xf32>
    %cst_187 = arith.constant 0.000000e+00 : f32
    %1157 = vector.shape_cast %9 : vector<1x256xi1> to vector<1x256xi1>
    %1158 = vector.broadcast %1157 : vector<1x256xi1> to vector<2x256xi1>
    %1159 = vector.broadcast %cst_187 : f32 to vector<2x256xf32>
    %1160 = arith.select %1158, %1156, %1159 : vector<2x256xi1>, vector<2x256xf32>
    %c16_188 = arith.constant 16 : index
    %1161 = memref.load %arg4[%c16_188] : memref<144xf32, #tpu.memory_space<smem>>
    %1162 = vector.broadcast %1161 : f32 to vector<2x256xf32>
    %1163 = arith.mulf %1162, %1139 : vector<2x256xf32>
    %1164 = arith.addf %1084, %1163 : vector<2x256xf32>
    %c20_189 = arith.constant 20 : index
    %1165 = memref.load %arg4[%c20_189] : memref<144xf32, #tpu.memory_space<smem>>
    %1166 = vector.broadcast %1165 : f32 to vector<2x256xf32>
    %1167 = arith.mulf %1166, %1146 : vector<2x256xf32>
    %1168 = arith.addf %1164, %1167 : vector<2x256xf32>
    %c24_190 = arith.constant 24 : index
    %1169 = memref.load %arg4[%c24_190] : memref<144xf32, #tpu.memory_space<smem>>
    %1170 = vector.broadcast %1169 : f32 to vector<2x256xf32>
    %1171 = arith.mulf %1170, %1153 : vector<2x256xf32>
    %1172 = arith.addf %1168, %1171 : vector<2x256xf32>
    %c28_191 = arith.constant 28 : index
    %1173 = memref.load %arg4[%c28_191] : memref<144xf32, #tpu.memory_space<smem>>
    %1174 = vector.broadcast %1173 : f32 to vector<2x256xf32>
    %1175 = arith.mulf %1174, %1160 : vector<2x256xf32>
    %1176 = arith.addf %1172, %1175 : vector<2x256xf32>
    %c17_192 = arith.constant 17 : index
    %1177 = memref.load %arg4[%c17_192] : memref<144xf32, #tpu.memory_space<smem>>
    %1178 = vector.broadcast %1177 : f32 to vector<2x256xf32>
    %1179 = arith.mulf %1178, %1139 : vector<2x256xf32>
    %1180 = arith.addf %1100, %1179 : vector<2x256xf32>
    %c21_193 = arith.constant 21 : index
    %1181 = memref.load %arg4[%c21_193] : memref<144xf32, #tpu.memory_space<smem>>
    %1182 = vector.broadcast %1181 : f32 to vector<2x256xf32>
    %1183 = arith.mulf %1182, %1146 : vector<2x256xf32>
    %1184 = arith.addf %1180, %1183 : vector<2x256xf32>
    %c25_194 = arith.constant 25 : index
    %1185 = memref.load %arg4[%c25_194] : memref<144xf32, #tpu.memory_space<smem>>
    %1186 = vector.broadcast %1185 : f32 to vector<2x256xf32>
    %1187 = arith.mulf %1186, %1153 : vector<2x256xf32>
    %1188 = arith.addf %1184, %1187 : vector<2x256xf32>
    %c29_195 = arith.constant 29 : index
    %1189 = memref.load %arg4[%c29_195] : memref<144xf32, #tpu.memory_space<smem>>
    %1190 = vector.broadcast %1189 : f32 to vector<2x256xf32>
    %1191 = arith.mulf %1190, %1160 : vector<2x256xf32>
    %1192 = arith.addf %1188, %1191 : vector<2x256xf32>
    %c18_196 = arith.constant 18 : index
    %1193 = memref.load %arg4[%c18_196] : memref<144xf32, #tpu.memory_space<smem>>
    %1194 = vector.broadcast %1193 : f32 to vector<2x256xf32>
    %1195 = arith.mulf %1194, %1139 : vector<2x256xf32>
    %1196 = arith.addf %1116, %1195 : vector<2x256xf32>
    %c22_197 = arith.constant 22 : index
    %1197 = memref.load %arg4[%c22_197] : memref<144xf32, #tpu.memory_space<smem>>
    %1198 = vector.broadcast %1197 : f32 to vector<2x256xf32>
    %1199 = arith.mulf %1198, %1146 : vector<2x256xf32>
    %1200 = arith.addf %1196, %1199 : vector<2x256xf32>
    %c26_198 = arith.constant 26 : index
    %1201 = memref.load %arg4[%c26_198] : memref<144xf32, #tpu.memory_space<smem>>
    %1202 = vector.broadcast %1201 : f32 to vector<2x256xf32>
    %1203 = arith.mulf %1202, %1153 : vector<2x256xf32>
    %1204 = arith.addf %1200, %1203 : vector<2x256xf32>
    %c30_199 = arith.constant 30 : index
    %1205 = memref.load %arg4[%c30_199] : memref<144xf32, #tpu.memory_space<smem>>
    %1206 = vector.broadcast %1205 : f32 to vector<2x256xf32>
    %1207 = arith.mulf %1206, %1160 : vector<2x256xf32>
    %1208 = arith.addf %1204, %1207 : vector<2x256xf32>
    %c19_200 = arith.constant 19 : index
    %1209 = memref.load %arg4[%c19_200] : memref<144xf32, #tpu.memory_space<smem>>
    %1210 = vector.broadcast %1209 : f32 to vector<2x256xf32>
    %1211 = arith.mulf %1210, %1139 : vector<2x256xf32>
    %1212 = arith.addf %1132, %1211 : vector<2x256xf32>
    %c23_201 = arith.constant 23 : index
    %1213 = memref.load %arg4[%c23_201] : memref<144xf32, #tpu.memory_space<smem>>
    %1214 = vector.broadcast %1213 : f32 to vector<2x256xf32>
    %1215 = arith.mulf %1214, %1146 : vector<2x256xf32>
    %1216 = arith.addf %1212, %1215 : vector<2x256xf32>
    %c27_202 = arith.constant 27 : index
    %1217 = memref.load %arg4[%c27_202] : memref<144xf32, #tpu.memory_space<smem>>
    %1218 = vector.broadcast %1217 : f32 to vector<2x256xf32>
    %1219 = arith.mulf %1218, %1153 : vector<2x256xf32>
    %1220 = arith.addf %1216, %1219 : vector<2x256xf32>
    %c31_203 = arith.constant 31 : index
    %1221 = memref.load %arg4[%c31_203] : memref<144xf32, #tpu.memory_space<smem>>
    %1222 = vector.broadcast %1221 : f32 to vector<2x256xf32>
    %1223 = arith.mulf %1222, %1160 : vector<2x256xf32>
    %1224 = arith.addf %1220, %1223 : vector<2x256xf32>
    %1225 = vector.shape_cast %40 : vector<1x1xi1> to vector<1x1xi1>
    %1226 = vector.broadcast %1225 : vector<1x1xi1> to vector<2x256xi1>
    %1227 = arith.select %1226, %1007, %1010 : vector<2x256xi1>, vector<2x256xf32>
    %cst_204 = arith.constant 0.000000e+00 : f32
    %1228 = vector.shape_cast %14 : vector<1x256xi1> to vector<1x256xi1>
    %1229 = vector.broadcast %1228 : vector<1x256xi1> to vector<2x256xi1>
    %1230 = vector.broadcast %cst_204 : f32 to vector<2x256xf32>
    %1231 = arith.select %1229, %1227, %1230 : vector<2x256xi1>, vector<2x256xf32>
    %1232 = vector.shape_cast %40 : vector<1x1xi1> to vector<1x1xi1>
    %1233 = vector.broadcast %1232 : vector<1x1xi1> to vector<2x256xi1>
    %1234 = arith.select %1233, %1015, %1018 : vector<2x256xi1>, vector<2x256xf32>
    %cst_205 = arith.constant 0.000000e+00 : f32
    %1235 = vector.shape_cast %14 : vector<1x256xi1> to vector<1x256xi1>
    %1236 = vector.broadcast %1235 : vector<1x256xi1> to vector<2x256xi1>
    %1237 = vector.broadcast %cst_205 : f32 to vector<2x256xf32>
    %1238 = arith.select %1236, %1234, %1237 : vector<2x256xi1>, vector<2x256xf32>
    %1239 = vector.shape_cast %40 : vector<1x1xi1> to vector<1x1xi1>
    %1240 = vector.broadcast %1239 : vector<1x1xi1> to vector<2x256xi1>
    %1241 = arith.select %1240, %1023, %1026 : vector<2x256xi1>, vector<2x256xf32>
    %cst_206 = arith.constant 0.000000e+00 : f32
    %1242 = vector.shape_cast %14 : vector<1x256xi1> to vector<1x256xi1>
    %1243 = vector.broadcast %1242 : vector<1x256xi1> to vector<2x256xi1>
    %1244 = vector.broadcast %cst_206 : f32 to vector<2x256xf32>
    %1245 = arith.select %1243, %1241, %1244 : vector<2x256xi1>, vector<2x256xf32>
    %1246 = vector.shape_cast %40 : vector<1x1xi1> to vector<1x1xi1>
    %1247 = vector.broadcast %1246 : vector<1x1xi1> to vector<2x256xi1>
    %1248 = arith.select %1247, %1031, %1034 : vector<2x256xi1>, vector<2x256xf32>
    %cst_207 = arith.constant 0.000000e+00 : f32
    %1249 = vector.shape_cast %14 : vector<1x256xi1> to vector<1x256xi1>
    %1250 = vector.broadcast %1249 : vector<1x256xi1> to vector<2x256xi1>
    %1251 = vector.broadcast %cst_207 : f32 to vector<2x256xf32>
    %1252 = arith.select %1250, %1248, %1251 : vector<2x256xi1>, vector<2x256xf32>
    %c32_208 = arith.constant 32 : index
    %1253 = memref.load %arg4[%c32_208] : memref<144xf32, #tpu.memory_space<smem>>
    %1254 = vector.broadcast %1253 : f32 to vector<2x256xf32>
    %1255 = arith.mulf %1254, %1231 : vector<2x256xf32>
    %1256 = arith.addf %1176, %1255 : vector<2x256xf32>
    %c36_209 = arith.constant 36 : index
    %1257 = memref.load %arg4[%c36_209] : memref<144xf32, #tpu.memory_space<smem>>
    %1258 = vector.broadcast %1257 : f32 to vector<2x256xf32>
    %1259 = arith.mulf %1258, %1238 : vector<2x256xf32>
    %1260 = arith.addf %1256, %1259 : vector<2x256xf32>
    %c40_210 = arith.constant 40 : index
    %1261 = memref.load %arg4[%c40_210] : memref<144xf32, #tpu.memory_space<smem>>
    %1262 = vector.broadcast %1261 : f32 to vector<2x256xf32>
    %1263 = arith.mulf %1262, %1245 : vector<2x256xf32>
    %1264 = arith.addf %1260, %1263 : vector<2x256xf32>
    %c44_211 = arith.constant 44 : index
    %1265 = memref.load %arg4[%c44_211] : memref<144xf32, #tpu.memory_space<smem>>
    %1266 = vector.broadcast %1265 : f32 to vector<2x256xf32>
    %1267 = arith.mulf %1266, %1252 : vector<2x256xf32>
    %1268 = arith.addf %1264, %1267 : vector<2x256xf32>
    %c33_212 = arith.constant 33 : index
    %1269 = memref.load %arg4[%c33_212] : memref<144xf32, #tpu.memory_space<smem>>
    %1270 = vector.broadcast %1269 : f32 to vector<2x256xf32>
    %1271 = arith.mulf %1270, %1231 : vector<2x256xf32>
    %1272 = arith.addf %1192, %1271 : vector<2x256xf32>
    %c37_213 = arith.constant 37 : index
    %1273 = memref.load %arg4[%c37_213] : memref<144xf32, #tpu.memory_space<smem>>
    %1274 = vector.broadcast %1273 : f32 to vector<2x256xf32>
    %1275 = arith.mulf %1274, %1238 : vector<2x256xf32>
    %1276 = arith.addf %1272, %1275 : vector<2x256xf32>
    %c41_214 = arith.constant 41 : index
    %1277 = memref.load %arg4[%c41_214] : memref<144xf32, #tpu.memory_space<smem>>
    %1278 = vector.broadcast %1277 : f32 to vector<2x256xf32>
    %1279 = arith.mulf %1278, %1245 : vector<2x256xf32>
    %1280 = arith.addf %1276, %1279 : vector<2x256xf32>
    %c45_215 = arith.constant 45 : index
    %1281 = memref.load %arg4[%c45_215] : memref<144xf32, #tpu.memory_space<smem>>
    %1282 = vector.broadcast %1281 : f32 to vector<2x256xf32>
    %1283 = arith.mulf %1282, %1252 : vector<2x256xf32>
    %1284 = arith.addf %1280, %1283 : vector<2x256xf32>
    %c34_216 = arith.constant 34 : index
    %1285 = memref.load %arg4[%c34_216] : memref<144xf32, #tpu.memory_space<smem>>
    %1286 = vector.broadcast %1285 : f32 to vector<2x256xf32>
    %1287 = arith.mulf %1286, %1231 : vector<2x256xf32>
    %1288 = arith.addf %1208, %1287 : vector<2x256xf32>
    %c38_217 = arith.constant 38 : index
    %1289 = memref.load %arg4[%c38_217] : memref<144xf32, #tpu.memory_space<smem>>
    %1290 = vector.broadcast %1289 : f32 to vector<2x256xf32>
    %1291 = arith.mulf %1290, %1238 : vector<2x256xf32>
    %1292 = arith.addf %1288, %1291 : vector<2x256xf32>
    %c42_218 = arith.constant 42 : index
    %1293 = memref.load %arg4[%c42_218] : memref<144xf32, #tpu.memory_space<smem>>
    %1294 = vector.broadcast %1293 : f32 to vector<2x256xf32>
    %1295 = arith.mulf %1294, %1245 : vector<2x256xf32>
    %1296 = arith.addf %1292, %1295 : vector<2x256xf32>
    %c46_219 = arith.constant 46 : index
    %1297 = memref.load %arg4[%c46_219] : memref<144xf32, #tpu.memory_space<smem>>
    %1298 = vector.broadcast %1297 : f32 to vector<2x256xf32>
    %1299 = arith.mulf %1298, %1252 : vector<2x256xf32>
    %1300 = arith.addf %1296, %1299 : vector<2x256xf32>
    %c35_220 = arith.constant 35 : index
    %1301 = memref.load %arg4[%c35_220] : memref<144xf32, #tpu.memory_space<smem>>
    %1302 = vector.broadcast %1301 : f32 to vector<2x256xf32>
    %1303 = arith.mulf %1302, %1231 : vector<2x256xf32>
    %1304 = arith.addf %1224, %1303 : vector<2x256xf32>
    %c39_221 = arith.constant 39 : index
    %1305 = memref.load %arg4[%c39_221] : memref<144xf32, #tpu.memory_space<smem>>
    %1306 = vector.broadcast %1305 : f32 to vector<2x256xf32>
    %1307 = arith.mulf %1306, %1238 : vector<2x256xf32>
    %1308 = arith.addf %1304, %1307 : vector<2x256xf32>
    %c43_222 = arith.constant 43 : index
    %1309 = memref.load %arg4[%c43_222] : memref<144xf32, #tpu.memory_space<smem>>
    %1310 = vector.broadcast %1309 : f32 to vector<2x256xf32>
    %1311 = arith.mulf %1310, %1245 : vector<2x256xf32>
    %1312 = arith.addf %1308, %1311 : vector<2x256xf32>
    %c47_223 = arith.constant 47 : index
    %1313 = memref.load %arg4[%c47_223] : memref<144xf32, #tpu.memory_space<smem>>
    %1314 = vector.broadcast %1313 : f32 to vector<2x256xf32>
    %1315 = arith.mulf %1314, %1252 : vector<2x256xf32>
    %1316 = arith.addf %1312, %1315 : vector<2x256xf32>
    %1317 = vector.shape_cast %40 : vector<1x1xi1> to vector<1x1xi1>
    %1318 = vector.broadcast %1317 : vector<1x1xi1> to vector<2x256xi1>
    %1319 = arith.select %1318, %1008, %1009 : vector<2x256xi1>, vector<2x256xf32>
    %cst_224 = arith.constant 0.000000e+00 : f32
    %1320 = vector.shape_cast %16 : vector<1x256xi1> to vector<1x256xi1>
    %1321 = vector.broadcast %1320 : vector<1x256xi1> to vector<2x256xi1>
    %1322 = vector.broadcast %cst_224 : f32 to vector<2x256xf32>
    %1323 = arith.select %1321, %1319, %1322 : vector<2x256xi1>, vector<2x256xf32>
    %1324 = vector.shape_cast %40 : vector<1x1xi1> to vector<1x1xi1>
    %1325 = vector.broadcast %1324 : vector<1x1xi1> to vector<2x256xi1>
    %1326 = arith.select %1325, %1016, %1017 : vector<2x256xi1>, vector<2x256xf32>
    %cst_225 = arith.constant 0.000000e+00 : f32
    %1327 = vector.shape_cast %16 : vector<1x256xi1> to vector<1x256xi1>
    %1328 = vector.broadcast %1327 : vector<1x256xi1> to vector<2x256xi1>
    %1329 = vector.broadcast %cst_225 : f32 to vector<2x256xf32>
    %1330 = arith.select %1328, %1326, %1329 : vector<2x256xi1>, vector<2x256xf32>
    %1331 = vector.shape_cast %40 : vector<1x1xi1> to vector<1x1xi1>
    %1332 = vector.broadcast %1331 : vector<1x1xi1> to vector<2x256xi1>
    %1333 = arith.select %1332, %1024, %1025 : vector<2x256xi1>, vector<2x256xf32>
    %cst_226 = arith.constant 0.000000e+00 : f32
    %1334 = vector.shape_cast %16 : vector<1x256xi1> to vector<1x256xi1>
    %1335 = vector.broadcast %1334 : vector<1x256xi1> to vector<2x256xi1>
    %1336 = vector.broadcast %cst_226 : f32 to vector<2x256xf32>
    %1337 = arith.select %1335, %1333, %1336 : vector<2x256xi1>, vector<2x256xf32>
    %1338 = vector.shape_cast %40 : vector<1x1xi1> to vector<1x1xi1>
    %1339 = vector.broadcast %1338 : vector<1x1xi1> to vector<2x256xi1>
    %1340 = arith.select %1339, %1032, %1033 : vector<2x256xi1>, vector<2x256xf32>
    %cst_227 = arith.constant 0.000000e+00 : f32
    %1341 = vector.shape_cast %16 : vector<1x256xi1> to vector<1x256xi1>
    %1342 = vector.broadcast %1341 : vector<1x256xi1> to vector<2x256xi1>
    %1343 = vector.broadcast %cst_227 : f32 to vector<2x256xf32>
    %1344 = arith.select %1342, %1340, %1343 : vector<2x256xi1>, vector<2x256xf32>
    %c48_228 = arith.constant 48 : index
    %1345 = memref.load %arg4[%c48_228] : memref<144xf32, #tpu.memory_space<smem>>
    %1346 = vector.broadcast %1345 : f32 to vector<2x256xf32>
    %1347 = arith.mulf %1346, %1323 : vector<2x256xf32>
    %1348 = arith.addf %1268, %1347 : vector<2x256xf32>
    %c52_229 = arith.constant 52 : index
    %1349 = memref.load %arg4[%c52_229] : memref<144xf32, #tpu.memory_space<smem>>
    %1350 = vector.broadcast %1349 : f32 to vector<2x256xf32>
    %1351 = arith.mulf %1350, %1330 : vector<2x256xf32>
    %1352 = arith.addf %1348, %1351 : vector<2x256xf32>
    %c56_230 = arith.constant 56 : index
    %1353 = memref.load %arg4[%c56_230] : memref<144xf32, #tpu.memory_space<smem>>
    %1354 = vector.broadcast %1353 : f32 to vector<2x256xf32>
    %1355 = arith.mulf %1354, %1337 : vector<2x256xf32>
    %1356 = arith.addf %1352, %1355 : vector<2x256xf32>
    %c60_231 = arith.constant 60 : index
    %1357 = memref.load %arg4[%c60_231] : memref<144xf32, #tpu.memory_space<smem>>
    %1358 = vector.broadcast %1357 : f32 to vector<2x256xf32>
    %1359 = arith.mulf %1358, %1344 : vector<2x256xf32>
    %1360 = arith.addf %1356, %1359 : vector<2x256xf32>
    %c49_232 = arith.constant 49 : index
    %1361 = memref.load %arg4[%c49_232] : memref<144xf32, #tpu.memory_space<smem>>
    %1362 = vector.broadcast %1361 : f32 to vector<2x256xf32>
    %1363 = arith.mulf %1362, %1323 : vector<2x256xf32>
    %1364 = arith.addf %1284, %1363 : vector<2x256xf32>
    %c53_233 = arith.constant 53 : index
    %1365 = memref.load %arg4[%c53_233] : memref<144xf32, #tpu.memory_space<smem>>
    %1366 = vector.broadcast %1365 : f32 to vector<2x256xf32>
    %1367 = arith.mulf %1366, %1330 : vector<2x256xf32>
    %1368 = arith.addf %1364, %1367 : vector<2x256xf32>
    %c57_234 = arith.constant 57 : index
    %1369 = memref.load %arg4[%c57_234] : memref<144xf32, #tpu.memory_space<smem>>
    %1370 = vector.broadcast %1369 : f32 to vector<2x256xf32>
    %1371 = arith.mulf %1370, %1337 : vector<2x256xf32>
    %1372 = arith.addf %1368, %1371 : vector<2x256xf32>
    %c61_235 = arith.constant 61 : index
    %1373 = memref.load %arg4[%c61_235] : memref<144xf32, #tpu.memory_space<smem>>
    %1374 = vector.broadcast %1373 : f32 to vector<2x256xf32>
    %1375 = arith.mulf %1374, %1344 : vector<2x256xf32>
    %1376 = arith.addf %1372, %1375 : vector<2x256xf32>
    %c50_236 = arith.constant 50 : index
    %1377 = memref.load %arg4[%c50_236] : memref<144xf32, #tpu.memory_space<smem>>
    %1378 = vector.broadcast %1377 : f32 to vector<2x256xf32>
    %1379 = arith.mulf %1378, %1323 : vector<2x256xf32>
    %1380 = arith.addf %1300, %1379 : vector<2x256xf32>
    %c54_237 = arith.constant 54 : index
    %1381 = memref.load %arg4[%c54_237] : memref<144xf32, #tpu.memory_space<smem>>
    %1382 = vector.broadcast %1381 : f32 to vector<2x256xf32>
    %1383 = arith.mulf %1382, %1330 : vector<2x256xf32>
    %1384 = arith.addf %1380, %1383 : vector<2x256xf32>
    %c58_238 = arith.constant 58 : index
    %1385 = memref.load %arg4[%c58_238] : memref<144xf32, #tpu.memory_space<smem>>
    %1386 = vector.broadcast %1385 : f32 to vector<2x256xf32>
    %1387 = arith.mulf %1386, %1337 : vector<2x256xf32>
    %1388 = arith.addf %1384, %1387 : vector<2x256xf32>
    %c62_239 = arith.constant 62 : index
    %1389 = memref.load %arg4[%c62_239] : memref<144xf32, #tpu.memory_space<smem>>
    %1390 = vector.broadcast %1389 : f32 to vector<2x256xf32>
    %1391 = arith.mulf %1390, %1344 : vector<2x256xf32>
    %1392 = arith.addf %1388, %1391 : vector<2x256xf32>
    %c51_240 = arith.constant 51 : index
    %1393 = memref.load %arg4[%c51_240] : memref<144xf32, #tpu.memory_space<smem>>
    %1394 = vector.broadcast %1393 : f32 to vector<2x256xf32>
    %1395 = arith.mulf %1394, %1323 : vector<2x256xf32>
    %1396 = arith.addf %1316, %1395 : vector<2x256xf32>
    %c55_241 = arith.constant 55 : index
    %1397 = memref.load %arg4[%c55_241] : memref<144xf32, #tpu.memory_space<smem>>
    %1398 = vector.broadcast %1397 : f32 to vector<2x256xf32>
    %1399 = arith.mulf %1398, %1330 : vector<2x256xf32>
    %1400 = arith.addf %1396, %1399 : vector<2x256xf32>
    %c59_242 = arith.constant 59 : index
    %1401 = memref.load %arg4[%c59_242] : memref<144xf32, #tpu.memory_space<smem>>
    %1402 = vector.broadcast %1401 : f32 to vector<2x256xf32>
    %1403 = arith.mulf %1402, %1337 : vector<2x256xf32>
    %1404 = arith.addf %1400, %1403 : vector<2x256xf32>
    %c63_243 = arith.constant 63 : index
    %1405 = memref.load %arg4[%c63_243] : memref<144xf32, #tpu.memory_space<smem>>
    %1406 = vector.broadcast %1405 : f32 to vector<2x256xf32>
    %1407 = arith.mulf %1406, %1344 : vector<2x256xf32>
    %1408 = arith.addf %1404, %1407 : vector<2x256xf32>
    %c64_244 = arith.constant 64 : index
    %1409 = memref.load %arg4[%c64_244] : memref<144xf32, #tpu.memory_space<smem>>
    %1410 = vector.broadcast %1409 : f32 to vector<2x256xf32>
    %1411 = arith.mulf %1410, %914 : vector<2x256xf32>
    %1412 = arith.addf %1360, %1411 : vector<2x256xf32>
    %c68_245 = arith.constant 68 : index
    %1413 = memref.load %arg4[%c68_245] : memref<144xf32, #tpu.memory_space<smem>>
    %1414 = vector.broadcast %1413 : f32 to vector<2x256xf32>
    %1415 = arith.mulf %1414, %944 : vector<2x256xf32>
    %1416 = arith.addf %1412, %1415 : vector<2x256xf32>
    %c72_246 = arith.constant 72 : index
    %1417 = memref.load %arg4[%c72_246] : memref<144xf32, #tpu.memory_space<smem>>
    %1418 = vector.broadcast %1417 : f32 to vector<2x256xf32>
    %1419 = arith.mulf %1418, %974 : vector<2x256xf32>
    %1420 = arith.addf %1416, %1419 : vector<2x256xf32>
    %c76_247 = arith.constant 76 : index
    %1421 = memref.load %arg4[%c76_247] : memref<144xf32, #tpu.memory_space<smem>>
    %1422 = vector.broadcast %1421 : f32 to vector<2x256xf32>
    %1423 = arith.mulf %1422, %1004 : vector<2x256xf32>
    %1424 = arith.addf %1420, %1423 : vector<2x256xf32>
    %c65_248 = arith.constant 65 : index
    %1425 = memref.load %arg4[%c65_248] : memref<144xf32, #tpu.memory_space<smem>>
    %1426 = vector.broadcast %1425 : f32 to vector<2x256xf32>
    %1427 = arith.mulf %1426, %914 : vector<2x256xf32>
    %1428 = arith.addf %1376, %1427 : vector<2x256xf32>
    %c69_249 = arith.constant 69 : index
    %1429 = memref.load %arg4[%c69_249] : memref<144xf32, #tpu.memory_space<smem>>
    %1430 = vector.broadcast %1429 : f32 to vector<2x256xf32>
    %1431 = arith.mulf %1430, %944 : vector<2x256xf32>
    %1432 = arith.addf %1428, %1431 : vector<2x256xf32>
    %c73_250 = arith.constant 73 : index
    %1433 = memref.load %arg4[%c73_250] : memref<144xf32, #tpu.memory_space<smem>>
    %1434 = vector.broadcast %1433 : f32 to vector<2x256xf32>
    %1435 = arith.mulf %1434, %974 : vector<2x256xf32>
    %1436 = arith.addf %1432, %1435 : vector<2x256xf32>
    %c77_251 = arith.constant 77 : index
    %1437 = memref.load %arg4[%c77_251] : memref<144xf32, #tpu.memory_space<smem>>
    %1438 = vector.broadcast %1437 : f32 to vector<2x256xf32>
    %1439 = arith.mulf %1438, %1004 : vector<2x256xf32>
    %1440 = arith.addf %1436, %1439 : vector<2x256xf32>
    %c66_252 = arith.constant 66 : index
    %1441 = memref.load %arg4[%c66_252] : memref<144xf32, #tpu.memory_space<smem>>
    %1442 = vector.broadcast %1441 : f32 to vector<2x256xf32>
    %1443 = arith.mulf %1442, %914 : vector<2x256xf32>
    %1444 = arith.addf %1392, %1443 : vector<2x256xf32>
    %c70_253 = arith.constant 70 : index
    %1445 = memref.load %arg4[%c70_253] : memref<144xf32, #tpu.memory_space<smem>>
    %1446 = vector.broadcast %1445 : f32 to vector<2x256xf32>
    %1447 = arith.mulf %1446, %944 : vector<2x256xf32>
    %1448 = arith.addf %1444, %1447 : vector<2x256xf32>
    %c74_254 = arith.constant 74 : index
    %1449 = memref.load %arg4[%c74_254] : memref<144xf32, #tpu.memory_space<smem>>
    %1450 = vector.broadcast %1449 : f32 to vector<2x256xf32>
    %1451 = arith.mulf %1450, %974 : vector<2x256xf32>
    %1452 = arith.addf %1448, %1451 : vector<2x256xf32>
    %c78_255 = arith.constant 78 : index
    %1453 = memref.load %arg4[%c78_255] : memref<144xf32, #tpu.memory_space<smem>>
    %1454 = vector.broadcast %1453 : f32 to vector<2x256xf32>
    %1455 = arith.mulf %1454, %1004 : vector<2x256xf32>
    %1456 = arith.addf %1452, %1455 : vector<2x256xf32>
    %c67_256 = arith.constant 67 : index
    %1457 = memref.load %arg4[%c67_256] : memref<144xf32, #tpu.memory_space<smem>>
    %1458 = vector.broadcast %1457 : f32 to vector<2x256xf32>
    %1459 = arith.mulf %1458, %914 : vector<2x256xf32>
    %1460 = arith.addf %1408, %1459 : vector<2x256xf32>
    %c71_257 = arith.constant 71 : index
    %1461 = memref.load %arg4[%c71_257] : memref<144xf32, #tpu.memory_space<smem>>
    %1462 = vector.broadcast %1461 : f32 to vector<2x256xf32>
    %1463 = arith.mulf %1462, %944 : vector<2x256xf32>
    %1464 = arith.addf %1460, %1463 : vector<2x256xf32>
    %c75_258 = arith.constant 75 : index
    %1465 = memref.load %arg4[%c75_258] : memref<144xf32, #tpu.memory_space<smem>>
    %1466 = vector.broadcast %1465 : f32 to vector<2x256xf32>
    %1467 = arith.mulf %1466, %974 : vector<2x256xf32>
    %1468 = arith.addf %1464, %1467 : vector<2x256xf32>
    %c79_259 = arith.constant 79 : index
    %1469 = memref.load %arg4[%c79_259] : memref<144xf32, #tpu.memory_space<smem>>
    %1470 = vector.broadcast %1469 : f32 to vector<2x256xf32>
    %1471 = arith.mulf %1470, %1004 : vector<2x256xf32>
    %1472 = arith.addf %1468, %1471 : vector<2x256xf32>
    %1473 = vector.shape_cast %40 : vector<1x1xi1> to vector<1x1xi1>
    %1474 = vector.broadcast %1473 : vector<1x1xi1> to vector<2x256xi1>
    %1475 = arith.select %1474, %1009, %1008 : vector<2x256xi1>, vector<2x256xf32>
    %cst_260 = arith.constant 0.000000e+00 : f32
    %1476 = vector.shape_cast %18 : vector<1x256xi1> to vector<1x256xi1>
    %1477 = vector.broadcast %1476 : vector<1x256xi1> to vector<2x256xi1>
    %1478 = vector.broadcast %cst_260 : f32 to vector<2x256xf32>
    %1479 = arith.select %1477, %1475, %1478 : vector<2x256xi1>, vector<2x256xf32>
    %1480 = vector.shape_cast %40 : vector<1x1xi1> to vector<1x1xi1>
    %1481 = vector.broadcast %1480 : vector<1x1xi1> to vector<2x256xi1>
    %1482 = arith.select %1481, %1017, %1016 : vector<2x256xi1>, vector<2x256xf32>
    %cst_261 = arith.constant 0.000000e+00 : f32
    %1483 = vector.shape_cast %18 : vector<1x256xi1> to vector<1x256xi1>
    %1484 = vector.broadcast %1483 : vector<1x256xi1> to vector<2x256xi1>
    %1485 = vector.broadcast %cst_261 : f32 to vector<2x256xf32>
    %1486 = arith.select %1484, %1482, %1485 : vector<2x256xi1>, vector<2x256xf32>
    %1487 = vector.shape_cast %40 : vector<1x1xi1> to vector<1x1xi1>
    %1488 = vector.broadcast %1487 : vector<1x1xi1> to vector<2x256xi1>
    %1489 = arith.select %1488, %1025, %1024 : vector<2x256xi1>, vector<2x256xf32>
    %cst_262 = arith.constant 0.000000e+00 : f32
    %1490 = vector.shape_cast %18 : vector<1x256xi1> to vector<1x256xi1>
    %1491 = vector.broadcast %1490 : vector<1x256xi1> to vector<2x256xi1>
    %1492 = vector.broadcast %cst_262 : f32 to vector<2x256xf32>
    %1493 = arith.select %1491, %1489, %1492 : vector<2x256xi1>, vector<2x256xf32>
    %1494 = vector.shape_cast %40 : vector<1x1xi1> to vector<1x1xi1>
    %1495 = vector.broadcast %1494 : vector<1x1xi1> to vector<2x256xi1>
    %1496 = arith.select %1495, %1033, %1032 : vector<2x256xi1>, vector<2x256xf32>
    %cst_263 = arith.constant 0.000000e+00 : f32
    %1497 = vector.shape_cast %18 : vector<1x256xi1> to vector<1x256xi1>
    %1498 = vector.broadcast %1497 : vector<1x256xi1> to vector<2x256xi1>
    %1499 = vector.broadcast %cst_263 : f32 to vector<2x256xf32>
    %1500 = arith.select %1498, %1496, %1499 : vector<2x256xi1>, vector<2x256xf32>
    %c80_264 = arith.constant 80 : index
    %1501 = memref.load %arg4[%c80_264] : memref<144xf32, #tpu.memory_space<smem>>
    %1502 = vector.broadcast %1501 : f32 to vector<2x256xf32>
    %1503 = arith.mulf %1502, %1479 : vector<2x256xf32>
    %1504 = arith.addf %1424, %1503 : vector<2x256xf32>
    %c84_265 = arith.constant 84 : index
    %1505 = memref.load %arg4[%c84_265] : memref<144xf32, #tpu.memory_space<smem>>
    %1506 = vector.broadcast %1505 : f32 to vector<2x256xf32>
    %1507 = arith.mulf %1506, %1486 : vector<2x256xf32>
    %1508 = arith.addf %1504, %1507 : vector<2x256xf32>
    %c88_266 = arith.constant 88 : index
    %1509 = memref.load %arg4[%c88_266] : memref<144xf32, #tpu.memory_space<smem>>
    %1510 = vector.broadcast %1509 : f32 to vector<2x256xf32>
    %1511 = arith.mulf %1510, %1493 : vector<2x256xf32>
    %1512 = arith.addf %1508, %1511 : vector<2x256xf32>
    %c92_267 = arith.constant 92 : index
    %1513 = memref.load %arg4[%c92_267] : memref<144xf32, #tpu.memory_space<smem>>
    %1514 = vector.broadcast %1513 : f32 to vector<2x256xf32>
    %1515 = arith.mulf %1514, %1500 : vector<2x256xf32>
    %1516 = arith.addf %1512, %1515 : vector<2x256xf32>
    %c81_268 = arith.constant 81 : index
    %1517 = memref.load %arg4[%c81_268] : memref<144xf32, #tpu.memory_space<smem>>
    %1518 = vector.broadcast %1517 : f32 to vector<2x256xf32>
    %1519 = arith.mulf %1518, %1479 : vector<2x256xf32>
    %1520 = arith.addf %1440, %1519 : vector<2x256xf32>
    %c85_269 = arith.constant 85 : index
    %1521 = memref.load %arg4[%c85_269] : memref<144xf32, #tpu.memory_space<smem>>
    %1522 = vector.broadcast %1521 : f32 to vector<2x256xf32>
    %1523 = arith.mulf %1522, %1486 : vector<2x256xf32>
    %1524 = arith.addf %1520, %1523 : vector<2x256xf32>
    %c89_270 = arith.constant 89 : index
    %1525 = memref.load %arg4[%c89_270] : memref<144xf32, #tpu.memory_space<smem>>
    %1526 = vector.broadcast %1525 : f32 to vector<2x256xf32>
    %1527 = arith.mulf %1526, %1493 : vector<2x256xf32>
    %1528 = arith.addf %1524, %1527 : vector<2x256xf32>
    %c93_271 = arith.constant 93 : index
    %1529 = memref.load %arg4[%c93_271] : memref<144xf32, #tpu.memory_space<smem>>
    %1530 = vector.broadcast %1529 : f32 to vector<2x256xf32>
    %1531 = arith.mulf %1530, %1500 : vector<2x256xf32>
    %1532 = arith.addf %1528, %1531 : vector<2x256xf32>
    %c82_272 = arith.constant 82 : index
    %1533 = memref.load %arg4[%c82_272] : memref<144xf32, #tpu.memory_space<smem>>
    %1534 = vector.broadcast %1533 : f32 to vector<2x256xf32>
    %1535 = arith.mulf %1534, %1479 : vector<2x256xf32>
    %1536 = arith.addf %1456, %1535 : vector<2x256xf32>
    %c86_273 = arith.constant 86 : index
    %1537 = memref.load %arg4[%c86_273] : memref<144xf32, #tpu.memory_space<smem>>
    %1538 = vector.broadcast %1537 : f32 to vector<2x256xf32>
    %1539 = arith.mulf %1538, %1486 : vector<2x256xf32>
    %1540 = arith.addf %1536, %1539 : vector<2x256xf32>
    %c90_274 = arith.constant 90 : index
    %1541 = memref.load %arg4[%c90_274] : memref<144xf32, #tpu.memory_space<smem>>
    %1542 = vector.broadcast %1541 : f32 to vector<2x256xf32>
    %1543 = arith.mulf %1542, %1493 : vector<2x256xf32>
    %1544 = arith.addf %1540, %1543 : vector<2x256xf32>
    %c94_275 = arith.constant 94 : index
    %1545 = memref.load %arg4[%c94_275] : memref<144xf32, #tpu.memory_space<smem>>
    %1546 = vector.broadcast %1545 : f32 to vector<2x256xf32>
    %1547 = arith.mulf %1546, %1500 : vector<2x256xf32>
    %1548 = arith.addf %1544, %1547 : vector<2x256xf32>
    %c83_276 = arith.constant 83 : index
    %1549 = memref.load %arg4[%c83_276] : memref<144xf32, #tpu.memory_space<smem>>
    %1550 = vector.broadcast %1549 : f32 to vector<2x256xf32>
    %1551 = arith.mulf %1550, %1479 : vector<2x256xf32>
    %1552 = arith.addf %1472, %1551 : vector<2x256xf32>
    %c87_277 = arith.constant 87 : index
    %1553 = memref.load %arg4[%c87_277] : memref<144xf32, #tpu.memory_space<smem>>
    %1554 = vector.broadcast %1553 : f32 to vector<2x256xf32>
    %1555 = arith.mulf %1554, %1486 : vector<2x256xf32>
    %1556 = arith.addf %1552, %1555 : vector<2x256xf32>
    %c91_278 = arith.constant 91 : index
    %1557 = memref.load %arg4[%c91_278] : memref<144xf32, #tpu.memory_space<smem>>
    %1558 = vector.broadcast %1557 : f32 to vector<2x256xf32>
    %1559 = arith.mulf %1558, %1493 : vector<2x256xf32>
    %1560 = arith.addf %1556, %1559 : vector<2x256xf32>
    %c95_279 = arith.constant 95 : index
    %1561 = memref.load %arg4[%c95_279] : memref<144xf32, #tpu.memory_space<smem>>
    %1562 = vector.broadcast %1561 : f32 to vector<2x256xf32>
    %1563 = arith.mulf %1562, %1500 : vector<2x256xf32>
    %1564 = arith.addf %1560, %1563 : vector<2x256xf32>
    %1565 = vector.shape_cast %40 : vector<1x1xi1> to vector<1x1xi1>
    %1566 = vector.broadcast %1565 : vector<1x1xi1> to vector<2x256xi1>
    %1567 = arith.select %1566, %1010, %1007 : vector<2x256xi1>, vector<2x256xf32>
    %cst_280 = arith.constant 0.000000e+00 : f32
    %1568 = vector.shape_cast %23 : vector<1x256xi1> to vector<1x256xi1>
    %1569 = vector.broadcast %1568 : vector<1x256xi1> to vector<2x256xi1>
    %1570 = vector.broadcast %cst_280 : f32 to vector<2x256xf32>
    %1571 = arith.select %1569, %1567, %1570 : vector<2x256xi1>, vector<2x256xf32>
    %1572 = vector.shape_cast %40 : vector<1x1xi1> to vector<1x1xi1>
    %1573 = vector.broadcast %1572 : vector<1x1xi1> to vector<2x256xi1>
    %1574 = arith.select %1573, %1018, %1015 : vector<2x256xi1>, vector<2x256xf32>
    %cst_281 = arith.constant 0.000000e+00 : f32
    %1575 = vector.shape_cast %23 : vector<1x256xi1> to vector<1x256xi1>
    %1576 = vector.broadcast %1575 : vector<1x256xi1> to vector<2x256xi1>
    %1577 = vector.broadcast %cst_281 : f32 to vector<2x256xf32>
    %1578 = arith.select %1576, %1574, %1577 : vector<2x256xi1>, vector<2x256xf32>
    %1579 = vector.shape_cast %40 : vector<1x1xi1> to vector<1x1xi1>
    %1580 = vector.broadcast %1579 : vector<1x1xi1> to vector<2x256xi1>
    %1581 = arith.select %1580, %1026, %1023 : vector<2x256xi1>, vector<2x256xf32>
    %cst_282 = arith.constant 0.000000e+00 : f32
    %1582 = vector.shape_cast %23 : vector<1x256xi1> to vector<1x256xi1>
    %1583 = vector.broadcast %1582 : vector<1x256xi1> to vector<2x256xi1>
    %1584 = vector.broadcast %cst_282 : f32 to vector<2x256xf32>
    %1585 = arith.select %1583, %1581, %1584 : vector<2x256xi1>, vector<2x256xf32>
    %1586 = vector.shape_cast %40 : vector<1x1xi1> to vector<1x1xi1>
    %1587 = vector.broadcast %1586 : vector<1x1xi1> to vector<2x256xi1>
    %1588 = arith.select %1587, %1034, %1031 : vector<2x256xi1>, vector<2x256xf32>
    %cst_283 = arith.constant 0.000000e+00 : f32
    %1589 = vector.shape_cast %23 : vector<1x256xi1> to vector<1x256xi1>
    %1590 = vector.broadcast %1589 : vector<1x256xi1> to vector<2x256xi1>
    %1591 = vector.broadcast %cst_283 : f32 to vector<2x256xf32>
    %1592 = arith.select %1590, %1588, %1591 : vector<2x256xi1>, vector<2x256xf32>
    %c96_284 = arith.constant 96 : index
    %1593 = memref.load %arg4[%c96_284] : memref<144xf32, #tpu.memory_space<smem>>
    %1594 = vector.broadcast %1593 : f32 to vector<2x256xf32>
    %1595 = arith.mulf %1594, %1571 : vector<2x256xf32>
    %1596 = arith.addf %1516, %1595 : vector<2x256xf32>
    %c100_285 = arith.constant 100 : index
    %1597 = memref.load %arg4[%c100_285] : memref<144xf32, #tpu.memory_space<smem>>
    %1598 = vector.broadcast %1597 : f32 to vector<2x256xf32>
    %1599 = arith.mulf %1598, %1578 : vector<2x256xf32>
    %1600 = arith.addf %1596, %1599 : vector<2x256xf32>
    %c104_286 = arith.constant 104 : index
    %1601 = memref.load %arg4[%c104_286] : memref<144xf32, #tpu.memory_space<smem>>
    %1602 = vector.broadcast %1601 : f32 to vector<2x256xf32>
    %1603 = arith.mulf %1602, %1585 : vector<2x256xf32>
    %1604 = arith.addf %1600, %1603 : vector<2x256xf32>
    %c108_287 = arith.constant 108 : index
    %1605 = memref.load %arg4[%c108_287] : memref<144xf32, #tpu.memory_space<smem>>
    %1606 = vector.broadcast %1605 : f32 to vector<2x256xf32>
    %1607 = arith.mulf %1606, %1592 : vector<2x256xf32>
    %1608 = arith.addf %1604, %1607 : vector<2x256xf32>
    %c97_288 = arith.constant 97 : index
    %1609 = memref.load %arg4[%c97_288] : memref<144xf32, #tpu.memory_space<smem>>
    %1610 = vector.broadcast %1609 : f32 to vector<2x256xf32>
    %1611 = arith.mulf %1610, %1571 : vector<2x256xf32>
    %1612 = arith.addf %1532, %1611 : vector<2x256xf32>
    %c101_289 = arith.constant 101 : index
    %1613 = memref.load %arg4[%c101_289] : memref<144xf32, #tpu.memory_space<smem>>
    %1614 = vector.broadcast %1613 : f32 to vector<2x256xf32>
    %1615 = arith.mulf %1614, %1578 : vector<2x256xf32>
    %1616 = arith.addf %1612, %1615 : vector<2x256xf32>
    %c105_290 = arith.constant 105 : index
    %1617 = memref.load %arg4[%c105_290] : memref<144xf32, #tpu.memory_space<smem>>
    %1618 = vector.broadcast %1617 : f32 to vector<2x256xf32>
    %1619 = arith.mulf %1618, %1585 : vector<2x256xf32>
    %1620 = arith.addf %1616, %1619 : vector<2x256xf32>
    %c109_291 = arith.constant 109 : index
    %1621 = memref.load %arg4[%c109_291] : memref<144xf32, #tpu.memory_space<smem>>
    %1622 = vector.broadcast %1621 : f32 to vector<2x256xf32>
    %1623 = arith.mulf %1622, %1592 : vector<2x256xf32>
    %1624 = arith.addf %1620, %1623 : vector<2x256xf32>
    %c98_292 = arith.constant 98 : index
    %1625 = memref.load %arg4[%c98_292] : memref<144xf32, #tpu.memory_space<smem>>
    %1626 = vector.broadcast %1625 : f32 to vector<2x256xf32>
    %1627 = arith.mulf %1626, %1571 : vector<2x256xf32>
    %1628 = arith.addf %1548, %1627 : vector<2x256xf32>
    %c102_293 = arith.constant 102 : index
    %1629 = memref.load %arg4[%c102_293] : memref<144xf32, #tpu.memory_space<smem>>
    %1630 = vector.broadcast %1629 : f32 to vector<2x256xf32>
    %1631 = arith.mulf %1630, %1578 : vector<2x256xf32>
    %1632 = arith.addf %1628, %1631 : vector<2x256xf32>
    %c106_294 = arith.constant 106 : index
    %1633 = memref.load %arg4[%c106_294] : memref<144xf32, #tpu.memory_space<smem>>
    %1634 = vector.broadcast %1633 : f32 to vector<2x256xf32>
    %1635 = arith.mulf %1634, %1585 : vector<2x256xf32>
    %1636 = arith.addf %1632, %1635 : vector<2x256xf32>
    %c110_295 = arith.constant 110 : index
    %1637 = memref.load %arg4[%c110_295] : memref<144xf32, #tpu.memory_space<smem>>
    %1638 = vector.broadcast %1637 : f32 to vector<2x256xf32>
    %1639 = arith.mulf %1638, %1592 : vector<2x256xf32>
    %1640 = arith.addf %1636, %1639 : vector<2x256xf32>
    %c99_296 = arith.constant 99 : index
    %1641 = memref.load %arg4[%c99_296] : memref<144xf32, #tpu.memory_space<smem>>
    %1642 = vector.broadcast %1641 : f32 to vector<2x256xf32>
    %1643 = arith.mulf %1642, %1571 : vector<2x256xf32>
    %1644 = arith.addf %1564, %1643 : vector<2x256xf32>
    %c103_297 = arith.constant 103 : index
    %1645 = memref.load %arg4[%c103_297] : memref<144xf32, #tpu.memory_space<smem>>
    %1646 = vector.broadcast %1645 : f32 to vector<2x256xf32>
    %1647 = arith.mulf %1646, %1578 : vector<2x256xf32>
    %1648 = arith.addf %1644, %1647 : vector<2x256xf32>
    %c107_298 = arith.constant 107 : index
    %1649 = memref.load %arg4[%c107_298] : memref<144xf32, #tpu.memory_space<smem>>
    %1650 = vector.broadcast %1649 : f32 to vector<2x256xf32>
    %1651 = arith.mulf %1650, %1585 : vector<2x256xf32>
    %1652 = arith.addf %1648, %1651 : vector<2x256xf32>
    %c111_299 = arith.constant 111 : index
    %1653 = memref.load %arg4[%c111_299] : memref<144xf32, #tpu.memory_space<smem>>
    %1654 = vector.broadcast %1653 : f32 to vector<2x256xf32>
    %1655 = arith.mulf %1654, %1592 : vector<2x256xf32>
    %1656 = arith.addf %1652, %1655 : vector<2x256xf32>
    %1657 = vector.shape_cast %40 : vector<1x1xi1> to vector<1x1xi1>
    %1658 = vector.broadcast %1657 : vector<1x1xi1> to vector<2x256xi1>
    %1659 = arith.select %1658, %1011, %1006 : vector<2x256xi1>, vector<2x256xf32>
    %cst_300 = arith.constant 0.000000e+00 : f32
    %1660 = vector.shape_cast %25 : vector<1x256xi1> to vector<1x256xi1>
    %1661 = vector.broadcast %1660 : vector<1x256xi1> to vector<2x256xi1>
    %1662 = vector.broadcast %cst_300 : f32 to vector<2x256xf32>
    %1663 = arith.select %1661, %1659, %1662 : vector<2x256xi1>, vector<2x256xf32>
    %1664 = vector.shape_cast %40 : vector<1x1xi1> to vector<1x1xi1>
    %1665 = vector.broadcast %1664 : vector<1x1xi1> to vector<2x256xi1>
    %1666 = arith.select %1665, %1019, %1014 : vector<2x256xi1>, vector<2x256xf32>
    %cst_301 = arith.constant 0.000000e+00 : f32
    %1667 = vector.shape_cast %25 : vector<1x256xi1> to vector<1x256xi1>
    %1668 = vector.broadcast %1667 : vector<1x256xi1> to vector<2x256xi1>
    %1669 = vector.broadcast %cst_301 : f32 to vector<2x256xf32>
    %1670 = arith.select %1668, %1666, %1669 : vector<2x256xi1>, vector<2x256xf32>
    %1671 = vector.shape_cast %40 : vector<1x1xi1> to vector<1x1xi1>
    %1672 = vector.broadcast %1671 : vector<1x1xi1> to vector<2x256xi1>
    %1673 = arith.select %1672, %1027, %1022 : vector<2x256xi1>, vector<2x256xf32>
    %cst_302 = arith.constant 0.000000e+00 : f32
    %1674 = vector.shape_cast %25 : vector<1x256xi1> to vector<1x256xi1>
    %1675 = vector.broadcast %1674 : vector<1x256xi1> to vector<2x256xi1>
    %1676 = vector.broadcast %cst_302 : f32 to vector<2x256xf32>
    %1677 = arith.select %1675, %1673, %1676 : vector<2x256xi1>, vector<2x256xf32>
    %1678 = vector.shape_cast %40 : vector<1x1xi1> to vector<1x1xi1>
    %1679 = vector.broadcast %1678 : vector<1x1xi1> to vector<2x256xi1>
    %1680 = arith.select %1679, %1035, %1030 : vector<2x256xi1>, vector<2x256xf32>
    %cst_303 = arith.constant 0.000000e+00 : f32
    %1681 = vector.shape_cast %25 : vector<1x256xi1> to vector<1x256xi1>
    %1682 = vector.broadcast %1681 : vector<1x256xi1> to vector<2x256xi1>
    %1683 = vector.broadcast %cst_303 : f32 to vector<2x256xf32>
    %1684 = arith.select %1682, %1680, %1683 : vector<2x256xi1>, vector<2x256xf32>
    %c112_304 = arith.constant 112 : index
    %1685 = memref.load %arg4[%c112_304] : memref<144xf32, #tpu.memory_space<smem>>
    %1686 = vector.broadcast %1685 : f32 to vector<2x256xf32>
    %1687 = arith.mulf %1686, %1663 : vector<2x256xf32>
    %1688 = arith.addf %1608, %1687 : vector<2x256xf32>
    %c116_305 = arith.constant 116 : index
    %1689 = memref.load %arg4[%c116_305] : memref<144xf32, #tpu.memory_space<smem>>
    %1690 = vector.broadcast %1689 : f32 to vector<2x256xf32>
    %1691 = arith.mulf %1690, %1670 : vector<2x256xf32>
    %1692 = arith.addf %1688, %1691 : vector<2x256xf32>
    %c120_306 = arith.constant 120 : index
    %1693 = memref.load %arg4[%c120_306] : memref<144xf32, #tpu.memory_space<smem>>
    %1694 = vector.broadcast %1693 : f32 to vector<2x256xf32>
    %1695 = arith.mulf %1694, %1677 : vector<2x256xf32>
    %1696 = arith.addf %1692, %1695 : vector<2x256xf32>
    %c124_307 = arith.constant 124 : index
    %1697 = memref.load %arg4[%c124_307] : memref<144xf32, #tpu.memory_space<smem>>
    %1698 = vector.broadcast %1697 : f32 to vector<2x256xf32>
    %1699 = arith.mulf %1698, %1684 : vector<2x256xf32>
    %1700 = arith.addf %1696, %1699 : vector<2x256xf32>
    %c113_308 = arith.constant 113 : index
    %1701 = memref.load %arg4[%c113_308] : memref<144xf32, #tpu.memory_space<smem>>
    %1702 = vector.broadcast %1701 : f32 to vector<2x256xf32>
    %1703 = arith.mulf %1702, %1663 : vector<2x256xf32>
    %1704 = arith.addf %1624, %1703 : vector<2x256xf32>
    %c117_309 = arith.constant 117 : index
    %1705 = memref.load %arg4[%c117_309] : memref<144xf32, #tpu.memory_space<smem>>
    %1706 = vector.broadcast %1705 : f32 to vector<2x256xf32>
    %1707 = arith.mulf %1706, %1670 : vector<2x256xf32>
    %1708 = arith.addf %1704, %1707 : vector<2x256xf32>
    %c121_310 = arith.constant 121 : index
    %1709 = memref.load %arg4[%c121_310] : memref<144xf32, #tpu.memory_space<smem>>
    %1710 = vector.broadcast %1709 : f32 to vector<2x256xf32>
    %1711 = arith.mulf %1710, %1677 : vector<2x256xf32>
    %1712 = arith.addf %1708, %1711 : vector<2x256xf32>
    %c125_311 = arith.constant 125 : index
    %1713 = memref.load %arg4[%c125_311] : memref<144xf32, #tpu.memory_space<smem>>
    %1714 = vector.broadcast %1713 : f32 to vector<2x256xf32>
    %1715 = arith.mulf %1714, %1684 : vector<2x256xf32>
    %1716 = arith.addf %1712, %1715 : vector<2x256xf32>
    %c114_312 = arith.constant 114 : index
    %1717 = memref.load %arg4[%c114_312] : memref<144xf32, #tpu.memory_space<smem>>
    %1718 = vector.broadcast %1717 : f32 to vector<2x256xf32>
    %1719 = arith.mulf %1718, %1663 : vector<2x256xf32>
    %1720 = arith.addf %1640, %1719 : vector<2x256xf32>
    %c118_313 = arith.constant 118 : index
    %1721 = memref.load %arg4[%c118_313] : memref<144xf32, #tpu.memory_space<smem>>
    %1722 = vector.broadcast %1721 : f32 to vector<2x256xf32>
    %1723 = arith.mulf %1722, %1670 : vector<2x256xf32>
    %1724 = arith.addf %1720, %1723 : vector<2x256xf32>
    %c122_314 = arith.constant 122 : index
    %1725 = memref.load %arg4[%c122_314] : memref<144xf32, #tpu.memory_space<smem>>
    %1726 = vector.broadcast %1725 : f32 to vector<2x256xf32>
    %1727 = arith.mulf %1726, %1677 : vector<2x256xf32>
    %1728 = arith.addf %1724, %1727 : vector<2x256xf32>
    %c126_315 = arith.constant 126 : index
    %1729 = memref.load %arg4[%c126_315] : memref<144xf32, #tpu.memory_space<smem>>
    %1730 = vector.broadcast %1729 : f32 to vector<2x256xf32>
    %1731 = arith.mulf %1730, %1684 : vector<2x256xf32>
    %1732 = arith.addf %1728, %1731 : vector<2x256xf32>
    %c115_316 = arith.constant 115 : index
    %1733 = memref.load %arg4[%c115_316] : memref<144xf32, #tpu.memory_space<smem>>
    %1734 = vector.broadcast %1733 : f32 to vector<2x256xf32>
    %1735 = arith.mulf %1734, %1663 : vector<2x256xf32>
    %1736 = arith.addf %1656, %1735 : vector<2x256xf32>
    %c119_317 = arith.constant 119 : index
    %1737 = memref.load %arg4[%c119_317] : memref<144xf32, #tpu.memory_space<smem>>
    %1738 = vector.broadcast %1737 : f32 to vector<2x256xf32>
    %1739 = arith.mulf %1738, %1670 : vector<2x256xf32>
    %1740 = arith.addf %1736, %1739 : vector<2x256xf32>
    %c123_318 = arith.constant 123 : index
    %1741 = memref.load %arg4[%c123_318] : memref<144xf32, #tpu.memory_space<smem>>
    %1742 = vector.broadcast %1741 : f32 to vector<2x256xf32>
    %1743 = arith.mulf %1742, %1677 : vector<2x256xf32>
    %1744 = arith.addf %1740, %1743 : vector<2x256xf32>
    %c127_319 = arith.constant 127 : index
    %1745 = memref.load %arg4[%c127_319] : memref<144xf32, #tpu.memory_space<smem>>
    %1746 = vector.broadcast %1745 : f32 to vector<2x256xf32>
    %1747 = arith.mulf %1746, %1684 : vector<2x256xf32>
    %1748 = arith.addf %1744, %1747 : vector<2x256xf32>
    %1749 = vector.shape_cast %40 : vector<1x1xi1> to vector<1x1xi1>
    %1750 = vector.broadcast %1749 : vector<1x1xi1> to vector<2x256xi1>
    %1751 = arith.select %1750, %1012, %1005 : vector<2x256xi1>, vector<2x256xf32>
    %cst_320 = arith.constant 0.000000e+00 : f32
    %1752 = vector.shape_cast %30 : vector<1x256xi1> to vector<1x256xi1>
    %1753 = vector.broadcast %1752 : vector<1x256xi1> to vector<2x256xi1>
    %1754 = vector.broadcast %cst_320 : f32 to vector<2x256xf32>
    %1755 = arith.select %1753, %1751, %1754 : vector<2x256xi1>, vector<2x256xf32>
    %1756 = vector.shape_cast %40 : vector<1x1xi1> to vector<1x1xi1>
    %1757 = vector.broadcast %1756 : vector<1x1xi1> to vector<2x256xi1>
    %1758 = arith.select %1757, %1020, %1013 : vector<2x256xi1>, vector<2x256xf32>
    %cst_321 = arith.constant 0.000000e+00 : f32
    %1759 = vector.shape_cast %30 : vector<1x256xi1> to vector<1x256xi1>
    %1760 = vector.broadcast %1759 : vector<1x256xi1> to vector<2x256xi1>
    %1761 = vector.broadcast %cst_321 : f32 to vector<2x256xf32>
    %1762 = arith.select %1760, %1758, %1761 : vector<2x256xi1>, vector<2x256xf32>
    %1763 = vector.shape_cast %40 : vector<1x1xi1> to vector<1x1xi1>
    %1764 = vector.broadcast %1763 : vector<1x1xi1> to vector<2x256xi1>
    %1765 = arith.select %1764, %1028, %1021 : vector<2x256xi1>, vector<2x256xf32>
    %cst_322 = arith.constant 0.000000e+00 : f32
    %1766 = vector.shape_cast %30 : vector<1x256xi1> to vector<1x256xi1>
    %1767 = vector.broadcast %1766 : vector<1x256xi1> to vector<2x256xi1>
    %1768 = vector.broadcast %cst_322 : f32 to vector<2x256xf32>
    %1769 = arith.select %1767, %1765, %1768 : vector<2x256xi1>, vector<2x256xf32>
    %1770 = vector.shape_cast %40 : vector<1x1xi1> to vector<1x1xi1>
    %1771 = vector.broadcast %1770 : vector<1x1xi1> to vector<2x256xi1>
    %1772 = arith.select %1771, %1036, %1029 : vector<2x256xi1>, vector<2x256xf32>
    %cst_323 = arith.constant 0.000000e+00 : f32
    %1773 = vector.shape_cast %30 : vector<1x256xi1> to vector<1x256xi1>
    %1774 = vector.broadcast %1773 : vector<1x256xi1> to vector<2x256xi1>
    %1775 = vector.broadcast %cst_323 : f32 to vector<2x256xf32>
    %1776 = arith.select %1774, %1772, %1775 : vector<2x256xi1>, vector<2x256xf32>
    %c128_324 = arith.constant 128 : index
    %1777 = memref.load %arg4[%c128_324] : memref<144xf32, #tpu.memory_space<smem>>
    %1778 = vector.broadcast %1777 : f32 to vector<2x256xf32>
    %1779 = arith.mulf %1778, %1755 : vector<2x256xf32>
    %1780 = arith.addf %1700, %1779 : vector<2x256xf32>
    %c132_325 = arith.constant 132 : index
    %1781 = memref.load %arg4[%c132_325] : memref<144xf32, #tpu.memory_space<smem>>
    %1782 = vector.broadcast %1781 : f32 to vector<2x256xf32>
    %1783 = arith.mulf %1782, %1762 : vector<2x256xf32>
    %1784 = arith.addf %1780, %1783 : vector<2x256xf32>
    %c136_326 = arith.constant 136 : index
    %1785 = memref.load %arg4[%c136_326] : memref<144xf32, #tpu.memory_space<smem>>
    %1786 = vector.broadcast %1785 : f32 to vector<2x256xf32>
    %1787 = arith.mulf %1786, %1769 : vector<2x256xf32>
    %1788 = arith.addf %1784, %1787 : vector<2x256xf32>
    %c140_327 = arith.constant 140 : index
    %1789 = memref.load %arg4[%c140_327] : memref<144xf32, #tpu.memory_space<smem>>
    %1790 = vector.broadcast %1789 : f32 to vector<2x256xf32>
    %1791 = arith.mulf %1790, %1776 : vector<2x256xf32>
    %1792 = arith.addf %1788, %1791 : vector<2x256xf32>
    %c129_328 = arith.constant 129 : index
    %1793 = memref.load %arg4[%c129_328] : memref<144xf32, #tpu.memory_space<smem>>
    %1794 = vector.broadcast %1793 : f32 to vector<2x256xf32>
    %1795 = arith.mulf %1794, %1755 : vector<2x256xf32>
    %1796 = arith.addf %1716, %1795 : vector<2x256xf32>
    %c133_329 = arith.constant 133 : index
    %1797 = memref.load %arg4[%c133_329] : memref<144xf32, #tpu.memory_space<smem>>
    %1798 = vector.broadcast %1797 : f32 to vector<2x256xf32>
    %1799 = arith.mulf %1798, %1762 : vector<2x256xf32>
    %1800 = arith.addf %1796, %1799 : vector<2x256xf32>
    %c137_330 = arith.constant 137 : index
    %1801 = memref.load %arg4[%c137_330] : memref<144xf32, #tpu.memory_space<smem>>
    %1802 = vector.broadcast %1801 : f32 to vector<2x256xf32>
    %1803 = arith.mulf %1802, %1769 : vector<2x256xf32>
    %1804 = arith.addf %1800, %1803 : vector<2x256xf32>
    %c141_331 = arith.constant 141 : index
    %1805 = memref.load %arg4[%c141_331] : memref<144xf32, #tpu.memory_space<smem>>
    %1806 = vector.broadcast %1805 : f32 to vector<2x256xf32>
    %1807 = arith.mulf %1806, %1776 : vector<2x256xf32>
    %1808 = arith.addf %1804, %1807 : vector<2x256xf32>
    %c130_332 = arith.constant 130 : index
    %1809 = memref.load %arg4[%c130_332] : memref<144xf32, #tpu.memory_space<smem>>
    %1810 = vector.broadcast %1809 : f32 to vector<2x256xf32>
    %1811 = arith.mulf %1810, %1755 : vector<2x256xf32>
    %1812 = arith.addf %1732, %1811 : vector<2x256xf32>
    %c134_333 = arith.constant 134 : index
    %1813 = memref.load %arg4[%c134_333] : memref<144xf32, #tpu.memory_space<smem>>
    %1814 = vector.broadcast %1813 : f32 to vector<2x256xf32>
    %1815 = arith.mulf %1814, %1762 : vector<2x256xf32>
    %1816 = arith.addf %1812, %1815 : vector<2x256xf32>
    %c138_334 = arith.constant 138 : index
    %1817 = memref.load %arg4[%c138_334] : memref<144xf32, #tpu.memory_space<smem>>
    %1818 = vector.broadcast %1817 : f32 to vector<2x256xf32>
    %1819 = arith.mulf %1818, %1769 : vector<2x256xf32>
    %1820 = arith.addf %1816, %1819 : vector<2x256xf32>
    %c142_335 = arith.constant 142 : index
    %1821 = memref.load %arg4[%c142_335] : memref<144xf32, #tpu.memory_space<smem>>
    %1822 = vector.broadcast %1821 : f32 to vector<2x256xf32>
    %1823 = arith.mulf %1822, %1776 : vector<2x256xf32>
    %1824 = arith.addf %1820, %1823 : vector<2x256xf32>
    %c131_336 = arith.constant 131 : index
    %1825 = memref.load %arg4[%c131_336] : memref<144xf32, #tpu.memory_space<smem>>
    %1826 = vector.broadcast %1825 : f32 to vector<2x256xf32>
    %1827 = arith.mulf %1826, %1755 : vector<2x256xf32>
    %1828 = arith.addf %1748, %1827 : vector<2x256xf32>
    %c135_337 = arith.constant 135 : index
    %1829 = memref.load %arg4[%c135_337] : memref<144xf32, #tpu.memory_space<smem>>
    %1830 = vector.broadcast %1829 : f32 to vector<2x256xf32>
    %1831 = arith.mulf %1830, %1762 : vector<2x256xf32>
    %1832 = arith.addf %1828, %1831 : vector<2x256xf32>
    %c139_338 = arith.constant 139 : index
    %1833 = memref.load %arg4[%c139_338] : memref<144xf32, #tpu.memory_space<smem>>
    %1834 = vector.broadcast %1833 : f32 to vector<2x256xf32>
    %1835 = arith.mulf %1834, %1769 : vector<2x256xf32>
    %1836 = arith.addf %1832, %1835 : vector<2x256xf32>
    %c143_339 = arith.constant 143 : index
    %1837 = memref.load %arg4[%c143_339] : memref<144xf32, #tpu.memory_space<smem>>
    %1838 = vector.broadcast %1837 : f32 to vector<2x256xf32>
    %1839 = arith.mulf %1838, %1776 : vector<2x256xf32>
    %1840 = arith.addf %1836, %1839 : vector<2x256xf32>
    %c0_340 = arith.constant 0 : index
    %1841 = memref.load %arg5[%c0_340] : memref<4xf32, #tpu.memory_space<smem>>
    %c0_341 = arith.constant 0 : index
    %1842 = memref.load %arg6[%c0_341] : memref<4xf32, #tpu.memory_space<smem>>
    %cst_342 = arith.constant dense<0.000000e+00> : vector<2xf32>
    %1843 = vector.multi_reduction <add>, %1792, %cst_342 [1] : vector<2x256xf32> to vector<2xf32>
    %1844 = vector.shape_cast %1843 : vector<2xf32> to vector<2x1xf32>
    %cst_343 = arith.constant dense<0.000000e+00> : vector<1xf32>
    %1845 = vector.multi_reduction <add>, %1844, %cst_343 [0] : vector<2x1xf32> to vector<1xf32>
    %1846 = vector.shape_cast %1845 : vector<1xf32> to vector<1x1xf32>
    %1847 = arith.mulf %1792, %1792 : vector<2x256xf32>
    %cst_344 = arith.constant dense<0.000000e+00> : vector<2xf32>
    %1848 = vector.multi_reduction <add>, %1847, %cst_344 [1] : vector<2x256xf32> to vector<2xf32>
    %1849 = vector.shape_cast %1848 : vector<2xf32> to vector<2x1xf32>
    %cst_345 = arith.constant dense<0.000000e+00> : vector<1xf32>
    %1850 = vector.multi_reduction <add>, %1849, %cst_345 [0] : vector<2x1xf32> to vector<1xf32>
    %1851 = vector.shape_cast %1850 : vector<1xf32> to vector<1x1xf32>
    %cst_346 = arith.constant 0.001953125 : f32
    %1852 = vector.broadcast %cst_346 : f32 to vector<1x1xf32>
    %1853 = arith.mulf %1846, %1852 : vector<1x1xf32>
    %cst_347 = arith.constant 0.001953125 : f32
    %1854 = vector.broadcast %cst_347 : f32 to vector<1x1xf32>
    %1855 = arith.mulf %1851, %1854 : vector<1x1xf32>
    %1856 = arith.mulf %1853, %1853 : vector<1x1xf32>
    %1857 = arith.subf %1855, %1856 : vector<1x1xf32>
    %1858 = vector.broadcast %1853 : vector<1x1xf32> to vector<2x256xf32>
    %1859 = arith.subf %1792, %1858 : vector<2x256xf32>
    %1860 = vector.broadcast %1841 : f32 to vector<2x256xf32>
    %1861 = arith.mulf %1860, %1859 : vector<2x256xf32>
    %cst_348 = arith.constant 9.99999974E-6 : f32
    %1862 = vector.broadcast %cst_348 : f32 to vector<1x1xf32>
    %1863 = arith.addf %1857, %1862 : vector<1x1xf32>
    %1864 = math.rsqrt %1863 : vector<1x1xf32>
    %1865 = vector.broadcast %1864 : vector<1x1xf32> to vector<2x256xf32>
    %1866 = arith.mulf %1861, %1865 : vector<2x256xf32>
    %1867 = vector.broadcast %1842 : f32 to vector<2x256xf32>
    %1868 = arith.addf %1866, %1867 : vector<2x256xf32>
    %1869 = arith.addf %1868, %42 : vector<2x256xf32>
    %cst_349 = arith.constant 0.000000e+00 : f32
    %1870 = vector.broadcast %cst_349 : f32 to vector<2x256xf32>
    %1871 = arith.maximumf %1869, %1870 : vector<2x256xf32>
    %c0_350 = arith.constant 0 : index
    %c0_351 = arith.constant 0 : index
    %c0_352 = arith.constant 0 : index
    %1872 = vector.load %arg7[%c0_350, %c0_351, %c0_352] : memref<2x4x256xf32, #tpu.memory_space<vmem>>, vector<2x1x256xf32>
    %1873 = vector.shape_cast %1872 : vector<2x1x256xf32> to vector<2x256xf32>
    %1874 = vector.shape_cast %1871 : vector<2x256xf32> to vector<2x1x256xf32>
    tpu.vector_store %arg7[%c0_350, %c0_351, %c0_352], %1874 {strides = array<i32>} : memref<2x4x256xf32, #tpu.memory_space<vmem>>, vector<2x1x256xf32>,
    %c1_353 = arith.constant 1 : index
    %1875 = memref.load %arg5[%c1_353] : memref<4xf32, #tpu.memory_space<smem>>
    %c1_354 = arith.constant 1 : index
    %1876 = memref.load %arg6[%c1_354] : memref<4xf32, #tpu.memory_space<smem>>
    %cst_355 = arith.constant dense<0.000000e+00> : vector<2xf32>
    %1877 = vector.multi_reduction <add>, %1808, %cst_355 [1] : vector<2x256xf32> to vector<2xf32>
    %1878 = vector.shape_cast %1877 : vector<2xf32> to vector<2x1xf32>
    %cst_356 = arith.constant dense<0.000000e+00> : vector<1xf32>
    %1879 = vector.multi_reduction <add>, %1878, %cst_356 [0] : vector<2x1xf32> to vector<1xf32>
    %1880 = vector.shape_cast %1879 : vector<1xf32> to vector<1x1xf32>
    %1881 = arith.mulf %1808, %1808 : vector<2x256xf32>
    %cst_357 = arith.constant dense<0.000000e+00> : vector<2xf32>
    %1882 = vector.multi_reduction <add>, %1881, %cst_357 [1] : vector<2x256xf32> to vector<2xf32>
    %1883 = vector.shape_cast %1882 : vector<2xf32> to vector<2x1xf32>
    %cst_358 = arith.constant dense<0.000000e+00> : vector<1xf32>
    %1884 = vector.multi_reduction <add>, %1883, %cst_358 [0] : vector<2x1xf32> to vector<1xf32>
    %1885 = vector.shape_cast %1884 : vector<1xf32> to vector<1x1xf32>
    %cst_359 = arith.constant 0.001953125 : f32
    %1886 = vector.broadcast %cst_359 : f32 to vector<1x1xf32>
    %1887 = arith.mulf %1880, %1886 : vector<1x1xf32>
    %cst_360 = arith.constant 0.001953125 : f32
    %1888 = vector.broadcast %cst_360 : f32 to vector<1x1xf32>
    %1889 = arith.mulf %1885, %1888 : vector<1x1xf32>
    %1890 = arith.mulf %1887, %1887 : vector<1x1xf32>
    %1891 = arith.subf %1889, %1890 : vector<1x1xf32>
    %1892 = vector.broadcast %1887 : vector<1x1xf32> to vector<2x256xf32>
    %1893 = arith.subf %1808, %1892 : vector<2x256xf32>
    %1894 = vector.broadcast %1875 : f32 to vector<2x256xf32>
    %1895 = arith.mulf %1894, %1893 : vector<2x256xf32>
    %cst_361 = arith.constant 9.99999974E-6 : f32
    %1896 = vector.broadcast %cst_361 : f32 to vector<1x1xf32>
    %1897 = arith.addf %1891, %1896 : vector<1x1xf32>
    %1898 = math.rsqrt %1897 : vector<1x1xf32>
    %1899 = vector.broadcast %1898 : vector<1x1xf32> to vector<2x256xf32>
    %1900 = arith.mulf %1895, %1899 : vector<2x256xf32>
    %1901 = vector.broadcast %1876 : f32 to vector<2x256xf32>
    %1902 = arith.addf %1900, %1901 : vector<2x256xf32>
    %1903 = arith.addf %1902, %44 : vector<2x256xf32>
    %cst_362 = arith.constant 0.000000e+00 : f32
    %1904 = vector.broadcast %cst_362 : f32 to vector<2x256xf32>
    %1905 = arith.maximumf %1903, %1904 : vector<2x256xf32>
    %c0_363 = arith.constant 0 : index
    %c1_364 = arith.constant 1 : index
    %c0_365 = arith.constant 0 : index
    %1906 = vector.load %arg7[%c0_363, %c1_364, %c0_365] : memref<2x4x256xf32, #tpu.memory_space<vmem>>, vector<2x1x256xf32>
    %1907 = vector.shape_cast %1906 : vector<2x1x256xf32> to vector<2x256xf32>
    %1908 = vector.shape_cast %1905 : vector<2x256xf32> to vector<2x1x256xf32>
    tpu.vector_store %arg7[%c0_363, %c1_364, %c0_365], %1908 {strides = array<i32>} : memref<2x4x256xf32, #tpu.memory_space<vmem>>, vector<2x1x256xf32>,
    %c2_366 = arith.constant 2 : index
    %1909 = memref.load %arg5[%c2_366] : memref<4xf32, #tpu.memory_space<smem>>
    %c2_367 = arith.constant 2 : index
    %1910 = memref.load %arg6[%c2_367] : memref<4xf32, #tpu.memory_space<smem>>
    %cst_368 = arith.constant dense<0.000000e+00> : vector<2xf32>
    %1911 = vector.multi_reduction <add>, %1824, %cst_368 [1] : vector<2x256xf32> to vector<2xf32>
    %1912 = vector.shape_cast %1911 : vector<2xf32> to vector<2x1xf32>
    %cst_369 = arith.constant dense<0.000000e+00> : vector<1xf32>
    %1913 = vector.multi_reduction <add>, %1912, %cst_369 [0] : vector<2x1xf32> to vector<1xf32>
    %1914 = vector.shape_cast %1913 : vector<1xf32> to vector<1x1xf32>
    %1915 = arith.mulf %1824, %1824 : vector<2x256xf32>
    %cst_370 = arith.constant dense<0.000000e+00> : vector<2xf32>
    %1916 = vector.multi_reduction <add>, %1915, %cst_370 [1] : vector<2x256xf32> to vector<2xf32>
    %1917 = vector.shape_cast %1916 : vector<2xf32> to vector<2x1xf32>
    %cst_371 = arith.constant dense<0.000000e+00> : vector<1xf32>
    %1918 = vector.multi_reduction <add>, %1917, %cst_371 [0] : vector<2x1xf32> to vector<1xf32>
    %1919 = vector.shape_cast %1918 : vector<1xf32> to vector<1x1xf32>
    %cst_372 = arith.constant 0.001953125 : f32
    %1920 = vector.broadcast %cst_372 : f32 to vector<1x1xf32>
    %1921 = arith.mulf %1914, %1920 : vector<1x1xf32>
    %cst_373 = arith.constant 0.001953125 : f32
    %1922 = vector.broadcast %cst_373 : f32 to vector<1x1xf32>
    %1923 = arith.mulf %1919, %1922 : vector<1x1xf32>
    %1924 = arith.mulf %1921, %1921 : vector<1x1xf32>
    %1925 = arith.subf %1923, %1924 : vector<1x1xf32>
    %1926 = vector.broadcast %1921 : vector<1x1xf32> to vector<2x256xf32>
    %1927 = arith.subf %1824, %1926 : vector<2x256xf32>
    %1928 = vector.broadcast %1909 : f32 to vector<2x256xf32>
    %1929 = arith.mulf %1928, %1927 : vector<2x256xf32>
    %cst_374 = arith.constant 9.99999974E-6 : f32
    %1930 = vector.broadcast %cst_374 : f32 to vector<1x1xf32>
    %1931 = arith.addf %1925, %1930 : vector<1x1xf32>
    %1932 = math.rsqrt %1931 : vector<1x1xf32>
    %1933 = vector.broadcast %1932 : vector<1x1xf32> to vector<2x256xf32>
    %1934 = arith.mulf %1929, %1933 : vector<2x256xf32>
    %1935 = vector.broadcast %1910 : f32 to vector<2x256xf32>
    %1936 = arith.addf %1934, %1935 : vector<2x256xf32>
    %1937 = arith.addf %1936, %46 : vector<2x256xf32>
    %cst_375 = arith.constant 0.000000e+00 : f32
    %1938 = vector.broadcast %cst_375 : f32 to vector<2x256xf32>
    %1939 = arith.maximumf %1937, %1938 : vector<2x256xf32>
    %c0_376 = arith.constant 0 : index
    %c2_377 = arith.constant 2 : index
    %c0_378 = arith.constant 0 : index
    %1940 = vector.load %arg7[%c0_376, %c2_377, %c0_378] : memref<2x4x256xf32, #tpu.memory_space<vmem>>, vector<2x1x256xf32>
    %1941 = vector.shape_cast %1940 : vector<2x1x256xf32> to vector<2x256xf32>
    %1942 = vector.shape_cast %1939 : vector<2x256xf32> to vector<2x1x256xf32>
    tpu.vector_store %arg7[%c0_376, %c2_377, %c0_378], %1942 {strides = array<i32>} : memref<2x4x256xf32, #tpu.memory_space<vmem>>, vector<2x1x256xf32>,
    %c3_379 = arith.constant 3 : index
    %1943 = memref.load %arg5[%c3_379] : memref<4xf32, #tpu.memory_space<smem>>
    %c3_380 = arith.constant 3 : index
    %1944 = memref.load %arg6[%c3_380] : memref<4xf32, #tpu.memory_space<smem>>
    %cst_381 = arith.constant dense<0.000000e+00> : vector<2xf32>
    %1945 = vector.multi_reduction <add>, %1840, %cst_381 [1] : vector<2x256xf32> to vector<2xf32>
    %1946 = vector.shape_cast %1945 : vector<2xf32> to vector<2x1xf32>
    %cst_382 = arith.constant dense<0.000000e+00> : vector<1xf32>
    %1947 = vector.multi_reduction <add>, %1946, %cst_382 [0] : vector<2x1xf32> to vector<1xf32>
    %1948 = vector.shape_cast %1947 : vector<1xf32> to vector<1x1xf32>
    %1949 = arith.mulf %1840, %1840 : vector<2x256xf32>
    %cst_383 = arith.constant dense<0.000000e+00> : vector<2xf32>
    %1950 = vector.multi_reduction <add>, %1949, %cst_383 [1] : vector<2x256xf32> to vector<2xf32>
    %1951 = vector.shape_cast %1950 : vector<2xf32> to vector<2x1xf32>
    %cst_384 = arith.constant dense<0.000000e+00> : vector<1xf32>
    %1952 = vector.multi_reduction <add>, %1951, %cst_384 [0] : vector<2x1xf32> to vector<1xf32>
    %1953 = vector.shape_cast %1952 : vector<1xf32> to vector<1x1xf32>
    %cst_385 = arith.constant 0.001953125 : f32
    %1954 = vector.broadcast %cst_385 : f32 to vector<1x1xf32>
    %1955 = arith.mulf %1948, %1954 : vector<1x1xf32>
    %cst_386 = arith.constant 0.001953125 : f32
    %1956 = vector.broadcast %cst_386 : f32 to vector<1x1xf32>
    %1957 = arith.mulf %1953, %1956 : vector<1x1xf32>
    %1958 = arith.mulf %1955, %1955 : vector<1x1xf32>
    %1959 = arith.subf %1957, %1958 : vector<1x1xf32>
    %1960 = vector.broadcast %1955 : vector<1x1xf32> to vector<2x256xf32>
    %1961 = arith.subf %1840, %1960 : vector<2x256xf32>
    %1962 = vector.broadcast %1943 : f32 to vector<2x256xf32>
    %1963 = arith.mulf %1962, %1961 : vector<2x256xf32>
    %cst_387 = arith.constant 9.99999974E-6 : f32
    %1964 = vector.broadcast %cst_387 : f32 to vector<1x1xf32>
    %1965 = arith.addf %1959, %1964 : vector<1x1xf32>
    %1966 = math.rsqrt %1965 : vector<1x1xf32>
    %1967 = vector.broadcast %1966 : vector<1x1xf32> to vector<2x256xf32>
    %1968 = arith.mulf %1963, %1967 : vector<2x256xf32>
    %1969 = vector.broadcast %1944 : f32 to vector<2x256xf32>
    %1970 = arith.addf %1968, %1969 : vector<2x256xf32>
    %1971 = arith.addf %1970, %48 : vector<2x256xf32>
    %cst_388 = arith.constant 0.000000e+00 : f32
    %1972 = vector.broadcast %cst_388 : f32 to vector<2x256xf32>
    %1973 = arith.maximumf %1971, %1972 : vector<2x256xf32>
    %c0_389 = arith.constant 0 : index
    %c3_390 = arith.constant 3 : index
    %c0_391 = arith.constant 0 : index
    %1974 = vector.load %arg7[%c0_389, %c3_390, %c0_391] : memref<2x4x256xf32, #tpu.memory_space<vmem>>, vector<2x1x256xf32>
    %1975 = vector.shape_cast %1974 : vector<2x1x256xf32> to vector<2x256xf32>
    %1976 = vector.shape_cast %1973 : vector<2x256xf32> to vector<2x1x256xf32>
    tpu.vector_store %arg7[%c0_389, %c3_390, %c0_391], %1976 {strides = array<i32>} : memref<2x4x256xf32, #tpu.memory_space<vmem>>, vector<2x1x256xf32>,
    return
  }
}

</mosaic_0001>

<bundles_post_ra>
// kernel: tpu_custom_call.1
= control target key start
LH: loop header
LB: loop body
LE: loop exit
PB: predicated region body
PF: predicated region fallthrough
CT: control target
= control target key end

     0   :  { %s9876_s0 = inlined_call_operand.hbm [shape: f32[2,4,256], index: 0, kind: input, shape index: {}]   ;;  %s9877_s1 = inlined_call_operand.vmem [shape: f32[144], index: 1, kind: input, shape index: {}]   ;;  %s9878_s2 = inlined_call_operand.vmem [shape: f32[4], index: 2, kind: input, shape index: {}]   ;;  %s9879_s3 = inlined_call_operand.vmem [shape: f32[4], index: 3, kind: input, shape index: {}]   ;;  %s9880_s4 = inlined_call_operand.vmem [shape: f32[144], index: 4, kind: input, shape index: {}]   ;;  %s9881_s5 = inlined_call_operand.vmem [shape: f32[4], index: 5, kind: input, shape index: {}]   ;;  %s9882_s6 = inlined_call_operand.vmem [shape: f32[4], index: 6, kind: input, shape index: {}]   ;;  %s9883_s7 = inlined_call_operand.hbm [shape: f32[2,4,256], index: 7, kind: output, shape index: {}]  }
   0x1   :  { %10321 = sst [smem:[#allocation356_spill]] %s9883_s7 }
   0x2   :  { %12 = vsyncpa [#allocation3], 0 }
   0x3   :  { %13 = vsyncpa [#allocation5], 0 }
   0x4   :  { %14 = vsyncpa [#allocation8], 0 }
   0x5   :  { %15 = vsyncpa [#allocation11], 0 }
   0x6   :  { %16 = vsyncpa [#allocation14], 0  ;;  %s46_s26 = sshll.u32 %s9878_s2, 4  ;;  %s47_s26 = int_to_ptr.vmem [resolvable:$true] %s46_s26 }
   0x7   :  { %17 = vsyncpa [#allocation4], 0  ;;  %s66_s29 = sshll.u32 %s9880_s4, 4  ;;  %s3988_s30 = scalar_lea.vmem %s47_s26, 16  ;;  %s67_s29 = int_to_ptr.vmem [resolvable:$true] %s66_s29 }
   0x8   :  { %p3989_p0 = scmp.ne.s32.totalorder %s47_s26, %s3988_s30  ;;  %p3993_p1 = scmp.lt.s32.totalorder %s47_s26, %s47_s26 }
   0x9   :  { %p3994_p2 = scmp.lt.s32.totalorder %s3988_s30, %s3988_s30 }
   0xb   :  { %p3995_p3 = por %p3994_p2, %p3993_p1 }
   0xd   :  { %p3996_p4 = pnand %p3995_p3, %p3989_p0 }
   0xf   :  { %3999 = shalt.err (!%p3996_p4)
}
  0x10   :  { %s4116_s8 = smov [#allocation7]   ;;  %s4000_s9 = scalar_lea.vmem %s67_s29, 32 }
  0x11   :  { %49 = dma.vmem_to_smem %s47_s26, 16, %s4116_s8, [#allocation8]  }
  0x12   :  { %p4001_p5 = scmp.ne.s32.totalorder %s67_s29, %s4000_s9  ;;  %p4005_p6 = scmp.lt.s32.totalorder %s67_s29, %s67_s29 }
  0x13   :  { %p4006_p7 = scmp.lt.s32.totalorder %s4000_s9, %s4000_s9 }
  0x15   :  { %p4007_p8 = por %p4006_p7, %p4005_p6 }
  0x17   :  { %p4008_p9 = pnand %p4007_p8, %p4001_p5 }
  0x19   :  { %4011 = shalt.err (!%p4008_p9)
}
  0x1a   :  { %s4117_s2 = smov [#allocation10]   ;;  %s4118_s4 = smov [#allocation2]  }
  0x1b   :  { %69 = dma.vmem_to_smem %s67_s29, 32, %s4117_s2, [#allocation11]  }
  0x1c   :  { %s23_s10 = sshll.u32 %s4118_s4, 4  ;;  %s36_s13 = sshll.u32 %s9877_s1, 4  ;;  %s24_s10 = int_to_ptr.vmem [resolvable:$true] %s23_s10  ;;  %s37_s13 = int_to_ptr.vmem [resolvable:$true] %s36_s13 }
  0x1d   :  { %s4012_s16 = scalar_lea.hbm %s9876_s0, 256 }
  0x1e   :  { %p4013_p10 = scmp.ne.s32.totalorder %s9876_s0, %s4012_s16  ;;  %p4016_p11 = scmp.lt.u32.totalorder %s4012_s16, %s9876_s0 }
  0x20   :  { %p4018_p12 = pnand %p4016_p11, %p4013_p10 }
  0x22   :  { %4021 = shalt.err (!%p4018_p12)
}
  0x23   :  { %s4022_s21 = scalar_lea.vmem %s24_s10, 256  ;;  %p4027_p0 = scmp.lt.s32.totalorder %s24_s10, %s24_s10 }
  0x24   :  { %p4023_p13 = scmp.ne.s32.totalorder %s24_s10, %s4022_s21  ;;  %p4028_p1 = scmp.lt.s32.totalorder %s4022_s21, %s4022_s21 }
  0x26   :  { %p4029_p2 = por %p4028_p1, %p4027_p0 }
  0x28   :  { %p4030_p3 = pnand %p4029_p2, %p4023_p13 }
  0x2a   :  { %4033 = shalt.err (!%p4030_p3)
}
  0x2b   :  { %s9884_s1 = smov 128   ;;  %s9885_s22 = smov 8  }
  0x2c   :  { %29 = dma.hbm_to_vmem [thread:$0]  %s9876_s0, 256, %s24_s10, [#allocation3], %s9884_s1, %s9884_s1, %s9885_s22  }
  0x2d   :  { %s4034_s25 = scalar_lea.vmem %s37_s13, 32  ;;  %p4039_p5 = scmp.lt.s32.totalorder %s37_s13, %s37_s13 }
  0x2e   :  { %p4035_p4 = scmp.ne.s32.totalorder %s37_s13, %s4034_s25  ;;  %p4040_p6 = scmp.lt.s32.totalorder %s4034_s25, %s4034_s25 }
  0x30   :  { %p4041_p7 = por %p4040_p6, %p4039_p5 }
  0x32   :  { %p4042_p8 = pnand %p4041_p7, %p4035_p4 }
  0x34   :  { %4045 = shalt.err (!%p4042_p8)
}
  0x35   :  { %s4121_s26 = smov [#allocation6]   ;;  %s56_s29 = sshll.u32 %s9879_s3, 4  ;;  %s57_s29 = int_to_ptr.vmem [resolvable:$true] %s56_s29 }
  0x36   :  { %39 = dma.vmem_to_smem %s37_s13, 32, %s4121_s26, [#allocation5]  }
  0x37   :  { %s76_s9 = sshll.u32 %s9881_s5, 4  ;;  %s4046_s0 = scalar_lea.vmem %s57_s29, 16  ;;  %s77_s9 = int_to_ptr.vmem [resolvable:$true] %s76_s9 }
  0x38   :  { %p4047_p9 = scmp.ne.s32.totalorder %s57_s29, %s4046_s0  ;;  %p4051_p10 = scmp.lt.s32.totalorder %s57_s29, %s57_s29 }
  0x39   :  { %p4052_p11 = scmp.lt.s32.totalorder %s4046_s0, %s4046_s0 }
  0x3b   :  { %p4053_p12 = por %p4052_p11, %p4051_p10 }
  0x3d   :  { %p4054_p13 = pnand %p4053_p12, %p4047_p9 }
  0x3f   :  { %4057 = shalt.err (!%p4054_p13)
}
  0x40   :  { %s4122_s2 = smov [#allocation9]   ;;  %s4058_s4 = scalar_lea.vmem %s77_s9, 16 }
  0x41   :  { %59 = dma.vmem_to_smem %s57_s29, 16, %s4122_s2, [#allocation8]  }
  0x42   :  { %p4059_p0 = scmp.ne.s32.totalorder %s77_s9, %s4058_s4  ;;  %p4063_p1 = scmp.lt.s32.totalorder %s77_s9, %s77_s9 }
  0x43   :  { %p4064_p2 = scmp.lt.s32.totalorder %s4058_s4, %s4058_s4 }
  0x45   :  { %p4065_p3 = por %p4064_p2, %p4063_p1 }
  0x47   :  { %p4066_p4 = pnand %p4065_p3, %p4059_p0 }
  0x49   :  { %4069 = shalt.err (!%p4066_p4)
}
  0x4a   :  { %s4123_s3 = smov [#allocation12]   ;;  %s86_s11 = sshll.u32 %s9882_s6, 4  ;;  %s87_s11 = int_to_ptr.vmem [resolvable:$true] %s86_s11 }
  0x4b   :  { %79 = dma.vmem_to_smem %s77_s9, 16, %s4123_s3, [#allocation11]  }
  0x4c   :  { %s4070_s12 = scalar_lea.vmem %s87_s11, 16  ;;  %p4075_p6 = scmp.lt.s32.totalorder %s87_s11, %s87_s11 }
  0x4d   :  { %p4071_p5 = scmp.ne.s32.totalorder %s87_s11, %s4070_s12  ;;  %p4076_p7 = scmp.lt.s32.totalorder %s4070_s12, %s4070_s12 }
  0x4f   :  { %p4077_p8 = por %p4076_p7, %p4075_p6 }
  0x51   :  { %p4078_p9 = pnand %p4077_p8, %p4071_p5 }
  0x53   :  { %4081 = shalt.err (!%p4078_p9)
}
  0x54   :  { %s4124_s13 = smov [#allocation13]  }
  0x55   :  { %89 = dma.vmem_to_smem %s87_s11, 16, %s4124_s13, [#allocation14]  }
  0x56   :  { %4104 = dma.done.wait [#allocation3], 256  }
  0x57   :  { %4105 = vsyncadd [#allocation3], 4294967040 }
  0x58   :  { %4106 = dma.done.wait [#allocation5], 32  }
  0x59   :  { %4107 = vsyncadd [#allocation5], 4294967264 }
  0x5a   :  { %4108 = dma.done.wait [#allocation8], 32  }
  0x5b   :  { %4109 = vsyncadd [#allocation8], 4294967264 }
  0x5c   :  { %4110 = dma.done.wait [#allocation11], 48  }
  0x5d   :  { %4111 = vsyncadd [#allocation11], 4294967248 }
  0x5e   :  { %4112 = dma.done.wait [#allocation14], 16  }
  0x5f   :  { %4113 = vsyncadd [#allocation14], 4294967280 }
  0x60   :  { %111 = sfence }
  0x61   :  { %v9941_v0 = vlaneseq  ;;  %v4209_v1 = vld [vmem:[#allocation2] ss:$4 sm:$0x3]  ;;  %v4125_v2 = vmov 1966171168   ;;  %s9888_s6 = smov 1  }
  0x62   :  { %10322 = vst [vmem:[#allocation22_spill] sm:$0xff] %v4209_v1  ;;  %v172_v3 = vunpack.c.l.s4 %v4125_v2  ;;  %v4211_v4 = vld [vmem:[#allocation2 + $0x8] ss:$4 sm:$0x3]  ;;  %s9900_s14 = smov 17   ;;  %s9898_s15 = smov 111  }
  0x63   :  { %10323 = vst [vmem:[#allocation23_spill] sm:$0xff] %v4211_v4  ;;  %v4214_v5 = vand.u32 127, %v9941_v0  ;;  %v4217_v6 = vshrl.u32 %v9941_v0, 7  ;;  %v4219_v7 = vld [vmem:[#allocation2 + $0x1] ss:$4 sm:$0x3]  ;;  %v170_v9 = vcombine.low %v4209_v1, %v4211_v4 }
  0x64   :  { %10325 = vst [vmem:[#allocation25_spill] sm:$0xff] %v4219_v7  ;;  %v173_v8 = vunpack.c.0.s8 %v172_v3  ;;  %v4223_v10 = vld [vmem:[#allocation2 + $0x9] ss:$4 sm:$0x3]  ;;  %s9896_s16 = smov 16   ;;  %s9894_s17 = smov 112  }
  0x65   :  { %10324 = vst [vmem:[#allocation24_spill] sm:$0xff] %v4214_v5  ;;  %10326 = vst [vmem:[#allocation26_spill] sm:$0xff] %v4223_v10  ;;  %v4225_v11 = vld [vmem:[#allocation2 + $0x2] ss:$4 sm:$0x3]  ;;  %v133_v12 = vcvt.s32.f32 %v4214_v5  ;;  %v4229_v13 = vadd.s32 128, %v4214_v5  ;;  %v252_v14 = vcombine.low %v4219_v7, %v4223_v10 }
  0x66   :  { %10327 = vst [vmem:[#allocation27_spill] sm:$0xff] %v4225_v11  ;;  %v4233_v15 = vld [vmem:[#allocation2 + $0xa] ss:$4 sm:$0x3]  ;;  %v4236_v16 = vsub.s32 %v173_v8, %v4217_v6  ;;  %s9892_s18 = smov 15   ;;  %s9890_s19 = smov 113  }
  0x67   :  { %10328 = vst [vmem:[#allocation28_spill] sm:$0xff] %v4229_v13  ;;  %10329 = vst [vmem:[#allocation29_spill] sm:$0xff] %v4233_v15  ;;  %135 = vrot.lane.b32.xlu0 %v133_v12, %s9888_s6  ;;  %v134_v17 = vcvt.s32.f32 %v4229_v13  ;;  %v327_v20 = vcombine.low %v4225_v11, %v4233_v15  ;;  %v165_v26 = vld [vmem:[#allocation2 + $0x3] ss:$4 sm:$0x3]  ;;  %s9886_s20 = smov 127  }
  0x68   :  { %10330 = vst [vmem:[#allocation30_spill] sm:$0xff] %v4236_v16  ;;  %v177_v18 = vrot.slane %v170_v9, %v4236_v16  ;;  %v259_v19 = vrot.slane %v252_v14, %v4236_v16  ;;  %v167_v27 = vld [vmem:[#allocation2 + $0xb] ss:$4 sm:$0x3]  ;;  %vm139_vm0 = vcmp.lt.s32.totalorder %v4214_v5, 1  ;;  %vm142_vm1 = vcmp.eq.s32.totalorder %v4214_v5, 0 }
  0x69   :  { %v334_v25 = vrot.slane %v327_v20, %v4236_v16  ;;  %v402_v30 = vcombine.low %v165_v26, %v167_v27  ;;  %vm146_vm2 = vcmask 1040384   ;;  %s4463_s21 = sld [smem:[#allocation6]]  ;;  %s4467_s23 = sld [smem:[#allocation6 + $0x1]]  ;;  %vm199_vm3 = vcmp.lt.s32.totalorder %v4214_v5, 17 }
  0x6a   :  { %v4245_v21 = vrot.slane %v177_v18, %v4236_v16  ;;  %v260_v22 = vcombine.high %v259_v19, %v259_v19  ;;  %v178_v23 = vcombine.high %v177_v18, %v177_v18  ;;  %v4272_v33 = vrot.slane %v259_v19, %v4236_v16  ;;  %s4469_s24 = sld [smem:[#allocation6 + $0x2]]  ;;  %s4471_s25 = sld [smem:[#allocation6 + $0x3]] }
  0x6b   :  { %137 = vrot.lane.b32.xlu0 %v134_v17, %s9888_s6  ;;  %v335_v29 = vcombine.high %v334_v25, %v334_v25  ;;  %v409_v32 = vrot.slane %v402_v30, %v4236_v16  ;;  %v4286_v36 = vrot.slane %v334_v25, %v4236_v16  ;;  %s4473_s26 = sld [smem:[#allocation6 + $0x80]]  ;;  %s4477_s27 = sld [smem:[#allocation6 + $0x81]]  ;;  %vm247_vm4 = vcmp.lt.s32.totalorder %v4214_v5, 111 }
  0x6c   :  { %10331 = vst [vmem:[#allocation31_spill] sm:$0xff] %v4245_v21  ;;  %195 = vrot.lane.b32.xlu1 %v4245_v21, %s9900_s14  ;;  %v4251_v24 = vrot.slane %v260_v22, %v4236_v16  ;;  %v4257_v28 = vrot.slane %v178_v23, %v4236_v16  ;;  %10335 = vst [vmem:[#allocation35_spill] sm:$0xff] %v4272_v33  ;;  %s4479_s28 = sld [smem:[#allocation6 + $0x82]]  ;;  %s4481_s29 = sld [smem:[#allocation6 + $0x83]]  ;;  %vm206_vm5 = vcmp.lt.s32.totalorder %v4214_v5, 16  ;;  %vm240_vm6 = vcmp.lt.s32.totalorder %v4214_v5, 112 }
  0x6d   :  { %v4266_v31 = vrot.slane %v335_v29, %v4236_v16  ;;  %v410_v34 = vcombine.high %v409_v32, %v409_v32  ;;  %10337 = vst [vmem:[#allocation37_spill] sm:$0xff] %v4286_v36  ;;  %v4297_v37 = vrot.slane %v409_v32, %v4236_v16  ;;  %s4483_s30 = sld [smem:[#allocation6 + $0x4]]  ;;  %s4485_s8 = sld [smem:[#allocation6 + $0x5]]  ;;  %vm10136_vm7 = vcmp.lt.s32.totalorder %v4214_v5, 15 }
  0x6e   :  { %10332 = vst [vmem:[#allocation32_spill] sm:$0xff] %v4251_v24  ;;  %10333 = vst [vmem:[#allocation33_spill] sm:$0xff] %v4257_v28  ;;  %s4487_s9 = sld [smem:[#allocation6 + $0x6]]  ;;  %s4489_s0 = sld [smem:[#allocation6 + $0x7]]  ;;  %vm10131_vm8 = vcmp.lt.s32.totalorder %v4214_v5, 113  ;;  %vm10177_vm9 = vcmp.lt.s32.totalorder %v4214_v5, 127 }
  0x6f   :  { %243 = vrot.lane.b32.xlu0 %v4245_v21, %s9898_s15  ;;  %10334 = vst [vmem:[#allocation34_spill] sm:$0xff] %v4266_v31  ;;  %v4281_v35 = vrot.slane %v410_v34, %v4236_v16  ;;  %10338 = vst [vmem:[#allocation38_spill] sm:$0xff] %v4297_v37  ;;  %10339 = sst [smem:[#allocation39_spill]] %s4463_s21  ;;  %s4491_s2 = sld [smem:[#allocation6 + $0x84]]  ;;  %vm10156_vm12 = vcmp.ge.s32.totalorder %v4214_v5, 16 }
  0x70   :  { %279 = vrot.lane.b32.xlu1 %v4251_v24, %s9900_s14  ;;  %10340 = sst [smem:[#allocation40_spill]] %s4467_s23  ;;  %s4495_s4 = sld [smem:[#allocation6 + $0x85]] }
  0x71   :  { %10336 = vst [vmem:[#allocation36_spill] sm:$0xff] %v4281_v35  ;;  %10341 = sst [smem:[#allocation41_spill]] %s4469_s24  ;;  %s4497_s3 = sld [smem:[#allocation6 + $0x86]] }
  0x72   :  { %10342 = sst [smem:[#allocation42_spill]] %s4471_s25  ;;  %s4499_s5 = sld [smem:[#allocation6 + $0x87]] }
  0x73   :  { %197 = vrot.lane.b32.xlu0 %v4257_v28, %s9900_s14  ;;  %10343 = sst [smem:[#allocation43_spill]] %s4473_s26  ;;  %s4501_s10 = sld [smem:[#allocation6 + $0x8]] }
  0x74   :  { %321 = vrot.lane.b32.xlu1 %v4251_v24, %s9898_s15  ;;  %10344 = sst [smem:[#allocation44_spill]] %s4477_s27  ;;  %s4505_s11 = sld [smem:[#allocation6 + $0x9]] }
  0x75   :  { %10345 = sst [smem:[#allocation45_spill]] %s4479_s28  ;;  %s4507_s12 = sld [smem:[#allocation6 + $0xa]] }
  0x76   :  { %10346 = sst [smem:[#allocation46_spill]] %s4481_s29  ;;  %s4509_s13 = sld [smem:[#allocation6 + $0xb]] }
  0x77   :  { %245 = vrot.lane.b32.xlu0 %v4257_v28, %s9898_s15  ;;  %10347 = sst [smem:[#allocation47_spill]] %s4483_s30  ;;  %s4513_s22 = sld [smem:[#allocation6 + $0x89]] }
  0x78   :  { %354 = vrot.lane.b32.xlu1 %v4266_v31, %s9900_s14  ;;  %10348 = sst [smem:[#allocation48_spill]] %s4485_s8  ;;  %s4511_s1 = sld [smem:[#allocation6 + $0x88]] }
  0x79   :  { %10349 = sst [smem:[#allocation49_spill]] %s4487_s9  ;;  %s4640_s21 = sld [smem:[#allocation6 + $0x27]] }
  0x7a   :  { %10350 = sst [smem:[#allocation50_spill]] %s4489_s0  ;;  %s4535_s7 = sld [smem:[#allocation6 + $0x12]] }
  0x7b   :  { %277 = vrot.lane.b32.xlu0 %v4272_v33, %s9900_s14  ;;  %10351 = sst [smem:[#allocation51_spill]] %s4491_s2  ;;  %s4650_s27 = sld [smem:[#allocation6 + $0x65]] }
  0x7c   :  { %396 = vrot.lane.b32.xlu1 %v4266_v31, %s9898_s15  ;;  %10352 = sst [smem:[#allocation52_spill]] %s4495_s4  ;;  %s4642_s23 = sld [smem:[#allocation6 + $0x64]] }
  0x7d   :  { %10353 = sst [smem:[#allocation53_spill]] %s4497_s3  ;;  %s4662_s2 = sld [smem:[#allocation6 + $0x28]] }
  0x7e   :  { %10354 = sst [smem:[#allocation54_spill]] %s4499_s5  ;;  %s4652_s29 = sld [smem:[#allocation6 + $0x66]] }
  0x7f   :  { %319 = vrot.lane.b32.xlu0 %v4272_v33, %s9898_s15  ;;  %10355 = sst [smem:[#allocation55_spill]] %s4501_s10  ;;  %s4670_s3 = sld [smem:[#allocation6 + $0x2a]] }
  0x80   :  { %429 = vrot.lane.b32.xlu1 %v4281_v35, %s9900_s14  ;;  %10356 = sst [smem:[#allocation56_spill]] %s4505_s11  ;;  %s4678_s11 = sld [smem:[#allocation6 + $0x68]] }
  0x81   :  { %10357 = sst [smem:[#allocation57_spill]] %s4507_s12  ;;  %s4692_s24 = sld [smem:[#allocation6 + $0x6b]] }
  0x82   :  { %10358 = sst [smem:[#allocation58_spill]] %s4509_s13  ;;  %s4686_s26 = sld [smem:[#allocation6 + $0x6a]] }
  0x83   :  { %352 = vrot.lane.b32.xlu0 %v4286_v36, %s9900_s14  ;;  %10359 = sst [smem:[#allocation59_spill]] %s4511_s1  ;;  %s4704_s5 = sld [smem:[#allocation6 + $0x2e]] }
  0x84   :  { %471 = vrot.lane.b32.xlu1 %v4281_v35, %s9898_s15  ;;  %10360 = sst [smem:[#allocation60_spill]] %s4513_s22  ;;  %s4543_s22 = sld [smem:[#allocation6 + $0x72]] }
  0x85   :  { %10369 = sst [smem:[#allocation69_spill]] %s4535_s7  ;;  %s4557_s7 = sld [smem:[#allocation6 + $0x74]] }
  0x86   :  { %10410 = sst [smem:[#allocation110_spill]] %s4640_s21  ;;  %s4676_s21 = sld [smem:[#allocation6 + $0x2b]] }
  0x87   :  { %394 = vrot.lane.b32.xlu0 %v4286_v36, %s9898_s15  ;;  %10411 = sst [smem:[#allocation111_spill]] %s4642_s23  ;;  %s4660_s23 = sld [smem:[#allocation6 + $0x67]] }
  0x88   :  { %204 = vrot.lane.b32.xlu1 %v4257_v28, %s9896_s16  ;;  %10413 = sst [smem:[#allocation112_spill]] %s4650_s27  ;;  %s4696_s0 = sld [smem:[#allocation6 + $0x2c]] }
  0x89   :  { %10415 = sst [smem:[#allocation113_spill]] %s4652_s29  ;;  %s4668_s27 = sld [smem:[#allocation6 + $0x29]] }
  0x8a   :  { %10373 = sst [smem:[#allocation73_spill]] %s4543_s22  ;;  %s4565_s22 = sld [smem:[#allocation6 + $0x77]] }
  0x8b   :  { %427 = vrot.lane.b32.xlu0 %v4297_v37, %s9900_s14  ;;  %s4533_s14 = sld [smem:[#allocation6 + $0x11]]  ;;  %10379 = sst [smem:[#allocation79_spill]] %s4557_s7 }
  0x8c   :  { %238 = vrot.lane.b32.xlu1 %v4257_v28, %s9894_s17  ;;  %s4579_s7 = sld [smem:[#allocation6 + $0x79]]  ;;  %10422 = sst [smem:[#allocation115_spill]] %s4662_s2 }
  0x8d   :  { %10420 = sst [smem:[#allocation114_spill]] %s4660_s23  ;;  %s4702_s29 = sld [smem:[#allocation6 + $0x2d]] }
  0x8e   :  { %10428 = sst [smem:[#allocation117_spill]] %s4670_s3  ;;  %s4714_s13 = sld [smem:[#allocation6 + $0x6c]] }
  0x8f   :  { %469 = vrot.lane.b32.xlu0 %v4297_v37, %s9898_s15  ;;  %s4529_s15 = sld [smem:[#allocation6 + $0x10]]  ;;  %10426 = sst [smem:[#allocation116_spill]] %s4668_s27 }
  0x90   :  { %285 = vrot.lane.b32.xlu1 %v4251_v24, %s9896_s16  ;;  %10382 = sst [smem:[#allocation82_spill]] %s4565_s22  ;;  %s4684_s27 = sld [smem:[#allocation6 + $0x69]] }
  0x91   :  { %10368 = sst [smem:[#allocation68_spill]] %s4533_s14  ;;  %s4555_s14 = sld [smem:[#allocation6 + $0x17]] }
  0x92   :  { %10388 = sst [smem:[#allocation88_spill]] %s4579_s7  ;;  %s4599_s7 = sld [smem:[#allocation6 + $0x7e]] }
  0x93   :  { %202 = vrot.lane.b32.xlu0 %v4245_v21, %s9896_s16  ;;  %10431 = sst [smem:[#allocation118_spill]] %s4676_s21  ;;  %s4722_s28 = sld [smem:[#allocation6 + $0x6e]] }
  0x94   :  { %315 = vrot.lane.b32.xlu1 %v4251_v24, %s9894_s17  ;;  %10433 = sst [smem:[#allocation119_spill]] %s4678_s11  ;;  %s4736_s30 = sld [smem:[#allocation6 + $0x31]] }
  0x95   :  { %10367 = sst [smem:[#allocation67_spill]] %s4529_s15  ;;  %s4551_s15 = sld [smem:[#allocation6 + $0x15]] }
  0x96   :  { %10437 = sst [smem:[#allocation120_spill]] %s4684_s27  ;;  %s4730_s11 = sld [smem:[#allocation6 + $0x30]] }
  0x97   :  { %236 = vrot.lane.b32.xlu0 %v4245_v21, %s9894_s17  ;;  %10378 = sst [smem:[#allocation78_spill]] %s4555_s14  ;;  %s4581_s14 = sld [smem:[#allocation6 + $0x7a]] }
  0x98   :  { %360 = vrot.lane.b32.xlu1 %v4266_v31, %s9896_s16  ;;  %10397 = sst [smem:[#allocation97_spill]] %s4599_s7  ;;  %s4748_s23 = sld [smem:[#allocation6 + $0x50]] }
  0x99   :  { %10439 = sst [smem:[#allocation121_spill]] %s4686_s26  ;;  %s4754_s4 = sld [smem:[#allocation6 + $0x51]] }
  0x9a   :  { %10442 = sst [smem:[#allocation122_spill]] %s4692_s24  ;;  %s4738_s9 = sld [smem:[#allocation6 + $0x32]] }
  0x9b   :  { %283 = vrot.lane.b32.xlu0 %v4272_v33, %s9896_s16  ;;  %10376 = sst [smem:[#allocation76_spill]] %s4551_s15  ;;  %s4573_s15 = sld [smem:[#allocation6 + $0x1b]] }
  0x9c   :  { %390 = vrot.lane.b32.xlu1 %v4266_v31, %s9894_s17  ;;  %10445 = sst [smem:[#allocation123_spill]] %s4696_s0  ;;  %s4712_s0 = sld [smem:[#allocation6 + $0x2f]] }
  0x9d   :  { %10389 = sst [smem:[#allocation89_spill]] %s4581_s14  ;;  %s4601_s14 = sld [smem:[#allocation6 + $0x7f]] }
  0x9e   :  { %10448 = sst [smem:[#allocation124_spill]] %s4702_s29  ;;  %s4746_s24 = sld [smem:[#allocation6 + $0x33]] }
  0x9f   :  { %313 = vrot.lane.b32.xlu0 %v4272_v33, %s9894_s17  ;;  %10450 = sst [smem:[#allocation125_spill]] %s4704_s5  ;;  %s4720_s5 = sld [smem:[#allocation6 + $0x6d]] }
  0xa0   :  { %435 = vrot.lane.b32.xlu1 %v4281_v35, %s9896_s16  ;;  %10456 = sst [smem:[#allocation127_spill]] %s4714_s13  ;;  %s4756_s1 = sld [smem:[#allocation6 + $0x52]] }
  0xa1   :  { %10386 = sst [smem:[#allocation86_spill]] %s4573_s15  ;;  %s4597_s15 = sld [smem:[#allocation6 + $0x7d]] }
  0xa2   :  { %10455 = sst [smem:[#allocation126_spill]] %s4712_s0  ;;  %s4764_s3 = sld [smem:[#allocation6 + $0x53]] }
  0xa3   :  { %358 = vrot.lane.b32.xlu0 %v4286_v36, %s9896_s16  ;;  %10398 = sst [smem:[#allocation98_spill]] %s4601_s14  ;;  %s4617_s14 = sld [smem:[#allocation6 + $0x61]] }
  0xa4   :  { %465 = vrot.lane.b32.xlu1 %v4281_v35, %s9894_s17  ;;  %10462 = sst [smem:[#allocation129_spill]] %s4722_s28  ;;  %s4728_s0 = sld [smem:[#allocation6 + $0x6f]] }
  0xa5   :  { %10460 = sst [smem:[#allocation128_spill]] %s4720_s5  ;;  %s4766_s12 = sld [smem:[#allocation6 + $0x34]] }
  0xa6   :  { %10465 = sst [smem:[#allocation131_spill]] %s4730_s11  ;;  %s4773_s10 = sld [smem:[#allocation6 + $0x35]] }
  0xa7   :  { %388 = vrot.lane.b32.xlu0 %v4286_v36, %s9894_s17  ;;  %10396 = sst [smem:[#allocation96_spill]] %s4597_s15  ;;  %s4613_s15 = sld [smem:[#allocation6 + $0x60]] }
  0xa8   :  { %211 = vrot.lane.b32.xlu1 %v4257_v28, %s9892_s18  ;;  %10468 = sst [smem:[#allocation132_spill]] %s4736_s30  ;;  %s4800_s22 = sld [smem:[#allocation6 + $0x57]] }
  0xa9   :  { %10404 = sst [smem:[#allocation104_spill]] %s4617_s14  ;;  %s4632_s14 = sld [smem:[#allocation6 + $0x25]] }
  0xaa   :  { %10464 = sst [smem:[#allocation130_spill]] %s4728_s0  ;;  %s4955_s0 = sld [smem:[#allocation6 + $0x38]] }
  0xab   :  { %433 = vrot.lane.b32.xlu0 %v4297_v37, %s9896_s16  ;;  %s4527_s16 = sld [smem:[#allocation6 + $0xf]]  ;;  %10470 = sst [smem:[#allocation133_spill]] %s4738_s9 }
  0xac   :  { %231 = vrot.lane.b32.xlu1 %v4257_v28, %s9890_s19  ;;  %10472 = sst [smem:[#allocation134_spill]] %s4746_s24  ;;  %s4957_s26 = sld [smem:[#allocation6 + $0x39]] }
  0xad   :  { %10403 = sst [smem:[#allocation103_spill]] %s4613_s15  ;;  %s4983_s25 = sld [smem:[#allocation6 + $0x3a]] }
  0xae   :  { %10474 = sst [smem:[#allocation135_spill]] %s4748_s23  ;;  %s5013_s27 = sld [smem:[#allocation6 + $0x59]] }
  0xaf   :  { %463 = vrot.lane.b32.xlu0 %v4297_v37, %s9894_s17  ;;  %s4525_s17 = sld [smem:[#allocation6 + $0xe]]  ;;  %10408 = sst [smem:[#allocation108_spill]] %s4632_s14 }
  0xb0   :  { %291 = vrot.lane.b32.xlu1 %v4251_v24, %s9892_s18  ;;  %10476 = sst [smem:[#allocation136_spill]] %s4754_s4  ;;  %s4792_s14 = sld [smem:[#allocation6 + $0x56]] }
  0xb1   :  { %10366 = sst [smem:[#allocation66_spill]] %s4527_s16  ;;  %s4553_s16 = sld [smem:[#allocation6 + $0x16]] }
  0xb2   :  { %10477 = sst [smem:[#allocation137_spill]] %s4756_s1  ;;  %s5011_s5 = sld [smem:[#allocation6 + $0x58]] }
  0xb3   :  { %209 = vrot.lane.b32.xlu0 %v4245_v21, %s9892_s18  ;;  %10480 = sst [smem:[#allocation138_spill]] %s4764_s3  ;;  %s5039_s13 = sld [smem:[#allocation6 + $0x5a]] }
  0xb4   :  { %309 = vrot.lane.b32.xlu1 %v4251_v24, %s9890_s19  ;;  %10482 = sst [smem:[#allocation139_spill]] %s4766_s12  ;;  %s4782_s12 = sld [smem:[#allocation6 + $0x37]] }
  0xb5   :  { %10365 = sst [smem:[#allocation65_spill]] %s4525_s17  ;;  %s4547_s17 = sld [smem:[#allocation6 + $0x14]] }
  0xb6   :  { %10487 = sst [smem:[#allocation140_spill]] %s4773_s10  ;;  %s5067_s8 = sld [smem:[#allocation6 + $0x3c]] }
  0xb7   :  { %229 = vrot.lane.b32.xlu0 %v4245_v21, %s9890_s19  ;;  %10377 = sst [smem:[#allocation77_spill]] %s4553_s16  ;;  %s4575_s16 = sld [smem:[#allocation6 + $0x78]] }
  0xb8   :  { %366 = vrot.lane.b32.xlu1 %v4266_v31, %s9892_s18  ;;  %10498 = sst [smem:[#allocation145_spill]] %s4792_s14  ;;  %s5069_s14 = sld [smem:[#allocation6 + $0x3d]] }
  0xb9   :  { %10502 = sst [smem:[#allocation147_spill]] %s4800_s22  ;;  %s5119_s1 = sld [smem:[#allocation6 + $0x3e]] }
  0xba   :  { %10491 = sst [smem:[#allocation142_spill]] %s4782_s12  ;;  %s5041_s22 = sld [smem:[#allocation6 + $0x5b]] }
  0xbb   :  { %289 = vrot.lane.b32.xlu0 %v4272_v33, %s9892_s18  ;;  %10375 = sst [smem:[#allocation75_spill]] %s4547_s17  ;;  %s4569_s17 = sld [smem:[#allocation6 + $0x19]] }
  0xbc   :  { %384 = vrot.lane.b32.xlu1 %v4266_v31, %s9890_s19  ;;  %10518 = sst [smem:[#allocation159_spill]] %s4955_s0  ;;  %s5147_s4 = sld [smem:[#allocation6 + $0x3f]] }
  0xbd   :  { %10387 = sst [smem:[#allocation87_spill]] %s4575_s16  ;;  %s4595_s16 = sld [smem:[#allocation6 + $0x7c]] }
  0xbe   :  { %10519 = sst [smem:[#allocation160_spill]] %s4957_s26  ;;  %s5175_s23 = sld [smem:[#allocation6 + $0x5c]] }
  0xbf   :  { %307 = vrot.lane.b32.xlu0 %v4272_v33, %s9890_s19  ;;  %10520 = sst [smem:[#allocation161_spill]] %s4983_s25  ;;  %s5177_s12 = sld [smem:[#allocation6 + $0x5d]] }
  0xc0   :  { %441 = vrot.lane.b32.xlu1 %v4281_v35, %s9892_s18  ;;  %10522 = sst [smem:[#allocation163_spill]] %s5011_s5  ;;  %s5199_s21 = sld [smem:[#allocation6 + $0x5e]] }
  0xc1   :  { %10384 = sst [smem:[#allocation84_spill]] %s4569_s17  ;;  %s4591_s17 = sld [smem:[#allocation6 + $0x1e]] }
  0xc2   :  { %10523 = sst [smem:[#allocation164_spill]] %s5013_s27  ;;  %s5197_s24 = sld [smem:[#allocation6 + $0x48]] }
  0xc3   :  { %364 = vrot.lane.b32.xlu0 %v4286_v36, %s9892_s18  ;;  %10395 = sst [smem:[#allocation95_spill]] %s4595_s16  ;;  %s10641_s5 = sld [smem:[#allocation78_spill]] }
  0xc4   :  { %459 = vrot.lane.b32.xlu1 %v4281_v35, %s9890_s19  ;;  %10524 = sst [smem:[#allocation165_spill]] %s5039_s13  ;;  %s10699_s0 = sld [smem:[#allocation79_spill]] }
  0xc5   :  { %10525 = sst [smem:[#allocation166_spill]] %s5041_s22  ;;  %s10700_s9 = sld [smem:[#allocation87_spill]] }
  0xc6   :  { %10526 = sst [smem:[#allocation167_spill]] %s5067_s8  ;;  %s10637_s8 = sld [smem:[#allocation77_spill]] }
  0xc7   :  { %382 = vrot.lane.b32.xlu0 %v4286_v36, %s9890_s19  ;;  %10393 = sst [smem:[#allocation93_spill]] %s4591_s17  ;;  %s4607_s17 = sld [smem:[#allocation6 + $0x21]] }
  0xc8   :  { %218 = vrot.lane.b32.xlu1 %v4257_v28, %s9888_s6  ;;  %10527 = sst [smem:[#allocation168_spill]] %s5069_s14  ;;  %s10636_s14 = sld [smem:[#allocation69_spill]] }
  0xc9   :  { %10529 = sst [smem:[#allocation170_spill]] %s5119_s1  ;;  %s10701_s3 = sld [smem:[#allocation95_spill]] }
  0xca   :  { %10533 = sst [smem:[#allocation174_spill]] %s5147_s4  ;;  %s10634_s4 = sld [smem:[#allocation84_spill]] }
  0xcb   :  { %439 = vrot.lane.b32.xlu0 %v4297_v37, %s9892_s18  ;;  %s4523_s18 = sld [smem:[#allocation6 + $0xd]]  ;;  %10539 = sst [smem:[#allocation178_spill]] %s5175_s23 }
  0xcc   :  { %224 = vrot.lane.b32.xlu1 %v4257_v28, %s9886_s20  ;;  %10540 = sst [smem:[#allocation179_spill]] %s5177_s12  ;;  %s10632_s12 = sld [smem:[#allocation68_spill]] }
  0xcd   :  { %10400 = sst [smem:[#allocation100_spill]] %s4607_s17  ;;  %s4775_s17 = sld [smem:[#allocation6 + $0x36]] }
  0xce   :  { %10545 = sst [smem:[#allocation184_spill]] %s5199_s21  ;;  %s10633_s23 = sld [smem:[#allocation76_spill]] }
  0xcf   :  { %457 = vrot.lane.b32.xlu0 %v4297_v37, %s9890_s19  ;;  %s4519_s19 = sld [smem:[#allocation6 + $0xc]]  ;;  %s10639_s13 = sld [smem:[#allocation93_spill]] }
  0xd0   :  { %297 = vrot.lane.b32.xlu1 %v4251_v24, %s9888_s6  ;;  %s10704_s11 = sld [smem:[#allocation88_spill]]  ;;  %s10706_s10 = sld [smem:[#allocation73_spill]] }
  0xd1   :  { %10364 = sst [smem:[#allocation64_spill]] %s4523_s18  ;;  %s4545_s18 = sld [smem:[#allocation6 + $0x73]] }
  0xd2   :  { %s10705_s16 = sld [smem:[#allocation96_spill]]  ;;  %s10709_s29 = sld [smem:[#allocation97_spill]] }
  0xd3   :  { %216 = vrot.lane.b32.xlu0 %v4245_v21, %s9888_s6  ;;  %10489 = sst [smem:[#allocation141_spill]] %s4775_s17  ;;  %s4790_s17 = sld [smem:[#allocation6 + $0x55]] }
  0xd4   :  { %303 = vrot.lane.b32.xlu1 %v4251_v24, %s9886_s20  ;;  %v4134_v24 = vmov 0  }
  0xd5   :  { %10363 = sst [smem:[#allocation63_spill]] %s4519_s19  ;;  %s4541_s19 = sld [smem:[#allocation6 + $0x71]] }
  0xd7   :  { %222 = vrot.lane.b32.xlu0 %v4245_v21, %s9886_s20  ;;  %10374 = sst [smem:[#allocation74_spill]] %s4545_s18  ;;  %s4567_s18 = sld [smem:[#allocation6 + $0x18]] }
  0xd8   :  { %s10710_s28 = sld [smem:[#allocation74_spill]] }
  0xd9   :  { %v136_v38 = vpop.permute.xlu0 %135  ;;  %10496 = sst [smem:[#allocation144_spill]] %s4790_s17  ;;  %s5121_s17 = sld [smem:[#allocation6 + $0x40]] }
  0xdb   :  { %295 = vrot.lane.b32.xlu0 %v4272_v33, %s9888_s6  ;;  %10372 = sst [smem:[#allocation72_spill]] %s4541_s19  ;;  %s4563_s19 = sld [smem:[#allocation6 + $0x76]] }
  0xdc   :  { %s10702_s30 = sld [smem:[#allocation72_spill]] }
  0xdd   :  { %v138_v39 = vpop.permute.xlu0 %137  ;;  %10383 = sst [smem:[#allocation83_spill]] %s4567_s18  ;;  %s4589_s18 = sld [smem:[#allocation6 + $0x1d]] }
  0xde   :  { %v4387_v41 = vpop.permute.xlu1 %195  ;;  %v141_v46 = vsel %vm139_vm0, %v138_v39, %v136_v38 }
  0xdf   :  { %301 = vrot.lane.b32.xlu0 %v4272_v33, %s9886_s20  ;;  %v144_v49 = vsel %vm142_vm1, %v141_v46, 0.0 }
  0xe0   :  { %v147_v52 = vsel %vm146_vm2, %v144_v49, 0.0 }
  0xe1   :  { %v4383_v40 = vpop.permute.xlu0 %243  ;;  %10381 = sst [smem:[#allocation81_spill]] %s4563_s19  ;;  %s4585_s19 = sld [smem:[#allocation6 + $0x1c]] }
  0xe2   :  { %v4395_v44 = vpop.permute.xlu1 %279  ;;  %s10707_s15 = sld [smem:[#allocation81_spill]] }
  0xe3   :  { %370 = vrot.lane.b32.xlu0 %v4286_v36, %s9888_s6  ;;  %10392 = sst [smem:[#allocation92_spill]] %s4589_s18  ;;  %s4611_s18 = sld [smem:[#allocation6 + $0x23]] }
  0xe4   :  { %s10635_s1 = sld [smem:[#allocation92_spill]] }
  0xe5   :  { %v4389_v42 = vpop.permute.xlu0 %197 }
  0xe6   :  { %v4406_v47 = vpop.permute.xlu1 %321  ;;  %v4841_v1 = vsel %vm199_vm3, %v4387_v41, %v4389_v42  ;;  %v4847_v10 = vsel %vm199_vm3, %v4389_v42, %v4387_v41 }
  0xe7   :  { %376 = vrot.lane.b32.xlu0 %v4286_v36, %s9886_s20  ;;  %10391 = sst [smem:[#allocation91_spill]] %s4585_s19  ;;  %s4603_s19 = sld [smem:[#allocation6 + $0x20]]  ;;  %10507 = vst [vmem:[#allocation148_spill] sm:$0xff] %v4841_v1  ;;  %10508 = vst [vmem:[#allocation149_spill] sm:$0xff] %v4847_v10 }
  0xe8   :  { %s10631_s21 = sld [smem:[#allocation91_spill]] }
  0xe9   :  { %v4393_v43 = vpop.permute.xlu0 %245  ;;  %10402 = sst [smem:[#allocation102_spill]] %s4611_s18  ;;  %s4626_s18 = sld [smem:[#allocation6 + $0x24]] }
  0xea   :  { %v4413_v51 = vpop.permute.xlu1 %354  ;;  %v4853_v11 = vsel %vm247_vm4, %v4383_v40, %v4393_v43  ;;  %v4862_v15 = vsel %vm247_vm4, %v4393_v43, %v4383_v40 }
  0xeb   :  { %445 = vrot.lane.b32.xlu0 %v4297_v37, %s9888_s6  ;;  %10509 = vst [vmem:[#allocation150_spill] sm:$0xff] %v4853_v11  ;;  %10510 = vst [vmem:[#allocation151_spill] sm:$0xff] %v4862_v15 }
  0xed   :  { %v4399_v45 = vpop.permute.xlu0 %277  ;;  %10399 = sst [smem:[#allocation99_spill]] %s4603_s19  ;;  %s4619_s19 = sld [smem:[#allocation6 + $0x62]] }
  0xee   :  { %v4417_v54 = vpop.permute.xlu1 %396  ;;  %v4868_v41 = vsel %vm199_vm3, %v4399_v45, %v4395_v44  ;;  %v4874_v42 = vsel %vm199_vm3, %v4395_v44, %v4399_v45 }
  0xef   :  { %451 = vrot.lane.b32.xlu0 %v4297_v37, %s9886_s20  ;;  %10407 = sst [smem:[#allocation107_spill]] %s4626_s18  ;;  %s10711_s18 = sld [smem:[#allocation82_spill]] }
  0xf1   :  { %v4408_v48 = vpop.permute.xlu0 %319 }
  0xf2   :  { %v4421_v56 = vpop.permute.xlu1 %429  ;;  %v4887_v40 = vsel %vm247_vm4, %v4406_v47, %v4408_v48 }
  0xf3   :  { %10405 = sst [smem:[#allocation105_spill]] %s4619_s19  ;;  %s4634_s19 = sld [smem:[#allocation6 + $0x26]] }
  0xf5   :  { %v4411_v50 = vpop.permute.xlu0 %352 }
  0xf6   :  { %v4425_v58 = vpop.permute.xlu1 %471  ;;  %v4893_v43 = vsel %vm199_vm3, %v4411_v50, %v4413_v51  ;;  %v4899_v44 = vsel %vm199_vm3, %v4413_v51, %v4411_v50 }
  0xf7   :  { %10511 = vst [vmem:[#allocation152_spill] sm:$0xff] %v4893_v43 }
  0xf8   :  { %150 = vadd.xlane.f32.xlu1 %v147_v52  ;;  %v4880_v52 = vsel %vm247_vm4, %v4408_v48, %v4406_v47 }
  0xf9   :  { %v4415_v53 = vpop.permute.xlu0 %394  ;;  %10409 = sst [smem:[#allocation109_spill]] %s4634_s19  ;;  %s10708_s19 = sld [smem:[#allocation89_spill]] }
  0xfa   :  { %v4433_v60 = vpop.permute.xlu1 %204  ;;  %v4905_v45 = vsel %vm247_vm4, %v4415_v53, %v4417_v54  ;;  %v4911_v47 = vsel %vm247_vm4, %v4417_v54, %v4415_v53 }
  0xfb   :  { %10512 = vst [vmem:[#allocation153_spill] sm:$0xff] %v4905_v45  ;;  %10513 = vst [vmem:[#allocation154_spill] sm:$0xff] %v4911_v47 }
  0xfd   :  { %v4419_v55 = vpop.permute.xlu0 %427 }
  0xfe   :  { %v4439_v62 = vpop.permute.xlu1 %238  ;;  %v4917_v48 = vsel %vm199_vm3, %v4419_v55, %v4421_v56  ;;  %v4923_v50 = vsel %vm199_vm3, %v4421_v56, %v4419_v55 }
  0xff   :  { %10514 = vst [vmem:[#allocation155_spill] sm:$0xff] %v4917_v48  ;;  %10515 = vst [vmem:[#allocation156_spill] sm:$0xff] %v4923_v50 }
 0x101   :  { %v4423_v57 = vpop.permute.xlu0 %469 }
 0x102   :  { %v4445_v2 = vpop.permute.xlu1 %285  ;;  %v4929_v51 = vsel %vm247_vm4, %v4423_v57, %v4425_v58  ;;  %v4935_v53 = vsel %vm247_vm4, %v4425_v58, %v4423_v57 }
 0x103   :  { %10516 = vst [vmem:[#allocation157_spill] sm:$0xff] %v4929_v51  ;;  %10517 = vst [vmem:[#allocation158_spill] sm:$0xff] %v4935_v53 }
 0x105   :  { %v4429_v59 = vpop.permute.xlu0 %202 }
 0x106   :  { %v4449_v8 = vpop.permute.xlu1 %315  ;;  %v4941_v54 = vsel %vm206_vm5, %v4429_v59, %v4433_v60  ;;  %v4947_v55 = vsel %vm206_vm5, %v4433_v60, %v4429_v59 }
 0x109   :  { %372 = vrot.lane.b32.xlu1 %v4266_v31, %s9888_s6  ;;  %v4437_v61 = vpop.permute.xlu0 %236 }
 0x10a   :  { %v4453_v12 = vpop.permute.xlu1 %360  ;;  %v4953_v56 = vsel %vm240_vm6, %v4437_v61, %v4439_v62  ;;  %v4963_v58 = vsel %vm240_vm6, %v4439_v62, %v4437_v61 }
 0x10d   :  { %378 = vrot.lane.b32.xlu1 %v4266_v31, %s9886_s20  ;;  %v4443_v63 = vpop.permute.xlu0 %283 }
 0x10e   :  { %v4457_v17 = vpop.permute.xlu1 %390  ;;  %v4969_v59 = vsel %vm206_vm5, %v4443_v63, %v4445_v2  ;;  %v4975_v60 = vsel %vm206_vm5, %v4445_v2, %v4443_v63 }
 0x111   :  { %447 = vrot.lane.b32.xlu1 %v4281_v35, %s9888_s6  ;;  %v4447_v3 = vpop.permute.xlu0 %313  ;;  %s4517_s6 = sld [smem:[#allocation6 + $0x8b]] }
 0x112   :  { %v4461_v19 = vpop.permute.xlu1 %435  ;;  %v4981_v49 = vsel %vm240_vm6, %v4447_v3, %v4449_v8  ;;  %v4991_v61 = vsel %vm240_vm6, %v4449_v8, %v4447_v3 }
 0x115   :  { %453 = vrot.lane.b32.xlu1 %v4281_v35, %s9886_s20  ;;  %v4451_v9 = vpop.permute.xlu0 %358  ;;  %s4515_s20 = sld [smem:[#allocation6 + $0x8a]] }
 0x116   :  { %v4475_v22 = vpop.permute.xlu1 %465  ;;  %v4997_v62 = vsel %vm206_vm5, %v4451_v9, %v4453_v12  ;;  %v5003_v63 = vsel %vm206_vm5, %v4453_v12, %v4451_v9 }
 0x117   :  { %10362 = sst [smem:[#allocation62_spill]] %s4517_s6  ;;  %s4539_s6 = sld [smem:[#allocation6 + $0x70]] }
 0x119   :  { %v4455_v14 = vpop.permute.xlu0 %388 }
 0x11a   :  { %v4503_v25 = vpop.permute.xlu1 %211  ;;  %v5009_v2 = vsel %vm240_vm6, %v4455_v14, %v4457_v17  ;;  %v5019_v8 = vsel %vm240_vm6, %v4457_v17, %v4455_v14 }
 0x11b   :  { %10361 = sst [smem:[#allocation61_spill]] %s4515_s20  ;;  %s4537_s20 = sld [smem:[#allocation6 + $0x13]] }
 0x11d   :  { %v4459_v18 = vpop.permute.xlu0 %433  ;;  %10371 = sst [smem:[#allocation71_spill]] %s4539_s6  ;;  %s4561_s6 = sld [smem:[#allocation6 + $0x75]] }
 0x11e   :  { %v4531_v27 = vpop.permute.xlu1 %231  ;;  %v5025_v9 = vsel %vm206_vm5, %v4459_v18, %v4461_v19  ;;  %v5031_v12 = vsel %vm206_vm5, %v4461_v19, %v4459_v18  ;;  %s10698_s26 = sld [smem:[#allocation71_spill]] }
 0x121   :  { %v4465_v20 = vpop.permute.xlu0 %463  ;;  %10370 = sst [smem:[#allocation70_spill]] %s4537_s20  ;;  %s4571_s20 = sld [smem:[#allocation6 + $0x1a]] }
 0x122   :  { %v4559_v30 = vpop.permute.xlu1 %291  ;;  %v5037_v31 = vsel %vm240_vm6, %v4465_v20, %v4475_v22  ;;  %v5047_v14 = vsel %vm240_vm6, %v4475_v22, %v4465_v20  ;;  %s10640_s27 = sld [smem:[#allocation70_spill]] }
 0x123   :  { %10380 = sst [smem:[#allocation80_spill]] %s4561_s6  ;;  %s4583_s6 = sld [smem:[#allocation6 + $0x7b]] }
 0x124   :  { %s10703_s7 = sld [smem:[#allocation80_spill]] }
 0x125   :  { %v4493_v23 = vpop.permute.xlu0 %209 }
 0x126   :  { %v4587_v34 = vpop.permute.xlu1 %309  ;;  %v5053_v17 = vsel %vm10136_vm7, %v4493_v23, %v4503_v25  ;;  %v5059_v18 = vsel %vm10136_vm7, %v4503_v25, %v4493_v23 }
 0x127   :  { %10385 = sst [smem:[#allocation85_spill]] %s4571_s20  ;;  %s4593_s20 = sld [smem:[#allocation6 + $0x1f]] }
 0x128   :  { %s10638_s22 = sld [smem:[#allocation85_spill]] }
 0x129   :  { %v4521_v26 = vpop.permute.xlu0 %229  ;;  %10390 = sst [smem:[#allocation90_spill]] %s4583_s6  ;;  %s4784_s6 = sld [smem:[#allocation6 + $0x54]] }
 0x12a   :  { %v4615_v39 = vpop.permute.xlu1 %366  ;;  %v5065_v19 = vsel %vm10131_vm8, %v4521_v26, %v4531_v27  ;;  %v5075_v20 = vsel %vm10131_vm8, %v4531_v27, %v4521_v26  ;;  %s10714_s2 = sld [smem:[#allocation90_spill]] }
 0x12d   :  { %v4549_v29 = vpop.permute.xlu0 %289  ;;  %10394 = sst [smem:[#allocation94_spill]] %s4593_s20  ;;  %s4609_s20 = sld [smem:[#allocation6 + $0x22]] }
 0x12e   :  { %v4658_v36 = vpop.permute.xlu1 %384  ;;  %v5081_v22 = vsel %vm10136_vm7, %v4549_v29, %v4559_v30  ;;  %v5087_v23 = vsel %vm10136_vm7, %v4559_v30, %v4549_v29  ;;  %s10648_s25 = sld [smem:[#allocation94_spill]] }
 0x12f   :  { %10492 = sst [smem:[#allocation143_spill]] %s4784_s6  ;;  %s5149_s6 = sld [smem:[#allocation6 + $0x44]] }
 0x131   :  { %v4577_v32 = vpop.permute.xlu0 %307 }
 0x132   :  { %v4710_v21 = vpop.permute.xlu1 %441  ;;  %v5093_v25 = vsel %vm10131_vm8, %v4577_v32, %v4587_v34  ;;  %v5099_v26 = vsel %vm10131_vm8, %v4587_v34, %v4577_v32 }
 0x133   :  { %10401 = sst [smem:[#allocation101_spill]] %s4609_s20  ;;  %s4624_s20 = sld [smem:[#allocation6 + $0x63]] }
 0x135   :  { %v4605_v38 = vpop.permute.xlu0 %364 }
 0x136   :  { %v4762_v16 = vpop.permute.xlu1 %459  ;;  %v5105_v27 = vsel %vm10136_vm7, %v4605_v38, %v4615_v39  ;;  %v5111_v29 = vsel %vm10136_vm7, %v4615_v39, %v4605_v38 }
 0x137   :  { %10528 = vst [vmem:[#allocation169_spill] sm:$0xff] %v5105_v27 }
 0x139   :  { %10406 = sst [smem:[#allocation106_spill]] %s4624_s20  ;;  %v4644_v37 = vpop.permute.xlu0 %382 }
 0x13a   :  { %v4808_v33 = vpop.permute.xlu1 %218  ;;  %s4985_s20 = sld [smem:[#allocation6 + $0x3b]]  ;;  %v5117_v30 = vsel %vm10131_vm8, %v4644_v37, %v4658_v36  ;;  %v5127_v34 = vsel %vm10131_vm8, %v4658_v36, %v4644_v37 }
 0x13d   :  { %v4694_v35 = vpop.permute.xlu0 %439 }
 0x13e   :  { %v5133_v38 = vsel %vm10136_vm7, %v4694_v35, %v4710_v21  ;;  %v5139_v39 = vsel %vm10136_vm7, %v4710_v21, %v4694_v35 }
 0x13f   :  { %10530 = vst [vmem:[#allocation171_spill] sm:$0xff] %v5133_v38  ;;  %10531 = vst [vmem:[#allocation172_spill] sm:$0xff] %v5139_v39  ;;  %v946_v38 = vstv %s5121_s17  ;;  %v1012_v39 = vstv %s5197_s24  ;;  %s10624_s17 = sld [smem:[#allocation75_spill]] }
 0x140   :  { %10521 = sst [smem:[#allocation162_spill]] %s4985_s20  ;;  %s10628_s24 = sld [smem:[#allocation83_spill]] }
 0x141   :  { %v4744_v13 = vpop.permute.xlu0 %457  ;;  %s10644_s20 = sld [smem:[#allocation86_spill]] }
 0x142   :  { %v5145_v28 = vsel %vm10131_vm8, %v4744_v13, %v4762_v16  ;;  %v5155_v36 = vsel %vm10131_vm8, %v4762_v16, %v4744_v13 }
 0x143   :  { %10532 = vst [vmem:[#allocation173_spill] sm:$0xff] %v5145_v28  ;;  %10534 = vst [vmem:[#allocation175_spill] sm:$0xff] %v5155_v36  ;;  %v10547_v36 = vld [vmem:[#allocation22_spill] sm:$0xff] }
 0x145   :  { %v4798_v0 = vpop.permute.xlu0 %216 }
 0x146   :  { %10501 = vst [vmem:[#allocation146_spill] sm:$0xff] %v4798_v0  ;;  %v4855_v0 = vpop.permute.xlu1 %224 }
 0x149   :  { %v4827_v46 = vpop.permute.xlu0 %222 }
 0x14a   :  { %v298_v3 = vpop.permute.xlu1 %297  ;;  %v5173_v13 = vsel %vm10177_vm9, %v4827_v46, %v4855_v0  ;;  %v5183_v16 = vsel %vm10177_vm9, %v4855_v0, %v4827_v46 }
 0x14b   :  { %10538 = vst [vmem:[#allocation177_spill] sm:$0xff] %v5173_v13  ;;  %10541 = vst [vmem:[#allocation180_spill] sm:$0xff] %v5183_v16  ;;  %v10553_v13 = vsub.s32 0, %v4217_v6  ;;  %v10558_v6 = vld [vmem:[#allocation29_spill] sm:$0xff] }
 0x14d   :  { %v296_v57 = vpop.permute.xlu0 %295  ;;  %v10535_v21 = vld [vmem:[#allocation146_spill] sm:$0xff] }
 0x14e   :  { %v5161_v35 = vsel %vm139_vm0, %v10535_v21, %v4808_v33  ;;  %v5167_v37 = vsel %vm139_vm0, %v4808_v33, %v10535_v21  ;;  %v304_v7 = vpop.permute.xlu1 %303  ;;  %v5187_v33 = vsel %vm139_vm0, %v296_v57, %v298_v3  ;;  %v5191_v21 = vsel %vm139_vm0, %v298_v3, %v296_v57  ;;  %v10555_v3 = vld [vmem:[#allocation27_spill] sm:$0xff] }
 0x14f   :  { %10536 = vst [vmem:[#allocation146_spill] sm:$0xff] %v5161_v35  ;;  %10537 = vst [vmem:[#allocation176_spill] sm:$0xff] %v5167_v37  ;;  %v5235_v28 = vmul.f32 %v1012_v39, %v10555_v3 }
 0x150   :  { %10542 = vst [vmem:[#allocation181_spill] sm:$0xff] %v5187_v33  ;;  %10543 = vst [vmem:[#allocation182_spill] sm:$0xff] %v5191_v21  ;;  %v979_v33 = vstv %s5149_s6  ;;  %v10549_v21 = vld [vmem:[#allocation25_spill] sm:$0xff]  ;;  %s10621_s6 = sld [smem:[#allocation67_spill]] }
 0x151   :  { %v302_v32 = vpop.permute.xlu0 %301  ;;  %v5221_v35 = vmul.f32 %v979_v33, %v10549_v21 }
 0x152   :  { %v5195_v4 = vsel %vm10177_vm9, %v302_v32, %v304_v7  ;;  %v5203_v0 = vsel %vm10177_vm9, %v304_v7, %v302_v32  ;;  %v947_v7 = vmul.f32 %v946_v38, %v10547_v36  ;;  %v10548_v32 = vld [vmem:[#allocation23_spill] sm:$0xff] }
 0x153   :  { %10544 = vst [vmem:[#allocation183_spill] sm:$0xff] %v5195_v4  ;;  %10546 = vst [vmem:[#allocation185_spill] sm:$0xff] %v5203_v0  ;;  %v948_v46 = vmul.f32 %v946_v38, %v10548_v32  ;;  %v10551_v4 = vld [vmem:[#allocation26_spill] sm:$0xff] }
 0x154   :  { %10550 = vst [vmem:[#allocation22_spill] sm:$0xff] %v5221_v35  ;;  %v5224_v0 = vmul.f32 %v979_v33, %v10551_v4  ;;  %10556 = vst [vmem:[#allocation26_spill] sm:$0xff] %v5235_v28  ;;  %v10570_v28 = vld [vmem:[#allocation28_spill] sm:$0xff] }
 0x155   :  { %v951_v37 = vcombine.low %v947_v7, %v948_v46  ;;  %v371_v32 = vpop.permute.xlu0 %370  ;;  %v10560_v46 = vand.u32 15, %v4214_v5  ;;  %vm128_vm2 = vcmp.lt.s32.totalorder %v10570_v28, 240 }
 0x156   :  { %10552 = vst [vmem:[#allocation23_spill] sm:$0xff] %v5224_v0  ;;  %v10572_v0 = vmov 0 }
 0x157   :  { %vm5251_vm13 = vcmp.ge.s32.totalorder %v10560_v46, 1 }
 0x185   :  { %v151_v16 = vpop.xlane.xlu1 %150 }
 0x186   :  { %vm152_vm10 = vcmp.gt.f32.partialorder %v151_v16, 1.5 }
 0x187   :  { %v475_v57 = vsel %vm152_vm10, 1, %v4134_v24  ;;  %vm5517_vm10 = vmand %vm10156_vm12, %vm5251_vm13 }
 0x188   :  { %v5228_v16 = vrot.slane %v475_v57, %v10553_v13  ;;  %v5245_v13 = vmul.f32 %v1012_v39, %v10558_v6  ;;  %v10561_v57 = vmov 0  ;;  %v10567_v6 = vld [vmem:[#allocation30_spill] sm:$0xff] }
 0x189   :  { %v373_v38 = vpop.permute.xlu1 %372  ;;  %v10562_v57 = vsel %vm5251_vm13, 4294967295, %v10561_v57  ;;  %v5272_v46 = vrot.slane %v951_v37, %v10567_v6 }
 0x18a   :  { %10554 = vst [vmem:[#allocation25_spill] sm:$0xff] %v5228_v16  ;;  %vm480_vm11 = vcmp.eq.s32.totalorder %v5228_v16, 1  ;;  %v5242_v4 = vsel %vm139_vm0, %v371_v32, %v373_v38  ;;  %10559 = vst [vmem:[#allocation29_spill] sm:$0xff] %v5245_v13  ;;  %v5269_v7 = vsel %vm139_vm0, %v373_v38, %v371_v32  ;;  %v10571_v13 = vand.u32 15, %v10570_v28 }
 0x18b   :  { %10557 = vst [vmem:[#allocation27_spill] sm:$0xff] %v5242_v4  ;;  %10563 = vst [vmem:[#allocation186_spill] sm:$0xff] %v10562_v57  ;;  %v5259_v3 = vsel %vm480_vm11, %v4847_v10, %v4853_v11  ;;  %v5265_v39 = vsel %vm480_vm11, %v4841_v1, %v4862_v15  ;;  %v489_v33 = vsel %vm480_vm11, %v4874_v42, %v4880_v52  ;;  %v10588_v15 = vld [vmem:[#allocation175_spill] sm:$0xff]  ;;  %v10591_v11 = vld [vmem:[#allocation177_spill] sm:$0xff]  ;;  %v10665_v16 = vstv %s10635_s1 }
 0x18c   :  { %10564 = vst [vmem:[#allocation187_spill] sm:$0xff] %v5259_v3  ;;  %10565 = vst [vmem:[#allocation188_spill] sm:$0xff] %v5265_v39  ;;  %v490_v27 = vsel %vm480_vm11, %v4868_v41, %v4887_v40  ;;  %v493_v21 = vsel %vm480_vm11, %v4899_v44, %v4905_v45  ;;  %v494_v37 = vsel %vm480_vm11, %v4893_v43, %v4911_v47  ;;  %vm5310_vm14 = vcmp.ge.s32.totalorder %v10571_v13, 1  ;;  %v10585_v39 = vld [vmem:[#allocation173_spill] sm:$0xff] }
 0x18d   :  { %10566 = vst [vmem:[#allocation189_spill] sm:$0xff] %v5269_v7  ;;  %10568 = vst [vmem:[#allocation190_spill] sm:$0xff] %v5272_v46  ;;  %v497_v38 = vsel %vm480_vm11, %v4923_v50, %v4929_v51  ;;  %v498_v32 = vsel %vm480_vm11, %v4917_v48, %v4935_v53  ;;  %v597_v36 = vsel %vm480_vm11, %v4947_v55, %v4953_v56  ;;  %v10573_v0 = vsel %vm5310_vm14, 4294967295, %v10572_v0  ;;  %v10594_v53 = vld [vmem:[#allocation180_spill] sm:$0xff]  ;;  %v10601_v50 = vld [vmem:[#allocation183_spill] sm:$0xff] }
 0x18e   :  { %v5306_v24 = vsel %vm480_vm11, %v4941_v54, %v4963_v58  ;;  %10574 = vst [vmem:[#allocation192_spill] sm:$0xff] %v10573_v0  ;;  %v605_v35 = vsel %vm480_vm11, %v4975_v60, %v4981_v49  ;;  %v5322_v6 = vsel %vm480_vm11, %v4969_v59, %v4991_v61  ;;  %v609_v46 = vsel %vm480_vm11, %v5003_v63, %v5009_v2  ;;  %v10604_v43 = vld [vmem:[#allocation185_spill] sm:$0xff]  ;;  %vm5757_vm7 = vmand %vm128_vm2, %vm5310_vm14 }
 0x18f   :  { %10569 = vst [vmem:[#allocation191_spill] sm:$0xff] %v5306_v24  ;;  %10575 = vst [vmem:[#allocation193_spill] sm:$0xff] %v5322_v6  ;;  %v5332_v13 = vsel %vm480_vm11, %v4997_v62, %v5019_v8  ;;  %v613_v4 = vsel %vm480_vm11, %v5031_v12, %v5037_v31  ;;  %v5342_v7 = vsel %vm480_vm11, %v5025_v9, %v5047_v14  ;;  %v10598_v51 = vmov 0 }
 0x190   :  { %10576 = vst [vmem:[#allocation194_spill] sm:$0xff] %v5332_v13  ;;  %10577 = vst [vmem:[#allocation195_spill] sm:$0xff] %v5342_v7  ;;  %v5348_v6 = vsel %vm480_vm11, %v5059_v18, %v5065_v19  ;;  %v5354_v13 = vsel %vm480_vm11, %v5053_v17, %v5075_v20  ;;  %v5360_v24 = vsel %vm480_vm11, %v5087_v23, %v5093_v25 }
 0x191   :  { %10578 = vst [vmem:[#allocation196_spill] sm:$0xff] %v5348_v6  ;;  %10579 = vst [vmem:[#allocation197_spill] sm:$0xff] %v5354_v13  ;;  %v5366_v7 = vsel %vm480_vm11, %v5081_v22, %v5099_v26  ;;  %v5372_v6 = vsel %vm480_vm11, %v5111_v29, %v5117_v30  ;;  %v10583_v13 = vld [vmem:[#allocation169_spill] sm:$0xff] }
 0x192   :  { %10580 = vst [vmem:[#allocation198_spill] sm:$0xff] %v5360_v24  ;;  %10581 = vst [vmem:[#allocation199_spill] sm:$0xff] %v5366_v7  ;;  %v5378_v0 = vsel %vm480_vm11, %v10583_v13, %v5127_v34  ;;  %v10586_v24 = vld [vmem:[#allocation172_spill] sm:$0xff]  ;;  %v10589_v7 = vld [vmem:[#allocation171_spill] sm:$0xff] }
 0x193   :  { %10582 = vst [vmem:[#allocation200_spill] sm:$0xff] %v5372_v6  ;;  %10584 = vst [vmem:[#allocation169_spill] sm:$0xff] %v5378_v0  ;;  %v5384_v3 = vsel %vm480_vm11, %v10586_v24, %v10585_v39  ;;  %v5390_v1 = vsel %vm480_vm11, %v10589_v7, %v10588_v15  ;;  %v10592_v6 = vld [vmem:[#allocation176_spill] sm:$0xff]  ;;  %v10595_v0 = vld [vmem:[#allocation146_spill] sm:$0xff] }
 0x194   :  { %10587 = vst [vmem:[#allocation173_spill] sm:$0xff] %v5384_v3  ;;  %10590 = vst [vmem:[#allocation172_spill] sm:$0xff] %v5390_v1  ;;  %v5396_v10 = vsel %vm480_vm11, %v10592_v6, %v10591_v11  ;;  %v5402_v48 = vsel %vm480_vm11, %v10595_v0, %v10594_v53  ;;  %v10597_v3 = vand.u32 15, %v4214_v5  ;;  %v10602_v1 = vld [vmem:[#allocation182_spill] sm:$0xff] }
 0x195   :  { %10593 = vst [vmem:[#allocation175_spill] sm:$0xff] %v5396_v10  ;;  %10596 = vst [vmem:[#allocation171_spill] sm:$0xff] %v5402_v48  ;;  %v5414_v47 = vsel %vm480_vm11, %v10602_v1, %v10601_v50  ;;  %v10605_v10 = vld [vmem:[#allocation181_spill] sm:$0xff]  ;;  %v5432_v48 = vsel %vm480_vm11, %v10594_v53, %v10595_v0  ;;  %v5456_v53 = vsel %vm480_vm11, %v5075_v20, %v5053_v17  ;;  %v10607_v17 = vand.u32 15, %v10570_v28 }
 0x196   :  { %vm5406_vm15 = vcmp.lt.s32.totalorder %v10597_v3, 15  ;;  %10603 = vst [vmem:[#allocation176_spill] sm:$0xff] %v5414_v47  ;;  %v5420_v45 = vsel %vm480_vm11, %v10605_v10, %v10604_v43  ;;  %v5426_v3 = vsel %vm480_vm11, %v10591_v11, %v10592_v6  ;;  %v5438_v47 = vsel %vm480_vm11, %v10601_v50, %v10602_v1 }
 0x197   :  { %v10599_v51 = vsel %vm5406_vm15, 4294967295, %v10598_v51  ;;  %10606 = vst [vmem:[#allocation180_spill] sm:$0xff] %v5420_v45  ;;  %v5444_v45 = vsel %vm480_vm11, %v10604_v43, %v10605_v10  ;;  %v5450_v11 = vsel %vm480_vm11, %v5065_v19, %v5059_v18  ;;  %v5462_v1 = vsel %vm480_vm11, %v5093_v25, %v5087_v23  ;;  %vm5669_vm8 = vmand %vm10156_vm12, %vm5406_vm15 }
 0x198   :  { %10600 = vst [vmem:[#allocation177_spill] sm:$0xff] %v10599_v51  ;;  %v5468_v10 = vsel %vm480_vm11, %v5099_v26, %v5081_v22  ;;  %v5474_v43 = vsel %vm480_vm11, %v5117_v30, %v5111_v29  ;;  %v5480_v50 = vsel %vm480_vm11, %v5127_v34, %v10583_v13  ;;  %vm5484_vm1 = vcmp.lt.s32.totalorder %v10607_v17, 15  ;;  %v10625_v26 = vld [vmem:[#allocation148_spill] sm:$0xff]  ;;  %v10626_v29 = vld [vmem:[#allocation151_spill] sm:$0xff] }
 0x199   :  { %v10608_v18 = vmov 0  ;;  %v5492_v19 = vsel %vm480_vm11, %v10585_v39, %v10586_v24  ;;  %v5498_v20 = vsel %vm480_vm11, %v10588_v15, %v10589_v7  ;;  %v5504_v22 = vsel %vm480_vm11, %v4953_v56, %v4947_v55  ;;  %v10627_v34 = vld [vmem:[#allocation187_spill] sm:$0xff]  ;;  %v10629_v24 = vld [vmem:[#allocation188_spill] sm:$0xff] }
 0x19a   :  { %v10609_v18 = vsel %vm5484_vm1, 4294967295, %v10608_v18  ;;  %v5510_v23 = vsel %vm480_vm11, %v4963_v58, %v4941_v54  ;;  %v10611_v15 = vmov 0  ;;  %v5525_v55 = vsel %vm480_vm11, %v4981_v49, %v4975_v60 }
 0x19b   :  { %10610 = vst [vmem:[#allocation146_spill] sm:$0xff] %v10609_v18  ;;  %v10612_v15 = vsel %vm5517_vm10, 4294967295, %v10611_v15  ;;  %v5531_v54 = vsel %vm480_vm11, %v4991_v61, %v4969_v59  ;;  %v5537_v56 = vsel %vm480_vm11, %v5009_v2, %v5003_v63  ;;  %v5543_v58 = vsel %vm480_vm11, %v5019_v8, %v4997_v62  ;;  %v10615_v63 = vld [vmem:[#allocation152_spill] sm:$0xff]  ;;  %v10616_v2 = vld [vmem:[#allocation154_spill] sm:$0xff] }
 0x19c   :  { %10613 = vst [vmem:[#allocation183_spill] sm:$0xff] %v10612_v15  ;;  %v5549_v49 = vsel %vm480_vm11, %v5037_v31, %v5031_v12  ;;  %v5555_v59 = vsel %vm480_vm11, %v5047_v14, %v5025_v9  ;;  %v5561_v60 = vsel %vm480_vm11, %v4880_v52, %v4874_v42  ;;  %v5567_v61 = vsel %vm480_vm11, %v4887_v40, %v4868_v41  ;;  %v10614_v31 = vld [vmem:[#allocation153_spill] sm:$0xff]  ;;  %v10617_v52 = vld [vmem:[#allocation156_spill] sm:$0xff]  ;;  %v10619_v41 = vld [vmem:[#allocation155_spill] sm:$0xff] }
 0x19d   :  { %v5573_v62 = vsel %vm480_vm11, %v10614_v31, %v4899_v44  ;;  %v5579_v8 = vsel %vm480_vm11, %v10616_v2, %v10615_v63  ;;  %v10618_v42 = vld [vmem:[#allocation157_spill] sm:$0xff]  ;;  %v10620_v40 = vld [vmem:[#allocation158_spill] sm:$0xff]  ;;  %v5603_v30 = vsel %vm480_vm11, %v10626_v29, %v10625_v26  ;;  %v5608_v0 = vsel %vm5517_vm10, %v10627_v34, 0.0  ;;  %v10642_v63 = vld [vmem:[#allocation191_spill] sm:$0xff] }
 0x19e   :  { %v5585_v9 = vsel %vm480_vm11, %v10618_v42, %v10617_v52  ;;  %v5591_v12 = vsel %vm480_vm11, %v10620_v40, %v10619_v41  ;;  %v10622_v44 = vld [vmem:[#allocation149_spill] sm:$0xff]  ;;  %v10623_v14 = vld [vmem:[#allocation150_spill] sm:$0xff]  ;;  %v5613_v7 = vsel %vm5310_vm14, %v10629_v24, 0.0  ;;  %v5617_v6 = vsel %vm5517_vm10, %v489_v33, 0.0 }
 0x19f   :  { %v5597_v25 = vsel %vm480_vm11, %v10623_v14, %v10622_v44  ;;  %v5621_v13 = vsel %vm5310_vm14, %v490_v27, 0.0  ;;  %v5625_v17 = vsel %vm5517_vm10, %v493_v21, 0.0  ;;  %v5629_v31 = vsel %vm5310_vm14, %v494_v37, 0.0  ;;  %v10646_v52 = vld [vmem:[#allocation193_spill] sm:$0xff]  ;;  %v10656_v44 = vld [vmem:[#allocation195_spill] sm:$0xff] }
 0x1a0   :  { %v5633_v33 = vsel %vm5517_vm10, %v497_v38, 0.0  ;;  %v5637_v27 = vsel %vm5310_vm14, %v498_v32, 0.0  ;;  %v5641_v21 = vsel %vm10156_vm12, %v597_v36, 0.0  ;;  %v5645_v37 = vsel %vm10156_vm12, %v605_v35, 0.0 }
 0x1a1   :  { %v5649_v38 = vsel %vm10156_vm12, %v609_v46, 0.0  ;;  %v5653_v32 = vsel %vm10156_vm12, %v613_v4, 0.0  ;;  %v10643_v2 = vstv %s10621_s6  ;;  %v10647_v42 = vstv %s10624_s17  ;;  %v10653_v4 = vld [vmem:[#allocation194_spill] sm:$0xff]  ;;  %vm5905_vm12 = vmand %vm128_vm2, %vm5484_vm1 }
 0x1a2   :  { %v5658_v36 = vmul.f32 %v10643_v2, %v10642_v63  ;;  %v5663_v35 = vmul.f32 %v10647_v42, %v10646_v52  ;;  %v10650_v46 = vmov 0  ;;  %v10654_v41 = vstv %s10628_s24 }
 0x1a3   :  { %v10651_v46 = vsel %vm5669_vm8, 4294967295, %v10650_v46  ;;  %v5676_v40 = vmul.f32 %v10654_v41, %v10653_v4  ;;  %v10657_v14 = vstv %s10631_s21  ;;  %v10659_v29 = vstv %s10632_s12 }
 0x1a4   :  { %10645 = vst [vmem:[#allocation182_spill] sm:$0xff] %v5658_v36  ;;  %10649 = vst [vmem:[#allocation185_spill] sm:$0xff] %v5663_v35  ;;  %v5681_v26 = vmul.f32 %v10657_v14, %v10656_v44  ;;  %v5686_v34 = vmul.f32 %v10659_v29, %v10642_v63  ;;  %v10661_v24 = vstv %s10633_s23  ;;  %v10663_v42 = vstv %s10634_s4 }
 0x1a5   :  { %10652 = vst [vmem:[#allocation181_spill] sm:$0xff] %v10651_v46  ;;  %10655 = vst [vmem:[#allocation153_spill] sm:$0xff] %v5676_v40  ;;  %v5691_v2 = vmul.f32 %v10661_v24, %v10646_v52  ;;  %v5696_v15 = vmul.f32 %v10663_v42, %v10653_v4  ;;  %v5701_v41 = vmul.f32 %v10665_v16, %v10656_v44  ;;  %v10667_v40 = vstv %s10636_s14  ;;  %v10697_v46 = vld [vmem:[#allocation180_spill] sm:$0xff] }
 0x1a6   :  { %10658 = vst [vmem:[#allocation152_spill] sm:$0xff] %v5681_v26  ;;  %10660 = vst [vmem:[#allocation154_spill] sm:$0xff] %v5686_v34  ;;  %v5706_v14 = vmul.f32 %v10667_v40, %v10642_v63  ;;  %v10669_v26 = vstv %s10637_s8  ;;  %v10671_v35 = vstv %s10638_s22  ;;  %v10696_v34 = vld [vmem:[#allocation176_spill] sm:$0xff]  ;;  %v10726_v36 = vstv %s10702_s30  ;;  %s10737_s30 = sld [smem:[#allocation39_spill]] }
 0x1a7   :  { %10662 = vst [vmem:[#allocation156_spill] sm:$0xff] %v5691_v2  ;;  %10664 = vst [vmem:[#allocation157_spill] sm:$0xff] %v5696_v15  ;;  %v5711_v29 = vmul.f32 %v10669_v26, %v10646_v52  ;;  %v5716_v24 = vmul.f32 %v10671_v35, %v10653_v4  ;;  %v10673_v2 = vstv %s10639_s13  ;;  %v10675_v15 = vstv %s10640_s27 }
 0x1a8   :  { %10666 = vst [vmem:[#allocation155_spill] sm:$0xff] %v5701_v41  ;;  %10668 = vst [vmem:[#allocation158_spill] sm:$0xff] %v5706_v14  ;;  %v5721_v42 = vmul.f32 %v10673_v2, %v10656_v44  ;;  %v5726_v16 = vmul.f32 %v10675_v15, %v10642_v63  ;;  %v10677_v41 = vstv %s10641_s5  ;;  %v10679_v14 = vstv %s10644_s20 }
 0x1a9   :  { %10670 = vst [vmem:[#allocation149_spill] sm:$0xff] %v5711_v29  ;;  %10672 = vst [vmem:[#allocation150_spill] sm:$0xff] %v5716_v24  ;;  %v5731_v40 = vmul.f32 %v10677_v41, %v10646_v52  ;;  %v5736_v26 = vmul.f32 %v10679_v14, %v10653_v4  ;;  %v10681_v29 = vstv %s10648_s25  ;;  %v10683_v24 = vld [vmem:[#allocation196_spill] sm:$0xff]  ;;  %v10685_v63 = vmov 0  ;;  %v10688_v52 = vld [vmem:[#allocation198_spill] sm:$0xff]  ;;  %s10717_s25 = sld [smem:[#allocation98_spill]] }
 0x1aa   :  { %10674 = vst [vmem:[#allocation148_spill] sm:$0xff] %v5721_v42  ;;  %10676 = vst [vmem:[#allocation151_spill] sm:$0xff] %v5726_v16  ;;  %v5741_v35 = vmul.f32 %v10681_v29, %v10656_v44  ;;  %v5746_v2 = vsel %vm5669_vm8, %v10683_v24, 0.0  ;;  %v10684_v42 = vld [vmem:[#allocation197_spill] sm:$0xff]  ;;  %v10686_v63 = vsel %vm5757_vm7, 4294967295, %v10685_v63  ;;  %v5764_v4 = vsel %vm5669_vm8, %v10688_v52, 0.0 }
 0x1ab   :  { %10678 = vst [vmem:[#allocation187_spill] sm:$0xff] %v5731_v40  ;;  %10680 = vst [vmem:[#allocation188_spill] sm:$0xff] %v5736_v26  ;;  %v5751_v15 = vsel %vm5484_vm1, %v10684_v42, 0.0  ;;  %v10689_v44 = vld [vmem:[#allocation199_spill] sm:$0xff]  ;;  %v10690_v14 = vld [vmem:[#allocation200_spill] sm:$0xff]  ;;  %v10730_v28 = vstv %s10704_s11  ;;  %s10742_s11 = sld [smem:[#allocation47_spill]] }
 0x1ac   :  { %10682 = vst [vmem:[#allocation191_spill] sm:$0xff] %v5741_v35  ;;  %10687 = vst [vmem:[#allocation193_spill] sm:$0xff] %v10686_v63  ;;  %v5769_v41 = vsel %vm5484_vm1, %v10689_v44, 0.0  ;;  %v5774_v29 = vsel %vm5669_vm8, %v10690_v14, 0.0  ;;  %v10691_v24 = vld [vmem:[#allocation169_spill] sm:$0xff]  ;;  %v10692_v35 = vld [vmem:[#allocation173_spill] sm:$0xff]  ;;  %v5932_v5 = vmul.f32 %v10730_v28, %v5537_v56  ;;  %v10741_v28 = vstv %s10709_s29 }
 0x1ad   :  { %v5779_v42 = vsel %vm5484_vm1, %v10691_v24, 0.0  ;;  %v5784_v52 = vsel %vm5669_vm8, %v10692_v35, 0.0  ;;  %v10693_v26 = vld [vmem:[#allocation172_spill] sm:$0xff]  ;;  %v10694_v40 = vld [vmem:[#allocation175_spill] sm:$0xff]  ;;  %v10695_v16 = vld [vmem:[#allocation171_spill] sm:$0xff]  ;;  %v5804_v35 = vsel %vm5251_vm13, %v10696_v34, 0.0 }
 0x1ae   :  { %v5789_v44 = vsel %vm5484_vm1, %v10693_v26, 0.0  ;;  %v5794_v14 = vsel %vm5251_vm13, %v10694_v40, 0.0  ;;  %v5799_v24 = vsel %vm5310_vm14, %v10695_v16, 0.0  ;;  %v5809_v26 = vsel %vm5310_vm14, %v10697_v46, 0.0  ;;  %10731 = vst [vmem:[#allocation173_spill] sm:$0xff] %v5932_v5  ;;  %s10752_s29 = sld [smem:[#allocation63_spill]] }
 0x1af   :  { %v5814_v40 = vsel %vm5406_vm15, %v5426_v3, 0.0  ;;  %v5819_v16 = vsel %vm5484_vm1, %v5432_v48, 0.0  ;;  %v5824_v34 = vsel %vm5406_vm15, %v5438_v47, 0.0  ;;  %v5829_v46 = vsel %vm5484_vm1, %v5444_v45, 0.0 }
 0x1b0   :  { %v5834_v3 = vsel %vm5251_vm13, %v5450_v11, 0.0  ;;  %v5839_v48 = vsel %vm5757_vm7, %v5456_v53, 0.0  ;;  %v5844_v47 = vsel %vm5251_vm13, %v5462_v1, 0.0  ;;  %v5849_v45 = vsel %vm5757_vm7, %v5468_v10, 0.0 }
 0x1b1   :  { %v5854_v11 = vsel %vm5251_vm13, %v5474_v43, 0.0  ;;  %v5859_v53 = vsel %vm5757_vm7, %v5480_v50, 0.0  ;;  %v5864_v1 = vsel %vm5251_vm13, %v5492_v19, 0.0  ;;  %v5869_v10 = vsel %vm5757_vm7, %v5498_v20, 0.0 }
 0x1b2   :  { %v5874_v43 = vsel %vm128_vm2, %v5510_v23, 0.0  ;;  %v5879_v50 = vsel %vm128_vm2, %v5531_v54, 0.0  ;;  %v5884_v19 = vsel %vm128_vm2, %v5543_v58, 0.0  ;;  %v5889_v20 = vsel %vm128_vm2, %v5555_v59, 0.0 }
 0x1b3   :  { %10712 = vst [vmem:[#allocation194_spill] sm:$0xff] %v5889_v20  ;;  %v10713_v23 = vstv %s10698_s26  ;;  %v10716_v54 = vstv %s10699_s0  ;;  %v10719_v58 = vmov 0  ;;  %v10722_v59 = vstv %s10700_s9 }
 0x1b4   :  { %v5894_v63 = vmul.f32 %v10713_v23, %v5504_v22  ;;  %v5899_v39 = vmul.f32 %v10716_v54, %v5525_v55  ;;  %v10720_v58 = vsel %vm5905_vm12, 4294967295, %v10719_v58  ;;  %v5912_v57 = vmul.f32 %v10722_v59, %v5537_v56 }
 0x1b5   :  { %10721 = vst [vmem:[#allocation197_spill] sm:$0xff] %v10720_v58  ;;  %v10724_v23 = vstv %s10701_s3  ;;  %v5922_v54 = vmul.f32 %v10726_v36, %v5504_v22  ;;  %v10732_v20 = vstv %s10705_s16  ;;  %v5957_v5 = vmul.f32 %v10741_v28, %v5549_v49 }
 0x1b6   :  { %10715 = vst [vmem:[#allocation195_spill] sm:$0xff] %v5894_v63  ;;  %10718 = vst [vmem:[#allocation196_spill] sm:$0xff] %v5899_v39  ;;  %v5917_v63 = vmul.f32 %v10724_v23, %v5549_v49  ;;  %v10728_v39 = vstv %s10703_s7  ;;  %v5937_v59 = vmul.f32 %v10732_v20, %v5549_v49  ;;  %v10744_v20 = vstv %s10710_s28  ;;  %s10760_s28 = sld [smem:[#allocation64_spill]] }
 0x1b7   :  { %10723 = vst [vmem:[#allocation198_spill] sm:$0xff] %v5912_v57  ;;  %10727 = vst [vmem:[#allocation200_spill] sm:$0xff] %v5922_v54  ;;  %v5927_v18 = vmul.f32 %v10728_v39, %v5525_v55  ;;  %v10734_v57 = vstv %s10706_s10  ;;  %v10739_v39 = vstv %s10708_s19  ;;  %s10764_s19 = sld [smem:[#allocation41_spill]] }
 0x1b8   :  { %10725 = vst [vmem:[#allocation199_spill] sm:$0xff] %v5917_v63  ;;  %10733 = vst [vmem:[#allocation172_spill] sm:$0xff] %v5937_v59  ;;  %v5942_v23 = vmul.f32 %v10734_v57, %v5504_v22  ;;  %v10736_v63 = vstv %s10707_s15  ;;  %v5962_v57 = vmul.f32 %v10744_v20, %v5504_v22  ;;  %v10746_v59 = vstv %s10711_s18  ;;  %s10747_s15 = sld [smem:[#allocation55_spill]]  ;;  %s10754_s18 = sld [smem:[#allocation40_spill]] }
 0x1b9   :  { %10729 = vst [vmem:[#allocation169_spill] sm:$0xff] %v5927_v18  ;;  %v5947_v36 = vmul.f32 %v10736_v63, %v5525_v55  ;;  %v5952_v18 = vmul.f32 %v10739_v39, %v5537_v56  ;;  %10743 = vst [vmem:[#allocation180_spill] sm:$0xff] %v5957_v5  ;;  %v5967_v63 = vmul.f32 %v10746_v59, %v5525_v55  ;;  %v5982_v22 = vsel %vm5406_vm15, %v5597_v25, 0.0  ;;  %s10767_s10 = sld [smem:[#allocation49_spill]] }
 0x1ba   :  { %10735 = vst [vmem:[#allocation175_spill] sm:$0xff] %v5942_v23  ;;  %10745 = vst [vmem:[#allocation201_spill] sm:$0xff] %v5962_v57  ;;  %v5987_v55 = vsel %vm5905_vm12, %v5603_v30, 0.0  ;;  %v6007_v25 = vsel %vm5905_vm12, %v5579_v8, 0.0 }
 0x1bb   :  { %10738 = vst [vmem:[#allocation171_spill] sm:$0xff] %v5947_v36  ;;  %10740 = vst [vmem:[#allocation176_spill] sm:$0xff] %v5952_v18  ;;  %v10749_v36 = vstv %s10714_s2  ;;  %v10751_v18 = vstv %s10717_s25  ;;  %s10755_s25 = sld [smem:[#allocation48_spill]] }
 0x1bc   :  { %10748 = vst [vmem:[#allocation202_spill] sm:$0xff] %v5967_v63  ;;  %v5972_v39 = vmul.f32 %v10749_v36, %v5537_v56  ;;  %v5977_v28 = vmul.f32 %v10751_v18, %v5549_v49  ;;  %v5992_v56 = vsel %vm5406_vm15, %v5561_v60, 0.0  ;;  %v5997_v18 = vsel %vm5905_vm12, %v5567_v61, 0.0  ;;  %s10757_s2 = sld [smem:[#allocation56_spill]]  ;;  %10758 = vst [vmem:[#allocation206_spill] sm:$0xff] %v6007_v25 }
 0x1bd   :  { %v6002_v49 = vsel %vm5406_vm15, %v5573_v62, 0.0  ;;  %v6012_v60 = vsel %vm5406_vm15, %v5585_v9, 0.0  ;;  %v6017_v61 = vsel %vm5905_vm12, %v5591_v12, 0.0  ;;  %v10762_v62 = vstv %s10737_s30  ;;  %s10771_s30 = sld [smem:[#allocation57_spill]] }
 0x1be   :  { %10750 = vst [vmem:[#allocation203_spill] sm:$0xff] %v5972_v39  ;;  %10753 = vst [vmem:[#allocation204_spill] sm:$0xff] %v5977_v28  ;;  %v6022_v30 = vmul.f32 %v10762_v62, %v5608_v0  ;;  %v10763_v8 = vmov %v10762_v62  ;;  %v10765_v36 = vstv %s10742_s11  ;;  %v10768_v58 = vstv %s10747_s15  ;;  %s10776_s11 = sld [smem:[#allocation65_spill]]  ;;  %s10780_s15 = sld [smem:[#allocation42_spill]] }
 0x1bf   :  { %10756 = vst [vmem:[#allocation205_spill] sm:$0xff] %v6002_v49  ;;  %10759 = vst [vmem:[#allocation207_spill] sm:$0xff] %v6012_v60  ;;  %v6027_v59 = vmul.f32 %v10763_v8, %v5613_v7  ;;  %v6032_v9 = vmul.f32 %v10765_v36, %v5617_v6  ;;  %v10766_v20 = vmov %v10765_v36  ;;  %v6042_v62 = vmul.f32 %v10768_v58, %v5625_v17 }
 0x1c0   :  { %10761 = vst [vmem:[#allocation208_spill] sm:$0xff] %v6017_v61  ;;  %v6037_v12 = vmul.f32 %v10766_v20, %v5621_v13  ;;  %v10770_v28 = vmov %v10768_v58  ;;  %v10773_v39 = vstv %s10752_s29  ;;  %v10778_v57 = vstv %s10754_s18  ;;  %s10783_s29 = sld [smem:[#allocation50_spill]] }
 0x1c1   :  { %10769 = vst [vmem:[#allocation209_spill] sm:$0xff] %v6042_v62  ;;  %v6047_v8 = vmul.f32 %v10770_v28, %v5629_v31  ;;  %v6052_v36 = vmul.f32 %v10773_v39, %v5633_v33  ;;  %v10775_v63 = vmov %v10773_v39  ;;  %v6062_v58 = vmul.f32 %v10778_v57, %v5608_v0  ;;  %s10787_s18 = sld [smem:[#allocation58_spill]] }
 0x1c2   :  { %v6057_v20 = vmul.f32 %v10775_v63, %v5637_v27  ;;  %v10779_v5 = vmov %v10778_v57  ;;  %v10781_v23 = vstv %s10755_s25  ;;  %v10784_v60 = vstv %s10757_s2  ;;  %s10792_s25 = sld [smem:[#allocation66_spill]]  ;;  %s10825_s2 = sld [smem:[#allocation107_spill]] }
 0x1c3   :  { %10772 = vst [vmem:[#allocation210_spill] sm:$0xff] %v6047_v8  ;;  %10774 = vst [vmem:[#allocation211_spill] sm:$0xff] %v6052_v36  ;;  %v6067_v28 = vmul.f32 %v10779_v5, %v5613_v7  ;;  %v6072_v39 = vmul.f32 %v10781_v23, %v5617_v6  ;;  %v10782_v61 = vmov %v10781_v23  ;;  %v6082_v57 = vmul.f32 %v10784_v60, %v5625_v17 }
 0x1c4   :  { %10777 = vst [vmem:[#allocation212_spill] sm:$0xff] %v6057_v20  ;;  %v6077_v63 = vmul.f32 %v10782_v61, %v5621_v13  ;;  %v10786_v54 = vmov %v10784_v60  ;;  %v10789_v51 = vstv %s10760_s28  ;;  %v10794_v36 = vstv %s10764_s19  ;;  %s10818_s19 = sld [smem:[#allocation94_spill]]  ;;  %s10820_s28 = sld [smem:[#allocation99_spill]] }
 0x1c5   :  { %10785 = vst [vmem:[#allocation213_spill] sm:$0xff] %v6082_v57  ;;  %v6087_v5 = vmul.f32 %v10786_v54, %v5629_v31  ;;  %v6092_v23 = vmul.f32 %v10789_v51, %v5633_v33  ;;  %v10791_v20 = vmov %v10789_v51  ;;  %v6102_v60 = vmul.f32 %v10794_v36, %v5608_v0 }
 0x1c6   :  { %v6097_v61 = vmul.f32 %v10791_v20, %v5637_v27  ;;  %v10795_v8 = vmov %v10794_v36  ;;  %v10804_v62 = vstv %s10776_s11  ;;  %s10911_s11 = sld [smem:[#allocation140_spill]] }
 0x1c7   :  { %10788 = vst [vmem:[#allocation214_spill] sm:$0xff] %v6087_v5  ;;  %10790 = vst [vmem:[#allocation215_spill] sm:$0xff] %v6092_v23  ;;  %v6107_v54 = vmul.f32 %v10795_v8, %v5613_v7  ;;  %v10797_v5 = vstv %s10767_s10  ;;  %s10830_s10 = sld [smem:[#allocation115_spill]] }
 0x1c8   :  { %10793 = vst [vmem:[#allocation216_spill] sm:$0xff] %v6097_v61  ;;  %v6112_v51 = vmul.f32 %v10797_v5, %v5617_v6  ;;  %v10798_v23 = vmov %v10797_v5  ;;  %v10800_v61 = vstv %s10771_s30  ;;  %v6132_v5 = vmul.f32 %v10804_v62, %v5633_v33  ;;  %s10906_s30 = sld [smem:[#allocation132_spill]] }
 0x1c9   :  { %10796 = vst [vmem:[#allocation217_spill] sm:$0xff] %v6107_v54  ;;  %v6117_v20 = vmul.f32 %v10798_v23, %v5621_v13  ;;  %v6122_v36 = vmul.f32 %v10800_v61, %v5625_v17  ;;  %v10802_v57 = vmov %v10800_v61  ;;  %v10806_v54 = vmov %v10804_v62 }
 0x1ca   :  { %v6127_v8 = vmul.f32 %v10802_v57, %v5629_v31  ;;  %10805 = vst [vmem:[#allocation221_spill] sm:$0xff] %v6132_v5  ;;  %v6137_v23 = vmul.f32 %v10806_v54, %v5637_v27 }
 0x1cb   :  { %10799 = vst [vmem:[#allocation218_spill] sm:$0xff] %v6117_v20  ;;  %10801 = vst [vmem:[#allocation219_spill] sm:$0xff] %v6122_v36  ;;  %v10808_v20 = vstv %s10780_s15  ;;  %s10915_s15 = sld [smem:[#allocation133_spill]] }
 0x1cc   :  { %10803 = vst [vmem:[#allocation220_spill] sm:$0xff] %v6127_v8  ;;  %10807 = vst [vmem:[#allocation222_spill] sm:$0xff] %v6137_v23  ;;  %v6142_v61 = vmul.f32 %v10808_v20, %v5608_v0  ;;  %v10809_v36 = vmov %v10808_v20  ;;  %v10810_v8 = vstv %s10783_s29  ;;  %v10812_v23 = vstv %s10787_s18  ;;  %s10918_s29 = sld [smem:[#allocation141_spill]]  ;;  %s10921_s18 = sld [smem:[#allocation134_spill]] }
 0x1cd   :  { %v6147_v57 = vmul.f32 %v10809_v36, %v5613_v7  ;;  %v6152_v62 = vmul.f32 %v10810_v8, %v5617_v6  ;;  %v10811_v5 = vmov %v10810_v8  ;;  %v6162_v0 = vmul.f32 %v10812_v23, %v5625_v17 }
 0x1ce   :  { %v6157_v54 = vmul.f32 %v10811_v5, %v5621_v13  ;;  %v10813_v20 = vmov %v10812_v23  ;;  %v10814_v36 = vstv %s10792_s25  ;;  %v10817_v5 = vstv %s10621_s6  ;;  %s10891_s6 = sld [smem:[#allocation126_spill]] }
 0x1cf   :  { %v6167_v7 = vmul.f32 %v10813_v20, %v5629_v31  ;;  %v6172_v6 = vmul.f32 %v10814_v36, %v5633_v33  ;;  %v10815_v8 = vmov %v10814_v36  ;;  %v6182_v17 = vmul.f32 %v10817_v5, %v5641_v21  ;;  %s10924_s25 = sld [smem:[#allocation142_spill]] }
 0x1d0   :  { %v6177_v13 = vmul.f32 %v10815_v8, %v5637_v27  ;;  %v10819_v23 = vstv %s10624_s17  ;;  %v10822_v20 = vstv %s10628_s24  ;;  %v10824_v36 = vstv %s10631_s21  ;;  %s10835_s21 = sld [smem:[#allocation123_spill]] }
 0x1d1   :  { %v6187_v31 = vmul.f32 %v10819_v23, %v5645_v37  ;;  %v6192_v33 = vmul.f32 %v10822_v20, %v5649_v38  ;;  %v6197_v27 = vmul.f32 %v10824_v36, %v5653_v32  ;;  %v10827_v8 = vstv %s10632_s12  ;;  %s10881_s12 = sld [smem:[#allocation110_spill]]  ;;  %s10896_s17 = sld [smem:[#allocation131_spill]] }
 0x1d2   :  { %10816 = vst [vmem:[#allocation223_spill] sm:$0xff] %v6177_v13  ;;  %v6202_v5 = vmul.f32 %v10827_v8, %v5641_v21  ;;  %v10829_v13 = vstv %s10633_s23  ;;  %s10840_s23 = sld [smem:[#allocation100_spill]]  ;;  %s10901_s24 = sld [smem:[#allocation139_spill]] }
 0x1d3   :  { %10821 = vst [vmem:[#allocation224_spill] sm:$0xff] %v6187_v31  ;;  %10823 = vst [vmem:[#allocation225_spill] sm:$0xff] %v6192_v33  ;;  %v6207_v23 = vmul.f32 %v10829_v13, %v5645_v37  ;;  %v10832_v31 = vstv %s10634_s4  ;;  %v10834_v33 = vstv %s10635_s1  ;;  %s10845_s1 = sld [smem:[#allocation108_spill]]  ;;  %s10871_s4 = sld [smem:[#allocation125_spill]] }
 0x1d4   :  { %10826 = vst [vmem:[#allocation226_spill] sm:$0xff] %v6197_v27  ;;  %10828 = vst [vmem:[#allocation227_spill] sm:$0xff] %v6202_v5  ;;  %v6212_v20 = vmul.f32 %v10832_v31, %v5649_v38  ;;  %v6217_v36 = vmul.f32 %v10834_v33, %v5653_v32  ;;  %v10837_v27 = vstv %s10636_s14  ;;  %v10839_v5 = vstv %s10637_s8  ;;  %s10849_s14 = sld [smem:[#allocation116_spill]]  ;;  %s10866_s8 = sld [smem:[#allocation117_spill]] }
 0x1d5   :  { %10831 = vst [vmem:[#allocation228_spill] sm:$0xff] %v6207_v23  ;;  %v6222_v8 = vmul.f32 %v10837_v27, %v5641_v21  ;;  %v6227_v13 = vmul.f32 %v10839_v5, %v5645_v37  ;;  %v10842_v23 = vstv %s10638_s22  ;;  %s10852_s22 = sld [smem:[#allocation124_spill]] }
 0x1d6   :  { %10833 = vst [vmem:[#allocation229_spill] sm:$0xff] %v6212_v20  ;;  %10836 = vst [vmem:[#allocation230_spill] sm:$0xff] %v6217_v36  ;;  %v6232_v31 = vmul.f32 %v10842_v23, %v5649_v38  ;;  %v10844_v20 = vstv %s10639_s13  ;;  %v10847_v36 = vstv %s10640_s27  ;;  %s10856_s27 = sld [smem:[#allocation101_spill]]  ;;  %s10886_s13 = sld [smem:[#allocation118_spill]] }
 0x1d7   :  { %10838 = vst [vmem:[#allocation231_spill] sm:$0xff] %v6222_v8  ;;  %10841 = vst [vmem:[#allocation232_spill] sm:$0xff] %v6227_v13  ;;  %v6237_v33 = vmul.f32 %v10844_v20, %v5653_v32  ;;  %v6242_v27 = vmul.f32 %v10847_v36, %v5641_v21  ;;  %v10848_v8 = vstv %s10641_s5  ;;  %v10850_v13 = vstv %s10644_s20  ;;  %s10861_s20 = sld [smem:[#allocation109_spill]]  ;;  %s10876_s5 = sld [smem:[#allocation102_spill]] }
 0x1d8   :  { %10843 = vst [vmem:[#allocation233_spill] sm:$0xff] %v6232_v31  ;;  %v6247_v5 = vmul.f32 %v10848_v8, %v5645_v37  ;;  %v6252_v23 = vmul.f32 %v10850_v13, %v5649_v38  ;;  %v10851_v31 = vstv %s10818_s19  ;;  %v10858_v8 = vstv %s10825_s2  ;;  %s10928_s19 = sld [smem:[#allocation135_spill]]  ;;  %s10938_s2 = sld [smem:[#allocation136_spill]] }
 0x1d9   :  { %10846 = vst [vmem:[#allocation234_spill] sm:$0xff] %v6237_v33  ;;  %v6257_v20 = vmul.f32 %v10851_v31, %v5653_v32  ;;  %v10853_v33 = vstv %s10820_s28  ;;  %v6272_v38 = vmul.f32 %v10858_v8, %v5764_v4  ;;  %v10860_v13 = vmov %v10858_v8  ;;  %s10933_s28 = sld [smem:[#allocation143_spill]] }
 0x1da   :  { %v6262_v21 = vmul.f32 %v10853_v33, %v5746_v2  ;;  %v10855_v36 = vmov %v10853_v33  ;;  %v6277_v32 = vmul.f32 %v10860_v13, %v5769_v41  ;;  %v10863_v31 = vstv %s10830_s10  ;;  %s10943_s10 = sld [smem:[#allocation144_spill]] }
 0x1db   :  { %v6267_v37 = vmul.f32 %v10855_v36, %v5751_v15  ;;  %10859 = vst [vmem:[#allocation237_spill] sm:$0xff] %v6272_v38  ;;  %v6282_v33 = vmul.f32 %v10863_v31, %v5774_v29 }
 0x1dc   :  { %10854 = vst [vmem:[#allocation235_spill] sm:$0xff] %v6262_v21  ;;  %10862 = vst [vmem:[#allocation238_spill] sm:$0xff] %v6277_v32  ;;  %v10865_v21 = vmov %v10863_v31  ;;  %v10873_v32 = vstv %s10840_s23  ;;  %s10953_s23 = sld [smem:[#allocation145_spill]] }
 0x1dd   :  { %10857 = vst [vmem:[#allocation236_spill] sm:$0xff] %v6267_v37  ;;  %10864 = vst [vmem:[#allocation239_spill] sm:$0xff] %v6282_v33  ;;  %v6287_v36 = vmul.f32 %v10865_v21, %v5779_v42  ;;  %v10868_v37 = vstv %s10835_s21  ;;  %v6302_v31 = vmul.f32 %v10873_v32, %v5746_v2  ;;  %v10875_v33 = vmov %v10873_v32  ;;  %s10948_s21 = sld [smem:[#allocation137_spill]] }
 0x1de   :  { %v6292_v8 = vmul.f32 %v10868_v37, %v5784_v52  ;;  %v10870_v38 = vmov %v10868_v37  ;;  %v6307_v21 = vmul.f32 %v10875_v33, %v5751_v15 }
 0x1df   :  { %10867 = vst [vmem:[#allocation240_spill] sm:$0xff] %v6287_v36  ;;  %v6297_v13 = vmul.f32 %v10870_v38, %v5789_v44  ;;  %10874 = vst [vmem:[#allocation243_spill] sm:$0xff] %v6302_v31  ;;  %v10878_v36 = vstv %s10845_s1  ;;  %s10957_s1 = sld [smem:[#allocation138_spill]] }
 0x1e0   :  { %10869 = vst [vmem:[#allocation241_spill] sm:$0xff] %v6292_v8  ;;  %10877 = vst [vmem:[#allocation244_spill] sm:$0xff] %v6307_v21  ;;  %v6312_v37 = vmul.f32 %v10878_v36, %v5764_v4  ;;  %v10880_v8 = vmov %v10878_v36  ;;  %v10888_v21 = vstv %s10852_s22  ;;  %s10964_s22 = sld [smem:[#allocation103_spill]] }
 0x1e1   :  { %10872 = vst [vmem:[#allocation242_spill] sm:$0xff] %v6297_v13  ;;  %v6317_v38 = vmul.f32 %v10880_v8, %v5769_v41  ;;  %v10883_v13 = vstv %s10849_s14  ;;  %v6332_v36 = vmul.f32 %v10888_v21, %v5784_v52  ;;  %s10960_s14 = sld [smem:[#allocation147_spill]] }
 0x1e2   :  { %10879 = vst [vmem:[#allocation245_spill] sm:$0xff] %v6312_v37  ;;  %v6322_v32 = vmul.f32 %v10883_v13, %v5774_v29  ;;  %v10885_v31 = vmov %v10883_v13  ;;  %v10890_v37 = vmov %v10888_v21 }
 0x1e3   :  { %10882 = vst [vmem:[#allocation246_spill] sm:$0xff] %v6317_v38  ;;  %v6327_v33 = vmul.f32 %v10885_v31, %v5779_v42  ;;  %10889 = vst [vmem:[#allocation249_spill] sm:$0xff] %v6332_v36  ;;  %v6337_v8 = vmul.f32 %v10890_v37, %v5789_v44  ;;  %v10893_v38 = vstv %s10856_s27  ;;  %s10969_s27 = sld [smem:[#allocation111_spill]] }
 0x1e4   :  { %10884 = vst [vmem:[#allocation247_spill] sm:$0xff] %v6322_v32  ;;  %v6342_v13 = vmul.f32 %v10893_v38, %v5746_v2  ;;  %v10895_v32 = vmov %v10893_v38 }
 0x1e5   :  { %10887 = vst [vmem:[#allocation248_spill] sm:$0xff] %v6327_v33  ;;  %10892 = vst [vmem:[#allocation250_spill] sm:$0xff] %v6337_v8  ;;  %v6347_v31 = vmul.f32 %v10895_v32, %v5751_v15  ;;  %v10898_v33 = vstv %s10861_s20  ;;  %v10903_v8 = vstv %s10866_s8  ;;  %s10974_s20 = sld [smem:[#allocation119_spill]] }
 0x1e6   :  { %10894 = vst [vmem:[#allocation251_spill] sm:$0xff] %v6342_v13  ;;  %v6352_v21 = vmul.f32 %v10898_v33, %v5764_v4  ;;  %v10900_v36 = vmov %v10898_v33  ;;  %v6362_v38 = vmul.f32 %v10903_v8, %v5774_v29  ;;  %v10905_v13 = vmov %v10903_v8  ;;  %s10979_s8 = sld [smem:[#allocation127_spill]] }
 0x1e7   :  { %10897 = vst [vmem:[#allocation252_spill] sm:$0xff] %v6347_v31  ;;  %v6357_v37 = vmul.f32 %v10900_v36, %v5769_v41  ;;  %v6367_v32 = vmul.f32 %v10905_v13, %v5779_v42  ;;  %v10908_v31 = vstv %s10871_s4  ;;  %s10984_s4 = sld [smem:[#allocation104_spill]] }
 0x1e8   :  { %10899 = vst [vmem:[#allocation253_spill] sm:$0xff] %v6352_v21  ;;  %10904 = vst [vmem:[#allocation255_spill] sm:$0xff] %v6362_v38  ;;  %v6372_v33 = vmul.f32 %v10908_v31, %v5784_v52  ;;  %v10910_v21 = vmov %v10908_v31 }
 0x1e9   :  { %10902 = vst [vmem:[#allocation254_spill] sm:$0xff] %v6357_v37  ;;  %10907 = vst [vmem:[#allocation256_spill] sm:$0xff] %v6367_v32  ;;  %v6377_v36 = vmul.f32 %v10910_v21, %v5789_v44  ;;  %v10913_v37 = vstv %s10876_s5  ;;  %v10916_v32 = vstv %s10881_s12  ;;  %s10989_s5 = sld [smem:[#allocation112_spill]] }
 0x1ea   :  { %10909 = vst [vmem:[#allocation257_spill] sm:$0xff] %v6372_v33  ;;  %v6382_v8 = vmul.f32 %v10913_v37, %v5746_v2  ;;  %v10914_v38 = vmov %v10913_v37  ;;  %v6392_v31 = vmul.f32 %v10916_v32, %v5764_v4  ;;  %v10917_v33 = vmov %v10916_v32  ;;  %s10994_s12 = sld [smem:[#allocation120_spill]] }
 0x1eb   :  { %10912 = vst [vmem:[#allocation258_spill] sm:$0xff] %v6377_v36  ;;  %v6387_v13 = vmul.f32 %v10914_v38, %v5751_v15  ;;  %v6397_v21 = vmul.f32 %v10917_v33, %v5769_v41  ;;  %v10919_v36 = vstv %s10886_s13  ;;  %v10922_v38 = vstv %s10891_s6  ;;  %s10999_s13 = sld [smem:[#allocation128_spill]]  ;;  %s11004_s6 = sld [smem:[#allocation105_spill]] }
 0x1ec   :  { %v6402_v2 = vmul.f32 %v10919_v36, %v5774_v29  ;;  %v10920_v37 = vmov %v10919_v36  ;;  %v6412_v4 = vmul.f32 %v10922_v38, %v5784_v52  ;;  %v10923_v32 = vmov %v10922_v38 }
 0x1ed   :  { %v6407_v15 = vmul.f32 %v10920_v37, %v5779_v42  ;;  %v6417_v41 = vmul.f32 %v10923_v32, %v5789_v44  ;;  %v10926_v33 = vstv %s10896_s17  ;;  %v10930_v37 = vstv %s10901_s24  ;;  %s11009_s17 = sld [smem:[#allocation113_spill]] }
 0x1ee   :  { %v6422_v29 = vmul.f32 %v10926_v33, %v5794_v14  ;;  %v10927_v36 = vmov %v10926_v33  ;;  %v6432_v52 = vmul.f32 %v10930_v37, %v5804_v35  ;;  %v10932_v38 = vmov %v10930_v37  ;;  %s11014_s24 = sld [smem:[#allocation121_spill]] }
 0x1ef   :  { %10925 = vst [vmem:[#allocation259_spill] sm:$0xff] %v6417_v41  ;;  %v6427_v42 = vmul.f32 %v10927_v36, %v5799_v24  ;;  %v6437_v44 = vmul.f32 %v10932_v38, %v5809_v26  ;;  %v10935_v32 = vstv %s10906_s30  ;;  %s11019_s30 = sld [smem:[#allocation129_spill]] }
 0x1f0   :  { %10931 = vst [vmem:[#allocation261_spill] sm:$0xff] %v6432_v52  ;;  %v6442_v33 = vmul.f32 %v10935_v32, %v5794_v14  ;;  %v10937_v41 = vmov %v10935_v32 }
 0x1f1   :  { %10929 = vst [vmem:[#allocation260_spill] sm:$0xff] %v6427_v42  ;;  %10934 = vst [vmem:[#allocation262_spill] sm:$0xff] %v6437_v44  ;;  %v6447_v36 = vmul.f32 %v10937_v41, %v5799_v24  ;;  %v10940_v42 = vstv %s10911_s11  ;;  %v10945_v44 = vstv %s10915_s15  ;;  %s11024_s11 = sld [smem:[#allocation106_spill]] }
 0x1f2   :  { %10936 = vst [vmem:[#allocation263_spill] sm:$0xff] %v6442_v33  ;;  %v6452_v37 = vmul.f32 %v10940_v42, %v5804_v35  ;;  %v10942_v52 = vmov %v10940_v42  ;;  %v6462_v32 = vmul.f32 %v10945_v44, %v5794_v14  ;;  %v10947_v33 = vmov %v10945_v44  ;;  %s11029_s15 = sld [smem:[#allocation114_spill]] }
 0x1f3   :  { %10939 = vst [vmem:[#allocation264_spill] sm:$0xff] %v6447_v36  ;;  %v6457_v38 = vmul.f32 %v10942_v52, %v5809_v26  ;;  %v6467_v41 = vmul.f32 %v10947_v33, %v5799_v24  ;;  %v10950_v36 = vstv %s10918_s29  ;;  %s11034_s29 = sld [smem:[#allocation122_spill]] }
 0x1f4   :  { %10941 = vst [vmem:[#allocation265_spill] sm:$0xff] %v6452_v37  ;;  %10946 = vst [vmem:[#allocation267_spill] sm:$0xff] %v6462_v32  ;;  %v6472_v42 = vmul.f32 %v10950_v36, %v5804_v35  ;;  %v10952_v37 = vmov %v10950_v36 }
 0x1f5   :  { %10944 = vst [vmem:[#allocation266_spill] sm:$0xff] %v6457_v38  ;;  %10949 = vst [vmem:[#allocation268_spill] sm:$0xff] %v6467_v41  ;;  %v6477_v52 = vmul.f32 %v10952_v37, %v5809_v26  ;;  %v10955_v38 = vstv %s10921_s18  ;;  %v10958_v41 = vstv %s10924_s25  ;;  %s11039_s18 = sld [smem:[#allocation130_spill]]  ;;  %s11052_s25 = sld [smem:[#allocation72_spill]] }
 0x1f6   :  { %10951 = vst [vmem:[#allocation269_spill] sm:$0xff] %v6472_v42  ;;  %v6482_v44 = vmul.f32 %v10955_v38, %v5794_v14  ;;  %v10956_v32 = vmov %v10955_v38  ;;  %v6492_v36 = vmul.f32 %v10958_v41, %v5804_v35  ;;  %v10959_v42 = vmov %v10958_v41 }
 0x1f7   :  { %10954 = vst [vmem:[#allocation270_spill] sm:$0xff] %v6477_v52  ;;  %v6487_v33 = vmul.f32 %v10956_v32, %v5799_v24  ;;  %v6497_v37 = vmul.f32 %v10959_v42, %v5809_v26  ;;  %v10961_v52 = vstv %s10928_s19  ;;  %v10966_v32 = vstv %s10933_s28  ;;  %s11057_s19 = sld [smem:[#allocation88_spill]]  ;;  %s11062_s28 = sld [smem:[#allocation73_spill]] }
 0x1f8   :  { %v6502_v14 = vmul.f32 %v10961_v52, %v5814_v40  ;;  %v10963_v38 = vmov %v10961_v52  ;;  %v6512_v35 = vmul.f32 %v10966_v32, %v5824_v34  ;;  %v10968_v41 = vmov %v10966_v32 }
 0x1f9   :  { %v6507_v24 = vmul.f32 %v10963_v38, %v5819_v16  ;;  %v6517_v26 = vmul.f32 %v10968_v41, %v5829_v46  ;;  %v10971_v42 = vstv %s10938_s2  ;;  %s11065_s2 = sld [smem:[#allocation81_spill]] }
 0x1fa   :  { %10962 = vst [vmem:[#allocation271_spill] sm:$0xff] %v6502_v14  ;;  %10967 = vst [vmem:[#allocation273_spill] sm:$0xff] %v6512_v35  ;;  %v6522_v52 = vmul.f32 %v10971_v42, %v5814_v40  ;;  %v10973_v14 = vmov %v10971_v42 }
 0x1fb   :  { %10965 = vst [vmem:[#allocation272_spill] sm:$0xff] %v6507_v24  ;;  %10970 = vst [vmem:[#allocation274_spill] sm:$0xff] %v6517_v26  ;;  %v6527_v38 = vmul.f32 %v10973_v14, %v5819_v16  ;;  %v10976_v24 = vstv %s10943_s10  ;;  %v10981_v26 = vstv %s10948_s21  ;;  %s11068_s10 = sld [smem:[#allocation89_spill]] }
 0x1fc   :  { %10972 = vst [vmem:[#allocation275_spill] sm:$0xff] %v6522_v52  ;;  %v6532_v32 = vmul.f32 %v10976_v24, %v5824_v34  ;;  %v10978_v35 = vmov %v10976_v24  ;;  %v6542_v42 = vmul.f32 %v10981_v26, %v5814_v40  ;;  %v10983_v52 = vmov %v10981_v26  ;;  %s11071_s21 = sld [smem:[#allocation97_spill]] }
 0x1fd   :  { %10975 = vst [vmem:[#allocation276_spill] sm:$0xff] %v6527_v38  ;;  %v6537_v41 = vmul.f32 %v10978_v35, %v5829_v46  ;;  %v6547_v14 = vmul.f32 %v10983_v52, %v5819_v16  ;;  %v10986_v38 = vstv %s10953_s23  ;;  %s11074_s23 = sld [smem:[#allocation74_spill]] }
 0x1fe   :  { %10977 = vst [vmem:[#allocation277_spill] sm:$0xff] %v6532_v32  ;;  %10982 = vst [vmem:[#allocation279_spill] sm:$0xff] %v6542_v42  ;;  %v6552_v24 = vmul.f32 %v10986_v38, %v5824_v34  ;;  %v10988_v32 = vmov %v10986_v38 }
 0x1ff   :  { %10980 = vst [vmem:[#allocation278_spill] sm:$0xff] %v6537_v41  ;;  %10985 = vst [vmem:[#allocation280_spill] sm:$0xff] %v6547_v14  ;;  %v6557_v35 = vmul.f32 %v10988_v32, %v5829_v46  ;;  %v10991_v41 = vstv %s10957_s1  ;;  %v10996_v14 = vstv %s10960_s14  ;;  %s11077_s1 = sld [smem:[#allocation82_spill]] }
 0x200   :  { %10987 = vst [vmem:[#allocation281_spill] sm:$0xff] %v6552_v24  ;;  %v6562_v26 = vmul.f32 %v10991_v41, %v5814_v40  ;;  %v10993_v42 = vmov %v10991_v41  ;;  %v6572_v38 = vmul.f32 %v10996_v14, %v5824_v34  ;;  %v10998_v24 = vmov %v10996_v14  ;;  %s11080_s14 = sld [smem:[#allocation90_spill]] }
 0x201   :  { %10990 = vst [vmem:[#allocation282_spill] sm:$0xff] %v6557_v35  ;;  %v6567_v52 = vmul.f32 %v10993_v42, %v5819_v16  ;;  %v6577_v32 = vmul.f32 %v10998_v24, %v5829_v46  ;;  %v11001_v35 = vstv %s10964_s22  ;;  %v11006_v42 = vstv %s10969_s27  ;;  %s11083_s22 = sld [smem:[#allocation98_spill]]  ;;  %s11086_s27 = sld [smem:[#allocation43_spill]] }
 0x202   :  { %10992 = vst [vmem:[#allocation283_spill] sm:$0xff] %v6562_v26  ;;  %10997 = vst [vmem:[#allocation285_spill] sm:$0xff] %v6572_v38  ;;  %v6582_v40 = vmul.f32 %v11001_v35, %v5834_v3  ;;  %v11003_v41 = vmov %v11001_v35  ;;  %v6592_v34 = vmul.f32 %v11006_v42, %v5844_v47  ;;  %v11008_v14 = vmov %v11006_v42 }
 0x203   :  { %10995 = vst [vmem:[#allocation284_spill] sm:$0xff] %v6567_v52  ;;  %11000 = vst [vmem:[#allocation286_spill] sm:$0xff] %v6577_v32  ;;  %v6587_v16 = vmul.f32 %v11003_v41, %v5839_v48  ;;  %v6597_v46 = vmul.f32 %v11008_v14, %v5849_v45  ;;  %v11011_v24 = vstv %s10974_s20  ;;  %s11092_s20 = sld [smem:[#allocation51_spill]] }
 0x204   :  { %11002 = vst [vmem:[#allocation287_spill] sm:$0xff] %v6582_v40  ;;  %11007 = vst [vmem:[#allocation289_spill] sm:$0xff] %v6592_v34  ;;  %v6602_v35 = vmul.f32 %v11011_v24, %v5854_v11  ;;  %v11013_v40 = vmov %v11011_v24 }
 0x205   :  { %11005 = vst [vmem:[#allocation288_spill] sm:$0xff] %v6587_v16  ;;  %11010 = vst [vmem:[#allocation290_spill] sm:$0xff] %v6597_v46  ;;  %v6607_v41 = vmul.f32 %v11013_v40, %v5859_v53  ;;  %v11016_v16 = vstv %s10979_s8  ;;  %v11021_v46 = vstv %s10984_s4  ;;  %s11127_s8 = sld [smem:[#allocation61_spill]]  ;;  %s11132_s4 = sld [smem:[#allocation46_spill]] }
 0x206   :  { %11012 = vst [vmem:[#allocation291_spill] sm:$0xff] %v6602_v35  ;;  %v6612_v42 = vmul.f32 %v11016_v16, %v5864_v1  ;;  %v11018_v34 = vmov %v11016_v16  ;;  %v6622_v24 = vmul.f32 %v11021_v46, %v5834_v3  ;;  %v11023_v35 = vmov %v11021_v46 }
 0x207   :  { %11015 = vst [vmem:[#allocation292_spill] sm:$0xff] %v6607_v41  ;;  %v6617_v14 = vmul.f32 %v11018_v34, %v5869_v10  ;;  %v6627_v40 = vmul.f32 %v11023_v35, %v5839_v48  ;;  %v11026_v41 = vstv %s10989_s5  ;;  %s11137_s5 = sld [smem:[#allocation54_spill]] }
 0x208   :  { %11017 = vst [vmem:[#allocation293_spill] sm:$0xff] %v6612_v42  ;;  %11022 = vst [vmem:[#allocation295_spill] sm:$0xff] %v6622_v24  ;;  %v6632_v16 = vmul.f32 %v11026_v41, %v5844_v47  ;;  %v11028_v42 = vmov %v11026_v41 }
 0x209   :  { %11020 = vst [vmem:[#allocation294_spill] sm:$0xff] %v6617_v14  ;;  %11025 = vst [vmem:[#allocation296_spill] sm:$0xff] %v6627_v40  ;;  %v6637_v34 = vmul.f32 %v11028_v42, %v5849_v45  ;;  %v11031_v14 = vstv %s10994_s12  ;;  %v11036_v40 = vstv %s10999_s13  ;;  %s11237_s12 = sld [smem:[#allocation159_spill]]  ;;  %s11241_s13 = sld [smem:[#allocation160_spill]] }
 0x20a   :  { %11027 = vst [vmem:[#allocation297_spill] sm:$0xff] %v6632_v16  ;;  %v6642_v46 = vmul.f32 %v11031_v14, %v5854_v11  ;;  %v11033_v24 = vmov %v11031_v14  ;;  %v6652_v41 = vmul.f32 %v11036_v40, %v5864_v1  ;;  %v11038_v16 = vmov %v11036_v40 }
 0x20b   :  { %11030 = vst [vmem:[#allocation298_spill] sm:$0xff] %v6637_v34  ;;  %v6647_v35 = vmul.f32 %v11033_v24, %v5859_v53  ;;  %v6657_v42 = vmul.f32 %v11038_v16, %v5869_v10  ;;  %v11041_v34 = vstv %s11004_s6  ;;  %s11247_s6 = sld [smem:[#allocation161_spill]] }
 0x20c   :  { %11032 = vst [vmem:[#allocation299_spill] sm:$0xff] %v6642_v46  ;;  %11037 = vst [vmem:[#allocation301_spill] sm:$0xff] %v6652_v41  ;;  %v6662_v14 = vmul.f32 %v11041_v34, %v5834_v3  ;;  %v11043_v46 = vmov %v11041_v34 }
 0x20d   :  { %11035 = vst [vmem:[#allocation300_spill] sm:$0xff] %v6647_v35  ;;  %11040 = vst [vmem:[#allocation302_spill] sm:$0xff] %v6657_v42  ;;  %v6667_v24 = vmul.f32 %v11043_v46, %v5839_v48  ;;  %v11045_v35 = vstv %s11009_s17  ;;  %v11049_v42 = vstv %s11014_s24  ;;  %s11259_s17 = sld [smem:[#allocation162_spill]]  ;;  %s7069_s24 = sld [smem:[#allocation6 + $0x4c]] }
 0x20e   :  { %11042 = vst [vmem:[#allocation303_spill] sm:$0xff] %v6662_v14  ;;  %v6672_v40 = vmul.f32 %v11045_v35, %v5844_v47  ;;  %v11047_v41 = vmov %v11045_v35  ;;  %v6682_v34 = vmul.f32 %v11049_v42, %v5854_v11  ;;  %v11051_v14 = vmov %v11049_v42 }
 0x20f   :  { %11044 = vst [vmem:[#allocation304_spill] sm:$0xff] %v6667_v24  ;;  %v6677_v16 = vmul.f32 %v11047_v41, %v5849_v45  ;;  %v6687_v46 = vmul.f32 %v11051_v14, %v5859_v53  ;;  %v11054_v24 = vstv %s11019_s30  ;;  %s7071_s30 = sld [smem:[#allocation6 + $0x41]] }
 0x210   :  { %11046 = vst [vmem:[#allocation305_spill] sm:$0xff] %v6672_v40  ;;  %11050 = vst [vmem:[#allocation307_spill] sm:$0xff] %v6682_v34  ;;  %v6692_v35 = vmul.f32 %v11054_v24, %v5864_v1  ;;  %v11056_v40 = vmov %v11054_v24 }
 0x211   :  { %11048 = vst [vmem:[#allocation306_spill] sm:$0xff] %v6677_v16  ;;  %11053 = vst [vmem:[#allocation308_spill] sm:$0xff] %v6687_v46  ;;  %v6697_v41 = vmul.f32 %v11056_v40, %v5869_v10  ;;  %v11059_v16 = vstv %s11024_s11  ;;  %v11064_v46 = vstv %s11029_s15  ;;  %s7079_s11 = sld [smem:[#allocation6 + $0x45]]  ;;  %s11264_s15 = sld [smem:[#allocation163_spill]] }
 0x212   :  { %11055 = vst [vmem:[#allocation309_spill] sm:$0xff] %v6692_v35  ;;  %v6702_v42 = vmul.f32 %v11059_v16, %v5834_v3  ;;  %v11061_v34 = vmov %v11059_v16  ;;  %v6712_v24 = vmul.f32 %v11064_v46, %v5844_v47  ;;  %v11067_v35 = vmov %v11064_v46 }
 0x213   :  { %11058 = vst [vmem:[#allocation310_spill] sm:$0xff] %v6697_v41  ;;  %v6707_v14 = vmul.f32 %v11061_v34, %v5839_v48  ;;  %v6717_v40 = vmul.f32 %v11067_v35, %v5849_v45  ;;  %v11070_v41 = vstv %s11034_s29  ;;  %v11076_v34 = vstv %s11039_s18  ;;  %s7081_s29 = sld [smem:[#allocation6 + $0x49]] }
 0x214   :  { %11060 = vst [vmem:[#allocation311_spill] sm:$0xff] %v6702_v42  ;;  %11066 = vst [vmem:[#allocation313_spill] sm:$0xff] %v6712_v24  ;;  %v6722_v3 = vmul.f32 %v11070_v41, %v5854_v11  ;;  %v11073_v16 = vmov %v11070_v41  ;;  %v6732_v47 = vmul.f32 %v11076_v34, %v5864_v1  ;;  %v11079_v46 = vmov %v11076_v34  ;;  %v11090_v34 = vld [vmem:[#allocation194_spill] sm:$0xff]  ;;  %s11265_s18 = sld [smem:[#allocation164_spill]] }
 0x215   :  { %11063 = vst [vmem:[#allocation312_spill] sm:$0xff] %v6707_v14  ;;  %11069 = vst [vmem:[#allocation314_spill] sm:$0xff] %v6717_v40  ;;  %v6727_v48 = vmul.f32 %v11073_v16, %v5859_v53  ;;  %v6737_v45 = vmul.f32 %v11079_v46, %v5869_v10  ;;  %v11082_v35 = vstv %s10698_s26  ;;  %v11085_v41 = vstv %s10699_s0  ;;  %s11097_s26 = sld [smem:[#allocation59_spill]]  ;;  %s11117_s0 = sld [smem:[#allocation45_spill]] }
 0x216   :  { %11072 = vst [vmem:[#allocation315_spill] sm:$0xff] %v6722_v3  ;;  %11078 = vst [vmem:[#allocation317_spill] sm:$0xff] %v6732_v47  ;;  %v6742_v11 = vmul.f32 %v11082_v35, %v5874_v43  ;;  %v6747_v53 = vmul.f32 %v11085_v41, %v5879_v50  ;;  %v11088_v16 = vstv %s10700_s9  ;;  %v11091_v47 = vstv %s10701_s3  ;;  %s11102_s9 = sld [smem:[#allocation44_spill]]  ;;  %s11122_s3 = sld [smem:[#allocation53_spill]] }
 0x217   :  { %11075 = vst [vmem:[#allocation316_spill] sm:$0xff] %v6727_v48  ;;  %11081 = vst [vmem:[#allocation318_spill] sm:$0xff] %v6737_v45  ;;  %v6752_v1 = vmul.f32 %v11088_v16, %v5884_v19  ;;  %v6757_v10 = vmul.f32 %v11091_v47, %v11090_v34  ;;  %v11094_v46 = vstv %s11052_s25  ;;  %v11096_v45 = vstv %s10703_s7  ;;  %s11107_s7 = sld [smem:[#allocation52_spill]]  ;;  %s11268_s25 = sld [smem:[#allocation165_spill]] }
 0x218   :  { %11084 = vst [vmem:[#allocation319_spill] sm:$0xff] %v6742_v11  ;;  %11087 = vst [vmem:[#allocation320_spill] sm:$0xff] %v6747_v53  ;;  %v6762_v35 = vmul.f32 %v11094_v46, %v5874_v43  ;;  %v6767_v41 = vmul.f32 %v11096_v45, %v5879_v50  ;;  %v11099_v53 = vstv %s11057_s19  ;;  %v11106_v11 = vstv %s11065_s2  ;;  %s11270_s19 = sld [smem:[#allocation166_spill]]  ;;  %s7139_s2 = sld [smem:[#allocation6 + $0x42]] }
 0x219   :  { %11089 = vst [vmem:[#allocation321_spill] sm:$0xff] %v6752_v1  ;;  %11093 = vst [vmem:[#allocation194_spill] sm:$0xff] %v6757_v10  ;;  %v6772_v16 = vmul.f32 %v11099_v53, %v5884_v19  ;;  %v11101_v1 = vstv %s10705_s16  ;;  %v11104_v10 = vstv %s11062_s28  ;;  %v6787_v45 = vmul.f32 %v11106_v11, %v5879_v50  ;;  %s11112_s16 = sld [smem:[#allocation60_spill]] }
 0x21a   :  { %11095 = vst [vmem:[#allocation322_spill] sm:$0xff] %v6762_v35  ;;  %11098 = vst [vmem:[#allocation323_spill] sm:$0xff] %v6767_v41  ;;  %v6777_v47 = vmul.f32 %v11101_v1, %v11090_v34  ;;  %v6782_v46 = vmul.f32 %v11104_v10, %v5874_v43  ;;  %v11109_v41 = vstv %s11068_s10  ;;  %s7137_s28 = sld [smem:[#allocation6 + $0x4d]]  ;;  %s7195_s10 = sld [smem:[#allocation6 + $0x46]] }
 0x21b   :  { %11100 = vst [vmem:[#allocation324_spill] sm:$0xff] %v6772_v16  ;;  %11108 = vst [vmem:[#allocation327_spill] sm:$0xff] %v6787_v45  ;;  %v6792_v53 = vmul.f32 %v11109_v41, %v5884_v19  ;;  %v11111_v16 = vstv %s11071_s21  ;;  %v11119_v45 = vstv %s11080_s14  ;;  %s7197_s21 = sld [smem:[#allocation6 + $0x4a]]  ;;  %s7251_s14 = sld [smem:[#allocation6 + $0x47]] }
 0x21c   :  { %11103 = vst [vmem:[#allocation325_spill] sm:$0xff] %v6777_v47  ;;  %11105 = vst [vmem:[#allocation326_spill] sm:$0xff] %v6782_v46  ;;  %v6797_v1 = vmul.f32 %v11111_v16, %v11090_v34  ;;  %v11114_v47 = vstv %s11074_s23  ;;  %v11116_v46 = vstv %s11077_s1  ;;  %v6812_v41 = vmul.f32 %v11119_v45, %v5884_v19  ;;  %s7233_s23 = sld [smem:[#allocation6 + $0x4e]]  ;;  %s7235_s1 = sld [smem:[#allocation6 + $0x43]] }
 0x21d   :  { %11110 = vst [vmem:[#allocation328_spill] sm:$0xff] %v6792_v53  ;;  %v6802_v10 = vmul.f32 %v11114_v47, %v5874_v43  ;;  %v6807_v11 = vmul.f32 %v11116_v46, %v5879_v50  ;;  %v11121_v53 = vstv %s11083_s22  ;;  %v11129_v46 = vstv %s11092_s20  ;;  %s7261_s22 = sld [smem:[#allocation6 + $0x4b]]  ;;  %s7299_s20 = sld [smem:[#allocation6 + $0x5f]] }
 0x21e   :  { %11113 = vst [vmem:[#allocation329_spill] sm:$0xff] %v6797_v1  ;;  %11120 = vst [vmem:[#allocation332_spill] sm:$0xff] %v6812_v41  ;;  %v6817_v16 = vmul.f32 %v11121_v53, %v11090_v34  ;;  %v11124_v1 = vstv %s11086_s27  ;;  %v6832_v19 = vmul.f32 %v11129_v46, %v5992_v56  ;;  %v11131_v45 = vmov %v11129_v46  ;;  %s7263_s27 = sld [smem:[#allocation6 + $0x4f]] }
 0x21f   :  { %11115 = vst [vmem:[#allocation330_spill] sm:$0xff] %v6802_v10  ;;  %11118 = vst [vmem:[#allocation331_spill] sm:$0xff] %v6807_v11  ;;  %v6822_v43 = vmul.f32 %v11124_v1, %v5982_v22  ;;  %v11126_v47 = vmov %v11124_v1  ;;  %v6837_v34 = vmul.f32 %v11131_v45, %v5997_v18  ;;  %v11134_v53 = vstv %s11097_s26  ;;  %s11296_s26 = sld [smem:[#allocation167_spill]] }
 0x220   :  { %11123 = vst [vmem:[#allocation333_spill] sm:$0xff] %v6817_v16  ;;  %v6827_v50 = vmul.f32 %v11126_v47, %v5987_v55  ;;  %11130 = vst [vmem:[#allocation336_spill] sm:$0xff] %v6832_v19  ;;  %v6842_v1 = vmul.f32 %v11134_v53, %v6002_v49  ;;  %v11136_v16 = vmov %v11134_v53  ;;  %v11139_v41 = vstv %s11102_s9  ;;  %s11297_s9 = sld [smem:[#allocation168_spill]] }
 0x221   :  { %11125 = vst [vmem:[#allocation334_spill] sm:$0xff] %v6822_v43  ;;  %11133 = vst [vmem:[#allocation337_spill] sm:$0xff] %v6837_v34  ;;  %v6847_v47 = vmul.f32 %v11136_v16, %v6007_v25  ;;  %v6852_v46 = vmul.f32 %v11139_v41, %v5982_v22  ;;  %v11141_v11 = vmov %v11139_v41  ;;  %v11143_v45 = vstv %s11107_s7  ;;  %s11298_s7 = sld [smem:[#allocation170_spill]] }
 0x222   :  { %11128 = vst [vmem:[#allocation335_spill] sm:$0xff] %v6827_v50  ;;  %11135 = vst [vmem:[#allocation338_spill] sm:$0xff] %v6842_v1  ;;  %v6857_v19 = vmul.f32 %v11141_v11, %v5987_v55  ;;  %v6862_v34 = vmul.f32 %v11143_v45, %v5992_v56  ;;  %v11145_v53 = vmov %v11143_v45  ;;  %v11147_v16 = vstv %s11112_s16  ;;  %s11299_s16 = sld [smem:[#allocation174_spill]] }
 0x223   :  { %11138 = vst [vmem:[#allocation339_spill] sm:$0xff] %v6847_v47  ;;  %11140 = vst [vmem:[#allocation340_spill] sm:$0xff] %v6852_v46  ;;  %v6867_v1 = vmul.f32 %v11145_v53, %v5997_v18  ;;  %v6872_v47 = vmul.f32 %v11147_v16, %v6002_v49  ;;  %v11149_v10 = vmov %v11147_v16  ;;  %v11151_v50 = vstv %s11117_s0  ;;  %v7218_v46 = vld [vmem:[#allocation2 + $0xa] ss:$4 sm:$0x3]  ;;  %s11318_s0 = sld [smem:[#allocation178_spill]] }
 0x224   :  { %11142 = vst [vmem:[#allocation341_spill] sm:$0xff] %v6857_v19  ;;  %11144 = vst [vmem:[#allocation342_spill] sm:$0xff] %v6862_v34  ;;  %v6877_v41 = vmul.f32 %v11149_v10, %v6007_v25  ;;  %v6882_v11 = vmul.f32 %v11151_v50, %v5982_v22  ;;  %v11153_v43 = vmov %v11151_v50  ;;  %v11155_v34 = vstv %s11122_s3  ;;  %v377_v19 = vpop.permute.xlu0 %376  ;;  %s11321_s3 = sld [smem:[#allocation179_spill]] }
 0x225   :  { %11146 = vst [vmem:[#allocation343_spill] sm:$0xff] %v6867_v1  ;;  %11148 = vst [vmem:[#allocation344_spill] sm:$0xff] %v6872_v47  ;;  %v6887_v45 = vmul.f32 %v11153_v43, %v5987_v55  ;;  %v6892_v53 = vmul.f32 %v11155_v34, %v5992_v56  ;;  %v11157_v1 = vmov %v11155_v34  ;;  %v11159_v47 = vstv %s11127_s8  ;;  %s11327_s8 = sld [smem:[#allocation184_spill]] }
 0x226   :  { %11150 = vst [vmem:[#allocation345_spill] sm:$0xff] %v6877_v41  ;;  %11152 = vst [vmem:[#allocation346_spill] sm:$0xff] %v6882_v11  ;;  %v6897_v16 = vmul.f32 %v11157_v1, %v5997_v18  ;;  %v6902_v10 = vmul.f32 %v11159_v47, %v6002_v49  ;;  %v11161_v41 = vmov %v11159_v47  ;;  %v11163_v11 = vstv %s11132_s4  ;;  %s7502_s4 = sld [smem:[#allocation6 + $0x8d]] }
 0x227   :  { %11154 = vst [vmem:[#allocation347_spill] sm:$0xff] %v6887_v45  ;;  %11156 = vst [vmem:[#allocation348_spill] sm:$0xff] %v6892_v53  ;;  %v6907_v50 = vmul.f32 %v11161_v41, %v6007_v25  ;;  %v6912_v43 = vmul.f32 %v11163_v11, %v5982_v22  ;;  %v11165_v45 = vmov %v11163_v11  ;;  %v11167_v53 = vstv %s11137_s5  ;;  %s11371_s5 = sld [smem:[#allocation62_spill]] }
 0x228   :  { %11158 = vst [vmem:[#allocation349_spill] sm:$0xff] %v6897_v16  ;;  %11160 = vst [vmem:[#allocation350_spill] sm:$0xff] %v6902_v10  ;;  %v6917_v34 = vmul.f32 %v11165_v45, %v5987_v55  ;;  %v6922_v1 = vmul.f32 %v11167_v53, %v5992_v56  ;;  %v11169_v16 = vmov %v11167_v53  ;;  %v379_v10 = vpop.permute.xlu1 %378  ;;  %v511_v41 = vadd.f32 %v6032_v9, %v6022_v30  ;;  %v11171_v45 = vld [vmem:[#allocation217_spill] sm:$0xff] }
 0x229   :  { %11162 = vst [vmem:[#allocation351_spill] sm:$0xff] %v6907_v50  ;;  %11164 = vst [vmem:[#allocation352_spill] sm:$0xff] %v6912_v43  ;;  %v6927_v47 = vmul.f32 %v11169_v16, %v5997_v18  ;;  %v512_v22 = vadd.f32 %v6037_v12, %v6027_v59  ;;  %v535_v55 = vadd.f32 %v6072_v39, %v6062_v58  ;;  %v11172_v18 = vld [vmem:[#allocation218_spill] sm:$0xff]  ;;  %v11173_v9 = vld [vmem:[#allocation209_spill] sm:$0xff]  ;;  %v1177_v48 = vstv %s7137_s28  ;;  %s11452_s28 = smov 111  }
 0x22a   :  { %11166 = vst [vmem:[#allocation353_spill] sm:$0xff] %v6917_v34  ;;  %11168 = vst [vmem:[#allocation354_spill] sm:$0xff] %v6922_v1  ;;  %v536_v11 = vadd.f32 %v6077_v63, %v6067_v28  ;;  %v559_v56 = vadd.f32 %v6112_v51, %v6102_v60  ;;  %v560_v53 = vadd.f32 %v11172_v18, %v11171_v45  ;;  %v11174_v12 = vld [vmem:[#allocation213_spill] sm:$0xff]  ;;  %v11176_v63 = vld [vmem:[#allocation219_spill] sm:$0xff]  ;;  %v1210_v35 = vstv %s7139_s2  ;;  %s11453_s2 = smov 16  }
 0x22b   :  { %11170 = vst [vmem:[#allocation355_spill] sm:$0xff] %v6927_v47  ;;  %v583_v16 = vadd.f32 %v6152_v62, %v6142_v61  ;;  %v584_v30 = vadd.f32 %v6157_v54, %v6147_v57  ;;  %v517_v59 = vadd.f32 %v11173_v9, %v511_v41  ;;  %v541_v47 = vadd.f32 %v11174_v12, %v535_v55  ;;  %v11177_v61 = vld [vmem:[#allocation210_spill] sm:$0xff]  ;;  %v11179_v54 = vld [vmem:[#allocation211_spill] sm:$0xff]  ;;  %v11181_v9 = vld [vmem:[#allocation220_spill] sm:$0xff] }
 0x22c   :  { %v6949_v39 = vsel %vm10177_vm9, %v377_v19, %v379_v10  ;;  %v6953_v28 = vsel %vm10177_vm9, %v379_v10, %v377_v19  ;;  %v565_v60 = vadd.f32 %v11176_v63, %v559_v56  ;;  %v518_v62 = vadd.f32 %v11177_v61, %v512_v22  ;;  %v11178_v45 = vld [vmem:[#allocation214_spill] sm:$0xff]  ;;  %v11180_v18 = vld [vmem:[#allocation215_spill] sm:$0xff]  ;;  %v11182_v1 = vld [vmem:[#allocation221_spill] sm:$0xff] }
 0x22d   :  { %v589_v51 = vadd.f32 %v6162_v0, %v583_v16  ;;  %v542_v57 = vadd.f32 %v11178_v45, %v536_v11  ;;  %v523_v41 = vadd.f32 %v11179_v54, %v517_v59  ;;  %v547_v55 = vadd.f32 %v11180_v18, %v541_v47  ;;  %v11183_v10 = vld [vmem:[#allocation212_spill] sm:$0xff]  ;;  %v11185_v16 = vld [vmem:[#allocation227_spill] sm:$0xff]  ;;  %v11186_v61 = vld [vmem:[#allocation222_spill] sm:$0xff] }
 0x22e   :  { %v566_v12 = vadd.f32 %v11181_v9, %v560_v53  ;;  %v590_v25 = vadd.f32 %v6167_v7, %v584_v30  ;;  %v571_v34 = vadd.f32 %v11182_v1, %v565_v60  ;;  %v524_v56 = vadd.f32 %v11183_v10, %v518_v62  ;;  %v11184_v63 = vld [vmem:[#allocation216_spill] sm:$0xff]  ;;  %v11187_v45 = vld [vmem:[#allocation223_spill] sm:$0xff]  ;;  %v11190_v60 = vld [vmem:[#allocation154_spill] sm:$0xff] }
 0x22f   :  { %v595_v19 = vadd.f32 %v6172_v6, %v589_v51  ;;  %v548_v0 = vadd.f32 %v11184_v63, %v542_v57  ;;  %v621_v22 = vadd.f32 %v6182_v17, %v523_v41  ;;  %v645_v11 = vadd.f32 %v11185_v16, %v547_v55  ;;  %v11188_v54 = vld [vmem:[#allocation231_spill] sm:$0xff]  ;;  %v11191_v51 = vld [vmem:[#allocation224_spill] sm:$0xff]  ;;  %v11193_v9 = vld [vmem:[#allocation158_spill] sm:$0xff] }
 0x230   :  { %v572_v59 = vadd.f32 %v11186_v61, %v566_v12  ;;  %v596_v47 = vadd.f32 %v11187_v45, %v590_v25  ;;  %v669_v53 = vadd.f32 %v11188_v54, %v571_v34  ;;  %v11189_v30 = vld [vmem:[#allocation182_spill] sm:$0xff]  ;;  %v11192_v18 = vld [vmem:[#allocation228_spill] sm:$0xff]  ;;  %v11194_v41 = vld [vmem:[#allocation151_spill] sm:$0xff]  ;;  %v1243_v49 = vstv %s7195_s10  ;;  %s11454_s10 = smov 112  }
 0x231   :  { %v693_v7 = vadd.f32 %v6242_v27, %v595_v19  ;;  %v622_v1 = vadd.f32 %v11189_v30, %v524_v56  ;;  %v646_v6 = vadd.f32 %v11190_v60, %v548_v0  ;;  %v627_v62 = vadd.f32 %v11191_v51, %v621_v22  ;;  %v11195_v10 = vld [vmem:[#allocation232_spill] sm:$0xff]  ;;  %v11196_v63 = vld [vmem:[#allocation185_spill] sm:$0xff]  ;;  %v11197_v16 = vld [vmem:[#allocation156_spill] sm:$0xff] }
 0x232   :  { %v651_v57 = vadd.f32 %v11192_v18, %v645_v11  ;;  %v670_v17 = vadd.f32 %v11193_v9, %v572_v59  ;;  %v694_v55 = vadd.f32 %v11194_v41, %v596_v47  ;;  %v675_v12 = vadd.f32 %v11195_v10, %v669_v53  ;;  %v11198_v19 = vld [vmem:[#allocation225_spill] sm:$0xff]  ;;  %v11200_v45 = vld [vmem:[#allocation149_spill] sm:$0xff]  ;;  %v11201_v54 = vld [vmem:[#allocation187_spill] sm:$0xff] }
 0x233   :  { %v699_v25 = vadd.f32 %v6247_v5, %v693_v7  ;;  %v628_v34 = vadd.f32 %v11196_v63, %v622_v1  ;;  %v652_v27 = vadd.f32 %v11197_v16, %v646_v6  ;;  %v633_v56 = vadd.f32 %v11198_v19, %v627_v62  ;;  %v11199_v61 = vld [vmem:[#allocation229_spill] sm:$0xff]  ;;  %v11203_v60 = vld [vmem:[#allocation153_spill] sm:$0xff]  ;;  %v11205_v7 = vld [vmem:[#allocation226_spill] sm:$0xff] }
 0x234   :  { %v657_v0 = vadd.f32 %v11199_v61, %v651_v57  ;;  %v676_v22 = vadd.f32 %v11200_v45, %v670_v17  ;;  %v700_v11 = vadd.f32 %v11201_v54, %v694_v55  ;;  %v11202_v30 = vld [vmem:[#allocation233_spill] sm:$0xff]  ;;  %v11204_v51 = vld [vmem:[#allocation157_spill] sm:$0xff]  ;;  %v11206_v18 = vld [vmem:[#allocation230_spill] sm:$0xff]  ;;  %v1276_v24 = vstv %s7197_s21  ;;  %s7804_s21 = sld [smem:[#allocation10 + $0x40]] }
 0x235   :  { %v681_v59 = vadd.f32 %v11202_v30, %v675_v12  ;;  %v705_v47 = vadd.f32 %v6252_v23, %v699_v25  ;;  %v634_v53 = vadd.f32 %v11203_v60, %v628_v34  ;;  %v658_v5 = vadd.f32 %v11204_v51, %v652_v27  ;;  %v11207_v9 = vld [vmem:[#allocation150_spill] sm:$0xff]  ;;  %v11208_v41 = vld [vmem:[#allocation188_spill] sm:$0xff]  ;;  %v11209_v10 = vld [vmem:[#allocation234_spill] sm:$0xff] }
 0x236   :  { %v639_v1 = vadd.f32 %v11205_v7, %v633_v56  ;;  %v663_v6 = vadd.f32 %v11206_v18, %v657_v0  ;;  %v682_v62 = vadd.f32 %v11207_v9, %v676_v22  ;;  %v706_v57 = vadd.f32 %v11208_v41, %v700_v11  ;;  %v11210_v63 = vld [vmem:[#allocation152_spill] sm:$0xff]  ;;  %v11211_v16 = vld [vmem:[#allocation155_spill] sm:$0xff]  ;;  %v11217_v30 = vld [vmem:[#allocation236_spill] sm:$0xff] }
 0x237   :  { %v687_v17 = vadd.f32 %v11209_v10, %v681_v59  ;;  %v711_v55 = vadd.f32 %v6257_v20, %v705_v47  ;;  %v640_v12 = vadd.f32 %v11210_v63, %v634_v53  ;;  %v664_v23 = vadd.f32 %v11211_v16, %v658_v5  ;;  %v11212_v25 = vld [vmem:[#allocation235_spill] sm:$0xff]  ;;  %v11218_v60 = vld [vmem:[#allocation244_spill] sm:$0xff]  ;;  %v11219_v47 = vld [vmem:[#allocation237_spill] sm:$0xff] }
 0x238   :  { %v737_v34 = vadd.f32 %v11212_v25, %v639_v1  ;;  %v11213_v19 = vld [vmem:[#allocation243_spill] sm:$0xff]  ;;  %v11220_v51 = vld [vmem:[#allocation245_spill] sm:$0xff]  ;;  %v11221_v7 = vld [vmem:[#allocation252_spill] sm:$0xff]  ;;  %v1408_v52 = vstv %s7261_s22  ;;  %s7812_s22 = sld [smem:[#allocation10 + $0x44]] }
 0x239   :  { %v761_v27 = vadd.f32 %v11213_v19, %v663_v6  ;;  %v11214_v61 = vld [vmem:[#allocation148_spill] sm:$0xff]  ;;  %v809_v11 = vadd.f32 %v6382_v8, %v711_v55  ;;  %v738_v59 = vadd.f32 %v11217_v30, %v640_v12  ;;  %v762_v20 = vadd.f32 %v11218_v60, %v664_v23  ;;  %v11222_v6 = vld [vmem:[#allocation253_spill] sm:$0xff]  ;;  %v11223_v41 = vld [vmem:[#allocation238_spill] sm:$0xff] }
 0x23a   :  { %v688_v56 = vadd.f32 %v11214_v61, %v682_v62  ;;  %v11215_v45 = vld [vmem:[#allocation191_spill] sm:$0xff]  ;;  %v743_v53 = vadd.f32 %v11219_v47, %v737_v34  ;;  %v11224_v10 = vld [vmem:[#allocation246_spill] sm:$0xff]  ;;  %v11234_v60 = vld [vmem:[#allocation257_spill] sm:$0xff]  ;;  %v1410_v26 = vmul.f32 %v7218_v46, %v1408_v52 }
 0x23b   :  { %v712_v0 = vadd.f32 %v11215_v45, %v706_v57  ;;  %v11216_v54 = vld [vmem:[#allocation251_spill] sm:$0xff]  ;;  %v767_v5 = vadd.f32 %v11220_v51, %v761_v27  ;;  %v815_v62 = vadd.f32 %v6392_v31, %v809_v11  ;;  %v744_v57 = vadd.f32 %v11223_v41, %v738_v59  ;;  %v11227_v16 = vld [vmem:[#allocation254_spill] sm:$0xff]  ;;  %v11229_v27 = vld [vmem:[#allocation240_spill] sm:$0xff] }
 0x23c   :  { %v785_v22 = vadd.f32 %v11216_v54, %v687_v17  ;;  %v786_v1 = vadd.f32 %v11221_v7, %v688_v56  ;;  %v768_v8 = vadd.f32 %v11224_v10, %v762_v20  ;;  %v11225_v17 = vld [vmem:[#allocation239_spill] sm:$0xff]  ;;  %v11230_v56 = vld [vmem:[#allocation248_spill] sm:$0xff]  ;;  %v11231_v45 = vld [vmem:[#allocation241_spill] sm:$0xff] }
 0x23d   :  { %v810_v18 = vadd.f32 %v6387_v13, %v712_v0  ;;  %v749_v55 = vadd.f32 %v11225_v17, %v743_v53  ;;  %v11226_v63 = vld [vmem:[#allocation247_spill] sm:$0xff]  ;;  %v821_v13 = vadd.f32 %v6402_v2, %v815_v62  ;;  %v750_v61 = vadd.f32 %v11229_v27, %v744_v57  ;;  %v11232_v54 = vld [vmem:[#allocation249_spill] sm:$0xff]  ;;  %v11233_v11 = vld [vmem:[#allocation256_spill] sm:$0xff] }
 0x23e   :  { %v791_v9 = vadd.f32 %v11222_v6, %v785_v22  ;;  %v773_v12 = vadd.f32 %v11226_v63, %v767_v5  ;;  %v792_v23 = vadd.f32 %v11227_v16, %v786_v1  ;;  %v11228_v34 = vld [vmem:[#allocation255_spill] sm:$0xff]  ;;  %v774_v31 = vadd.f32 %v11230_v56, %v768_v8  ;;  %v11235_v47 = vld [vmem:[#allocation242_spill] sm:$0xff]  ;;  %v11243_v57 = vld [vmem:[#allocation189_spill] sm:$0xff] }
 0x23f   :  { %v816_v25 = vadd.f32 %v6397_v21, %v810_v18  ;;  %v755_v0 = vadd.f32 %v11231_v45, %v749_v55  ;;  %v827_v21 = vadd.f32 %v6412_v4, %v821_v13  ;;  %v756_v53 = vadd.f32 %v11235_v47, %v750_v61  ;;  %v11236_v51 = vld [vmem:[#allocation250_spill] sm:$0xff]  ;;  %v11238_v7 = vld [vmem:[#allocation263_spill] sm:$0xff]  ;;  %v11246_v55 = vld [vmem:[#allocation261_spill] sm:$0xff] }
 0x240   :  { %v797_v19 = vadd.f32 %v11228_v34, %v791_v9  ;;  %v779_v22 = vadd.f32 %v11232_v54, %v773_v12  ;;  %v798_v30 = vadd.f32 %v11233_v11, %v792_v23  ;;  %v780_v2 = vadd.f32 %v11236_v51, %v774_v31  ;;  %v11239_v18 = vld [vmem:[#allocation258_spill] sm:$0xff]  ;;  %v11240_v9 = vld [vmem:[#allocation259_spill] sm:$0xff]  ;;  %v11248_v12 = vld [vmem:[#allocation265_spill] sm:$0xff] }
 0x241   :  { %v822_v59 = vadd.f32 %v6407_v15, %v816_v25  ;;  %v853_v5 = vadd.f32 %v6422_v29, %v755_v0  ;;  %v11242_v15 = vld [vmem:[#allocation267_spill] sm:$0xff]  ;;  %v925_v4 = vadd.f32 %v6482_v44, %v827_v21  ;;  %v841_v8 = vsel %vm480_vm11, %v11243_v57, %v6949_v39  ;;  %v11245_v29 = vld [vmem:[#allocation27_spill] sm:$0xff]  ;;  %v11252_v61 = vld [vmem:[#allocation260_spill] sm:$0xff] }
 0x242   :  { %v803_v20 = vadd.f32 %v11234_v60, %v797_v19  ;;  %v877_v1 = vadd.f32 %v11238_v7, %v779_v22  ;;  %v804_v6 = vadd.f32 %v11239_v18, %v798_v30  ;;  %v842_v17 = vsel %vm480_vm11, %v11245_v29, %v6953_v28  ;;  %v11251_v19 = vld [vmem:[#allocation269_spill] sm:$0xff]  ;;  %v11255_v22 = vld [vmem:[#allocation264_spill] sm:$0xff]  ;;  %v11258_v21 = vld [vmem:[#allocation262_spill] sm:$0xff] }
 0x243   :  { %v828_v62 = vadd.f32 %v11240_v9, %v822_v59  ;;  %v859_v63 = vadd.f32 %v11246_v55, %v853_v5  ;;  %v843_v25 = vsel %vm5251_vm13, %v841_v8, 0.0  ;;  %v844_v44 = vsel %vm5310_vm14, %v842_v17, 0.0  ;;  %v11260_v5 = vld [vmem:[#allocation268_spill] sm:$0xff]  ;;  %v7212_v43 = vld [vmem:[#allocation2 + $0x2] ss:$4 sm:$0x3] }
 0x244   :  { %v901_v41 = vadd.f32 %v11242_v15, %v803_v20  ;;  %v883_v16 = vadd.f32 %v11248_v12, %v877_v1  ;;  %v931_v27 = vadd.f32 %v6492_v36, %v925_v4  ;;  %v854_v56 = vadd.f32 %v11252_v61, %v756_v53  ;;  %v11262_v1 = vld [vmem:[#allocation266_spill] sm:$0xff] }
 0x245   :  { %v11253_v31 = vstv %s11237_s12  ;;  %v878_v11 = vadd.f32 %v11255_v22, %v780_v2  ;;  %v11256_v30 = vstv %s11241_s13  ;;  %v902_v7 = vadd.f32 %v11260_v5, %v804_v6  ;;  %v11266_v4 = vld [vmem:[#allocation270_spill] sm:$0xff]  ;;  %s7518_s12 = sld [smem:[#allocation6 + $0x8c]]  ;;  %s7532_s13 = sld [smem:[#allocation6 + $0x8e]] }
 0x246   :  { %v907_v13 = vadd.f32 %v11251_v19, %v901_v41  ;;  %v863_v45 = vmul.f32 %v11253_v31, %v843_v25  ;;  %v11254_v0 = vmov %v11253_v31  ;;  %v887_v59 = vmul.f32 %v11256_v30, %v843_v25 }
 0x247   :  { %v864_v54 = vmul.f32 %v11254_v0, %v844_v44  ;;  %v11257_v60 = vmov %v11256_v30  ;;  %v860_v47 = vadd.f32 %v11258_v21, %v854_v56  ;;  %v11261_v36 = vstv %s11247_s6  ;;  %v446_v21 = vpop.permute.xlu0 %445  ;;  %s7594_s6 = sld [smem:[#allocation6 + $0x8f]] }
 0x248   :  { %v888_v20 = vmul.f32 %v11257_v60, %v844_v44  ;;  %v7064_v51 = vadd.f32 %v863_v45, %v859_v63  ;;  %v911_v53 = vmul.f32 %v11261_v36, %v843_v25  ;;  %v884_v2 = vadd.f32 %v11262_v1, %v878_v11 }
 0x249   :  { %v7074_v18 = vadd.f32 %v887_v59, %v883_v16  ;;  %v11263_v9 = vmov %v11261_v36  ;;  %v926_v41 = vadd.f32 %v6487_v33, %v828_v62  ;;  %v7083_v6 = vadd.f32 %v864_v54, %v860_v47 }
 0x24a   :  { %v912_v15 = vmul.f32 %v11263_v9, %v844_v44  ;;  %v908_v8 = vadd.f32 %v11266_v4, %v902_v7  ;;  %v7086_v17 = vadd.f32 %v911_v53, %v907_v13  ;;  %v11267_v55 = vstv %s11259_s17  ;;  %v11291_v4 = vld [vmem:[#allocation22_spill] sm:$0xff]  ;;  %s7684_s17 = sld [smem:[#allocation7]] }
 0x24b   :  { %v935_v63 = vmul.f32 %v11267_v55, %v843_v25  ;;  %v7090_v12 = vadd.f32 %v888_v20, %v884_v2  ;;  %v932_v33 = vadd.f32 %v6497_v37, %v926_v41  ;;  %v11269_v62 = vmov %v11267_v55  ;;  %v448_v20 = vpop.permute.xlu1 %447  ;;  %v11289_v2 = vld [vmem:[#allocation190_spill] sm:$0xff] }
 0x24c   :  { %v936_v16 = vmul.f32 %v11269_v62, %v844_v44  ;;  %v1485_v19 = vsel %vm480_vm11, %v6949_v39, %v11243_v57  ;;  %v7099_v61 = vadd.f32 %v912_v15, %v908_v8  ;;  %v1486_v25 = vsel %vm480_vm11, %v6953_v28, %v11245_v29  ;;  %v11290_v15 = vld [vmem:[#allocation30_spill] sm:$0xff]  ;;  %v11292_v8 = vld [vmem:[#allocation23_spill] sm:$0xff] }
 0x24d   :  { %v7101_v13 = vadd.f32 %v935_v63, %v931_v27  ;;  %v1487_v37 = vsel %vm5406_vm15, %v1485_v19, 0.0  ;;  %v1488_v45 = vsel %vm5484_vm1, %v1486_v25, 0.0  ;;  %v11273_v39 = vstv %s11264_s15  ;;  %v11295_v62 = vld [vmem:[#allocation26_spill] sm:$0xff]  ;;  %s7703_s15 = sld [smem:[#allocation7 + $0x2]] }
 0x24e   :  { %v7109_v44 = vadd.f32 %v936_v16, %v932_v33  ;;  %v7115_v57 = vmul.f32 %v11273_v39, %v1487_v37  ;;  %v11275_v0 = vstv %s11265_s18  ;;  %v11277_v54 = vmov %v11273_v39  ;;  %v11294_v33 = vld [vmem:[#allocation29_spill] sm:$0xff]  ;;  %s7719_s18 = sld [smem:[#allocation7 + $0x3]] }
 0x24f   :  { %v7119_v27 = vmul.f32 %v11275_v0, %v1487_v37  ;;  %v7123_v22 = vmul.f32 %v11277_v54, %v1488_v45  ;;  %v11279_v11 = vmov %v11275_v0  ;;  %v11281_v29 = vstv %s11268_s25  ;;  %v7209_v54 = vld [vmem:[#allocation2 + $0x9] ss:$4 sm:$0x3]  ;;  %s11451_s25 = smov 17  }
 0x250   :  { %11274 = vst [vmem:[#allocation217_spill] sm:$0xff] %v7115_v57  ;;  %v7127_v28 = vmul.f32 %v11279_v11, %v1488_v45  ;;  %v7131_v30 = vmul.f32 %v11281_v29, %v1487_v37  ;;  %v11283_v59 = vmov %v11281_v29  ;;  %v11285_v47 = vstv %s11270_s19  ;;  %v7183_v29 = vld [vmem:[#allocation2 + $0x3] ss:$4 sm:$0x3]  ;;  %s7734_s19 = sld [smem:[#allocation9 + $0x3]] }
 0x251   :  { %11276 = vst [vmem:[#allocation218_spill] sm:$0xff] %v7119_v27  ;;  %11278 = vst [vmem:[#allocation209_spill] sm:$0xff] %v7123_v22  ;;  %v7135_v60 = vmul.f32 %v11283_v59, %v1488_v45  ;;  %v7143_v5 = vmul.f32 %v11285_v47, %v1487_v37  ;;  %v11287_v7 = vmov %v11285_v47  ;;  %v7151_v53 = vsel %vm139_vm0, %v446_v21, %v448_v20  ;;  %v7189_v47 = vld [vmem:[#allocation2] ss:$4 sm:$0x3] }
 0x252   :  { %11280 = vst [vmem:[#allocation213_spill] sm:$0xff] %v7127_v28  ;;  %11282 = vst [vmem:[#allocation219_spill] sm:$0xff] %v7131_v30  ;;  %v7147_v36 = vmul.f32 %v11287_v7, %v1488_v45  ;;  %v7155_v1 = vsel %vm139_vm0, %v448_v20, %v446_v21  ;;  %v959_v9 = vcombine.high %v11289_v2, %v11289_v2  ;;  %v1045_v19 = vstv %s7069_s24  ;;  %v7186_v20 = vld [vmem:[#allocation2 + $0xb] ss:$4 sm:$0x3]  ;;  %s7690_s24 = sld [smem:[#allocation7 + $0x1]] }
 0x253   :  { %11284 = vst [vmem:[#allocation210_spill] sm:$0xff] %v7135_v60  ;;  %11286 = vst [vmem:[#allocation214_spill] sm:$0xff] %v7143_v5  ;;  %v11293_v55 = vcombine.low %v11291_v4, %v11292_v8  ;;  %v1017_v16 = vcombine.low %v11295_v62, %v11294_v33  ;;  %v1078_v25 = vstv %s7071_s30  ;;  %v1111_v37 = vstv %s7079_s11  ;;  %v7206_v62 = vld [vmem:[#allocation2 + $0x1] ss:$4 sm:$0x3]  ;;  %s7692_s30 = sld [smem:[#allocation9]] }
 0x254   :  { %11288 = vst [vmem:[#allocation211_spill] sm:$0xff] %v7147_v36  ;;  %v1144_v45 = vstv %s7081_s29  ;;  %v7174_v39 = vrot.slane %v959_v9, %v11290_v15  ;;  %v1046_v59 = vmul.f32 %v7183_v29, %v1045_v19  ;;  %v1047_v21 = vmul.f32 %v7186_v20, %v1045_v19  ;;  %v7192_v9 = vld [vmem:[#allocation2 + $0x8] ss:$4 sm:$0x3]  ;;  %s7701_s11 = sld [smem:[#allocation9 + $0x1]]  ;;  %s7713_s29 = sld [smem:[#allocation9 + $0x2]] }
 0x255   :  { %v7165_v63 = vrot.slane %v11293_v55, %v11290_v15  ;;  %v7181_v11 = vrot.slane %v1017_v16, %v11290_v15  ;;  %v1079_v7 = vmul.f32 %v7189_v47, %v1078_v25  ;;  %v1080_v4 = vmul.f32 %v7192_v9, %v1078_v25 }
 0x256   :  { %v1112_v16 = vmul.f32 %v7206_v62, %v1111_v37  ;;  %v1050_v19 = vcombine.low %v1046_v59, %v1047_v21  ;;  %v1113_v41 = vmul.f32 %v7209_v54, %v1111_v37  ;;  %v1146_v33 = vmul.f32 %v7218_v46, %v1144_v45 }
 0x257   :  { %v992_v0 = vcombine.high %v7165_v63, %v7165_v63  ;;  %v1025_v55 = vcombine.high %v7181_v11, %v7181_v11  ;;  %v1083_v25 = vcombine.low %v1079_v7, %v1080_v4  ;;  %v1178_v7 = vmul.f32 %v7183_v29, %v1177_v48 }
 0x258   :  { %v7224_v59 = vrot.slane %v1050_v19, %v11290_v15  ;;  %v1116_v37 = vcombine.low %v1112_v16, %v1113_v41  ;;  %v1179_v3 = vmul.f32 %v7186_v20, %v1177_v48  ;;  %v1277_v14 = vmul.f32 %v7212_v43, %v1276_v24 }
 0x259   :  { %v7200_v8 = vrot.slane %v992_v0, %v11290_v15  ;;  %v1145_v0 = vmul.f32 %v7212_v43, %v1144_v45  ;;  %v7216_v50 = vrot.slane %v1025_v55, %v11290_v15  ;;  %v7227_v21 = vrot.slane %v1083_v25, %v11290_v15 }
 0x25a   :  { %v1211_v55 = vmul.f32 %v7189_v47, %v1210_v35  ;;  %v1212_v45 = vmul.f32 %v7192_v9, %v1210_v35  ;;  %v1058_v19 = vcombine.high %v7224_v59, %v7224_v59  ;;  %v7246_v16 = vrot.slane %v1116_v37, %v11290_v15 }
 0x25b   :  { %v1149_v4 = vcombine.low %v1145_v0, %v1146_v33  ;;  %v1091_v33 = vcombine.high %v7227_v21, %v7227_v21  ;;  %v1182_v25 = vcombine.low %v1178_v7, %v1179_v3  ;;  %v1309_v36 = vstv %s7233_s23  ;;  %s7806_s23 = sld [smem:[#allocation10 + $0x41]] }
 0x25c   :  { %v1215_v0 = vcombine.low %v1211_v55, %v1212_v45  ;;  %v7254_v40 = vrot.slane %v1058_v19, %v11290_v15  ;;  %v1124_v37 = vcombine.high %v7246_v16, %v7246_v16  ;;  %v1244_v19 = vmul.f32 %v7206_v62, %v1243_v49 }
 0x25d   :  { %v7249_v35 = vrot.slane %v1149_v4, %v11290_v15  ;;  %v7257_v41 = vrot.slane %v1091_v33, %v11290_v15  ;;  %v7274_v55 = vrot.slane %v1182_v25, %v11290_v15  ;;  %v1245_v33 = vmul.f32 %v7209_v54, %v1243_v49 }
 0x25e   :  { %v7277_v45 = vrot.slane %v1215_v0, %v11290_v15  ;;  %v7282_v3 = vrot.slane %v1124_v37, %v11290_v15  ;;  %v1278_v4 = vmul.f32 %v7218_v46, %v1276_v24  ;;  %v1342_v5 = vstv %s7235_s1  ;;  %s7808_s1 = sld [smem:[#allocation10 + $0x42]] }
 0x25f   :  { %v1157_v7 = vcombine.high %v7249_v35, %v7249_v35  ;;  %v1190_v25 = vcombine.high %v7274_v55, %v7274_v55  ;;  %v1248_v37 = vcombine.low %v1244_v19, %v1245_v33  ;;  %v1310_v32 = vmul.f32 %v7183_v29, %v1309_v36 }
 0x260   :  { %v1223_v42 = vcombine.high %v7277_v45, %v7277_v45  ;;  %v1311_v38 = vmul.f32 %v7186_v20, %v1309_v36  ;;  %v1441_v60 = vstv %s7263_s27  ;;  %v1409_v30 = vmul.f32 %v7212_v43, %v1408_v52  ;;  %s7814_s27 = sld [smem:[#allocation10 + $0x45]] }
 0x261   :  { %v7285_v48 = vrot.slane %v1157_v7, %v11290_v15  ;;  %v1281_v7 = vcombine.low %v1277_v14, %v1278_v4  ;;  %v7302_v24 = vrot.slane %v1190_v25, %v11290_v15  ;;  %v7310_v49 = vrot.slane %v1248_v37, %v11290_v15 }
 0x262   :  { %v7305_v0 = vrot.slane %v1223_v42, %v11290_v15  ;;  %v1343_v14 = vmul.f32 %v7189_v47, %v1342_v5  ;;  %v1344_v4 = vmul.f32 %v7192_v9, %v1342_v5  ;;  %v1314_v33 = vcombine.low %v1310_v32, %v1311_v38 }
 0x263   :  { %v7313_v19 = vrot.slane %v1281_v7, %v11290_v15  ;;  %v1375_v25 = vstv %s7251_s14  ;;  %v1256_v42 = vcombine.high %v7310_v49, %v7310_v49  ;;  %v454_v7 = vpop.permute.xlu1 %453  ;;  %v11302_v28 = vstv %s11297_s9  ;;  %s7810_s14 = sld [smem:[#allocation10 + $0x43]]  ;;  %s7824_s9 = sld [smem:[#allocation10 + $0x48]] }
 0x264   :  { %v7329_v47 = vrot.slane %v1314_v33, %v11290_v15  ;;  %v1347_v5 = vcombine.low %v1343_v14, %v1344_v4  ;;  %v1376_v38 = vmul.f32 %v7206_v62, %v1375_v25  ;;  %v1377_v32 = vmul.f32 %v7209_v54, %v1375_v25  ;;  %v452_v4 = vpop.permute.xlu0 %451 }
 0x265   :  { %v1289_v37 = vcombine.high %v7313_v19, %v7313_v19  ;;  %v7334_v9 = vrot.slane %v1256_v42, %v11290_v15  ;;  %v1413_v25 = vcombine.low %v1409_v30, %v1410_v26  ;;  %v1442_v42 = vmul.f32 %v7183_v29, %v1441_v60 }
 0x266   :  { %v1322_v33 = vcombine.high %v7329_v47, %v7329_v47  ;;  %v1354_v62 = vrot.slane %v1347_v5, %v11290_v15  ;;  %v1380_v54 = vcombine.low %v1376_v38, %v1377_v32  ;;  %v455_v5 = vsel %vm10177_vm9, %v452_v4, %v454_v7 }
 0x267   :  { %v7337_v36 = vrot.slane %v1289_v37, %v11290_v15  ;;  %v1443_v37 = vmul.f32 %v7186_v20, %v1441_v60  ;;  %v1420_v14 = vrot.slane %v1413_v25, %v11290_v15  ;;  %v7359_v26 = vsel %vm10177_vm9, %v454_v7, %v452_v4 }
 0x268   :  { %v7350_v43 = vrot.slane %v1322_v33, %v11290_v15  ;;  %v1355_v52 = vcombine.high %v1354_v62, %v1354_v62  ;;  %v1362_v46 = vrot.slane %v1354_v62, %v11290_v15  ;;  %v1387_v27 = vrot.slane %v1380_v54, %v11290_v15 }
 0x269   :  { %v1446_v22 = vcombine.low %v1442_v42, %v1443_v37  ;;  %v845_v20 = vsel %vm480_vm11, %v7155_v1, %v455_v5  ;;  %v1421_v38 = vcombine.high %v1420_v14, %v1420_v14  ;;  %v1428_v32 = vrot.slane %v1420_v14, %v11290_v15 }
 0x26a   :  { %v1369_v30 = vrot.slane %v1355_v52, %v11290_v15  ;;  %v1388_v60 = vcombine.high %v1387_v27, %v1387_v27  ;;  %v1395_v29 = vrot.slane %v1387_v27, %v11290_v15  ;;  %v846_v33 = vsel %vm480_vm11, %v7151_v53, %v7359_v26 }
 0x26b   :  { %v1453_v7 = vrot.slane %v1446_v22, %v11290_v15  ;;  %v847_v62 = vsel %vm5251_vm13, %v845_v20, 0.0  ;;  %v848_v54 = vsel %vm5310_vm14, %v846_v33, 0.0  ;;  %v1489_v14 = vsel %vm480_vm11, %v455_v5, %v7155_v1 }
 0x26c   :  { %v1402_v27 = vrot.slane %v1388_v60, %v11290_v15  ;;  %v1435_v22 = vrot.slane %v1421_v38, %v11290_v15  ;;  %v11300_v42 = vstv %s11296_s26  ;;  %v893_v23 = vmul.f32 %v11302_v28, %v847_v62  ;;  %s7820_s26 = sld [smem:[#allocation10 + $0x47]] }
 0x26d   :  { %v1454_v4 = vcombine.high %v1453_v7, %v1453_v7  ;;  %v1461_v25 = vrot.slane %v1453_v7, %v11290_v15  ;;  %v869_v37 = vmul.f32 %v11300_v42, %v847_v62  ;;  %v11301_v52 = vmov %v11300_v42 }
 0x26e   :  { %v870_v60 = vmul.f32 %v11301_v52, %v848_v54  ;;  %v11303_v20 = vmov %v11302_v28  ;;  %v11304_v34 = vstv %s11298_s7  ;;  %v11306_v31 = vstv %s11299_s16  ;;  %s7826_s7 = sld [smem:[#allocation10 + $0x49]]  ;;  %s7828_s16 = sld [smem:[#allocation10 + $0x4a]] }
 0x26f   :  { %v894_v58 = vmul.f32 %v11303_v20, %v848_v54  ;;  %v917_v33 = vmul.f32 %v11304_v34, %v847_v62  ;;  %v1468_v57 = vrot.slane %v1454_v4, %v11290_v15  ;;  %v871_v1 = vadd.f32 %v869_v37, %v7064_v51 }
 0x270   :  { %v11305_v5 = vmov %v11304_v34  ;;  %v941_v56 = vmul.f32 %v11306_v31, %v847_v62  ;;  %v872_v7 = vadd.f32 %v870_v60, %v7083_v6  ;;  %v895_v42 = vadd.f32 %v893_v23, %v7074_v18 }
 0x271   :  { %v918_v38 = vmul.f32 %v11305_v5, %v848_v54  ;;  %v896_v52 = vadd.f32 %v894_v58, %v7090_v12  ;;  %v919_v28 = vadd.f32 %v917_v33, %v7086_v17  ;;  %v11307_v10 = vmov %v11306_v31 }
 0x272   :  { %v942_v34 = vmul.f32 %v11307_v10, %v848_v54  ;;  %v943_v4 = vadd.f32 %v941_v56, %v7101_v13  ;;  %v11308_v51 = vrot.slane %v11289_v2, %v11290_v15  ;;  %v977_v31 = vadd.f32 %v7174_v39, %v872_v7 }
 0x273   :  { %v920_v20 = vadd.f32 %v918_v38, %v7099_v61  ;;  %v11309_v6 = vrot.slane %v7227_v21, %v11290_v15  ;;  %v1109_v58 = vadd.f32 %v7257_v41, %v896_v52  ;;  %v11310_v18 = vrot.slane %v7277_v45, %v11290_v15  ;;  %v11325_v52 = vld [vmem:[#allocation271_spill] sm:$0xff] }
 0x274   :  { %v976_v37 = vadd.f32 %v11308_v51, %v871_v1  ;;  %v944_v10 = vadd.f32 %v942_v34, %v7109_v44  ;;  %v11311_v12 = vrot.slane %v7165_v63, %v11290_v15  ;;  %v1372_v56 = vadd.f32 %v1362_v46, %v943_v4  ;;  %v11330_v51 = vld [vmem:[#allocation275_spill] sm:$0xff] }
 0x275   :  { %v1108_v23 = vadd.f32 %v11309_v6, %v895_v42  ;;  %v1240_v17 = vadd.f32 %v11310_v18, %v919_v28  ;;  %v1241_v13 = vadd.f32 %v7305_v0, %v920_v20  ;;  %v1010_v2 = vadd.f32 %v7200_v8, %v977_v31  ;;  %v11326_v28 = vld [vmem:[#allocation272_spill] sm:$0xff]  ;;  %v11331_v31 = vld [vmem:[#allocation273_spill] sm:$0xff] }
 0x276   :  { %v1009_v61 = vadd.f32 %v11311_v12, %v976_v37  ;;  %v11312_v39 = vrot.slane %v7246_v16, %v11290_v15  ;;  %v1142_v41 = vadd.f32 %v7282_v3, %v1109_v58  ;;  %v11313_v45 = vrot.slane %v7310_v49, %v11290_v15  ;;  %v11333_v6 = vld [vmem:[#allocation276_spill] sm:$0xff] }
 0x277   :  { %v11314_v44 = vrot.slane %v7181_v11, %v11290_v15  ;;  %v1274_v54 = vadd.f32 %v7334_v9, %v1241_v13  ;;  %v1373_v0 = vadd.f32 %v1369_v30, %v944_v10  ;;  %v1405_v46 = vadd.f32 %v1395_v29, %v1372_v56  ;;  %v11338_v56 = vld [vmem:[#allocation280_spill] sm:$0xff] }
 0x278   :  { %v1141_v21 = vadd.f32 %v11312_v39, %v1108_v23  ;;  %v1273_v62 = vadd.f32 %v11313_v45, %v1240_v17  ;;  %v1043_v8 = vadd.f32 %v7216_v50, %v1010_v2  ;;  %v11315_v16 = vrot.slane %v7249_v35, %v11290_v15  ;;  %v11335_v17 = vld [vmem:[#allocation277_spill] sm:$0xff] }
 0x279   :  { %v1042_v63 = vadd.f32 %v11314_v44, %v1009_v61  ;;  %v1175_v3 = vadd.f32 %v7285_v48, %v1142_v41  ;;  %v11316_v49 = vrot.slane %v7313_v19, %v11290_v15  ;;  %v11317_v11 = vrot.slane %v7224_v59, %v11290_v15  ;;  %v11339_v39 = vld [vmem:[#allocation217_spill] sm:$0xff] }
 0x27a   :  { %v1174_v60 = vadd.f32 %v11315_v16, %v1141_v21  ;;  %v1307_v9 = vadd.f32 %v7337_v36, %v1274_v54  ;;  %v1406_v30 = vadd.f32 %v1402_v27, %v1373_v0  ;;  %v1438_v50 = vadd.f32 %v1428_v32, %v1405_v46  ;;  %v11340_v41 = vld [vmem:[#allocation209_spill] sm:$0xff]  ;;  %v11343_v0 = vld [vmem:[#allocation218_spill] sm:$0xff] }
 0x27b   :  { %v1306_v33 = vadd.f32 %v11316_v49, %v1273_v62  ;;  %v1075_v1 = vadd.f32 %v11317_v11, %v1042_v63  ;;  %v1076_v29 = vadd.f32 %v7254_v40, %v1043_v8  ;;  %v11319_v35 = vrot.slane %v7274_v55, %v11290_v15  ;;  %v11341_v62 = vld [vmem:[#allocation278_spill] sm:$0xff]  ;;  %v11344_v8 = vld [vmem:[#allocation281_spill] sm:$0xff] }
 0x27c   :  { %v1208_v5 = vadd.f32 %v7302_v24, %v1175_v3  ;;  %v11320_v19 = vrot.slane %v7329_v47, %v11290_v15  ;;  %v1340_v59 = vadd.f32 %v7350_v43, %v1307_v9  ;;  %v1439_v36 = vadd.f32 %v1435_v22, %v1406_v30  ;;  %v11347_v9 = vld [vmem:[#allocation213_spill] sm:$0xff] }
 0x27d   :  { %v1207_v48 = vadd.f32 %v11319_v35, %v1174_v60  ;;  %v1471_v27 = vadd.f32 %v1461_v25, %v1438_v50  ;;  %v1490_v40 = vsel %vm480_vm11, %v7359_v26, %v7151_v53  ;;  %v1491_v55 = vsel %vm5406_vm15, %v1489_v14, 0.0  ;;  %v11332_v26 = vld [vmem:[#allocation274_spill] sm:$0xff]  ;;  %v11348_v50 = vld [vmem:[#allocation283_spill] sm:$0xff] }
 0x27e   :  { %v1339_v38 = vadd.f32 %v11320_v19, %v1306_v33  ;;  %v1492_v24 = vsel %vm5484_vm1, %v1490_v40, 0.0  ;;  %v1497_v47 = vadd.f32 %v11325_v52, %v1075_v1  ;;  %v1498_v20 = vadd.f32 %v11326_v28, %v1076_v29  ;;  %v11345_v60 = vld [vmem:[#allocation282_spill] sm:$0xff]  ;;  %v11352_v52 = vld [vmem:[#allocation285_spill] sm:$0xff] }
 0x27f   :  { %v1472_v43 = vadd.f32 %v1468_v57, %v1439_v36  ;;  %v11328_v22 = vstv %s11318_s0  ;;  %v1521_v37 = vadd.f32 %v11330_v51, %v1207_v48  ;;  %v1522_v23 = vadd.f32 %v11333_v6, %v1208_v5  ;;  %v11337_v57 = vld [vmem:[#allocation279_spill] sm:$0xff]  ;;  %v11350_v19 = vld [vmem:[#allocation210_spill] sm:$0xff]  ;;  %s7830_s0 = sld [smem:[#allocation10 + $0x4b]] }
 0x280   :  { %v1513_v34 = vmul.f32 %v11328_v22, %v1491_v55  ;;  %v11329_v25 = vmov %v11328_v22  ;;  %v1503_v53 = vadd.f32 %v11331_v31, %v1497_v47  ;;  %v1504_v14 = vadd.f32 %v11332_v26, %v1498_v20  ;;  %v11349_v48 = vld [vmem:[#allocation219_spill] sm:$0xff]  ;;  %v11355_v51 = vld [vmem:[#allocation286_spill] sm:$0xff] }
 0x281   :  { %v1514_v4 = vmul.f32 %v11329_v25, %v1492_v24  ;;  %v11334_v58 = vstv %s11321_s3  ;;  %v1527_v10 = vadd.f32 %v11335_v17, %v1521_v37  ;;  %v1545_v13 = vadd.f32 %v11337_v57, %v1339_v38  ;;  %v11356_v31 = vld [vmem:[#allocation287_spill] sm:$0xff]  ;;  %v11364_v57 = vld [vmem:[#allocation304_spill] sm:$0xff]  ;;  %s7832_s3 = sld [smem:[#allocation10 + $0x4c]] }
 0x282   :  { %v1537_v18 = vmul.f32 %v11334_v58, %v1491_v55  ;;  %v11336_v12 = vmov %v11334_v58  ;;  %v1546_v2 = vadd.f32 %v11338_v56, %v1340_v59  ;;  %v1509_v21 = vadd.f32 %v11339_v39, %v1503_v53  ;;  %v11351_v59 = vld [vmem:[#allocation284_spill] sm:$0xff]  ;;  %v11357_v53 = vld [vmem:[#allocation214_spill] sm:$0xff]  ;;  %v11361_v17 = vld [vmem:[#allocation211_spill] sm:$0xff] }
 0x283   :  { %v1538_v61 = vmul.f32 %v11336_v12, %v1492_v24  ;;  %v1510_v45 = vadd.f32 %v11340_v41, %v1504_v14  ;;  %v1528_v44 = vadd.f32 %v11341_v62, %v1522_v23  ;;  %v11342_v63 = vstv %s11327_s8  ;;  %v11358_v14 = vld [vmem:[#allocation288_spill] sm:$0xff]  ;;  %v11363_v12 = vld [vmem:[#allocation303_spill] sm:$0xff]  ;;  %s7834_s8 = sld [smem:[#allocation10 + $0x4d]] }
 0x284   :  { %v1561_v54 = vmul.f32 %v11342_v63, %v1491_v55  ;;  %v1533_v46 = vadd.f32 %v11343_v0, %v1527_v10  ;;  %v1551_v16 = vadd.f32 %v11344_v8, %v1545_v13  ;;  %v1552_v3 = vadd.f32 %v11345_v60, %v1546_v2  ;;  %v11360_v58 = vld [vmem:[#allocation296_spill] sm:$0xff]  ;;  %v11362_v10 = vld [vmem:[#allocation289_spill] sm:$0xff]  ;;  %v11365_v2 = vld [vmem:[#allocation290_spill] sm:$0xff] }
 0x285   :  { %v11346_v49 = vmov %v11342_v63  ;;  %v1515_v11 = vadd.f32 %v1513_v34, %v1509_v21  ;;  %v1516_v1 = vadd.f32 %v1514_v4, %v1510_v45  ;;  %v1534_v30 = vadd.f32 %v11347_v9, %v1528_v44  ;;  %v11366_v21 = vld [vmem:[#allocation297_spill] sm:$0xff]  ;;  %v11367_v45 = vld [vmem:[#allocation298_spill] sm:$0xff]  ;;  %v11368_v63 = vld [vmem:[#allocation291_spill] sm:$0xff] }
 0x286   :  { %v1562_v33 = vmul.f32 %v11346_v49, %v1492_v24  ;;  %v1569_v29 = vadd.f32 %v11348_v50, %v1471_v27  ;;  %v1539_v35 = vadd.f32 %v1537_v18, %v1533_v46  ;;  %v1557_v5 = vadd.f32 %v11349_v48, %v1551_v16  ;;  %v11369_v0 = vld [vmem:[#allocation305_spill] sm:$0xff]  ;;  %v11370_v8 = vld [vmem:[#allocation306_spill] sm:$0xff]  ;;  %v11372_v60 = vld [vmem:[#allocation292_spill] sm:$0xff] }
 0x287   :  { %v1558_v38 = vadd.f32 %v11350_v19, %v1552_v3  ;;  %v1570_v36 = vadd.f32 %v11351_v59, %v1472_v43  ;;  %v1540_v40 = vadd.f32 %v1538_v61, %v1534_v30  ;;  %v11353_v28 = vstv %s7299_s20  ;;  %v11359_v43 = vld [vmem:[#allocation295_spill] sm:$0xff]  ;;  %v11376_v50 = vld [vmem:[#allocation293_spill] sm:$0xff]  ;;  %s7818_s20 = sld [smem:[#allocation10 + $0x46]]  ;;  %11455 = sst [smem:[#allocation67_spill]] %s7832_s3 }
 0x288   :  { %v1575_v47 = vadd.f32 %v11352_v52, %v1569_v29  ;;  %v1585_v20 = vmul.f32 %v11353_v28, %v1491_v55  ;;  %v11354_v22 = vmov %v11353_v28  ;;  %v1563_v34 = vadd.f32 %v1561_v54, %v1557_v5  ;;  %v11373_v49 = vld [vmem:[#allocation299_spill] sm:$0xff]  ;;  %v11378_v5 = vld [vmem:[#allocation308_spill] sm:$0xff]  ;;  %v11381_v52 = vld [vmem:[#allocation301_spill] sm:$0xff] }
 0x289   :  { %v1586_v25 = vmul.f32 %v11354_v22, %v1492_v24  ;;  %v1564_v4 = vadd.f32 %v1562_v33, %v1558_v38  ;;  %v1576_v37 = vadd.f32 %v11355_v51, %v1570_v36  ;;  %v1613_v27 = vadd.f32 %v11356_v31, %v1515_v11  ;;  %v11374_v11 = vld [vmem:[#allocation300_spill] sm:$0xff]  ;;  %v11375_v9 = vld [vmem:[#allocation311_spill] sm:$0xff]  ;;  %v11380_v36 = vld [vmem:[#allocation294_spill] sm:$0xff]  ;;  %11456 = sst [smem:[#allocation75_spill]] %s7834_s8 }
 0x28a   :  { %v1581_v26 = vadd.f32 %v11357_v53, %v1575_v47  ;;  %v1614_v6 = vadd.f32 %v11358_v14, %v1516_v1  ;;  %v1637_v23 = vadd.f32 %v11359_v43, %v1539_v35  ;;  %v1638_v18 = vadd.f32 %v11360_v58, %v1540_v40  ;;  %v11377_v35 = vld [vmem:[#allocation307_spill] sm:$0xff]  ;;  %v11379_v38 = vld [vmem:[#allocation312_spill] sm:$0xff]  ;;  %v11382_v28 = vld [vmem:[#allocation302_spill] sm:$0xff] }
 0x28b   :  { %v1582_v55 = vadd.f32 %v11361_v17, %v1576_v37  ;;  %v1619_v24 = vadd.f32 %v11362_v10, %v1613_v27  ;;  %v1661_v61 = vadd.f32 %v11363_v12, %v1563_v34  ;;  %v1662_v13 = vadd.f32 %v11364_v57, %v1564_v4  ;;  %v11383_v22 = vld [vmem:[#allocation313_spill] sm:$0xff]  ;;  %v11387_v27 = vld [vmem:[#allocation314_spill] sm:$0xff]  ;;  %v11389_v43 = vld [vmem:[#allocation315_spill] sm:$0xff] }
 0x28c   :  { %v1587_v56 = vadd.f32 %v1585_v20, %v1581_v26  ;;  %v1620_v39 = vadd.f32 %v11365_v2, %v1614_v6  ;;  %v1643_v41 = vadd.f32 %v11366_v21, %v1637_v23  ;;  %v1644_v62 = vadd.f32 %v11367_v45, %v1638_v18  ;;  %v11384_v34 = vld [vmem:[#allocation205_spill] sm:$0xff]  ;;  %v11388_v14 = vld [vmem:[#allocation310_spill] sm:$0xff]  ;;  %v11390_v58 = vld [vmem:[#allocation200_spill] sm:$0xff] }
 0x28d   :  { %v1588_v44 = vadd.f32 %v1586_v25, %v1582_v55  ;;  %v1625_v54 = vadd.f32 %v11368_v63, %v1619_v24  ;;  %v1667_v46 = vadd.f32 %v11369_v0, %v1661_v61  ;;  %v1668_v16 = vadd.f32 %v11370_v8, %v1662_v13  ;;  %v11386_v37 = vld [vmem:[#allocation309_spill] sm:$0xff]  ;;  %v11391_v17 = vld [vmem:[#allocation322_spill] sm:$0xff]  ;;  %v11392_v10 = vld [vmem:[#allocation316_spill] sm:$0xff] }
 0x28e   :  { %v1626_v3 = vadd.f32 %v11372_v60, %v1620_v39  ;;  %v1649_v33 = vadd.f32 %v11373_v49, %v1643_v41  ;;  %v1650_v1 = vadd.f32 %v11374_v11, %v1644_v62  ;;  %v1685_v30 = vadd.f32 %v11375_v9, %v1587_v56  ;;  %v11393_v12 = vld [vmem:[#allocation207_spill] sm:$0xff]  ;;  %v11394_v57 = vld [vmem:[#allocation208_spill] sm:$0xff]  ;;  %v11396_v39 = vld [vmem:[#allocation317_spill] sm:$0xff] }
 0x28f   :  { %v1631_v29 = vadd.f32 %v11376_v50, %v1625_v54  ;;  %v1673_v48 = vadd.f32 %v11377_v35, %v1667_v46  ;;  %v1674_v19 = vadd.f32 %v11378_v5, %v1668_v16  ;;  %v1686_v59 = vadd.f32 %v11379_v38, %v1588_v44  ;;  %v11395_v56 = vld [vmem:[#allocation195_spill] sm:$0xff]  ;;  %v11397_v41 = vld [vmem:[#allocation169_spill] sm:$0xff]  ;;  %v11401_v8 = vld [vmem:[#allocation196_spill] sm:$0xff] }
 0x290   :  { %v1632_v40 = vadd.f32 %v11380_v36, %v1626_v3  ;;  %v1655_v47 = vadd.f32 %v11381_v52, %v1649_v33  ;;  %v1656_v20 = vadd.f32 %v11382_v28, %v1650_v1  ;;  %v1691_v25 = vadd.f32 %v11383_v22, %v1685_v30  ;;  %v11398_v62 = vld [vmem:[#allocation323_spill] sm:$0xff]  ;;  %v11400_v0 = vld [vmem:[#allocation318_spill] sm:$0xff]  ;;  %v11403_v33 = vld [vmem:[#allocation173_spill] sm:$0xff] }
 0x291   :  { %v11385_v4 = vstv %s11371_s5  ;;  %v1679_v31 = vadd.f32 %v11386_v37, %v1673_v48  ;;  %v1692_v53 = vadd.f32 %v11387_v27, %v1686_v59  ;;  %v1884_v26 = vstv %s7502_s4  ;;  %v11399_v63 = vld [vmem:[#allocation319_spill] sm:$0xff]  ;;  %v11402_v3 = vld [vmem:[#allocation175_spill] sm:$0xff]  ;;  %v11404_v1 = vld [vmem:[#allocation324_spill] sm:$0xff]  ;;  %s7838_s4 = sld [smem:[#allocation10 + $0x4e]] }
 0x292   :  { %v7537_v51 = vmul.f32 %v11385_v4, %v11384_v34  ;;  %v1680_v6 = vadd.f32 %v11388_v14, %v1674_v19  ;;  %v1697_v23 = vadd.f32 %v11389_v43, %v1691_v25  ;;  %v1753_v18 = vadd.f32 %v11390_v58, %v1655_v47  ;;  %v11405_v30 = vld [vmem:[#allocation320_spill] sm:$0xff]  ;;  %v11406_v35 = vld [vmem:[#allocation198_spill] sm:$0xff]  ;;  %v11408_v59 = vld [vmem:[#allocation171_spill] sm:$0xff] }
 0x293   :  { %v1754_v55 = vadd.f32 %v11391_v17, %v1656_v20  ;;  %v1698_v24 = vadd.f32 %v11392_v10, %v1692_v53  ;;  %v1885_v61 = vmul.f32 %v1884_v26, %v11393_v12  ;;  %v1886_v13 = vmul.f32 %v1884_v26, %v11394_v57  ;;  %v11407_v19 = vld [vmem:[#allocation326_spill] sm:$0xff]  ;;  %v11410_v47 = vld [vmem:[#allocation325_spill] sm:$0xff]  ;;  %v11412_v34 = vld [vmem:[#allocation199_spill] sm:$0xff] }
 0x294   :  { %v1729_v2 = vadd.f32 %v11395_v56, %v1631_v29  ;;  %v1703_v21 = vadd.f32 %v11396_v39, %v1697_v23  ;;  %v1759_v45 = vadd.f32 %v11397_v41, %v1753_v18  ;;  %v1730_v54 = vadd.f32 %v11399_v63, %v1632_v40  ;;  %v11409_v40 = vld [vmem:[#allocation172_spill] sm:$0xff]  ;;  %v11411_v20 = vld [vmem:[#allocation321_spill] sm:$0xff]  ;;  %v11413_v37 = vld [vmem:[#allocation327_spill] sm:$0xff] }
 0x295   :  { %v1760_v44 = vadd.f32 %v11398_v62, %v1754_v55  ;;  %v1704_v46 = vadd.f32 %v11400_v0, %v1698_v24  ;;  %v1860_v60 = vstv %s7518_s12  ;;  %v1777_v49 = vadd.f32 %v11402_v3, %v1679_v31  ;;  %v11414_v27 = vld [vmem:[#allocation176_spill] sm:$0xff]  ;;  %v11415_v14 = vld [vmem:[#allocation340_spill] sm:$0xff]  ;;  %v11417_v58 = vld [vmem:[#allocation194_spill] sm:$0xff]  ;;  %s11459_s12 = smov 15  }
 0x296   :  { %v1735_v16 = vadd.f32 %v11401_v8, %v1729_v2  ;;  %v1765_v11 = vadd.f32 %v11403_v33, %v1759_v45  ;;  %v1736_v50 = vadd.f32 %v11405_v30, %v1730_v54  ;;  %v1861_v29 = vmul.f32 %v1860_v60, %v11393_v12  ;;  %v11418_v55 = vld [vmem:[#allocation334_spill] sm:$0xff]  ;;  %v11419_v24 = vld [vmem:[#allocation328_spill] sm:$0xff]  ;;  %v11420_v2 = vld [vmem:[#allocation180_spill] sm:$0xff] }
 0x297   :  { %v1766_v9 = vadd.f32 %v11404_v1, %v1760_v44  ;;  %vm1939_vm9 = vcmask 1041408   ;;  %v1862_v5 = vmul.f32 %v1860_v60, %v11394_v57  ;;  %v1778_v38 = vadd.f32 %v11407_v19, %v1680_v6  ;;  %v11416_v6 = vld [vmem:[#allocation341_spill] sm:$0xff]  ;;  %v11422_v62 = vld [vmem:[#allocation342_spill] sm:$0xff]  ;;  %v11423_v63 = vld [vmem:[#allocation343_spill] sm:$0xff]  ;;  %11457 = sst [smem:[#allocation83_spill]] %s7838_s4 }
 0x298   :  { %v1741_v48 = vadd.f32 %v11406_v35, %v1735_v16  ;;  %v1783_v36 = vadd.f32 %v11408_v59, %v1777_v49  ;;  %v1771_v52 = vadd.f32 %v11409_v40, %v1765_v11  ;;  %v1742_v22 = vadd.f32 %v11411_v20, %v1736_v50  ;;  %v11421_v41 = vld [vmem:[#allocation201_spill] sm:$0xff]  ;;  %v11424_v0 = vld [vmem:[#allocation335_spill] sm:$0xff]  ;;  %v11425_v16 = vld [vmem:[#allocation330_spill] sm:$0xff] }
 0x299   :  { %v1772_v28 = vadd.f32 %v11410_v47, %v1766_v9  ;;  %v1908_v25 = vstv %s7532_s13  ;;  %v1784_v31 = vadd.f32 %v11413_v37, %v1778_v38  ;;  %v1801_v45 = vadd.f32 %v11421_v41, %v1703_v21  ;;  %v11426_v3 = vld [vmem:[#allocation336_spill] sm:$0xff]  ;;  %v11427_v33 = vld [vmem:[#allocation329_spill] sm:$0xff]  ;;  %v11428_v1 = vld [vmem:[#allocation346_spill] sm:$0xff]  ;;  %s7844_s13 = sld [smem:[#allocation10]] }
 0x29a   :  { %v1747_v4 = vadd.f32 %v11412_v34, %v1741_v48  ;;  %v1789_v53 = vadd.f32 %v11414_v27, %v1783_v36  ;;  %v1909_v26 = vmul.f32 %v1908_v25, %v11393_v12  ;;  %v1869_v43 = vadd.f32 %v11415_v14, %v1771_v52  ;;  %v11429_v30 = vld [vmem:[#allocation202_spill] sm:$0xff]  ;;  %v11430_v35 = vld [vmem:[#allocation344_spill] sm:$0xff]  ;;  %v11431_v19 = vld [vmem:[#allocation345_spill] sm:$0xff] }
 0x29b   :  { %v1870_v23 = vadd.f32 %v11416_v6, %v1772_v28  ;;  %v1748_v18 = vadd.f32 %v11417_v58, %v1742_v22  ;;  %v1910_v17 = vmul.f32 %v1908_v25, %v11394_v57  ;;  %v1790_v56 = vadd.f32 %v11419_v24, %v1784_v31  ;;  %v11432_v38 = vld [vmem:[#allocation337_spill] sm:$0xff]  ;;  %v11433_v36 = vld [vmem:[#allocation331_spill] sm:$0xff]  ;;  %v11434_v52 = vld [vmem:[#allocation338_spill] sm:$0xff] }
 0x29c   :  { %v1845_v10 = vadd.f32 %v11418_v55, %v1747_v4  ;;  %v1795_v39 = vadd.f32 %v11420_v2, %v1789_v53  ;;  %v1875_v44 = vadd.f32 %v11422_v62, %v1869_v43  ;;  %v1802_v60 = vadd.f32 %v11425_v16, %v1704_v46  ;;  %v11435_v47 = vld [vmem:[#allocation347_spill] sm:$0xff]  ;;  %v11436_v20 = vld [vmem:[#allocation348_spill] sm:$0xff]  ;;  %v11440_v6 = vld [vmem:[#allocation349_spill] sm:$0xff] }
 0x29d   :  { %v1876_v54 = vadd.f32 %v11423_v63, %v1870_v23  ;;  %v1846_v8 = vadd.f32 %v11424_v0, %v1748_v18  ;;  %v1796_v11 = vadd.f32 %v11427_v33, %v1790_v56  ;;  %v1807_v50 = vadd.f32 %v11429_v30, %v1801_v45  ;;  %v11437_v25 = vld [vmem:[#allocation203_spill] sm:$0xff]  ;;  %v11439_v53 = vld [vmem:[#allocation332_spill] sm:$0xff]  ;;  %v11441_v58 = vld [vmem:[#allocation350_spill] sm:$0xff] }
 0x29e   :  { %v1851_v49 = vadd.f32 %v11426_v3, %v1845_v10  ;;  %v1893_v9 = vadd.f32 %v11428_v1, %v1795_v39  ;;  %v1881_v48 = vadd.f32 %v11430_v35, %v1875_v44  ;;  %v1808_v40 = vadd.f32 %v11433_v36, %v1802_v60  ;;  %v11438_v31 = vld [vmem:[#allocation339_spill] sm:$0xff]  ;;  %v11442_v55 = vld [vmem:[#allocation204_spill] sm:$0xff]  ;;  %v11443_v56 = vld [vmem:[#allocation333_spill] sm:$0xff] }
 0x29f   :  { %v1882_v21 = vadd.f32 %v11431_v19, %v1876_v54  ;;  %v1852_v59 = vadd.f32 %v11432_v38, %v1846_v8  ;;  %v1894_v28 = vadd.f32 %v11435_v47, %v1796_v11  ;;  %v1813_v34 = vadd.f32 %v11437_v25, %v1807_v50  ;;  %v11444_v41 = vld [vmem:[#allocation351_spill] sm:$0xff]  ;;  %v11445_v54 = vld [vmem:[#allocation352_spill] sm:$0xff]  ;;  %v11447_v11 = vld [vmem:[#allocation354_spill] sm:$0xff]  ;;  %11460 = sst [smem:[#allocation68_spill]] %s7844_s13 }
 0x2a0   :  { %v1857_v46 = vadd.f32 %v11434_v52, %v1851_v49  ;;  %v1899_v22 = vadd.f32 %v11436_v20, %v1893_v9  ;;  %v7600_v4 = vadd.f32 %v1885_v61, %v1881_v48  ;;  %v1814_v14 = vadd.f32 %v11439_v53, %v1808_v40  ;;  %v11448_v30 = vld [vmem:[#allocation206_spill] sm:$0xff]  ;;  %v11450_v19 = vld [vmem:[#allocation355_spill] sm:$0xff] }
 0x2a1   :  { %v7602_v37 = vadd.f32 %v1886_v13, %v1882_v21  ;;  %v1858_v27 = vadd.f32 %v11438_v31, %v1852_v59  ;;  %v1900_v23 = vadd.f32 %v11440_v6, %v1894_v28  ;;  %v1819_v10 = vadd.f32 %v11442_v55, %v1813_v34 }
 0x2a2   :  { %v7606_v43 = vadd.f32 %v1861_v29, %v1857_v46  ;;  %v1905_v18 = vadd.f32 %v11441_v58, %v1899_v22  ;;  %v1986_v24 = vsel %vm1939_vm9, %v7600_v4, 0.0  ;;  %v1820_v2 = vadd.f32 %v11443_v56, %v1814_v14 }
 0x2a3   :  { %v1987_v61 = vsel %vm1939_vm9, %v7602_v37, 0.0  ;;  %v7615_v13 = vadd.f32 %v1862_v5, %v1858_v27  ;;  %v1906_v45 = vadd.f32 %v11444_v41, %v1900_v23  ;;  %v1917_v0 = vadd.f32 %v11445_v54, %v1819_v10 }
 0x2a4   :  { %v1988_v39 = vadd.f32 %v1987_v61, %v1986_v24  ;;  %v1940_v29 = vsel %vm1939_vm9, %v7606_v43, 0.0  ;;  %v7621_v62 = vadd.f32 %v1909_v26, %v1905_v18  ;;  %v1952_v63 = vmul.f32 %v7606_v43, %v7606_v43  ;;  %v11446_v26 = vld [vmem:[#allocation353_spill] sm:$0xff] }
 0x2a5   :  { %v1941_v44 = vsel %vm1939_vm9, %v7615_v13, 0.0  ;;  %v1953_v5 = vmul.f32 %v7615_v13, %v7615_v13  ;;  %v7630_v16 = vadd.f32 %v1910_v17, %v1906_v45  ;;  %v1918_v3 = vadd.f32 %v11446_v26, %v1820_v2 }
 0x2a6   :  { %1989 = vadd.xlane.f32.xlu1 %v1988_v39  ;;  %v1942_v8 = vadd.f32 %v1941_v44, %v1940_v29  ;;  %v2032_v60 = vsel %vm1939_vm9, %v7621_v62, 0.0  ;;  %v1954_v49 = vsel %vm1939_vm9, %v1952_v63, 0.0  ;;  %v1923_v1 = vadd.f32 %v11447_v11, %v1917_v0 }
 0x2a7   :  { %v1955_v33 = vsel %vm1939_vm9, %v1953_v5, 0.0  ;;  %v1932_v9 = vstv %s7594_s6  ;;  %v11449_v50 = vstv %s11371_s5  ;;  %v2033_v17 = vsel %vm1939_vm9, %v7630_v16, 0.0  ;;  %s7840_s5 = sld [smem:[#allocation10 + $0x4f]]  ;;  %s7846_s6 = sld [smem:[#allocation10 + $0x1]] }
 0x2a8   :  { %v1928_v35 = vmul.f32 %v11449_v50, %v11448_v30  ;;  %1943 = vadd.xlane.f32.xlu0 %v1942_v8  ;;  %v1956_v48 = vadd.f32 %v1955_v33, %v1954_v49  ;;  %v1924_v21 = vadd.f32 %v11450_v19, %v1918_v3  ;;  %v2034_v38 = vadd.f32 %v2033_v17, %v2032_v60 }
 0x2a9   :  { %v1929_v59 = vadd.f32 %v7537_v51, %v1923_v1  ;;  %v1933_v36 = vmul.f32 %v1932_v9, %v11393_v12  ;;  %v1998_v40 = vmul.f32 %v7600_v4, %v7600_v4  ;;  %v1934_v46 = vmul.f32 %v1932_v9, %v11394_v57 }
 0x2aa   :  { %v1930_v52 = vadd.f32 %v1928_v35, %v1924_v21  ;;  %v1999_v47 = vmul.f32 %v7602_v37, %v7602_v37  ;;  %v2044_v28 = vmul.f32 %v7621_v62, %v7621_v62  ;;  %2035 = vadd.xlane.f32.xlu1 %v2034_v38  ;;  %v2045_v51 = vmul.f32 %v7630_v16, %v7630_v16 }
 0x2ab   :  { %v7654_v20 = vadd.f32 %v1933_v36, %v1929_v59  ;;  %v2000_v22 = vsel %vm1939_vm9, %v1998_v40, 0.0 }
 0x2ac   :  { %1957 = vadd.xlane.f32.xlu0 %v1956_v48  ;;  %v7659_v12 = vadd.f32 %v1934_v46, %v1930_v52  ;;  %v2001_v25 = vsel %vm1939_vm9, %v1999_v47, 0.0  ;;  %v2046_v27 = vsel %vm1939_vm9, %v2044_v28, 0.0  ;;  %v2047_v14 = vsel %vm1939_vm9, %v2045_v51, 0.0 }
 0x2ad   :  { %v2078_v57 = vsel %vm1939_vm9, %v7654_v20, 0.0  ;;  %v2002_v31 = vadd.f32 %v2001_v25, %v2000_v22  ;;  %v2090_v6 = vmul.f32 %v7654_v20, %v7654_v20  ;;  %v2048_v58 = vadd.f32 %v2047_v14, %v2046_v27  ;;  %11458 = sst [smem:[#allocation91_spill]] %s7840_s5 }
 0x2ae   :  { %v2079_v34 = vsel %vm1939_vm9, %v7659_v12, 0.0  ;;  %v2091_v23 = vmul.f32 %v7659_v12, %v7659_v12  ;;  %11461 = sst [smem:[#allocation76_spill]] %s7846_s6 }
 0x2af   :  { %v2080_v53 = vadd.f32 %v2079_v34, %v2078_v57  ;;  %v2092_v18 = vsel %vm1939_vm9, %v2090_v6, 0.0 }
 0x2b0   :  { %2003 = vadd.xlane.f32.xlu0 %v2002_v31  ;;  %v2093_v55 = vsel %vm1939_vm9, %v2091_v23, 0.0 }
 0x2b1   :  { %2081 = vadd.xlane.f32.xlu1 %v2080_v53  ;;  %v2094_v10 = vadd.f32 %v2093_v55, %v2092_v18 }
 0x2b4   :  { %2049 = vadd.xlane.f32.xlu0 %v2048_v58 }
 0x2b8   :  { %2095 = vadd.xlane.f32.xlu0 %v2094_v10 }
 0x333   :  { %v1990_v24 = vpop.xlane.xlu1 %1989 }
 0x334   :  { %v1991_v61 = vsel %vm1939_vm9, %v1990_v24, 0.0 }
 0x335   :  { %v1992_v56 = vrot.slane %v1991_v61, 4  ;;  %v1944_v2 = vpop.xlane.xlu0 %1943 }
 0x336   :  { %v1945_v39 = vsel %vm1939_vm9, %v1944_v2, 0.0 }
 0x337   :  { %v1993_v29 = vadd.f32 %v1992_v56, %v1991_v61  ;;  %v1946_v41 = vrot.slane %v1945_v39, 4  ;;  %v2036_v45 = vpop.xlane.xlu1 %2035 }
 0x338   :  { %v2037_v5 = vsel %vm1939_vm9, %v2036_v45, 0.0 }
 0x339   :  { %v1994_v44 = vrot.slane %v1993_v29, 2  ;;  %v1947_v63 = vadd.f32 %v1946_v41, %v1945_v39  ;;  %v1958_v54 = vpop.xlane.xlu0 %1957  ;;  %v2038_v0 = vrot.slane %v2037_v5, 4 }
 0x33a   :  { %v1959_v8 = vsel %vm1939_vm9, %v1958_v54, 0.0 }
 0x33b   :  { %v1948_v60 = vrot.slane %v1947_v63, 2  ;;  %v1960_v26 = vrot.slane %v1959_v8, 4  ;;  %v2039_v3 = vadd.f32 %v2038_v0, %v2037_v5  ;;  %v1995_v49 = vadd.f32 %v1994_v44, %v1993_v29 }
 0x33d   :  { %v1949_v33 = vadd.f32 %v1948_v60, %v1947_v63  ;;  %v1961_v11 = vadd.f32 %v1960_v26, %v1959_v8  ;;  %v2004_v1 = vpop.xlane.xlu0 %2003  ;;  %v2040_v9 = vrot.slane %v2039_v3, 2  ;;  %v1996_v38 = vrot.slane %v1995_v49, 1 }
 0x33e   :  { %v2082_v30 = vpop.xlane.xlu1 %2081  ;;  %v2005_v50 = vsel %vm1939_vm9, %v2004_v1, 0.0 }
 0x33f   :  { %v1950_v35 = vrot.slane %v1949_v33, 1  ;;  %v1962_v17 = vrot.slane %v1961_v11, 2  ;;  %v2083_v48 = vsel %vm1939_vm9, %v2082_v30, 0.0  ;;  %v2006_v21 = vrot.slane %v2005_v50, 4 }
 0x340   :  { %v2084_v19 = vrot.slane %v2083_v48, 4  ;;  %v2041_v52 = vadd.f32 %v2040_v9, %v2039_v3  ;;  %v1997_v34 = vadd.f32 %v1996_v38, %v1995_v49  ;;  %v1972_v9 = vstv %s7684_s17  ;;  %s7848_s17 = sld [smem:[#allocation10 + $0x2]] }
 0x341   :  { %v1951_v59 = vadd.f32 %v1950_v35, %v1949_v33  ;;  %v1963_v36 = vadd.f32 %v1962_v17, %v1961_v11  ;;  %v2050_v40 = vpop.xlane.xlu0 %2049  ;;  %v2007_v47 = vadd.f32 %v2006_v21, %v2005_v50 }
 0x342   :  { %v2085_v46 = vadd.f32 %v2084_v19, %v2083_v48  ;;  %v2051_v57 = vsel %vm1939_vm9, %v2050_v40, 0.0  ;;  %v2042_v31 = vrot.slane %v2041_v52, 1  ;;  %v7681_v55 = vmul.f32 0.001953125, %v1997_v34 }
 0x343   :  { %v1964_v28 = vrot.slane %v1963_v36, 1  ;;  %v1966_v22 = vmul.f32 0.001953125, %v1951_v59  ;;  %v2008_v25 = vrot.slane %v2007_v47, 2  ;;  %v2052_v23 = vrot.slane %v2051_v57, 4 }
 0x344   :  { %v2086_v51 = vrot.slane %v2085_v46, 2  ;;  %v2043_v56 = vadd.f32 %v2042_v31, %v2041_v52  ;;  %v2014_v63 = vmul.f32 %v7681_v55, %v7681_v55 }
 0x345   :  { %v1965_v27 = vadd.f32 %v1964_v28, %v1963_v36  ;;  %v2096_v53 = vpop.xlane.xlu0 %2095  ;;  %v2009_v6 = vadd.f32 %v2008_v25, %v2007_v47  ;;  %v1968_v58 = vmul.f32 %v1966_v22, %v1966_v22  ;;  %v2053_v24 = vadd.f32 %v2052_v23, %v2051_v57 }
 0x346   :  { %v2087_v14 = vadd.f32 %v2086_v51, %v2085_v46  ;;  %v2097_v61 = vsel %vm1939_vm9, %v2096_v53, 0.0  ;;  %v7688_v8 = vmul.f32 0.001953125, %v2043_v56  ;;  %v1970_v30 = vsub.f32 %v7606_v43, %v1966_v22  ;;  %11462 = sst [smem:[#allocation84_spill]] %s7848_s17 }
 0x347   :  { %v1967_v18 = vmul.f32 0.001953125, %v1965_v27  ;;  %v2010_v10 = vrot.slane %v2009_v6, 1  ;;  %v2054_v41 = vrot.slane %v2053_v24, 2  ;;  %v2098_v45 = vrot.slane %v2097_v61, 4 }
 0x348   :  { %v2088_v39 = vrot.slane %v2087_v14, 1  ;;  %v1971_v50 = vsub.f32 %v7615_v13, %v1966_v22  ;;  %v2060_v35 = vmul.f32 %v7688_v8, %v7688_v8  ;;  %v1973_v59 = vmul.f32 %v1972_v9, %v1970_v30 }
 0x349   :  { %v1969_v2 = vsub.f32 %v1967_v18, %v1968_v58  ;;  %v2011_v29 = vadd.f32 %v2010_v10, %v2009_v6  ;;  %v2055_v54 = vadd.f32 %v2054_v41, %v2053_v24  ;;  %v2099_v0 = vadd.f32 %v2098_v45, %v2097_v61 }
 0x34a   :  { %v2089_v60 = vadd.f32 %v2088_v39, %v2087_v14  ;;  %v1974_v36 = vmul.f32 %v1972_v9, %v1971_v50  ;;  %v2018_v46 = vstv %s7690_s24  ;;  %v2016_v47 = vsub.f32 %v7600_v4, %v7681_v55  ;;  %s7850_s24 = sld [smem:[#allocation10 + $0x3]] }
 0x34b   :  { %v1975_v44 = vadd.f32 1e-05, %v1969_v2  ;;  %v2013_v5 = vmul.f32 0.001953125, %v2011_v29  ;;  %v2056_v3 = vrot.slane %v2055_v54, 1  ;;  %v2100_v49 = vrot.slane %v2099_v0, 2 }
 0x34c   :  { %v7699_v17 = vmul.f32 0.001953125, %v2089_v60  ;;  %v1979_v28 = vstv %s7692_s30  ;;  %v2017_v57 = vsub.f32 %v7602_v37, %v7681_v55  ;;  %v2019_v53 = vmul.f32 %v2018_v46, %v2016_v47  ;;  %s7852_s30 = sld [smem:[#allocation10 + $0x80]] }
 0x34d   :  { %3964 = vrsqrt.f32 %v1975_v44  ;;  %v2015_v26 = vsub.f32 %v2013_v5, %v2014_v63  ;;  %v2057_v11 = vadd.f32 %v2056_v3, %v2055_v54  ;;  %v2101_v1 = vadd.f32 %v2100_v49, %v2099_v0 }
 0x34e   :  { %v2106_v13 = vmul.f32 %v7699_v17, %v7699_v17  ;;  %v2025_v23 = vstv %s7701_s11  ;;  %v2062_v58 = vsub.f32 %v7621_v62, %v7688_v8  ;;  %v2020_v18 = vmul.f32 %v2018_v46, %v2017_v57  ;;  %s7854_s11 = sld [smem:[#allocation10 + $0x81]] }
 0x34f   :  { %v2021_v33 = vadd.f32 1e-05, %v2015_v26  ;;  %v2059_v48 = vmul.f32 0.001953125, %v2057_v11  ;;  %v2102_v19 = vrot.slane %v2101_v1, 1  ;;  %v2064_v55 = vstv %s7703_s15  ;;  %s7858_s15 = sld [smem:[#allocation10 + $0x82]] }
 0x350   :  { %v2065_v61 = vmul.f32 %v2064_v55, %v2062_v58  ;;  %v2063_v39 = vsub.f32 %v7630_v16, %v7688_v8  ;;  %v2071_v62 = vstv %s7713_s29  ;;  %v2108_v29 = vsub.f32 %v7654_v20, %v7699_v17  ;;  %11463 = sst [smem:[#allocation92_spill]] %s7850_s24  ;;  %s7860_s29 = sld [smem:[#allocation10 + $0x83]] }
 0x351   :  { %3966 = vrsqrt.f32 %v2021_v33  ;;  %v2061_v21 = vsub.f32 %v2059_v48, %v2060_v35  ;;  %v2103_v38 = vadd.f32 %v2102_v19, %v2101_v1  ;;  %v2110_v45 = vstv %s7719_s18  ;;  %s11468_s18 = smov 113  }
 0x352   :  { %v2066_v54 = vmul.f32 %v2064_v55, %v2063_v39  ;;  %v2111_v16 = vmul.f32 %v2110_v45, %v2108_v29  ;;  %v2109_v26 = vsub.f32 %v7659_v12, %v7699_v17  ;;  %v2117_v3 = vstv %s7734_s19  ;;  %11464 = sst [smem:[#allocation69_spill]] %s7852_s30  ;;  %s7866_s19 = sld [smem:[#allocation10 + $0x5]] }
 0x353   :  { %v2067_v43 = vadd.f32 1e-05, %v2061_v21  ;;  %v2105_v40 = vmul.f32 0.001953125, %v2103_v38  ;;  %s7872_s30 = sld [smem:[#allocation10 + $0x84]]  ;;  %v2763_v35 = vstv %s7804_s21  ;;  %v2787_v17 = vstv %s7806_s23  ;;  %s7971_s21 = sld [smem:[#allocation10 + $0x18]] }
 0x354   :  { %v2112_v11 = vmul.f32 %v2110_v45, %v2109_v26  ;;  %11465 = sst [smem:[#allocation77_spill]] %s7854_s11  ;;  %s7874_s11 = sld [smem:[#allocation10 + $0x85]]  ;;  %v2811_v48 = vstv %s7808_s1  ;;  %v2835_v19 = vstv %s7810_s14  ;;  %v2769_v21 = vstv %s7812_s22 }
 0x355   :  { %3968 = vrsqrt.f32 %v2067_v43  ;;  %v2107_v25 = vsub.f32 %v2105_v40, %v2106_v13  ;;  %11466 = sst [smem:[#allocation85_spill]] %s7858_s15  ;;  %v2793_v38 = vstv %s7814_s27  ;;  %s7973_s23 = sld [smem:[#allocation10 + $0x19]]  ;;  %v2799_v43 = vstv %s7826_s7 }
 0x356   :  { %11467 = sst [smem:[#allocation93_spill]] %s7860_s29  ;;  %s7880_s29 = sld [smem:[#allocation10 + $0x87]]  ;;  %v2841_v13 = vstv %s7820_s26  ;;  %v2781_v40 = vstv %s7832_s3  ;;  %v2823_v46 = vstv %s7828_s16  ;;  %v2847_v47 = vstv %s7830_s0 }
 0x357   :  { %v3965_v52 = vpop.eup %3964  ;;  %v2113_v27 = vadd.f32 1e-05, %v2107_v25  ;;  %s11511_s1 = sld [smem:[#allocation69_spill]]  ;;  %s7978_s14 = sld [smem:[#allocation10 + $0x1a]]  ;;  %v2853_v25 = vstv %s7840_s5  ;;  %v2379_v57 = vstv %s7848_s17 }
 0x358   :  { %v1977_v22 = vmul.f32 %v3965_v52, %v1973_v59  ;;  %v1978_v51 = vmul.f32 %v3965_v52, %v1974_v36  ;;  %11470 = sst [smem:[#allocation78_spill]] %s7866_s19  ;;  %s7886_s19 = sld [smem:[#allocation10 + $0x9]]  ;;  %v2817_v59 = vstv %s7818_s20  ;;  %v2775_v36 = vstv %s7824_s9 }
 0x359   :  { %3970 = vrsqrt.f32 %v2113_v27  ;;  %11473 = sst [smem:[#allocation79_spill]] %s7872_s30  ;;  %s7980_s22 = sld [smem:[#allocation10 + $0x1b]]  ;;  %v2805_v52 = vstv %s7834_s8 }
 0x35a   :  { %v1980_v34 = vadd.f32 %v1979_v28, %v1977_v22  ;;  %v1981_v31 = vadd.f32 %v1979_v28, %v1978_v51  ;;  %11474 = sst [smem:[#allocation87_spill]] %s7874_s11  ;;  %s7894_s11 = sld [smem:[#allocation10 + $0x89]]  ;;  %v2331_v28 = vstv %s7844_s13  ;;  %v2355_v22 = vstv %s7846_s6 }
 0x35b   :  { %v3967_v14 = vpop.eup %3966  ;;  %s7892_s30 = sld [smem:[#allocation10 + $0x88]]  ;;  %11509 = sst [smem:[#allocation118_spill]] %s7971_s21  ;;  %v2829_v51 = vstv %s7838_s4 }
 0x35c   :  { %v7715_v6 = vmax.f32 %v1980_v34, 0.0  ;;  %v7717_v4 = vmax.f32 %v1981_v31, 0.0  ;;  %v2023_v37 = vmul.f32 %v3967_v14, %v2019_v53  ;;  %v2024_v24 = vmul.f32 %v3967_v14, %v2020_v18  ;;  %11476 = sst [smem:[#allocation80_spill]] %s7880_s29  ;;  %s7900_s29 = sld [smem:[#allocation10 + $0x8b]] }
 0x35d   :  { %11510 = sst [smem:[#allocation126_spill]] %s7973_s23  ;;  %s7988_s23 = sld [smem:[#allocation10 + $0x78]]  ;;  %v2403_v34 = vstv %s7850_s24  ;;  %v3211_v31 = vstv %s11511_s1 }
 0x35e   :  { %2124 = vrot.lane.b32.xlu0 %v7717_v4, %s11451_s25  ;;  %2122 = vrot.lane.b32.xlu1 %v7715_v6, %s11451_s25  ;;  %v2026_v10 = vadd.f32 %v2025_v23, %v2023_v37  ;;  %v2027_v44 = vadd.f32 %v2025_v23, %v2024_v24  ;;  %11478 = sst [smem:[#allocation39_spill]] %s7886_s19  ;;  %s7906_s19 = sld [smem:[#allocation10 + $0xd]]  ;;  %v8004_v27 = vmul.f32 %v2763_v35, %v7715_v6 }
 0x35f   :  { %v3969_v2 = vpop.eup %3968  ;;  %11512 = sst [smem:[#allocation131_spill]] %s7978_s14  ;;  %s7990_s21 = sld [smem:[#allocation10 + $0x79]]  ;;  %v8016_v58 = vmul.f32 %v2763_v35, %v7717_v4  ;;  %v8023_v37 = vmul.f32 %v2787_v17, %v7715_v6  ;;  %v8026_v18 = vmul.f32 %v2787_v17, %v7717_v4  ;;  %v8029_v55 = vmul.f32 %v2811_v48, %v7715_v6 }
 0x360   :  { %v7729_v56 = vmax.f32 %v2026_v10, 0.0  ;;  %v2069_v41 = vmul.f32 %v3969_v2, %v2065_v61  ;;  %v7747_v0 = vmax.f32 %v2027_v44, 0.0  ;;  %v2070_v20 = vmul.f32 %v3969_v2, %v2066_v54  ;;  %11482 = sst [smem:[#allocation40_spill]] %s7894_s11  ;;  %s7914_s11 = sld [smem:[#allocation10 + $0x8d]] }
 0x361   :  { %11481 = sst [smem:[#allocation63_spill]] %s7892_s30  ;;  %s7912_s30 = sld [smem:[#allocation10 + $0x8c]]  ;;  %v8032_v10 = vmul.f32 %v2811_v48, %v7717_v4  ;;  %v8045_v2 = vmul.f32 %v2835_v19, %v7715_v6  ;;  %v8048_v39 = vmul.f32 %v2835_v19, %v7717_v4 }
 0x362   :  { %2164 = vrot.lane.b32.xlu1 %v7715_v6, %s11452_s28  ;;  %2170 = vrot.lane.b32.xlu0 %v7729_v56, %s11451_s25  ;;  %v2072_v63 = vadd.f32 %v2071_v62, %v2069_v41  ;;  %v2073_v49 = vadd.f32 %v2071_v62, %v2070_v20  ;;  %11484 = sst [smem:[#allocation56_spill]] %s7900_s29  ;;  %s7920_s29 = sld [smem:[#allocation10 + $0x8f]]  ;;  %v8039_v24 = vmul.f32 %v2769_v21, %v7729_v56 }
 0x363   :  { %v3971_v5 = vpop.eup %3970  ;;  %11513 = sst [smem:[#allocation139_spill]] %s7980_s22  ;;  %s7999_s26 = sld [smem:[#allocation10 + $0x7a]]  ;;  %v8042_v61 = vmul.f32 %v2769_v21, %v7747_v0  ;;  %v8057_v62 = vmul.f32 %v2793_v38, %v7729_v56  ;;  %v8060_v29 = vmul.f32 %v2793_v38, %v7747_v0  ;;  %v8063_v41 = vmul.f32 %v2817_v59, %v7729_v56 }
 0x364   :  { %v7749_v8 = vmax.f32 %v2072_v63, 0.0  ;;  %v2115_v60 = vmul.f32 %v3971_v5, %v2111_v16  ;;  %v7762_v1 = vmax.f32 %v2073_v49, 0.0  ;;  %v2116_v9 = vmul.f32 %v3971_v5, %v2112_v11  ;;  %11486 = sst [smem:[#allocation41_spill]] %s7906_s19  ;;  %s8001_s8 = sld [smem:[#allocation10 + $0x7b]] }
 0x365   :  { %11516 = sst [smem:[#allocation132_spill]] %s7988_s23  ;;  %s8011_s6 = sld [smem:[#allocation10 + $0x1c]]  ;;  %v8066_v45 = vmul.f32 %v2817_v59, %v7747_v0  ;;  %v8077_v5 = vmul.f32 %v2841_v13, %v7729_v56  ;;  %v8080_v54 = vmul.f32 %v2841_v13, %v7747_v0 }
 0x366   :  { %2166 = vrot.lane.b32.xlu1 %v7717_v4, %s11452_s28  ;;  %2212 = vrot.lane.b32.xlu0 %v7729_v56, %s11452_s28  ;;  %v2118_v33 = vadd.f32 %v2117_v3, %v2115_v60  ;;  %v2119_v30 = vadd.f32 %v2117_v3, %v2116_v9  ;;  %11490 = sst [smem:[#allocation42_spill]] %s7914_s11  ;;  %s8013_s13 = sld [smem:[#allocation10 + $0x1d]]  ;;  %v8104_v11 = vmul.f32 %v2775_v36, %v7762_v1 }
 0x367   :  { %11489 = sst [smem:[#allocation65_spill]] %s7912_s30  ;;  %s7930_s11 = sld [smem:[#allocation10 + $0x13]]  ;;  %v8118_v17 = vmul.f32 %v2799_v43, %v7749_v8  ;;  %v8132_v38 = vmul.f32 %v2799_v43, %v7762_v1  ;;  %v8162_v48 = vmul.f32 %v2823_v46, %v7749_v8  ;;  %v8206_v35 = vmul.f32 %v2847_v47, %v7749_v8 }
 0x368   :  { %v7764_v12 = vmax.f32 %v2118_v33, 0.0  ;;  %v7774_v50 = vmax.f32 %v2119_v30, 0.0  ;;  %11492 = sst [smem:[#allocation58_spill]] %s7920_s29  ;;  %s7932_s30 = sld [smem:[#allocation10 + $0x70]]  ;;  %v8099_v33 = vmul.f32 %v2775_v36, %v7749_v8  ;;  %11551 = vst [vmem:[#allocation220_spill] sm:$0xff] %v8104_v11  ;;  %v8176_v36 = vmul.f32 %v2823_v46, %v7762_v1 }
 0x369   :  { %s7938_s29 = sld [smem:[#allocation10 + $0x72]]  ;;  %11517 = sst [smem:[#allocation140_spill]] %s7990_s21  ;;  %11558 = vst [vmem:[#allocation221_spill] sm:$0xff] %v8118_v17  ;;  %11566 = vst [vmem:[#allocation212_spill] sm:$0xff] %v8132_v38  ;;  %v8220_v13 = vmul.f32 %v2847_v47, %v7762_v1 }
 0x36a   :  { %2172 = vrot.lane.b32.xlu1 %v7747_v0, %s11451_s25  ;;  %2218 = vrot.lane.b32.xlu0 %v7749_v8, %s11451_s25  ;;  %11518 = sst [smem:[#allocation133_spill]] %s7999_s26  ;;  %s8020_s24 = sld [smem:[#allocation10 + $0x1f]]  ;;  %11549 = vst [vmem:[#allocation215_spill] sm:$0xff] %v8099_v33  ;;  %11580 = vst [vmem:[#allocation216_spill] sm:$0xff] %v8162_v48  ;;  %v8250_v21 = vmul.f32 %v2781_v40, %v7764_v12  ;;  %v8264_v19 = vmul.f32 %v2781_v40, %v7774_v50  ;;  %v11641_v40 = vld [vmem:[#allocation24_spill] sm:$0xff] }
 0x36b   :  { %11519 = sst [smem:[#allocation141_spill]] %s8001_s8  ;;  %s8034_s27 = sld [smem:[#allocation10 + $0x7c]]  ;;  %11585 = vst [vmem:[#allocation227_spill] sm:$0xff] %v8176_v36  ;;  %11598 = vst [vmem:[#allocation222_spill] sm:$0xff] %v8206_v35  ;;  %v8308_v43 = vmul.f32 %v2805_v52, %v7774_v50  ;;  %v8368_v26 = vmul.f32 %v2853_v25, %v7764_v12 }
 0x36c   :  { %11520 = sst [smem:[#allocation134_spill]] %s8011_s6  ;;  %s8018_s1 = sld [smem:[#allocation10 + $0x1e]]  ;;  %11605 = vst [vmem:[#allocation223_spill] sm:$0xff] %v8220_v13  ;;  %11619 = vst [vmem:[#allocation231_spill] sm:$0xff] %v8250_v21 }
 0x36d   :  { %11496 = sst [smem:[#allocation107_spill]] %s7930_s11  ;;  %s7946_s11 = sld [smem:[#allocation10 + $0x15]]  ;;  %11624 = vst [vmem:[#allocation182_spill] sm:$0xff] %v8264_v19  ;;  %11631 = vst [vmem:[#allocation224_spill] sm:$0xff] %v8308_v43 }
 0x36e   :  { %2214 = vrot.lane.b32.xlu1 %v7747_v0, %s11452_s28  ;;  %2260 = vrot.lane.b32.xlu0 %v7749_v8, %s11452_s28  ;;  %11497 = sst [smem:[#allocation115_spill]] %s7932_s30  ;;  %s7948_s30 = sld [smem:[#allocation10 + $0x16]]  ;;  %11651 = vst [vmem:[#allocation151_spill] sm:$0xff] %v8368_v26 }
 0x36f   :  { %11499 = sst [smem:[#allocation100_spill]] %s7938_s29  ;;  %s8086_s15 = sld [smem:[#allocation10 + $0x22]] }
 0x370   :  { %s7954_s29 = sld [smem:[#allocation10 + $0x75]]  ;;  %11521 = sst [smem:[#allocation142_spill]] %s8013_s13 }
 0x371   :  { %11523 = sst [smem:[#allocation143_spill]] %s8020_s24  ;;  %s8036_s17 = sld [smem:[#allocation10 + $0x7d]] }
 0x372   :  { %2220 = vrot.lane.b32.xlu1 %v7762_v1, %s11451_s25  ;;  %2266 = vrot.lane.b32.xlu0 %v7764_v12, %s11451_s25  ;;  %11522 = sst [smem:[#allocation135_spill]] %s8018_s1  ;;  %s8054_s24 = sld [smem:[#allocation10 + $0x7f]] }
 0x373   :  { %11502 = sst [smem:[#allocation124_spill]] %s7946_s11  ;;  %s8092_s23 = sld [smem:[#allocation10 + $0x60]] }
 0x374   :  { %11503 = sst [smem:[#allocation101_spill]] %s7948_s30  ;;  %s8094_s22 = sld [smem:[#allocation10 + $0x61]] }
 0x375   :  { %s7962_s30 = sld [smem:[#allocation10 + $0x76]]  ;;  %11526 = sst [smem:[#allocation136_spill]] %s8034_s27 }
 0x376   :  { %2262 = vrot.lane.b32.xlu1 %v7762_v1, %s11452_s28  ;;  %2308 = vrot.lane.b32.xlu0 %v7764_v12, %s11452_s28  ;;  %11506 = sst [smem:[#allocation125_spill]] %s7954_s29  ;;  %s8111_s13 = sld [smem:[#allocation10 + $0x62]] }
 0x377   :  { %11527 = sst [smem:[#allocation144_spill]] %s8036_s17  ;;  %s8052_s27 = sld [smem:[#allocation10 + $0x7e]] }
 0x378   :  { %11533 = sst [smem:[#allocation145_spill]] %s8054_s24  ;;  %s8072_s24 = sld [smem:[#allocation10 + $0x20]] }
 0x379   :  { %11542 = sst [smem:[#allocation103_spill]] %s8086_s15  ;;  %s8113_s5 = sld [smem:[#allocation10 + $0x63]] }
 0x37a   :  { %2268 = vrot.lane.b32.xlu1 %v7774_v50, %s11451_s25  ;;  %2128 = vrot.lane.b32.xlu0 %v7715_v6, %s11453_s2  ;;  %s7864_s25 = sld [smem:[#allocation10 + $0x4]]  ;;  %11547 = sst [smem:[#allocation119_spill]] %s8092_s23 }
 0x37b   :  { %11507 = sst [smem:[#allocation102_spill]] %s7962_s30  ;;  %s8125_s8 = sld [smem:[#allocation10 + $0x24]] }
 0x37c   :  { %11548 = sst [smem:[#allocation127_spill]] %s8094_s22  ;;  %s11559_s22 = smov 127  }
 0x37d   :  { %11531 = sst [smem:[#allocation137_spill]] %s8052_s27  ;;  %s8074_s27 = sld [smem:[#allocation10 + $0x21]] }
 0x37e   :  { %2310 = vrot.lane.b32.xlu1 %v7774_v50, %s11452_s28  ;;  %2158 = vrot.lane.b32.xlu0 %v7715_v6, %s11454_s10  ;;  %s7868_s28 = sld [smem:[#allocation10 + $0x6]]  ;;  %11537 = sst [smem:[#allocation138_spill]] %s8072_s24 }
 0x37f   :  { %s8088_s24 = sld [smem:[#allocation10 + $0x23]]  ;;  %11554 = sst [smem:[#allocation104_spill]] %s8111_s13 }
 0x380   :  { %11469 = sst [smem:[#allocation70_spill]] %s7864_s25  ;;  %s7884_s25 = sld [smem:[#allocation10 + $0x8]] }
 0x381   :  { %11556 = sst [smem:[#allocation112_spill]] %s8113_s5  ;;  %s8127_s6 = sld [smem:[#allocation10 + $0x25]] }
 0x382   :  { %2130 = vrot.lane.b32.xlu1 %v7717_v4, %s11453_s2  ;;  %2176 = vrot.lane.b32.xlu0 %v7729_v56, %s11453_s2  ;;  %11562 = sst [smem:[#allocation120_spill]] %s8125_s8  ;;  %s8140_s21 = sld [smem:[#allocation10 + $0x27]] }
 0x383   :  { %11538 = sst [smem:[#allocation147_spill]] %s8074_s27  ;;  %s8146_s7 = sld [smem:[#allocation10 + $0x64]] }
 0x384   :  { %11471 = sst [smem:[#allocation86_spill]] %s7868_s28  ;;  %s7888_s28 = sld [smem:[#allocation10 + $0xa]] }
 0x385   :  { %11544 = sst [smem:[#allocation111_spill]] %s8088_s24  ;;  %s8138_s24 = sld [smem:[#allocation10 + $0x26]] }
 0x386   :  { %2160 = vrot.lane.b32.xlu1 %v7717_v4, %s11454_s10  ;;  %2206 = vrot.lane.b32.xlu0 %v7729_v56, %s11454_s10  ;;  %11477 = sst [smem:[#allocation96_spill]] %s7884_s25  ;;  %s7904_s25 = sld [smem:[#allocation10 + $0xc]] }
 0x387   :  { %11564 = sst [smem:[#allocation128_spill]] %s8127_s6  ;;  %s8148_s17 = sld [smem:[#allocation10 + $0x65]] }
 0x388   :  { %11570 = sst [smem:[#allocation113_spill]] %s8140_s21  ;;  %s8155_s4 = sld [smem:[#allocation10 + $0x66]] }
 0x389   :  { %11573 = sst [smem:[#allocation121_spill]] %s8146_s7  ;;  %s8157_s23 = sld [smem:[#allocation10 + $0x67]] }
 0x38a   :  { %2178 = vrot.lane.b32.xlu1 %v7747_v0, %s11453_s2  ;;  %2224 = vrot.lane.b32.xlu0 %v7749_v8, %s11453_s2  ;;  %11479 = sst [smem:[#allocation47_spill]] %s7888_s28  ;;  %s7908_s28 = sld [smem:[#allocation10 + $0xe]] }
 0x38b   :  { %11568 = sst [smem:[#allocation105_spill]] %s8138_s24  ;;  %s8169_s5 = sld [smem:[#allocation10 + $0x28]] }
 0x38c   :  { %11485 = sst [smem:[#allocation64_spill]] %s7904_s25  ;;  %s7924_s25 = sld [smem:[#allocation10 + $0x10]] }
 0x38d   :  { %11575 = sst [smem:[#allocation129_spill]] %s8148_s17  ;;  %s8171_s13 = sld [smem:[#allocation10 + $0x29]] }
 0x38e   :  { %2208 = vrot.lane.b32.xlu1 %v7747_v0, %s11454_s10  ;;  %2254 = vrot.lane.b32.xlu0 %v7749_v8, %s11454_s10  ;;  %11578 = sst [smem:[#allocation106_spill]] %s8155_s4  ;;  %s8182_s26 = sld [smem:[#allocation10 + $0x2a]] }
 0x38f   :  { %11579 = sst [smem:[#allocation114_spill]] %s8157_s23  ;;  %s8190_s16 = sld [smem:[#allocation10 + $0x68]] }
 0x390   :  { %11487 = sst [smem:[#allocation49_spill]] %s7908_s28  ;;  %s7926_s28 = sld [smem:[#allocation10 + $0x11]] }
 0x391   :  { %11583 = sst [smem:[#allocation122_spill]] %s8169_s5  ;;  %s8192_s6 = sld [smem:[#allocation10 + $0x69]] }
 0x392   :  { %2226 = vrot.lane.b32.xlu1 %v7762_v1, %s11453_s2  ;;  %2272 = vrot.lane.b32.xlu0 %v7764_v12, %s11453_s2  ;;  %11493 = sst [smem:[#allocation66_spill]] %s7924_s25  ;;  %s8213_s29 = sld [smem:[#allocation10 + $0x2c]] }
 0x393   :  { %s7940_s25 = sld [smem:[#allocation10 + $0x73]]  ;;  %s8228_s27 = sld [smem:[#allocation10 + $0x2f]] }
 0x394   :  { %11584 = sst [smem:[#allocation130_spill]] %s8171_s13  ;;  %s8234_s0 = sld [smem:[#allocation10 + $0x6c]] }
 0x395   :  { %s8184_s8 = sld [smem:[#allocation10 + $0x2b]]  ;;  %11589 = sst [smem:[#allocation88_spill]] %s8190_s16 }
 0x396   :  { %2256 = vrot.lane.b32.xlu1 %v7762_v1, %s11454_s10  ;;  %2302 = vrot.lane.b32.xlu0 %v7764_v12, %s11454_s10  ;;  %11494 = sst [smem:[#allocation94_spill]] %s7926_s28  ;;  %s7952_s28 = sld [smem:[#allocation10 + $0x74]] }
 0x397   :  { %11590 = sst [smem:[#allocation73_spill]] %s8192_s6  ;;  %s8236_s14 = sld [smem:[#allocation10 + $0x6d]] }
 0x398   :  { %11601 = sst [smem:[#allocation97_spill]] %s8213_s29  ;;  %s8243_s11 = sld [smem:[#allocation10 + $0x6e]] }
 0x399   :  { %11500 = sst [smem:[#allocation108_spill]] %s7940_s25  ;;  %s8245_s1 = sld [smem:[#allocation10 + $0x6f]] }
 0x39a   :  { %2274 = vrot.lane.b32.xlu1 %v7774_v50, %s11453_s2  ;;  %2134 = vrot.lane.b32.xlu0 %v7715_v6, %s11459_s12  ;;  %s7870_s2 = sld [smem:[#allocation10 + $0x7]]  ;;  %s8259_s30 = sld [smem:[#allocation10 + $0x31]] }
 0x39b   :  { %11586 = sst [smem:[#allocation72_spill]] %s8184_s8  ;;  %s8226_s8 = sld [smem:[#allocation10 + $0x2e]] }
 0x39c   :  { %11505 = sst [smem:[#allocation117_spill]] %s7952_s28  ;;  %s8215_s28 = sld [smem:[#allocation10 + $0x2d]] }
 0x39d   :  { %11612 = sst [smem:[#allocation82_spill]] %s8236_s14  ;;  %s8278_s16 = sld [smem:[#allocation10 + $0x50]] }
 0x39e   :  { %2304 = vrot.lane.b32.xlu1 %v7774_v50, %s11454_s10  ;;  %2152 = vrot.lane.b32.xlu0 %v7715_v6, %s11468_s18  ;;  %s7878_s10 = sld [smem:[#allocation10 + $0x86]]  ;;  %11615 = sst [smem:[#allocation90_spill]] %s8243_s11 }
 0x39f   :  { %11617 = sst [smem:[#allocation98_spill]] %s8245_s1  ;;  %s8287_s9 = sld [smem:[#allocation10 + $0x52]] }
 0x3a0   :  { %11472 = sst [smem:[#allocation71_spill]] %s7870_s2  ;;  %s7890_s2 = sld [smem:[#allocation10 + $0xb]] }
 0x3a1   :  { %s8272_s29 = sld [smem:[#allocation10 + $0x33]]  ;;  %s8301_s1 = sld [smem:[#allocation10 + $0x34]] }
 0x3a2   :  { %2136 = vrot.lane.b32.xlu1 %v7717_v4, %s11459_s12  ;;  %2182 = vrot.lane.b32.xlu0 %v7729_v56, %s11459_s12  ;;  %11603 = sst [smem:[#allocation74_spill]] %s8215_s28  ;;  %s8303_s24 = sld [smem:[#allocation10 + $0x35]] }
 0x3a3   :  { %s8289_s6 = sld [smem:[#allocation10 + $0x53]]  ;;  %s11632_s14 = sld [smem:[#allocation88_spill]] }
 0x3a4   :  { %11475 = sst [smem:[#allocation95_spill]] %s7878_s10  ;;  %s7898_s10 = sld [smem:[#allocation10 + $0x8a]] }
 0x3a5   :  { %s8314_s21 = sld [smem:[#allocation10 + $0x36]]  ;;  %s11639_s3 = sld [smem:[#allocation74_spill]] }
 0x3a6   :  { %11480 = sst [smem:[#allocation55_spill]] %s7890_s2  ;;  %2154 = vrot.lane.b32.xlu1 %v7717_v4, %s11468_s18  ;;  %2200 = vrot.lane.b32.xlu0 %v7729_v56, %s11468_s18  ;;  %s7910_s2 = sld [smem:[#allocation10 + $0xf]] }
 0x3a7   :  { %11629 = sst [smem:[#allocation51_spill]] %s8301_s1  ;;  %s8316_s28 = sld [smem:[#allocation10 + $0x37]] }
 0x3a8   :  { %11630 = sst [smem:[#allocation59_spill]] %s8303_s24  ;;  %s11643_s13 = sld [smem:[#allocation82_spill]] }
 0x3a9   :  { %11626 = sst [smem:[#allocation43_spill]] %s8289_s6  ;;  %s8326_s5 = sld [smem:[#allocation10 + $0x55]] }
 0x3aa   :  { %11483 = sst [smem:[#allocation48_spill]] %s7898_s10  ;;  %2184 = vrot.lane.b32.xlu1 %v7747_v0, %s11459_s12  ;;  %s7918_s10 = sld [smem:[#allocation10 + $0x8e]]  ;;  %2230 = vrot.lane.b32.xlu0 %v7749_v8, %s11459_s12 }
 0x3ab   :  { %11638 = sst [smem:[#allocation44_spill]] %s8314_s21  ;;  %s8324_s11 = sld [smem:[#allocation10 + $0x54]] }
 0x3ac   :  { %11488 = sst [smem:[#allocation57_spill]] %s7910_s2  ;;  %s11645_s23 = smov 1  }
 0x3ad   :  { %s7928_s2 = sld [smem:[#allocation10 + $0x12]]  ;;  %11640 = sst [smem:[#allocation52_spill]] %s8316_s28 }
 0x3ae   :  { %2202 = vrot.lane.b32.xlu1 %v7747_v0, %s11468_s18  ;;  %2248 = vrot.lane.b32.xlu0 %v7749_v8, %s11468_s18  ;;  %s11646_s4 = sld [smem:[#allocation90_spill]]  ;;  %s8352_s25 = sld [smem:[#allocation10 + $0x56]] }
 0x3af   :  { %11644 = sst [smem:[#allocation45_spill]] %s8326_s5  ;;  %s11647_s20 = sld [smem:[#allocation98_spill]] }
 0x3b0   :  { %11491 = sst [smem:[#allocation50_spill]] %s7918_s10  ;;  %s7934_s10 = sld [smem:[#allocation10 + $0x71]] }
 0x3b1   :  { %11642 = sst [smem:[#allocation60_spill]] %s8324_s11  ;;  %s8354_s17 = sld [smem:[#allocation10 + $0x57]] }
 0x3b2   :  { %2232 = vrot.lane.b32.xlu1 %v7762_v1, %s11459_s12  ;;  %2278 = vrot.lane.b32.xlu0 %v7764_v12, %s11459_s12  ;;  %s8390_s19 = sld [smem:[#allocation10 + $0x38]]  ;;  %s8392_s1 = sld [smem:[#allocation10 + $0x39]] }
 0x3b3   :  { %11495 = sst [smem:[#allocation99_spill]] %s7928_s2  ;;  %s11661_s21 = sld [smem:[#allocation77_spill]] }
 0x3b4   :  { %s7944_s2 = sld [smem:[#allocation10 + $0x14]]  ;;  %s11663_s24 = sld [smem:[#allocation93_spill]] }
 0x3b5   :  { %s11678_s5 = sld [smem:[#allocation70_spill]]  ;;  %s8468_s6 = sld [smem:[#allocation10 + $0x3a]] }
 0x3b6   :  { %11498 = sst [smem:[#allocation123_spill]] %s7934_s10  ;;  %s7950_s10 = sld [smem:[#allocation10 + $0x17]]  ;;  %2250 = vrot.lane.b32.xlu1 %v7762_v1, %s11468_s18  ;;  %2296 = vrot.lane.b32.xlu0 %v7764_v12, %s11468_s18 }
 0x3b7   :  { %s8470_s28 = sld [smem:[#allocation10 + $0x3b]]  ;;  %s11687_s11 = sld [smem:[#allocation79_spill]] }
 0x3b8   :  { %s11692_s15 = sld [smem:[#allocation87_spill]] }
 0x3ba   :  { %11501 = sst [smem:[#allocation116_spill]] %s7944_s2  ;;  %2280 = vrot.lane.b32.xlu1 %v7774_v50, %s11459_s12  ;;  %s11536_s12 = smov 1  }
 0x3bb   :  { %2140 = vrot.lane.b32.xlu0 %v7715_v6, %s11536_s12  ;;  %s8199_s2 = sld [smem:[#allocation10 + $0x6a]] }
 0x3bc   :  { %11504 = sst [smem:[#allocation109_spill]] %s7950_s10  ;;  %s7964_s10 = sld [smem:[#allocation10 + $0x77]] }
 0x3bd   :  { %11679 = sst [smem:[#allocation53_spill]] %s8470_s28  ;;  %v11694_v36 = vstv %s11687_s11  ;;  %s11714_s11 = sld [smem:[#allocation80_spill]] }
 0x3be   :  { %2298 = vrot.lane.b32.xlu1 %v7774_v50, %s11468_s18  ;;  %s8201_s18 = sld [smem:[#allocation10 + $0x6b]]  ;;  %v11696_v48 = vmov %v11694_v36  ;;  %v11698_v38 = vstv %s11692_s15  ;;  %s11716_s15 = sld [smem:[#allocation63_spill]] }
 0x3bf   :  { %2146 = vrot.lane.b32.xlu0 %v7715_v6, %s11559_s22  ;;  %v8294_v6 = vmul.f32 %v2805_v52, %v7764_v12  ;;  %s11788_s28 = sld [smem:[#allocation108_spill]] }
 0x3c1   :  { %11594 = sst [smem:[#allocation81_spill]] %s8199_s2  ;;  %11627 = vst [vmem:[#allocation154_spill] sm:$0xff] %v8294_v6  ;;  %s11628_s2 = sld [smem:[#allocation72_spill]] }
 0x3c2   :  { %11508 = sst [smem:[#allocation110_spill]] %s7964_s10  ;;  %2142 = vrot.lane.b32.xlu1 %v7717_v4, %s11536_s12  ;;  %s8280_s10 = sld [smem:[#allocation10 + $0x51]] }
 0x3c3   :  { %2188 = vrot.lane.b32.xlu0 %v7729_v56, %s11536_s12 }
 0x3c4   :  { %11596 = sst [smem:[#allocation89_spill]] %s8201_s18  ;;  %s8257_s18 = sld [smem:[#allocation10 + $0x30]] }
 0x3c5   :  { %s11636_s7 = sld [smem:[#allocation89_spill]] }
 0x3c6   :  { %2148 = vrot.lane.b32.xlu1 %v7717_v4, %s11559_s22  ;;  %v8346_v4 = vmul.f32 %v2829_v51, %v7774_v50 }
 0x3c7   :  { %2194 = vrot.lane.b32.xlu0 %v7729_v56, %s11559_s22 }
 0x3c8   :  { %11649 = vst [vmem:[#allocation158_spill] sm:$0xff] %v8346_v4 }
 0x3ca   :  { %2190 = vrot.lane.b32.xlu1 %v7747_v0, %s11536_s12 }
 0x3cb   :  { %2236 = vrot.lane.b32.xlu0 %v7749_v8, %s11536_s12  ;;  %s8270_s12 = sld [smem:[#allocation10 + $0x32]] }
 0x3ce   :  { %2196 = vrot.lane.b32.xlu1 %v7747_v0, %s11559_s22  ;;  %v8378_v0 = vmul.f32 %v2853_v25, %v7774_v50 }
 0x3cf   :  { %2242 = vrot.lane.b32.xlu0 %v7749_v8, %s11559_s22 }
 0x3d0   :  { %v2123_v59 = vpop.permute.xlu1 %2122  ;;  %v2125_v47 = vpop.permute.xlu0 %2124  ;;  %11652 = vst [vmem:[#allocation232_spill] sm:$0xff] %v8378_v0 }
 0x3d1   :  { %v2126_v52 = vsel %vm199_vm3, %v2123_v59, %v2125_v47  ;;  %v2127_v49 = vsel %vm199_vm3, %v2125_v47, %v2123_v59  ;;  %v8336_v59 = vmul.f32 %v2829_v51, %v7764_v12 }
 0x3d2   :  { %2238 = vrot.lane.b32.xlu1 %v7762_v1, %s11645_s23 }
 0x3d3   :  { %11648 = vst [vmem:[#allocation228_spill] sm:$0xff] %v8336_v59  ;;  %2284 = vrot.lane.b32.xlu0 %v7764_v12, %s11645_s23 }
 0x3d4   :  { %v2165_v56 = vpop.permute.xlu1 %2164  ;;  %v2171_v46 = vpop.permute.xlu0 %2170 }
 0x3d6   :  { %2244 = vrot.lane.b32.xlu1 %v7762_v1, %s11559_s22 }
 0x3d7   :  { %2290 = vrot.lane.b32.xlu0 %v7764_v12, %s11559_s22 }
 0x3d8   :  { %v2167_v1 = vpop.permute.xlu1 %2166  ;;  %v2213_v12 = vpop.permute.xlu0 %2212 }
 0x3d9   :  { %v2168_v20 = vsel %vm247_vm4, %v2165_v56, %v2167_v1  ;;  %v2169_v16 = vsel %vm247_vm4, %v2167_v1, %v2165_v56 }
 0x3da   :  { %v2314_v25 = vsel %vm480_vm11, %v2127_v49, %v2168_v20  ;;  %v2315_v30 = vsel %vm480_vm11, %v2126_v52, %v2169_v16  ;;  %v3194_v56 = vsel %vm480_vm11, %v2168_v20, %v2127_v49  ;;  %v3195_v1 = vsel %vm480_vm11, %v2169_v16, %v2126_v52  ;;  %2286 = vrot.lane.b32.xlu1 %v7774_v50, %s11645_s23  ;;  %s11662_s23 = sld [smem:[#allocation85_spill]] }
 0x3db   :  { %v2316_v8 = vsel %vm5517_vm10, %v2314_v25, 0.0  ;;  %v2317_v3 = vsel %vm5310_vm14, %v2315_v30, 0.0  ;;  %v3196_v9 = vsel %vm5406_vm15, %v3194_v56, 0.0  ;;  %v3197_v49 = vsel %vm5905_vm12, %v3195_v1, 0.0 }
 0x3dc   :  { %v2332_v16 = vmul.f32 %v2331_v28, %v2316_v8  ;;  %v2333_v52 = vmul.f32 %v2331_v28, %v2317_v3  ;;  %v2173_v51 = vpop.permute.xlu1 %2172  ;;  %v2356_v30 = vmul.f32 %v2355_v22, %v2316_v8  ;;  %v2357_v56 = vmul.f32 %v2355_v22, %v2317_v3  ;;  %v2219_v23 = vpop.permute.xlu0 %2218 }
 0x3dd   :  { %v2380_v44 = vmul.f32 %v2379_v57, %v2316_v8  ;;  %v2381_v1 = vmul.f32 %v2379_v57, %v2317_v3  ;;  %v2404_v14 = vmul.f32 %v2403_v34, %v2316_v8  ;;  %v2405_v28 = vmul.f32 %v2403_v34, %v2317_v3 }
 0x3de   :  { %v8432_v53 = vmul.f32 %v3211_v31, %v3196_v9  ;;  %v8436_v25 = vmul.f32 %v3211_v31, %v3197_v49  ;;  %2292 = vrot.lane.b32.xlu1 %v7774_v50, %s11559_s22  ;;  %v11666_v22 = vstv %s11661_s21  ;;  %v2174_v50 = vsel %vm199_vm3, %v2171_v46, %v2173_v51  ;;  %s11680_s21 = sld [smem:[#allocation78_spill]]  ;;  %s11682_s22 = sld [smem:[#allocation71_spill]] }
 0x3df   :  { %v8442_v63 = vmul.f32 %v11666_v22, %v3196_v9  ;;  %v11668_v57 = vmov %v11666_v22  ;;  %v2175_v22 = vsel %vm199_vm3, %v2173_v51, %v2171_v46 }
 0x3e0   :  { %11664 = vst [vmem:[#allocation185_spill] sm:$0xff] %v8432_v53  ;;  %11665 = vst [vmem:[#allocation156_spill] sm:$0xff] %v8436_v25  ;;  %v8446_v15 = vmul.f32 %v11668_v57, %v3197_v49  ;;  %v11670_v8 = vstv %s11662_s23  ;;  %v11674_v53 = vstv %s11663_s24  ;;  %v2215_v57 = vpop.permute.xlu1 %2214  ;;  %s11681_s24 = sld [smem:[#allocation86_spill]]  ;;  %s11693_s23 = sld [smem:[#allocation95_spill]] }
 0x3e1   :  { %11667 = vst [vmem:[#allocation225_spill] sm:$0xff] %v8442_v63  ;;  %v8450_v0 = vmul.f32 %v11670_v8, %v3196_v9  ;;  %v11672_v34 = vmov %v11670_v8  ;;  %v8458_v31 = vmul.f32 %v11674_v53, %v3196_v9  ;;  %v11676_v25 = vmov %v11674_v53 }
 0x3e2   :  { %11669 = vst [vmem:[#allocation229_spill] sm:$0xff] %v8446_v15  ;;  %v8454_v3 = vmul.f32 %v11672_v34, %v3197_v49  ;;  %v8462_v26 = vmul.f32 %v11676_v25, %v3197_v49  ;;  %v2216_v53 = vsel %vm247_vm4, %v2213_v12, %v2215_v57  ;;  %v2217_v9 = vsel %vm247_vm4, %v2215_v57, %v2213_v12  ;;  %v2261_v49 = vpop.permute.xlu0 %2260 }
 0x3e3   :  { %11671 = vst [vmem:[#allocation149_spill] sm:$0xff] %v8450_v0  ;;  %11675 = vst [vmem:[#allocation233_spill] sm:$0xff] %v8458_v31  ;;  %v2318_v51 = vsel %vm480_vm11, %v2175_v22, %v2216_v53  ;;  %v2319_v8 = vsel %vm480_vm11, %v2174_v50, %v2217_v9  ;;  %v3198_v34 = vsel %vm480_vm11, %v2216_v53, %v2175_v22  ;;  %v11683_v31 = vstv %s11678_s5  ;;  %s11705_s5 = sld [smem:[#allocation96_spill]] }
 0x3e4   :  { %11673 = vst [vmem:[#allocation187_spill] sm:$0xff] %v8454_v3  ;;  %11677 = vst [vmem:[#allocation153_spill] sm:$0xff] %v8462_v26  ;;  %v3199_v26 = vsel %vm480_vm11, %v2217_v9, %v2174_v50  ;;  %v2320_v12 = vsel %vm5517_vm10, %v2318_v51, 0.0  ;;  %v2321_v57 = vsel %vm5310_vm14, %v2319_v8, 0.0  ;;  %v3200_v46 = vsel %vm5406_vm15, %v3198_v34, 0.0  ;;  %v2221_v9 = vpop.permute.xlu1 %2220 }
 0x3e5   :  { %v3201_v25 = vsel %vm5905_vm12, %v3199_v26, 0.0  ;;  %v2338_v3 = vmul.f32 %v11683_v31, %v2320_v12  ;;  %v11684_v0 = vmov %v11683_v31  ;;  %v11685_v22 = vstv %s11680_s21  ;;  %s11707_s21 = sld [smem:[#allocation39_spill]] }
 0x3e6   :  { %v2339_v15 = vmul.f32 %v11684_v0, %v2321_v57  ;;  %v2362_v53 = vmul.f32 %v11685_v22, %v2320_v12  ;;  %v11686_v63 = vmov %v11685_v22  ;;  %v11688_v51 = vstv %s11681_s24  ;;  %v2267_v0 = vpop.permute.xlu0 %2266  ;;  %s11708_s24 = sld [smem:[#allocation47_spill]] }
 0x3e7   :  { %v2363_v50 = vmul.f32 %v11686_v63, %v2321_v57  ;;  %v2386_v4 = vmul.f32 %v11688_v51, %v2320_v12  ;;  %v11689_v8 = vmov %v11688_v51  ;;  %v11690_v34 = vstv %s11682_s22  ;;  %s11709_s22 = sld [smem:[#allocation55_spill]] }
 0x3e8   :  { %v2387_v59 = vmul.f32 %v11689_v8, %v2321_v57  ;;  %v2410_v43 = vmul.f32 %v11690_v34, %v2320_v12  ;;  %v11691_v26 = vmov %v11690_v34  ;;  %v2340_v22 = vadd.f32 %v2338_v3, %v2332_v16  ;;  %v2263_v34 = vpop.permute.xlu1 %2262 }
 0x3e9   :  { %v2411_v31 = vmul.f32 %v11691_v26, %v2321_v57  ;;  %v2341_v6 = vadd.f32 %v2339_v15, %v2333_v52  ;;  %v2364_v63 = vadd.f32 %v2362_v53, %v2356_v30  ;;  %v2365_v19 = vadd.f32 %v2363_v50, %v2357_v56 }
 0x3ea   :  { %v2388_v21 = vadd.f32 %v2386_v4, %v2380_v44  ;;  %v2389_v13 = vadd.f32 %v2387_v59, %v2381_v1  ;;  %v2412_v51 = vadd.f32 %v2410_v43, %v2404_v14  ;;  %v8512_v8 = vmul.f32 %v11694_v36, %v3200_v46  ;;  %v2309_v36 = vpop.permute.xlu0 %2308 }
 0x3eb   :  { %v2413_v35 = vadd.f32 %v2411_v31, %v2405_v28  ;;  %v8516_v12 = vmul.f32 %v11696_v48, %v3201_v25  ;;  %v8522_v17 = vmul.f32 %v11698_v38, %v3200_v46  ;;  %v11700_v16 = vmov %v11698_v38 }
 0x3ec   :  { %11695 = vst [vmem:[#allocation157_spill] sm:$0xff] %v8512_v8  ;;  %v8526_v15 = vmul.f32 %v11700_v16, %v3201_v25  ;;  %v11702_v52 = vstv %s11693_s23  ;;  %v2222_v48 = vsel %vm199_vm3, %v2219_v23, %v2221_v9  ;;  %v2223_v38 = vsel %vm199_vm3, %v2221_v9, %v2219_v23  ;;  %v2269_v50 = vpop.permute.xlu1 %2268  ;;  %s11720_s23 = sld [smem:[#allocation40_spill]] }
 0x3ed   :  { %11697 = vst [vmem:[#allocation226_spill] sm:$0xff] %v8516_v12  ;;  %11699 = vst [vmem:[#allocation230_spill] sm:$0xff] %v8522_v17  ;;  %v8530_v44 = vmul.f32 %v11702_v52, %v3200_v46  ;;  %v11704_v14 = vmov %v11702_v52  ;;  %v2264_v4 = vsel %vm247_vm4, %v2261_v49, %v2263_v34  ;;  %v2265_v59 = vsel %vm247_vm4, %v2263_v34, %v2261_v49 }
 0x3ee   :  { %11701 = vst [vmem:[#allocation150_spill] sm:$0xff] %v8526_v15  ;;  %v8534_v43 = vmul.f32 %v11704_v14, %v3201_v25  ;;  %v2322_v30 = vsel %vm480_vm11, %v2223_v38, %v2264_v4  ;;  %v2323_v56 = vsel %vm480_vm11, %v2222_v48, %v2265_v59  ;;  %v3202_v1 = vsel %vm480_vm11, %v2264_v4, %v2223_v38  ;;  %v8568_v4 = vpop.permute.xlu0 %2128 }
 0x3ef   :  { %11703 = vst [vmem:[#allocation188_spill] sm:$0xff] %v8530_v44  ;;  %v3203_v23 = vsel %vm480_vm11, %v2265_v59, %v2222_v48  ;;  %v2324_v28 = vsel %vm5517_vm10, %v2322_v30, 0.0  ;;  %v2325_v3 = vsel %vm5310_vm14, %v2323_v56, 0.0  ;;  %v3204_v49 = vsel %vm5406_vm15, %v3202_v1, 0.0 }
 0x3f0   :  { %11706 = vst [vmem:[#allocation234_spill] sm:$0xff] %v8534_v43  ;;  %v3205_v53 = vsel %vm5905_vm12, %v3203_v23, 0.0  ;;  %v11710_v9 = vstv %s11705_s5  ;;  %v11712_v52 = vstv %s11707_s21  ;;  %v11715_v59 = vstv %s11708_s24  ;;  %s11721_s5 = sld [smem:[#allocation48_spill]]  ;;  %s11739_s24 = sld [smem:[#allocation41_spill]] }
 0x3f1   :  { %v2344_v31 = vmul.f32 %v11710_v9, %v2324_v28  ;;  %v11711_v34 = vmov %v11710_v9  ;;  %v2368_v14 = vmul.f32 %v11712_v52, %v2324_v28  ;;  %v11713_v48 = vmov %v11712_v52  ;;  %s11737_s21 = sld [smem:[#allocation64_spill]] }
 0x3f2   :  { %v2345_v16 = vmul.f32 %v11711_v34, %v2325_v3  ;;  %v2369_v38 = vmul.f32 %v11713_v48, %v2325_v3  ;;  %v2392_v30 = vmul.f32 %v11715_v59, %v2324_v28  ;;  %v11717_v56 = vmov %v11715_v59  ;;  %v2311_v59 = vpop.permute.xlu1 %2310 }
 0x3f3   :  { %v2393_v1 = vmul.f32 %v11717_v56, %v2325_v3  ;;  %v11718_v23 = vstv %s11709_s22  ;;  %v2346_v34 = vadd.f32 %v2344_v31, %v2340_v22  ;;  %v2370_v48 = vadd.f32 %v2368_v14, %v2364_v63  ;;  %s11740_s22 = sld [smem:[#allocation49_spill]] }
 0x3f4   :  { %v2416_v26 = vmul.f32 %v11718_v23, %v2324_v28  ;;  %v11719_v57 = vmov %v11718_v23  ;;  %v2347_v52 = vadd.f32 %v2345_v16, %v2341_v6  ;;  %v2371_v43 = vadd.f32 %v2369_v38, %v2365_v19  ;;  %v2159_v6 = vpop.permute.xlu0 %2158 }
 0x3f5   :  { %v2417_v9 = vmul.f32 %v11719_v57, %v2325_v3  ;;  %v2394_v44 = vadd.f32 %v2392_v30, %v2388_v21  ;;  %v2395_v15 = vadd.f32 %v2393_v1, %v2389_v13  ;;  %v11722_v8 = vstv %s11714_s11  ;;  %s11741_s11 = sld [smem:[#allocation57_spill]] }
 0x3f6   :  { %v2418_v17 = vadd.f32 %v2416_v26, %v2412_v51  ;;  %v8580_v11 = vmul.f32 %v11722_v8, %v3200_v46  ;;  %v11724_v56 = vmov %v11722_v8  ;;  %v11726_v23 = vstv %s11716_s15  ;;  %v2131_v30 = vpop.permute.xlu1 %2130  ;;  %s11748_s15 = sld [smem:[#allocation56_spill]] }
 0x3f7   :  { %v2419_v12 = vadd.f32 %v2417_v9, %v2413_v35  ;;  %v8584_v28 = vmul.f32 %v11724_v56, %v3201_v25  ;;  %v8588_v57 = vmul.f32 %v11726_v23, %v3204_v49  ;;  %v11728_v22 = vmov %v11726_v23 }
 0x3f8   :  { %11723 = vst [vmem:[#allocation152_spill] sm:$0xff] %v8580_v11  ;;  %v8592_v3 = vmul.f32 %v11728_v22, %v3205_v53  ;;  %v11730_v63 = vstv %s11720_s23  ;;  %v11734_v35 = vstv %s11721_s5  ;;  %v2270_v8 = vsel %vm199_vm3, %v2267_v0, %v2269_v50  ;;  %v8638_v56 = vpop.permute.xlu0 %2176  ;;  %s11751_s23 = sld [smem:[#allocation65_spill]]  ;;  %s11754_s5 = sld [smem:[#allocation42_spill]] }
 0x3f9   :  { %11725 = vst [vmem:[#allocation155_spill] sm:$0xff] %v8584_v28  ;;  %11727 = vst [vmem:[#allocation235_spill] sm:$0xff] %v8588_v57  ;;  %v8596_v19 = vmul.f32 %v11730_v63, %v3204_v49  ;;  %v11732_v21 = vmov %v11730_v63  ;;  %v8604_v51 = vmul.f32 %v11734_v35, %v3204_v49  ;;  %v11736_v46 = vmov %v11734_v35 }
 0x3fa   :  { %11729 = vst [vmem:[#allocation243_spill] sm:$0xff] %v8592_v3  ;;  %v8600_v13 = vmul.f32 %v11732_v21, %v3205_v53  ;;  %v8608_v25 = vmul.f32 %v11736_v46, %v3205_v53  ;;  %v2271_v26 = vsel %vm199_vm3, %v2269_v50, %v2267_v0  ;;  %v2312_v31 = vsel %vm247_vm4, %v2309_v36, %v2311_v59 }
 0x3fb   :  { %11731 = vst [vmem:[#allocation148_spill] sm:$0xff] %v8596_v19  ;;  %11735 = vst [vmem:[#allocation251_spill] sm:$0xff] %v8604_v51  ;;  %v2313_v16 = vsel %vm247_vm4, %v2311_v59, %v2309_v36  ;;  %v2326_v14 = vsel %vm480_vm11, %v2271_v26, %v2312_v31  ;;  %v3206_v0 = vsel %vm480_vm11, %v2312_v31, %v2271_v26  ;;  %v11744_v23 = vstv %s11737_s21  ;;  %s11755_s21 = sld [smem:[#allocation50_spill]] }
 0x3fc   :  { %11733 = vst [vmem:[#allocation191_spill] sm:$0xff] %v8600_v13  ;;  %11738 = vst [vmem:[#allocation236_spill] sm:$0xff] %v8608_v25  ;;  %v2327_v38 = vsel %vm480_vm11, %v2270_v8, %v2313_v16  ;;  %v3207_v50 = vsel %vm480_vm11, %v2313_v16, %v2270_v8  ;;  %v2328_v1 = vsel %vm5517_vm10, %v2326_v14, 0.0  ;;  %v8632_v9 = vsel %vm5406_vm15, %v3206_v0, 0.0  ;;  %v2207_v13 = vpop.permute.xlu0 %2206 }
 0x3fd   :  { %v2329_v36 = vsel %vm5310_vm14, %v2327_v38, 0.0  ;;  %11742 = vst [vmem:[#allocation244_spill] sm:$0xff] %v8632_v9  ;;  %v8636_v59 = vsel %vm5905_vm12, %v3207_v50, 0.0  ;;  %v2350_v22 = vmul.f32 %v11744_v23, %v2328_v1  ;;  %v11745_v63 = vmov %v11744_v23 }
 0x3fe   :  { %11743 = vst [vmem:[#allocation237_spill] sm:$0xff] %v8636_v59  ;;  %v2351_v21 = vmul.f32 %v11745_v63, %v2329_v36  ;;  %v11746_v35 = vstv %s11739_s24  ;;  %v11749_v26 = vstv %s11740_s22  ;;  %v11752_v20 = vstv %s11741_s11  ;;  %s11765_s24 = sld [smem:[#allocation66_spill]]  ;;  %s11768_s22 = sld [smem:[#allocation94_spill]] }
 0x3ff   :  { %v2374_v47 = vmul.f32 %v11746_v35, %v2328_v1  ;;  %v11747_v46 = vmov %v11746_v35  ;;  %v2398_v31 = vmul.f32 %v11749_v26, %v2328_v1  ;;  %v11750_v16 = vmov %v11749_v26  ;;  %s11771_s11 = sld [smem:[#allocation99_spill]] }
 0x400   :  { %v2375_v8 = vmul.f32 %v11747_v46, %v2329_v36  ;;  %v2399_v14 = vmul.f32 %v11750_v16, %v2329_v36  ;;  %v2422_v38 = vmul.f32 %v11752_v20, %v2328_v1  ;;  %v11753_v0 = vmov %v11752_v20  ;;  %v2161_v46 = vpop.permute.xlu1 %2160 }
 0x401   :  { %v2423_v50 = vmul.f32 %v11753_v0, %v2329_v36  ;;  %v2352_v23 = vadd.f32 %v2350_v22, %v2346_v34  ;;  %v2353_v63 = vadd.f32 %v2351_v21, %v2347_v52  ;;  %v2376_v35 = vadd.f32 %v2374_v47, %v2370_v48 }
 0x402   :  { %v2377_v28 = vadd.f32 %v2375_v8, %v2371_v43  ;;  %v2400_v11 = vadd.f32 %v2398_v31, %v2394_v44  ;;  %v2401_v25 = vadd.f32 %v2399_v14, %v2395_v15  ;;  %v2424_v26 = vadd.f32 %v2422_v38, %v2418_v17 }
 0x403   :  { %v2425_v51 = vadd.f32 %v2423_v50, %v2419_v12  ;;  %v11756_v16 = vstv %s11748_s15  ;;  %v11760_v36 = vstv %s11751_s23  ;;  %v11764_v44 = vstv %s11754_s5  ;;  %s11775_s15 = sld [smem:[#allocation107_spill]] }
 0x404   :  { %v8658_v19 = vmul.f32 %v11756_v16, %v3204_v49  ;;  %v11758_v1 = vmov %v11756_v16  ;;  %v8667_v34 = vmul.f32 %v11760_v36, %v8632_v9  ;;  %v11762_v52 = vmov %v11760_v36  ;;  %v2179_v14 = vpop.permute.xlu1 %2178  ;;  %s11782_s23 = sld [smem:[#allocation115_spill]] }
 0x405   :  { %v8662_v20 = vmul.f32 %v11758_v1, %v3205_v53  ;;  %v8672_v48 = vmul.f32 %v11762_v52, %v8636_v59  ;;  %v8677_v17 = vmul.f32 %v11764_v44, %v8632_v9  ;;  %v11767_v12 = vmov %v11764_v44  ;;  %s11784_s5 = sld [smem:[#allocation123_spill]] }
 0x406   :  { %11757 = vst [vmem:[#allocation245_spill] sm:$0xff] %v8658_v19  ;;  %11761 = vst [vmem:[#allocation253_spill] sm:$0xff] %v8667_v34  ;;  %v8682_v15 = vmul.f32 %v11767_v12, %v8636_v59  ;;  %v11770_v43 = vstv %s11755_s21  ;;  %v2132_v21 = vsel %vm206_vm5, %v8568_v4, %v2131_v30  ;;  %v2133_v47 = vsel %vm206_vm5, %v2131_v30, %v8568_v4  ;;  %v2225_v30 = vpop.permute.xlu0 %2224  ;;  %s11786_s21 = sld [smem:[#allocation100_spill]] }
 0x407   :  { %11759 = vst [vmem:[#allocation252_spill] sm:$0xff] %v8662_v20  ;;  %11763 = vst [vmem:[#allocation238_spill] sm:$0xff] %v8672_v48  ;;  %v8687_v49 = vmul.f32 %v11770_v43, %v8632_v9  ;;  %v11773_v53 = vmov %v11770_v43  ;;  %v2162_v8 = vsel %vm240_vm6, %v2159_v6, %v2161_v46  ;;  %v2163_v31 = vsel %vm240_vm6, %v2161_v46, %v2159_v6 }
 0x408   :  { %11766 = vst [vmem:[#allocation246_spill] sm:$0xff] %v8677_v17  ;;  %11769 = vst [vmem:[#allocation239_spill] sm:$0xff] %v8682_v15  ;;  %v8692_v22 = vmul.f32 %v11773_v53, %v8636_v59  ;;  %v2426_v38 = vsel %vm480_vm11, %v2133_v47, %v2162_v8  ;;  %v2427_v0 = vsel %vm480_vm11, %v2132_v21, %v2163_v31  ;;  %vm11776_vm3 = vcmp.ge.s32.totalorder %v11641_v40, 16 }
 0x409   :  { %11772 = vst [vmem:[#allocation247_spill] sm:$0xff] %v8687_v49  ;;  %v3082_v50 = vsel %vm480_vm11, %v2162_v8, %v2133_v47  ;;  %v3083_v4 = vsel %vm480_vm11, %v2163_v31, %v2132_v21  ;;  %v2428_v16 = vsel %vm11776_vm3, %v2426_v38, 0.0  ;;  %v11777_v1 = vstv %s11765_s24  ;;  %s11803_s24 = sld [smem:[#allocation116_spill]]  ;;  %vm11810_vm4 = vmmov %vm11776_vm3 }
 0x40a   :  { %11774 = vst [vmem:[#allocation254_spill] sm:$0xff] %v8692_v22  ;;  %v2445_v6 = vmul.f32 %v11777_v1, %v2427_v0  ;;  %v11778_v46 = vstv %s11768_s22  ;;  %v11779_v52 = vstv %s11771_s11  ;;  %v11780_v12 = vmov %v11777_v1  ;;  %v2255_v49 = vpop.permute.xlu0 %2254  ;;  %s11806_s22 = sld [smem:[#allocation124_spill]]  ;;  %s11808_s11 = sld [smem:[#allocation101_spill]]  ;;  %vm11843_vm12 = vmmov %vm11776_vm3 }
 0x40b   :  { %v2469_v36 = vmul.f32 %v11778_v46, %v2427_v0  ;;  %v2493_v44 = vmul.f32 %v11779_v52, %v2427_v0  ;;  %v2444_v43 = vmul.f32 %v11780_v12, %v2428_v16  ;;  %v11781_v53 = vmov %v11778_v46  ;;  %v2209_v12 = vpop.permute.xlu1 %2208 }
 0x40c   :  { %v2468_v20 = vmul.f32 %v11781_v53, %v2428_v16  ;;  %v11783_v19 = vmov %v11779_v52  ;;  %v11785_v8 = vstv %s11775_s15  ;;  %v2447_v31 = vadd.f32 %v2445_v6, %v2353_v63  ;;  %s11816_s15 = sld [smem:[#allocation117_spill]] }
 0x40d   :  { %v2492_v47 = vmul.f32 %v11783_v19, %v2428_v16  ;;  %v2516_v21 = vmul.f32 %v11785_v8, %v2428_v16  ;;  %v2471_v38 = vadd.f32 %v2469_v36, %v2377_v28  ;;  %v2495_v1 = vadd.f32 %v2493_v44, %v2401_v25 }
 0x40e   :  { %v11787_v46 = vmov %v11785_v8  ;;  %v2446_v59 = vadd.f32 %v2444_v43, %v2352_v23  ;;  %v2470_v9 = vadd.f32 %v2468_v20, %v2376_v35  ;;  %v3085_v16 = vsel %vm128_vm2, %v3083_v4, 0.0 }
 0x40f   :  { %v2517_v52 = vmul.f32 %v11787_v46, %v2427_v0  ;;  %v2494_v53 = vadd.f32 %v2492_v47, %v2400_v11  ;;  %v2518_v22 = vadd.f32 %v2516_v21, %v2424_v26  ;;  %v11790_v8 = vstv %s11782_s23  ;;  %v2227_v46 = vpop.permute.xlu1 %2226  ;;  %s11818_s23 = sld [smem:[#allocation125_spill]] }
 0x410   :  { %v8734_v63 = vmul.f32 %v11790_v8, %v3082_v50  ;;  %v11792_v28 = vstv %s11784_s5  ;;  %v11794_v25 = vmov %v11790_v8  ;;  %v11798_v23 = vstv %s11786_s21  ;;  %s11820_s5 = sld [smem:[#allocation102_spill]] }
 0x411   :  { %v2519_v19 = vadd.f32 %v2517_v52, %v2425_v51  ;;  %v8738_v6 = vmul.f32 %v11792_v28, %v3082_v50  ;;  %v8742_v36 = vmul.f32 %v11794_v25, %v3085_v16  ;;  %v11796_v0 = vmov %v11792_v28  ;;  %v8778_v28 = vpop.permute.xlu0 %2272  ;;  %s11822_s21 = sld [smem:[#allocation110_spill]] }
 0x412   :  { %11791 = vst [vmem:[#allocation255_spill] sm:$0xff] %v8734_v63  ;;  %v8746_v44 = vmul.f32 %v11796_v0, %v3085_v16  ;;  %v8750_v11 = vmul.f32 %v11798_v23, %v3082_v50  ;;  %v11800_v35 = vmov %v11798_v23  ;;  %v11802_v26 = vstv %s11788_s28  ;;  %s11809_s28 = sld [smem:[#allocation109_spill]] }
 0x413   :  { %11793 = vst [vmem:[#allocation240_spill] sm:$0xff] %v8738_v6  ;;  %11795 = vst [vmem:[#allocation248_spill] sm:$0xff] %v8742_v36  ;;  %v8754_v51 = vmul.f32 %v11800_v35, %v3085_v16  ;;  %v8758_v20 = vmul.f32 %v11802_v26, %v3082_v50  ;;  %v11805_v4 = vmov %v11802_v26  ;;  %v2180_v47 = vsel %vm206_vm5, %v8638_v56, %v2179_v14 }
 0x414   :  { %11797 = vst [vmem:[#allocation241_spill] sm:$0xff] %v8746_v44  ;;  %11799 = vst [vmem:[#allocation249_spill] sm:$0xff] %v8750_v11  ;;  %v8762_v43 = vmul.f32 %v11805_v4, %v3085_v16  ;;  %v2181_v21 = vsel %vm206_vm5, %v2179_v14, %v8638_v56  ;;  %v2210_v50 = vsel %vm240_vm6, %v2207_v13, %v2209_v12  ;;  %v11811_v0 = vstv %s11803_s24  ;;  %s11828_s24 = sld [smem:[#allocation118_spill]] }
 0x415   :  { %11801 = vst [vmem:[#allocation256_spill] sm:$0xff] %v8754_v51  ;;  %11804 = vst [vmem:[#allocation257_spill] sm:$0xff] %v8758_v20  ;;  %v2211_v52 = vsel %vm240_vm6, %v2209_v12, %v2207_v13  ;;  %v2228_v16 = vsel %vm206_vm5, %v2225_v30, %v2227_v46  ;;  %v2229_v8 = vsel %vm206_vm5, %v2227_v46, %v2225_v30  ;;  %v11812_v23 = vstv %s11806_s22  ;;  %s11831_s22 = sld [smem:[#allocation126_spill]] }
 0x416   :  { %11807 = vst [vmem:[#allocation242_spill] sm:$0xff] %v8762_v43  ;;  %v2430_v56 = vsel %vm480_vm11, %v2181_v21, %v2210_v50  ;;  %v2431_v14 = vsel %vm480_vm11, %v2180_v47, %v2211_v52  ;;  %v3086_v25 = vsel %vm480_vm11, %v2210_v50, %v2181_v21  ;;  %v3087_v13 = vsel %vm480_vm11, %v2211_v52, %v2180_v47  ;;  %v2257_v52 = vpop.permute.xlu1 %2256 }
 0x417   :  { %v2432_v12 = vsel %vm11810_vm4, %v2430_v56, 0.0  ;;  %v2451_v30 = vmul.f32 %v11811_v0, %v2431_v14  ;;  %v2475_v35 = vmul.f32 %v11812_v23, %v2431_v14  ;;  %v11813_v26 = vstv %s11808_s11  ;;  %s11834_s11 = sld [smem:[#allocation131_spill]] }
 0x418   :  { %v2499_v4 = vmul.f32 %v11813_v26, %v2431_v14  ;;  %v11814_v46 = vmov %v11811_v0  ;;  %v11815_v48 = vmov %v11812_v23  ;;  %v11817_v3 = vmov %v11813_v26 }
 0x419   :  { %v2450_v17 = vmul.f32 %v11814_v46, %v2432_v12  ;;  %v2474_v34 = vmul.f32 %v11815_v48, %v2432_v12  ;;  %v2498_v21 = vmul.f32 %v11817_v3, %v2432_v12  ;;  %v11819_v50 = vstv %s11809_s28  ;;  %v2303_v46 = vpop.permute.xlu0 %2302  ;;  %s11841_s28 = sld [smem:[#allocation139_spill]] }
 0x41a   :  { %v2522_v47 = vmul.f32 %v11819_v50, %v2432_v12  ;;  %v2453_v56 = vadd.f32 %v2451_v30, %v2447_v31  ;;  %v2477_v0 = vadd.f32 %v2475_v35, %v2471_v38  ;;  %v2501_v23 = vadd.f32 %v2499_v4, %v2495_v1 }
 0x41b   :  { %v11821_v57 = vmov %v11819_v50  ;;  %v2452_v43 = vadd.f32 %v2450_v17, %v2446_v59  ;;  %v2476_v48 = vadd.f32 %v2474_v34, %v2470_v9  ;;  %v2500_v20 = vadd.f32 %v2498_v21, %v2494_v53  ;;  %v2275_v53 = vpop.permute.xlu1 %2274 }
 0x41c   :  { %v2523_v26 = vmul.f32 %v11821_v57, %v2431_v14  ;;  %v2524_v51 = vadd.f32 %v2522_v47, %v2518_v22  ;;  %v3089_v12 = vsel %vm128_vm2, %v3087_v13, 0.0  ;;  %v11823_v50 = vstv %s11816_s15  ;;  %s11849_s15 = sld [smem:[#allocation132_spill]] }
 0x41d   :  { %v8810_v11 = vmul.f32 %v11823_v50, %v3086_v25  ;;  %v11825_v31 = vstv %s11818_s23  ;;  %v11827_v38 = vmov %v11823_v50  ;;  %v11833_v9 = vstv %s11820_s5  ;;  %v2135_v47 = vpop.permute.xlu0 %2134  ;;  %s11851_s23 = sld [smem:[#allocation140_spill]]  ;;  %s11853_s5 = sld [smem:[#allocation133_spill]] }
 0x41e   :  { %v2525_v3 = vadd.f32 %v2523_v26, %v2519_v19  ;;  %v8814_v30 = vmul.f32 %v11825_v31, %v3086_v25  ;;  %v8818_v1 = vmul.f32 %v11827_v38, %v3089_v12  ;;  %v11830_v57 = vmov %v11825_v31 }
 0x41f   :  { %11824 = vst [vmem:[#allocation250_spill] sm:$0xff] %v8810_v11  ;;  %v8822_v59 = vmul.f32 %v11830_v57, %v3089_v12  ;;  %v8826_v34 = vmul.f32 %v11833_v9, %v3086_v25  ;;  %v11836_v17 = vmov %v11833_v9  ;;  %v11838_v19 = vstv %s11822_s21  ;;  %s11855_s21 = sld [smem:[#allocation141_spill]] }
 0x420   :  { %11826 = vst [vmem:[#allocation263_spill] sm:$0xff] %v8814_v30  ;;  %11829 = vst [vmem:[#allocation258_spill] sm:$0xff] %v8818_v1  ;;  %v8830_v22 = vmul.f32 %v11836_v17, %v3089_v12  ;;  %v8834_v14 = vmul.f32 %v11838_v19, %v3086_v25  ;;  %v11840_v13 = vmov %v11838_v19  ;;  %v2258_v4 = vsel %vm240_vm6, %v2255_v49, %v2257_v52 }
 0x421   :  { %11832 = vst [vmem:[#allocation259_spill] sm:$0xff] %v8822_v59  ;;  %11835 = vst [vmem:[#allocation267_spill] sm:$0xff] %v8826_v34  ;;  %v8838_v35 = vmul.f32 %v11840_v13, %v3089_v12  ;;  %v2259_v21 = vsel %vm240_vm6, %v2257_v52, %v2255_v49  ;;  %v2434_v26 = vsel %vm480_vm11, %v2229_v8, %v2258_v4  ;;  %v11844_v38 = vstv %s11828_s24  ;;  %s11868_s24 = sld [smem:[#allocation134_spill]] }
 0x422   :  { %11837 = vst [vmem:[#allocation189_spill] sm:$0xff] %v8830_v22  ;;  %11839 = vst [vmem:[#allocation27_spill] sm:$0xff] %v8834_v14  ;;  %v2435_v50 = vsel %vm480_vm11, %v2228_v16, %v2259_v21  ;;  %v3090_v25 = vsel %vm480_vm11, %v2258_v4, %v2229_v8  ;;  %v3091_v12 = vsel %vm480_vm11, %v2259_v21, %v2228_v16  ;;  %v2436_v31 = vsel %vm11843_vm12, %v2434_v26, 0.0  ;;  %v2305_v21 = vpop.permute.xlu1 %2304 }
 0x423   :  { %11842 = vst [vmem:[#allocation261_spill] sm:$0xff] %v8838_v35  ;;  %v2457_v57 = vmul.f32 %v11844_v38, %v2435_v50  ;;  %v11845_v49 = vstv %s11831_s22  ;;  %v11846_v9 = vstv %s11834_s11  ;;  %v11847_v19 = vmov %v11844_v38  ;;  %s11870_s22 = sld [smem:[#allocation142_spill]]  ;;  %s11873_s11 = sld [smem:[#allocation135_spill]] }
 0x424   :  { %v2481_v52 = vmul.f32 %v11845_v49, %v2435_v50  ;;  %v2505_v17 = vmul.f32 %v11846_v9, %v2435_v50  ;;  %v2456_v13 = vmul.f32 %v11847_v19, %v2436_v31  ;;  %v11848_v35 = vmov %v11845_v49  ;;  %v2153_v19 = vpop.permute.xlu0 %2152 }
 0x425   :  { %v2480_v14 = vmul.f32 %v11848_v35, %v2436_v31  ;;  %v11850_v22 = vmov %v11846_v9  ;;  %v11852_v4 = vstv %s11841_s28  ;;  %v2459_v26 = vadd.f32 %v2457_v57, %v2453_v56  ;;  %s11875_s28 = sld [smem:[#allocation143_spill]] }
 0x426   :  { %v2504_v8 = vmul.f32 %v11850_v22, %v2436_v31  ;;  %v2528_v16 = vmul.f32 %v11852_v4, %v2436_v31  ;;  %v2483_v38 = vadd.f32 %v2481_v52, %v2477_v0  ;;  %v2507_v49 = vadd.f32 %v2505_v17, %v2501_v23 }
 0x427   :  { %v11854_v34 = vmov %v11852_v4  ;;  %v2458_v59 = vadd.f32 %v2456_v13, %v2452_v43  ;;  %v2482_v35 = vadd.f32 %v2480_v14, %v2476_v48  ;;  %v3093_v31 = vsel %vm128_vm2, %v3091_v12, 0.0 }
 0x428   :  { %v2529_v9 = vmul.f32 %v11854_v34, %v2435_v50  ;;  %v2506_v30 = vadd.f32 %v2504_v8, %v2500_v20  ;;  %v2530_v1 = vadd.f32 %v2528_v16, %v2524_v51  ;;  %v11856_v4 = vstv %s11849_s15  ;;  %v8910_v16 = vpop.permute.xlu0 %2182  ;;  %s11883_s15 = sld [smem:[#allocation136_spill]] }
 0x429   :  { %v8874_v11 = vmul.f32 %v11856_v4, %v3090_v25  ;;  %v11858_v56 = vstv %s11851_s23  ;;  %v11860_v0 = vmov %v11856_v4  ;;  %v11864_v43 = vstv %s11853_s5  ;;  %s11885_s23 = sld [smem:[#allocation144_spill]]  ;;  %s11888_s5 = sld [smem:[#allocation137_spill]] }
 0x42a   :  { %v2531_v22 = vadd.f32 %v2529_v9, %v2525_v3  ;;  %v8878_v57 = vmul.f32 %v11858_v56, %v3090_v25  ;;  %v8882_v23 = vmul.f32 %v11860_v0, %v3093_v31  ;;  %v11862_v34 = vmov %v11858_v56  ;;  %v2137_v3 = vpop.permute.xlu1 %2136 }
 0x42b   :  { %11857 = vst [vmem:[#allocation265_spill] sm:$0xff] %v8874_v11  ;;  %v8886_v50 = vmul.f32 %v11862_v34, %v3093_v31  ;;  %v8890_v48 = vmul.f32 %v11864_v43, %v3090_v25  ;;  %v11866_v51 = vmov %v11864_v43  ;;  %v11869_v14 = vstv %s11855_s21  ;;  %s11890_s21 = sld [smem:[#allocation145_spill]] }
 0x42c   :  { %11859 = vst [vmem:[#allocation269_spill] sm:$0xff] %v8878_v57  ;;  %11861 = vst [vmem:[#allocation260_spill] sm:$0xff] %v8882_v23  ;;  %v8894_v20 = vmul.f32 %v11866_v51, %v3093_v31  ;;  %v8898_v12 = vmul.f32 %v11869_v14, %v3090_v25  ;;  %v11872_v52 = vmov %v11869_v14  ;;  %v2276_v13 = vsel %vm206_vm5, %v8778_v28, %v2275_v53 }
 0x42d   :  { %11863 = vst [vmem:[#allocation264_spill] sm:$0xff] %v8886_v50  ;;  %11865 = vst [vmem:[#allocation262_spill] sm:$0xff] %v8890_v48  ;;  %v8902_v17 = vmul.f32 %v11872_v52, %v3093_v31  ;;  %v2277_v8 = vsel %vm206_vm5, %v2275_v53, %v8778_v28  ;;  %v2306_v25 = vsel %vm240_vm6, %v2303_v46, %v2305_v21  ;;  %vm11876_vm10 = vcmp.lt.s32.totalorder %v11641_v40, 15 }
 0x42e   :  { %11867 = vst [vmem:[#allocation268_spill] sm:$0xff] %v8894_v20  ;;  %11871 = vst [vmem:[#allocation266_spill] sm:$0xff] %v8898_v12  ;;  %v2307_v9 = vsel %vm240_vm6, %v2305_v21, %v2303_v46  ;;  %v2138_v31 = vsel %vm11876_vm10, %v2135_v47, %v2137_v3  ;;  %v2438_v28 = vsel %vm480_vm11, %v2277_v8, %v2306_v25  ;;  %v11879_v21 = vstv %s11868_s24  ;;  %v2155_v14 = vpop.permute.xlu1 %2154  ;;  %s11902_s24 = sld [smem:[#allocation138_spill]] }
 0x42f   :  { %11874 = vst [vmem:[#allocation270_spill] sm:$0xff] %v8902_v17  ;;  %vm11877_vm3 = vmmov %vm11876_vm10  ;;  %v2439_v53 = vsel %vm480_vm11, %v2276_v13, %v2307_v9  ;;  %v3094_v56 = vsel %vm480_vm11, %v2306_v25, %v2277_v8  ;;  %v3095_v0 = vsel %vm480_vm11, %v2307_v9, %v2276_v13  ;;  %v11880_v43 = vstv %s11870_s22  ;;  %v2201_v9 = vpop.permute.xlu0 %2200  ;;  %s11905_s22 = sld [smem:[#allocation147_spill]] }
 0x430   :  { %v2139_v4 = vsel %vm11877_vm3, %v2137_v3, %v2135_v47  ;;  %vm11878_vm5 = vmmov %vm11810_vm4  ;;  %v2463_v34 = vmul.f32 %v11879_v21, %v2439_v53  ;;  %v2487_v47 = vmul.f32 %v11880_v43, %v2439_v53  ;;  %v11881_v51 = vstv %s11873_s11  ;;  %s11910_s11 = sld [smem:[#allocation103_spill]] }
 0x431   :  { %v2440_v46 = vsel %vm11878_vm5, %v2438_v28, 0.0  ;;  %v2511_v3 = vmul.f32 %v11881_v51, %v2439_v53  ;;  %v11882_v52 = vmov %v11879_v21  ;;  %v11884_v12 = vmov %v11880_v43  ;;  %vm11945_vm4 = vmmov %vm11877_vm3 }
 0x432   :  { %v2462_v17 = vmul.f32 %v11882_v52, %v2440_v46  ;;  %v2486_v20 = vmul.f32 %v11884_v12, %v2440_v46  ;;  %v11886_v8 = vmov %v11881_v51  ;;  %v11887_v48 = vstv %s11875_s28  ;;  %s11912_s28 = sld [smem:[#allocation111_spill]]  ;;  %vm11946_vm12 = vmmov %vm11877_vm3 }
 0x433   :  { %v2510_v25 = vmul.f32 %v11886_v8, %v2440_v46  ;;  %v2534_v13 = vmul.f32 %v11887_v48, %v2440_v46  ;;  %v2465_v28 = vadd.f32 %v2463_v34, %v2459_v26  ;;  %v2489_v21 = vadd.f32 %v2487_v47, %v2483_v38  ;;  %v2185_v38 = vpop.permute.xlu1 %2184  ;;  %vm11981_vm5 = vmmov %vm11945_vm4 }
 0x434   :  { %v2513_v43 = vadd.f32 %v2511_v3, %v2507_v49  ;;  %v11889_v51 = vmov %v11887_v48  ;;  %v2464_v52 = vadd.f32 %v2462_v17, %v2458_v59  ;;  %v2488_v57 = vadd.f32 %v2486_v20, %v2482_v35  ;;  %v8972_v35 = vpop.permute.xlu0 %2230 }
 0x435   :  { %v2535_v50 = vmul.f32 %v11889_v51, %v2439_v53  ;;  %v2512_v23 = vadd.f32 %v2510_v25, %v2506_v30  ;;  %v2536_v12 = vadd.f32 %v2534_v13, %v2530_v1  ;;  %v3097_v8 = vsel %vm128_vm2, %v3095_v0, 0.0 }
 0x436   :  { %v11891_v48 = vstv %s11883_s15  ;;  %v11893_v44 = vstv %s11885_s23  ;;  %v11899_v59 = vstv %s11888_s5  ;;  %vm11909_vm6 = vcmp.lt.s32.totalorder %v11641_v40, 113  ;;  %s11920_s15 = sld [smem:[#allocation119_spill]]  ;;  %s11926_s5 = sld [smem:[#allocation104_spill]] }
 0x437   :  { %v2537_v11 = vadd.f32 %v2535_v50, %v2531_v22  ;;  %v8950_v46 = vmul.f32 %v11891_v48, %v3094_v56  ;;  %v8954_v26 = vmul.f32 %v11893_v44, %v3094_v56  ;;  %v11895_v49 = vmov %v11891_v48  ;;  %vm11911_vm2 = vmmov %vm11909_vm6  ;;  %s11923_s23 = sld [smem:[#allocation127_spill]] }
 0x438   :  { %v8958_v34 = vmul.f32 %v11895_v49, %v3097_v8  ;;  %v11897_v53 = vmov %v11893_v44  ;;  %v8966_v30 = vmul.f32 %v11899_v59, %v3094_v56  ;;  %v11901_v1 = vmov %v11899_v59  ;;  %v2203_v59 = vpop.permute.xlu1 %2202  ;;  %vm11948_vm10 = vmmov %vm11911_vm2 }
 0x439   :  { %11892 = vst [vmem:[#allocation190_spill] sm:$0xff] %v8950_v46  ;;  %11894 = vst [vmem:[#allocation22_spill] sm:$0xff] %v8954_v26  ;;  %v8962_v47 = vmul.f32 %v11897_v53, %v3097_v8  ;;  %v8970_v15 = vmul.f32 %v11901_v1, %v3097_v8  ;;  %v11904_v22 = vstv %s11890_s21  ;;  %v2156_v17 = vsel %vm11909_vm6, %v2153_v19, %v2155_v14  ;;  %s11927_s21 = sld [smem:[#allocation112_spill]] }
 0x43a   :  { %11896 = vst [vmem:[#allocation23_spill] sm:$0xff] %v8958_v34  ;;  %11900 = vst [vmem:[#allocation26_spill] sm:$0xff] %v8966_v30  ;;  %v8976_v44 = vmul.f32 %v11904_v22, %v3094_v56  ;;  %v11907_v50 = vmov %v11904_v22  ;;  %v2157_v0 = vsel %vm11911_vm2, %v2155_v14, %v2153_v19  ;;  %v2538_v3 = vsel %vm480_vm11, %v2139_v4, %v2156_v17 }
 0x43b   :  { %11898 = vst [vmem:[#allocation29_spill] sm:$0xff] %v8962_v47  ;;  %11903 = vst [vmem:[#allocation25_spill] sm:$0xff] %v8970_v15  ;;  %v8980_v20 = vmul.f32 %v11907_v50, %v3097_v8  ;;  %v2539_v56 = vsel %vm480_vm11, %v2138_v31, %v2157_v0  ;;  %v2970_v25 = vsel %vm480_vm11, %v2156_v17, %v2139_v4  ;;  %v2540_v8 = vsel %vm5669_vm8, %v2538_v3, 0.0 }
 0x43c   :  { %11906 = vst [vmem:[#allocation177_spill] sm:$0xff] %v8976_v44  ;;  %v2971_v13 = vsel %vm480_vm11, %v2157_v0, %v2138_v31  ;;  %v2541_v19 = vsel %vm5484_vm1, %v2539_v56, 0.0  ;;  %v2972_v48 = vsel %vm5251_vm13, %v2970_v25, 0.0  ;;  %v11916_v1 = vstv %s11902_s24  ;;  %v2233_v36 = vpop.permute.xlu1 %2232  ;;  %s11943_s24 = sld [smem:[#allocation120_spill]]  ;;  %vm11949_vm3 = vmmov %vm11911_vm2 }
 0x43d   :  { %11908 = vst [vmem:[#allocation146_spill] sm:$0xff] %v8980_v20  ;;  %v2973_v53 = vsel %vm5757_vm7, %v2971_v13, 0.0  ;;  %v2556_v22 = vmul.f32 %v11916_v1, %v2540_v8  ;;  %v11917_v50 = vmov %v11916_v1  ;;  %v11918_v17 = vstv %s11905_s22  ;;  %s11947_s22 = sld [smem:[#allocation128_spill]]  ;;  %vm11983_vm6 = vmmov %vm11945_vm4 }
 0x43e   :  { %v2557_v4 = vmul.f32 %v11917_v50, %v2541_v19  ;;  %v2580_v20 = vmul.f32 %v11918_v17, %v2540_v8  ;;  %v11919_v31 = vmov %v11918_v17  ;;  %v11921_v3 = vstv %s11910_s11  ;;  %s11950_s11 = sld [smem:[#allocation105_spill]] }
 0x43f   :  { %v2581_v0 = vmul.f32 %v11919_v31, %v2541_v19  ;;  %v2604_v44 = vmul.f32 %v11921_v3, %v2540_v8  ;;  %v11922_v56 = vmov %v11921_v3  ;;  %v11924_v25 = vstv %s11912_s28  ;;  %v2249_v31 = vpop.permute.xlu0 %2248  ;;  %s11951_s28 = sld [smem:[#allocation113_spill]] }
 0x440   :  { %v2605_v15 = vmul.f32 %v11922_v56, %v2541_v19  ;;  %v2628_v30 = vmul.f32 %v11924_v25, %v2540_v8  ;;  %v11925_v13 = vmov %v11924_v25  ;;  %v2558_v1 = vadd.f32 %v2556_v22, %v2464_v52 }
 0x441   :  { %v2629_v47 = vmul.f32 %v11925_v13, %v2541_v19  ;;  %v2559_v50 = vadd.f32 %v2557_v4, %v2465_v28  ;;  %v2582_v17 = vadd.f32 %v2580_v20, %v2488_v57  ;;  %v2583_v26 = vadd.f32 %v2581_v0, %v2489_v21  ;;  %v2251_v4 = vpop.permute.xlu1 %2250 }
 0x442   :  { %v2606_v34 = vadd.f32 %v2604_v44, %v2512_v23  ;;  %v2607_v46 = vadd.f32 %v2605_v15, %v2513_v43  ;;  %v2630_v3 = vadd.f32 %v2628_v30, %v2536_v12  ;;  %v11928_v56 = vstv %s11920_s15  ;;  %s11955_s15 = sld [smem:[#allocation121_spill]] }
 0x443   :  { %v2631_v6 = vadd.f32 %v2629_v47, %v2537_v11  ;;  %v9020_v63 = vmul.f32 %v11928_v56, %v2972_v48  ;;  %v11930_v8 = vmov %v11928_v56  ;;  %v11932_v19 = vstv %s11923_s23  ;;  %s11958_s23 = sld [smem:[#allocation129_spill]] }
 0x444   :  { %v9024_v25 = vmul.f32 %v11930_v8, %v2973_v53  ;;  %v9028_v13 = vmul.f32 %v11932_v19, %v2972_v48  ;;  %v11934_v52 = vmov %v11932_v19  ;;  %v11936_v57 = vstv %s11926_s5  ;;  %v9076_v8 = vpop.permute.xlu0 %2278  ;;  %s11961_s5 = sld [smem:[#allocation106_spill]] }
 0x445   :  { %11929 = vst [vmem:[#allocation271_spill] sm:$0xff] %v9020_v63  ;;  %v9032_v28 = vmul.f32 %v11934_v52, %v2973_v53  ;;  %v9036_v21 = vmul.f32 %v11936_v57, %v2972_v48  ;;  %v11938_v23 = vmov %v11936_v57  ;;  %v11940_v11 = vstv %s11927_s21  ;;  %s11963_s21 = sld [smem:[#allocation114_spill]] }
 0x446   :  { %11931 = vst [vmem:[#allocation272_spill] sm:$0xff] %v9024_v25  ;;  %11933 = vst [vmem:[#allocation275_spill] sm:$0xff] %v9028_v13  ;;  %v9040_v43 = vmul.f32 %v11938_v23, %v2973_v53  ;;  %v9044_v12 = vmul.f32 %v11940_v11, %v2972_v48  ;;  %v11942_v47 = vmov %v11940_v11  ;;  %v2186_v15 = vsel %vm11945_vm4, %v8910_v16, %v2185_v38 }
 0x447   :  { %11935 = vst [vmem:[#allocation273_spill] sm:$0xff] %v9032_v28  ;;  %11937 = vst [vmem:[#allocation274_spill] sm:$0xff] %v9036_v21  ;;  %v9048_v30 = vmul.f32 %v11942_v47, %v2973_v53  ;;  %v2187_v44 = vsel %vm11946_vm12, %v2185_v38, %v8910_v16  ;;  %v2204_v20 = vsel %vm11948_vm10, %v2201_v9, %v2203_v59  ;;  %v11952_v19 = vstv %s11943_s24  ;;  %v2281_v21 = vpop.permute.xlu1 %2280  ;;  %s11979_s24 = sld [smem:[#allocation122_spill]] }
 0x448   :  { %11939 = vst [vmem:[#allocation276_spill] sm:$0xff] %v9040_v43  ;;  %11941 = vst [vmem:[#allocation277_spill] sm:$0xff] %v9044_v12  ;;  %v2205_v48 = vsel %vm11949_vm3, %v2203_v59, %v2201_v9  ;;  %v2542_v53 = vsel %vm480_vm11, %v2187_v44, %v2204_v20  ;;  %v2974_v16 = vsel %vm480_vm11, %v2204_v20, %v2187_v44  ;;  %v11953_v57 = vmov %v11952_v19 }
 0x449   :  { %11944 = vst [vmem:[#allocation279_spill] sm:$0xff] %v9048_v30  ;;  %v2543_v22 = vsel %vm480_vm11, %v2186_v15, %v2205_v48  ;;  %v2975_v38 = vsel %vm480_vm11, %v2205_v48, %v2186_v15  ;;  %v2544_v0 = vsel %vm5669_vm8, %v2542_v53, 0.0  ;;  %v2976_v59 = vsel %vm5251_vm13, %v2974_v16, 0.0  ;;  %vm11984_vm4 = vmmov %vm11911_vm2 }
 0x44a   :  { %v2545_v9 = vsel %vm5484_vm1, %v2543_v22, 0.0  ;;  %v2977_v56 = vsel %vm5757_vm7, %v2975_v38, 0.0  ;;  %v2562_v52 = vmul.f32 %v11952_v19, %v2544_v0  ;;  %v11954_v11 = vstv %s11947_s22  ;;  %s11982_s22 = sld [smem:[#allocation130_spill]]  ;;  %vm12012_vm12 = vmmov %vm11981_vm5 }
 0x44b   :  { %v2563_v23 = vmul.f32 %v11953_v57, %v2545_v9  ;;  %v2586_v47 = vmul.f32 %v11954_v11, %v2544_v0  ;;  %v11956_v15 = vmov %v11954_v11  ;;  %v11957_v20 = vstv %s11950_s11  ;;  %s11991_s11 = sld [smem:[#allocation73_spill]]  ;;  %vm12013_vm10 = vmmov %vm11981_vm5 }
 0x44c   :  { %v2587_v44 = vmul.f32 %v11956_v15, %v2545_v9  ;;  %v2610_v48 = vmul.f32 %v11957_v20, %v2544_v0  ;;  %v11959_v53 = vmov %v11957_v20  ;;  %v11960_v16 = vstv %s11951_s28  ;;  %s11994_s28 = sld [smem:[#allocation81_spill]]  ;;  %vm12014_vm3 = vmmov %vm11911_vm2 }
 0x44d   :  { %v2611_v22 = vmul.f32 %v11959_v53, %v2545_v9  ;;  %v2634_v38 = vmul.f32 %v11960_v16, %v2544_v0  ;;  %v11962_v30 = vmov %v11960_v16  ;;  %v2564_v57 = vadd.f32 %v2562_v52, %v2558_v1 }
 0x44e   :  { %v2635_v19 = vmul.f32 %v11962_v30, %v2545_v9  ;;  %v2565_v12 = vadd.f32 %v2563_v23, %v2559_v50  ;;  %v2588_v11 = vadd.f32 %v2586_v47, %v2582_v17  ;;  %v2589_v43 = vadd.f32 %v2587_v44, %v2583_v26  ;;  %v2297_v9 = vpop.permute.xlu0 %2296  ;;  %v2299_v47 = vpop.permute.xlu1 %2298 }
 0x44f   :  { %v2612_v15 = vadd.f32 %v2610_v48, %v2606_v34  ;;  %v2613_v28 = vadd.f32 %v2611_v22, %v2607_v46  ;;  %v2636_v13 = vadd.f32 %v2634_v38, %v2630_v3  ;;  %v11964_v25 = vstv %s11955_s15  ;;  %s9476_s15 = sld [smem:[#allocation10 + $0x5f]] }
 0x450   :  { %v2637_v20 = vadd.f32 %v2635_v19, %v2631_v6  ;;  %v9096_v63 = vmul.f32 %v11964_v25, %v2976_v59  ;;  %v11966_v53 = vmov %v11964_v25  ;;  %v11968_v0 = vstv %s11958_s23  ;;  %s9786_s23 = sld [smem:[#allocation12 + $0x2]] }
 0x451   :  { %v9100_v33 = vmul.f32 %v11966_v53, %v2977_v56  ;;  %v9104_v16 = vmul.f32 %v11968_v0, %v2976_v59  ;;  %v11970_v30 = vmov %v11968_v0  ;;  %v11972_v50 = vstv %s11961_s5  ;;  %s9791_s5 = sld [smem:[#allocation13 + $0x2]] }
 0x452   :  { %11965 = vst [vmem:[#allocation280_spill] sm:$0xff] %v9096_v63  ;;  %v9108_v1 = vmul.f32 %v11970_v30, %v2977_v56  ;;  %v9112_v17 = vmul.f32 %v11972_v50, %v2976_v59  ;;  %v11974_v26 = vmov %v11972_v50  ;;  %v11976_v46 = vstv %s11963_s21  ;;  %s9795_s21 = sld [smem:[#allocation12 + $0x1]] }
 0x453   :  { %11967 = vst [vmem:[#allocation217_spill] sm:$0xff] %v9100_v33  ;;  %11969 = vst [vmem:[#allocation209_spill] sm:$0xff] %v9104_v16  ;;  %v9116_v34 = vmul.f32 %v11974_v26, %v2977_v56  ;;  %v9120_v6 = vmul.f32 %v11976_v46, %v2976_v59  ;;  %v11978_v3 = vmov %v11976_v46  ;;  %v2234_v52 = vsel %vm11981_vm5, %v8972_v35, %v2233_v36 }
 0x454   :  { %11971 = vst [vmem:[#allocation278_spill] sm:$0xff] %v9108_v1  ;;  %11973 = vst [vmem:[#allocation218_spill] sm:$0xff] %v9112_v17  ;;  %v9124_v25 = vmul.f32 %v11978_v3, %v2977_v56  ;;  %v2235_v23 = vsel %vm11983_vm6, %v2233_v36, %v8972_v35  ;;  %v2252_v59 = vsel %vm11911_vm2, %v2249_v31, %v2251_v4  ;;  %v11985_v19 = vstv %s11979_s24  ;;  %s9803_s24 = sld [smem:[#allocation12 + $0x3]] }
 0x455   :  { %11975 = vst [vmem:[#allocation281_spill] sm:$0xff] %v9116_v34  ;;  %11977 = vst [vmem:[#allocation282_spill] sm:$0xff] %v9120_v6  ;;  %v2253_v56 = vsel %vm11984_vm4, %v2251_v4, %v2249_v31  ;;  %v2546_v44 = vsel %vm480_vm11, %v2235_v23, %v2252_v59  ;;  %v2978_v36 = vsel %vm480_vm11, %v2252_v59, %v2235_v23  ;;  %v11986_v0 = vmov %v11985_v19  ;;  %v2141_v6 = vpop.permute.xlu0 %2140 }
 0x456   :  { %11980 = vst [vmem:[#allocation213_spill] sm:$0xff] %v9124_v25  ;;  %v2547_v48 = vsel %vm480_vm11, %v2234_v52, %v2253_v56  ;;  %v2979_v35 = vsel %vm480_vm11, %v2253_v56, %v2234_v52  ;;  %v2548_v22 = vsel %vm5669_vm8, %v2546_v44, 0.0  ;;  %v2980_v4 = vsel %vm5251_vm13, %v2978_v36, 0.0  ;;  %vm12015_vm5 = vmmov %vm11911_vm2 }
 0x457   :  { %v2549_v31 = vsel %vm5484_vm1, %v2547_v48, 0.0  ;;  %v2981_v38 = vsel %vm5757_vm7, %v2979_v35, 0.0  ;;  %v2568_v53 = vmul.f32 %v11985_v19, %v2548_v22  ;;  %v11987_v50 = vstv %s11982_s22  ;;  %v2143_v19 = vpop.permute.xlu1 %2142  ;;  %s9806_s22 = sld [smem:[#allocation13 + $0x1]] }
 0x458   :  { %v2569_v30 = vmul.f32 %v11986_v0, %v2549_v31  ;;  %v2592_v26 = vmul.f32 %v11987_v50, %v2548_v22  ;;  %v11988_v46 = vmov %v11987_v50  ;;  %v11989_v52 = vstv %s8182_s26  ;;  %s12076_s26 = sld [smem:[#allocation45_spill]] }
 0x459   :  { %v2593_v3 = vmul.f32 %v11988_v46, %v2549_v31  ;;  %v2616_v23 = vmul.f32 %v11989_v52, %v2548_v22  ;;  %v11990_v59 = vmov %v11989_v52  ;;  %v11992_v44 = vstv %s11628_s2  ;;  %s12010_s2 = sld [smem:[#allocation97_spill]] }
 0x45a   :  { %v2617_v56 = vmul.f32 %v11990_v59, %v2549_v31  ;;  %v2640_v48 = vmul.f32 %v11992_v44, %v2548_v22  ;;  %v11993_v36 = vmov %v11992_v44  ;;  %v2570_v0 = vadd.f32 %v2568_v53, %v2564_v57 }
 0x45b   :  { %v2641_v35 = vmul.f32 %v11993_v36, %v2549_v31  ;;  %v2571_v50 = vadd.f32 %v2569_v30, %v2565_v12  ;;  %v2594_v25 = vadd.f32 %v2592_v26, %v2588_v11  ;;  %v2595_v46 = vadd.f32 %v2593_v3, %v2589_v43 }
 0x45c   :  { %v2618_v34 = vadd.f32 %v2616_v23, %v2612_v15  ;;  %v2619_v52 = vadd.f32 %v2617_v56, %v2613_v28  ;;  %v2642_v17 = vadd.f32 %v2640_v48, %v2636_v13  ;;  %v11995_v59 = vstv %s11632_s14  ;;  %s9366_s14 = sld [smem:[#allocation10 + $0x5a]] }
 0x45d   :  { %v2643_v1 = vadd.f32 %v2641_v35, %v2637_v20  ;;  %v9170_v16 = vmul.f32 %v11995_v59, %v2980_v4  ;;  %v11997_v22 = vmov %v11995_v59  ;;  %v11999_v31 = vstv %s11991_s11  ;;  %v2147_v35 = vpop.permute.xlu0 %2146  ;;  %s9813_s11 = sld [smem:[#allocation13 + $0x3]] }
 0x45e   :  { %v9174_v44 = vmul.f32 %v11997_v22, %v2981_v38  ;;  %v9178_v36 = vmul.f32 %v11999_v31, %v2980_v4  ;;  %v12001_v33 = vmov %v11999_v31  ;;  %v12003_v12 = vstv %s11994_s28  ;;  %s4135_s28 = smov [#allocation15]  }
 0x45f   :  { %11996 = vst [vmem:[#allocation283_spill] sm:$0xff] %v9170_v16  ;;  %v9182_v57 = vmul.f32 %v12001_v33, %v2981_v38  ;;  %v9186_v11 = vmul.f32 %v12003_v12, %v2980_v4  ;;  %v12005_v43 = vmov %v12003_v12  ;;  %v12007_v13 = vstv %s11636_s7  ;;  %s12098_s7 = sld [smem:[#allocation53_spill]] }
 0x460   :  { %11998 = vst [vmem:[#allocation219_spill] sm:$0xff] %v9174_v44  ;;  %12000 = vst [vmem:[#allocation210_spill] sm:$0xff] %v9178_v36  ;;  %v9190_v15 = vmul.f32 %v12005_v43, %v2981_v38  ;;  %v9194_v28 = vmul.f32 %v12007_v13, %v2980_v4  ;;  %v12009_v20 = vmov %v12007_v13  ;;  %v2282_v30 = vsel %vm12012_vm12, %v9076_v8, %v2281_v21 }
 0x461   :  { %12002 = vst [vmem:[#allocation284_spill] sm:$0xff] %v9182_v57  ;;  %12004 = vst [vmem:[#allocation285_spill] sm:$0xff] %v9186_v11  ;;  %v9198_v53 = vmul.f32 %v12009_v20, %v2981_v38  ;;  %v2283_v33 = vsel %vm12013_vm10, %v2281_v21, %v9076_v8  ;;  %v2300_v26 = vsel %vm12014_vm3, %v2297_v9, %v2299_v47  ;;  %v2149_v38 = vpop.permute.xlu1 %2148  ;;  %v12016_v59 = vstv %s12010_s2  ;;  %s3630_s2 = sshll.u32 %s4135_s28, 4  ;;  %s3631_s2 = int_to_ptr.vmem [resolvable:$true] %s3630_s2 }
 0x462   :  { %12006 = vst [vmem:[#allocation286_spill] sm:$0xff] %v9190_v15  ;;  %12008 = vst [vmem:[#allocation287_spill] sm:$0xff] %v9194_v28  ;;  %v2301_v4 = vsel %vm12015_vm5, %v2299_v47, %v2297_v9  ;;  %v2550_v3 = vsel %vm480_vm11, %v2283_v33, %v2300_v26  ;;  %v2982_v21 = vsel %vm480_vm11, %v2300_v26, %v2283_v33  ;;  %v12017_v31 = vmov %v12016_v59  ;;  %p4087_p11 = scmp.lt.s32.totalorder %s3631_s2, %s3631_s2 }
 0x463   :  { %12011 = vst [vmem:[#allocation214_spill] sm:$0xff] %v9198_v53  ;;  %v2551_v23 = vsel %vm480_vm11, %v2282_v30, %v2301_v4  ;;  %v2983_v8 = vsel %vm480_vm11, %v2301_v4, %v2282_v30  ;;  %v2552_v56 = vsel %vm5669_vm8, %v2550_v3, 0.0  ;;  %v2984_v47 = vsel %vm5251_vm13, %v2982_v21, 0.0 }
 0x464   :  { %v2553_v9 = vsel %vm5484_vm1, %v2551_v23, 0.0  ;;  %v2985_v48 = vsel %vm5757_vm7, %v2983_v8, 0.0  ;;  %v2574_v22 = vmul.f32 %v12016_v59, %v2552_v56  ;;  %v12018_v43 = vstv %s11639_s3  ;;  %s12050_s3 = sld [smem:[#allocation43_spill]] }
 0x465   :  { %v2575_v12 = vmul.f32 %v12017_v31, %v2553_v9  ;;  %v2598_v13 = vmul.f32 %v12018_v43, %v2552_v56  ;;  %v12019_v20 = vmov %v12018_v43  ;;  %v12020_v30 = vstv %s8226_s8  ;;  %s12066_s8 = sld [smem:[#allocation51_spill]] }
 0x466   :  { %v2599_v51 = vmul.f32 %v12019_v20, %v2553_v9  ;;  %v2622_v33 = vmul.f32 %v12020_v30, %v2552_v56  ;;  %v12021_v26 = vmov %v12020_v30  ;;  %v12022_v3 = vstv %s8228_s27  ;;  %v2191_v30 = vpop.permute.xlu1 %2190  ;;  %s9376_s27 = sld [smem:[#allocation10 + $0x5b]] }
 0x467   :  { %v2623_v4 = vmul.f32 %v12021_v26, %v2553_v9  ;;  %v2646_v49 = vmul.f32 %v12022_v3, %v2552_v56  ;;  %v12023_v23 = vmov %v12022_v3  ;;  %v2576_v8 = vadd.f32 %v2574_v22, %v2570_v0  ;;  %v2189_v22 = vpop.permute.xlu0 %2188 }
 0x468   :  { %v2647_v21 = vmul.f32 %v12023_v23, %v2553_v9  ;;  %v2577_v59 = vadd.f32 %v2575_v12, %v2571_v50  ;;  %v2600_v31 = vadd.f32 %v2598_v13, %v2594_v25  ;;  %v2601_v43 = vadd.f32 %v2599_v51, %v2595_v46 }
 0x469   :  { %v2624_v53 = vadd.f32 %v2622_v33, %v2618_v34  ;;  %v2625_v20 = vadd.f32 %v2623_v4, %v2619_v52  ;;  %v2648_v28 = vadd.f32 %v2646_v49, %v2642_v17  ;;  %v12024_v11 = vstv %s8234_s0  ;;  %s9464_s0 = sld [smem:[#allocation10 + $0x5d]] }
 0x46a   :  { %v2649_v15 = vadd.f32 %v2647_v21, %v2643_v1  ;;  %v9244_v57 = vmul.f32 %v12024_v11, %v2984_v47  ;;  %v12026_v26 = vmov %v12024_v11  ;;  %v12028_v56 = vstv %s11643_s13  ;;  %s9354_s13 = sld [smem:[#allocation10 + $0x58]] }
 0x46b   :  { %v9248_v36 = vmul.f32 %v12026_v26, %v2985_v48  ;;  %v9252_v3 = vmul.f32 %v12028_v56, %v2984_v47  ;;  %v12030_v9 = vmov %v12028_v56  ;;  %v12032_v50 = vstv %s11646_s4  ;;  %s12067_s4 = sld [smem:[#allocation59_spill]] }
 0x46c   :  { %12025 = vst [vmem:[#allocation288_spill] sm:$0xff] %v9244_v57  ;;  %v9256_v0 = vmul.f32 %v12030_v9, %v2985_v48  ;;  %v9260_v25 = vmul.f32 %v12032_v50, %v2984_v47  ;;  %v12034_v34 = vmov %v12032_v50  ;;  %v12036_v1 = vstv %s11647_s20  ;;  %s12073_s20 = sld [smem:[#allocation60_spill]] }
 0x46d   :  { %12027 = vst [vmem:[#allocation295_spill] sm:$0xff] %v9248_v36  ;;  %12029 = vst [vmem:[#allocation296_spill] sm:$0xff] %v9252_v3  ;;  %v9264_v46 = vmul.f32 %v12034_v34, %v2985_v48  ;;  %v9268_v17 = vmul.f32 %v12036_v1, %v2984_v47  ;;  %v12038_v52 = vmov %v12036_v1  ;;  %v2144_v12 = vsel %vm139_vm0, %v2141_v6, %v2143_v19 }
 0x46e   :  { %12031 = vst [vmem:[#allocation211_spill] sm:$0xff] %v9256_v0  ;;  %12033 = vst [vmem:[#allocation289_spill] sm:$0xff] %v9260_v25  ;;  %v9272_v11 = vmul.f32 %v12038_v52, %v2985_v48  ;;  %v2145_v13 = vsel %vm139_vm0, %v2143_v19, %v2141_v6  ;;  %vm12040_vm7 = vcmp.lt.s32.totalorder %v11641_v40, 127  ;;  %v12042_v23 = vstv %s8257_s18  ;;  %v2197_v52 = vpop.permute.xlu1 %2196  ;;  %s9454_s18 = sld [smem:[#allocation10 + $0x5c]] }
 0x46f   :  { %12035 = vst [vmem:[#allocation303_spill] sm:$0xff] %v9264_v46  ;;  %12037 = vst [vmem:[#allocation304_spill] sm:$0xff] %v9268_v17  ;;  %v2150_v51 = vsel %vm12040_vm7, %v2147_v35, %v2149_v38  ;;  %v12043_v26 = vmov %v12042_v23  ;;  %v12044_v9 = vstv %s8259_s30  ;;  %v12051_v0 = vstv %s8278_s16  ;;  %s12068_s30 = sld [smem:[#allocation44_spill]]  ;;  %s9474_s16 = sld [smem:[#allocation10 + $0x5e]] }
 0x470   :  { %12039 = vst [vmem:[#allocation290_spill] sm:$0xff] %v9272_v11  ;;  %vm12041_vm8 = vmmov %vm12040_vm7  ;;  %v2650_v48 = vsel %vm480_vm11, %v2145_v13, %v2150_v51  ;;  %v2858_v4 = vsel %vm480_vm11, %v2150_v51, %v2145_v13  ;;  %v12045_v34 = vmov %v12044_v9  ;;  %v2195_v11 = vpop.permute.xlu0 %2194 }
 0x471   :  { %v2151_v47 = vsel %vm12041_vm8, %v2149_v38, %v2147_v35  ;;  %v2652_v19 = vsel %vm5251_vm13, %v2650_v48, 0.0  ;;  %v2860_v35 = vsel %vm5406_vm15, %v2858_v4, 0.0  ;;  %v12048_v48 = vstv %s8272_s29  ;;  %vm12064_vm6 = vmmov %vm12040_vm7  ;;  %s12069_s29 = sld [smem:[#allocation52_spill]] }
 0x472   :  { %v2651_v33 = vsel %vm480_vm11, %v2144_v12, %v2151_v47  ;;  %v2859_v6 = vsel %vm480_vm11, %v2151_v47, %v2144_v12  ;;  %v2668_v21 = vmul.f32 %v12042_v23, %v2652_v19  ;;  %v2692_v50 = vmul.f32 %v12044_v9, %v2652_v19  ;;  %vm12065_vm2 = vmmov %vm12064_vm6 }
 0x473   :  { %v2653_v38 = vsel %vm5310_vm14, %v2651_v33, 0.0  ;;  %v2861_v49 = vsel %vm5484_vm1, %v2859_v6, 0.0  ;;  %v12046_v12 = vstv %s8270_s12  ;;  %v2740_v33 = vmul.f32 %v12048_v48, %v2652_v19  ;;  %s9432_s12 = sld [smem:[#allocation10 + $0x3c]]  ;;  %vm12096_vm4 = vmmov %vm12065_vm2 }
 0x474   :  { %v2669_v56 = vmul.f32 %v12043_v26, %v2653_v38  ;;  %v2693_v1 = vmul.f32 %v12045_v34, %v2653_v38  ;;  %v2716_v13 = vmul.f32 %v12046_v12, %v2652_v19  ;;  %v12047_v51 = vmov %v12046_v12  ;;  %vm12097_vm12 = vmmov %vm12065_vm2 }
 0x475   :  { %v2717_v47 = vmul.f32 %v12047_v51, %v2653_v38  ;;  %v12049_v4 = vmov %v12048_v48  ;;  %v2670_v23 = vadd.f32 %v2668_v21, %v2576_v8  ;;  %v2694_v9 = vadd.f32 %v2692_v50, %v2600_v31  ;;  %vm12107_vm10 = vmmov %vm12065_vm2 }
 0x476   :  { %v2741_v6 = vmul.f32 %v12049_v4, %v2653_v38  ;;  %v2671_v26 = vadd.f32 %v2669_v56, %v2577_v59  ;;  %v2695_v34 = vadd.f32 %v2693_v1, %v2601_v43  ;;  %v2718_v17 = vadd.f32 %v2716_v13, %v2624_v53  ;;  %v2239_v13 = vpop.permute.xlu1 %2238  ;;  %vm12108_vm3 = vmmov %vm12065_vm2 }
 0x477   :  { %v2719_v46 = vadd.f32 %v2717_v47, %v2625_v20  ;;  %v2742_v25 = vadd.f32 %v2740_v33, %v2648_v28  ;;  %v9316_v3 = vmul.f32 %v12051_v0, %v2860_v35  ;;  %v12052_v51 = vmov %v12051_v0 }
 0x478   :  { %v2743_v12 = vadd.f32 %v2741_v6, %v2649_v15  ;;  %v9320_v36 = vmul.f32 %v12052_v51, %v2861_v49  ;;  %v12053_v19 = vstv %s8280_s10  ;;  %v12056_v59 = vstv %s8287_s9  ;;  %s9364_s10 = sld [smem:[#allocation10 + $0x59]]  ;;  %s9452_s9 = sld [smem:[#allocation10 + $0x3f]] }
 0x479   :  { %v9324_v48 = vmul.f32 %v12053_v19, %v2860_v35  ;;  %v12054_v38 = vmov %v12053_v19  ;;  %v9332_v31 = vmul.f32 %v12056_v59, %v2860_v35  ;;  %v12058_v43 = vmov %v12056_v59 }
 0x47a   :  { %v9328_v8 = vmul.f32 %v12054_v38, %v2861_v49  ;;  %v9336_v53 = vmul.f32 %v12058_v43, %v2861_v49  ;;  %v12060_v28 = vstv %s12050_s3  ;;  %v2192_v21 = vsel %vm139_vm0, %v2189_v22, %v2191_v30  ;;  %s4082_s3 = scalar_lea.vmem %s3631_s2, 256 }
 0x47b   :  { %12057 = vst [vmem:[#allocation298_spill] sm:$0xff] %v9332_v31  ;;  %v9340_v15 = vmul.f32 %v12060_v28, %v2860_v35  ;;  %v12062_v20 = vmov %v12060_v28  ;;  %v2193_v56 = vsel %vm139_vm0, %v2191_v30, %v2189_v22  ;;  %v2198_v50 = vsel %vm12064_vm6, %v2195_v11, %v2197_v52  ;;  %p4083_p10 = scmp.ne.s32.totalorder %s3631_s2, %s4082_s3  ;;  %p4088_p12 = scmp.lt.s32.totalorder %s4082_s3, %s4082_s3 }
 0x47c   :  { %12055 = vst [vmem:[#allocation297_spill] sm:$0xff] %v9328_v8  ;;  %12059 = vst [vmem:[#allocation291_spill] sm:$0xff] %v9336_v53  ;;  %v9344_v0 = vmul.f32 %v12062_v20, %v2861_v49  ;;  %v2199_v1 = vsel %vm12065_vm2, %v2197_v52, %v2195_v11  ;;  %v2654_v35 = vsel %vm480_vm11, %v2193_v56, %v2198_v50  ;;  %v2237_v49 = vpop.permute.xlu0 %2236  ;;  %v12070_v6 = vstv %s12066_s8 }
 0x47d   :  { %12061 = vst [vmem:[#allocation305_spill] sm:$0xff] %v9340_v15  ;;  %v2655_v30 = vsel %vm480_vm11, %v2192_v21, %v2199_v1  ;;  %v2862_v22 = vsel %vm480_vm11, %v2198_v50, %v2193_v56  ;;  %v2863_v11 = vsel %vm480_vm11, %v2199_v1, %v2192_v21  ;;  %v2656_v52 = vsel %vm5251_vm13, %v2654_v35, 0.0  ;;  %p4089_p13 = por %p4088_p12, %p4087_p11 }
 0x47e   :  { %12063 = vst [vmem:[#allocation306_spill] sm:$0xff] %v9344_v0  ;;  %v2657_v47 = vsel %vm5310_vm14, %v2655_v30, 0.0  ;;  %v2864_v33 = vsel %vm5406_vm15, %v2862_v22, 0.0  ;;  %v2865_v4 = vsel %vm5484_vm1, %v2863_v11, 0.0  ;;  %v2674_v51 = vmul.f32 %v12070_v6, %v2656_v52 }
 0x47f   :  { %v12071_v19 = vmov %v12070_v6  ;;  %v12072_v59 = vstv %s12067_s4  ;;  %v12075_v21 = vstv %s12068_s30  ;;  %v12078_v35 = vstv %s12069_s29  ;;  %p4090_p0 = pnand %p4089_p13, %p4083_p10 }
 0x480   :  { %v2675_v38 = vmul.f32 %v12071_v19, %v2657_v47  ;;  %v2698_v43 = vmul.f32 %v12072_v59, %v2656_v52  ;;  %v12074_v28 = vmov %v12072_v59  ;;  %v2722_v56 = vmul.f32 %v12075_v21, %v2656_v52 }
 0x481   :  { %v2699_v20 = vmul.f32 %v12074_v28, %v2657_v47  ;;  %v12077_v50 = vmov %v12075_v21  ;;  %v2746_v30 = vmul.f32 %v12078_v35, %v2656_v52  ;;  %v12079_v22 = vmov %v12078_v35 }
 0x482   :  { %v2723_v1 = vmul.f32 %v12077_v50, %v2657_v47  ;;  %v2747_v11 = vmul.f32 %v12079_v22, %v2657_v47  ;;  %v2676_v6 = vadd.f32 %v2674_v51, %v2670_v23  ;;  %v2677_v19 = vadd.f32 %v2675_v38, %v2671_v26  ;;  %v2245_v50 = vpop.permute.xlu1 %2244 }
 0x483   :  { %v2700_v59 = vadd.f32 %v2698_v43, %v2694_v9  ;;  %v2701_v57 = vadd.f32 %v2699_v20, %v2695_v34  ;;  %v2724_v44 = vadd.f32 %v2722_v56, %v2718_v17  ;;  %v2748_v21 = vadd.f32 %v2746_v30, %v2742_v25  ;;  %v2243_v20 = vpop.permute.xlu0 %2242 }
 0x484   :  { %v2725_v28 = vadd.f32 %v2723_v1, %v2719_v46  ;;  %v2749_v16 = vadd.f32 %v2747_v11, %v2743_v12  ;;  %v12080_v63 = vstv %s12073_s20  ;;  %v12084_v23 = vstv %s12076_s26 }
 0x485   :  { %v9396_v52 = vmul.f32 %v12080_v63, %v2864_v33  ;;  %v12082_v35 = vmov %v12080_v63  ;;  %v9404_v51 = vmul.f32 %v12084_v23, %v2864_v33  ;;  %v12086_v26 = vmov %v12084_v23 }
 0x486   :  { %v9400_v47 = vmul.f32 %v12082_v35, %v2865_v4  ;;  %v9408_v9 = vmul.f32 %v12086_v26, %v2865_v4  ;;  %v12088_v17 = vstv %s8352_s25  ;;  %v12092_v12 = vstv %s8354_s17  ;;  %s9440_s17 = sld [smem:[#allocation10 + $0x3d]]  ;;  %s9442_s25 = sld [smem:[#allocation10 + $0x3e]] }
 0x487   :  { %12081 = vst [vmem:[#allocation292_spill] sm:$0xff] %v9396_v52  ;;  %12085 = vst [vmem:[#allocation300_spill] sm:$0xff] %v9404_v51  ;;  %v9412_v46 = vmul.f32 %v12088_v17, %v2864_v33  ;;  %v12090_v25 = vmov %v12088_v17  ;;  %v9420_v38 = vmul.f32 %v12092_v12, %v2864_v33  ;;  %v12094_v63 = vmov %v12092_v12 }
 0x488   :  { %12083 = vst [vmem:[#allocation299_spill] sm:$0xff] %v9400_v47  ;;  %12087 = vst [vmem:[#allocation311_spill] sm:$0xff] %v9408_v9  ;;  %v9416_v34 = vmul.f32 %v12090_v25, %v2865_v4  ;;  %v9424_v43 = vmul.f32 %v12094_v63, %v2865_v4  ;;  %v2240_v56 = vsel %vm139_vm0, %v2237_v49, %v2239_v13  ;;  %v2887_v30 = vstv %s9354_s13  ;;  %v2287_v63 = vpop.permute.xlu1 %2286 }
 0x489   :  { %12089 = vst [vmem:[#allocation293_spill] sm:$0xff] %v9412_v46  ;;  %12093 = vst [vmem:[#allocation308_spill] sm:$0xff] %v9420_v38  ;;  %v2241_v1 = vsel %vm139_vm0, %v2239_v13, %v2237_v49  ;;  %v2911_v22 = vstv %s9364_s10  ;;  %v2935_v11 = vstv %s9366_s14  ;;  %v2959_v35 = vstv %s9376_s27 }
 0x48a   :  { %12091 = vst [vmem:[#allocation307_spill] sm:$0xff] %v9416_v34  ;;  %12095 = vst [vmem:[#allocation312_spill] sm:$0xff] %v9424_v43  ;;  %v2246_v33 = vsel %vm12096_vm4, %v2243_v20, %v2245_v50  ;;  %v2247_v4 = vsel %vm12097_vm12, %v2245_v50, %v2243_v20  ;;  %v12099_v20 = vstv %s8390_s19  ;;  %v12105_v34 = vstv %s12098_s7  ;;  %s9781_s19 = sld [smem:[#allocation12]] }
 0x48b   :  { %v2658_v13 = vsel %vm480_vm11, %v2241_v1, %v2246_v33  ;;  %v2659_v49 = vsel %vm480_vm11, %v2240_v56, %v2247_v4  ;;  %v2866_v23 = vsel %vm480_vm11, %v2246_v33, %v2241_v1  ;;  %v2867_v26 = vsel %vm480_vm11, %v2247_v4, %v2240_v56 }
 0x48c   :  { %v2660_v50 = vsel %vm5251_vm13, %v2658_v13, 0.0  ;;  %v2661_v17 = vsel %vm5310_vm14, %v2659_v49, 0.0  ;;  %v2868_v25 = vsel %vm5406_vm15, %v2866_v23, 0.0  ;;  %v2869_v12 = vsel %vm5484_vm1, %v2867_v26, 0.0  ;;  %v2285_v49 = vpop.permute.xlu0 %2284 }
 0x48d   :  { %v2680_v56 = vmul.f32 %v12099_v20, %v2660_v50  ;;  %v12100_v1 = vmov %v12099_v20  ;;  %v12101_v4 = vstv %s8392_s1  ;;  %v12103_v23 = vstv %s8468_s6  ;;  %s12232_s1 = sld [smem:[#allocation58_spill]]  ;;  %s9784_s6 = sld [smem:[#allocation13]] }
 0x48e   :  { %v2681_v33 = vmul.f32 %v12100_v1, %v2661_v17  ;;  %v2704_v43 = vmul.f32 %v12101_v4, %v2660_v50  ;;  %v12102_v13 = vmov %v12101_v4  ;;  %v2728_v0 = vmul.f32 %v12103_v23, %v2660_v50 }
 0x48f   :  { %v2705_v38 = vmul.f32 %v12102_v13, %v2661_v17  ;;  %v12104_v15 = vmov %v12103_v23  ;;  %v2752_v46 = vmul.f32 %v12105_v34, %v2660_v50  ;;  %v12106_v9 = vmov %v12105_v34 }
 0x490   :  { %v2729_v26 = vmul.f32 %v12104_v15, %v2661_v17  ;;  %v2753_v51 = vmul.f32 %v12106_v9, %v2661_v17  ;;  %v2682_v20 = vadd.f32 %v2680_v56, %v2676_v6  ;;  %v2683_v53 = vadd.f32 %v2681_v33, %v2677_v19  ;;  %v2293_v19 = vpop.permute.xlu1 %2292  ;;  %v2291_v9 = vpop.permute.xlu0 %2290 }
 0x491   :  { %v2706_v1 = vadd.f32 %v2704_v43, %v2700_v59  ;;  %v2707_v31 = vadd.f32 %v2705_v38, %v2701_v57  ;;  %v2730_v4 = vadd.f32 %v2728_v0, %v2724_v44  ;;  %v2754_v47 = vadd.f32 %v2752_v46, %v2748_v21 }
 0x492   :  { %v2731_v13 = vadd.f32 %v2729_v26, %v2725_v28  ;;  %v2755_v52 = vadd.f32 %v2753_v51, %v2749_v16  ;;  %v9486_v8 = vmul.f32 %v2887_v30, %v2868_v25  ;;  %v9488_v15 = vmul.f32 %v2887_v30, %v2869_v12 }
 0x493   :  { %v9490_v34 = vmul.f32 %v2911_v22, %v2868_v25  ;;  %v9492_v6 = vmul.f32 %v2911_v22, %v2869_v12  ;;  %v9494_v57 = vmul.f32 %v2935_v11, %v2868_v25  ;;  %v9496_v44 = vmul.f32 %v2935_v11, %v2869_v12 }
 0x494   :  { %v9498_v0 = vmul.f32 %v2959_v35, %v2868_v25  ;;  %v9500_v16 = vmul.f32 %v2959_v35, %v2869_v12  ;;  %v2288_v59 = vsel %vm139_vm0, %v2285_v49, %v2287_v63  ;;  %v2289_v28 = vsel %vm139_vm0, %v2287_v63, %v2285_v49 }
 0x495   :  { %v2685_v21 = vstv %s9432_s12  ;;  %v2709_v51 = vstv %s9440_s17  ;;  %v2733_v46 = vstv %s9442_s25  ;;  %v2757_v38 = vstv %s9452_s9 }
 0x496   :  { %v2893_v43 = vstv %s9454_s18  ;;  %v2917_v30 = vstv %s9464_s0  ;;  %v2941_v22 = vstv %s9474_s16  ;;  %v2294_v35 = vsel %vm12107_vm10, %v2291_v9, %v2293_v19 }
 0x497   :  { %v2295_v50 = vsel %vm12108_vm3, %v2293_v19, %v2291_v9  ;;  %v2662_v17 = vsel %vm480_vm11, %v2289_v28, %v2294_v35  ;;  %v2870_v12 = vsel %vm480_vm11, %v2294_v35, %v2289_v28 }
 0x498   :  { %v2663_v25 = vsel %vm480_vm11, %v2288_v59, %v2295_v50  ;;  %v2871_v63 = vsel %vm480_vm11, %v2295_v50, %v2288_v59  ;;  %v2664_v56 = vsel %vm5251_vm13, %v2662_v17, 0.0  ;;  %v9532_v40 = vsel %vm5406_vm15, %v2870_v12, 0.0 }
 0x499   :  { %v2665_v33 = vsel %vm5310_vm14, %v2663_v25, 0.0  ;;  %v9536_v49 = vsel %vm5484_vm1, %v2871_v63, 0.0  ;;  %v2686_v23 = vmul.f32 %v2685_v21, %v2664_v56  ;;  %v2710_v19 = vmul.f32 %v2709_v51, %v2664_v56 }
 0x49a   :  { %v2687_v26 = vmul.f32 %v2685_v21, %v2665_v33  ;;  %v2711_v28 = vmul.f32 %v2709_v51, %v2665_v33  ;;  %v2734_v32 = vmul.f32 %v2733_v46, %v2664_v56  ;;  %v2735_v59 = vmul.f32 %v2733_v46, %v2665_v33 }
 0x49b   :  { %v2758_v9 = vmul.f32 %v2757_v38, %v2664_v56  ;;  %v2759_v14 = vmul.f32 %v2757_v38, %v2665_v33  ;;  %v2688_v35 = vadd.f32 %v2686_v23, %v2682_v20  ;;  %v2712_v60 = vadd.f32 %v2710_v19, %v2706_v1  ;;  %v12110_v1 = vld [vmem:[#allocation220_spill] sm:$0xff]  ;;  %v12115_v56 = vld [vmem:[#allocation222_spill] sm:$0xff]  ;;  %v12116_v33 = vld [vmem:[#allocation223_spill] sm:$0xff] }
 0x49c   :  { %v2689_v50 = vadd.f32 %v2687_v26, %v2683_v53  ;;  %v2713_v17 = vadd.f32 %v2711_v28, %v2707_v31  ;;  %v2736_v25 = vadd.f32 %v2734_v32, %v2730_v4  ;;  %v2737_v7 = vadd.f32 %v2735_v59, %v2731_v13  ;;  %v12111_v4 = vld [vmem:[#allocation221_spill] sm:$0xff]  ;;  %v12112_v13 = vld [vmem:[#allocation212_spill] sm:$0xff]  ;;  %v12118_v26 = vld [vmem:[#allocation182_spill] sm:$0xff] }
 0x49d   :  { %v2760_v12 = vadd.f32 %v2758_v9, %v2754_v47  ;;  %v2761_v11 = vadd.f32 %v2759_v14, %v2755_v52  ;;  %v2766_v42 = vadd.f32 %v8004_v27, %v2688_v35  ;;  %v2790_v21 = vadd.f32 %v8023_v37, %v2712_v60  ;;  %v12109_v47 = vld [vmem:[#allocation215_spill] sm:$0xff]  ;;  %v12119_v28 = vld [vmem:[#allocation154_spill] sm:$0xff]  ;;  %v12120_v59 = vld [vmem:[#allocation224_spill] sm:$0xff] }
 0x49e   :  { %v2767_v63 = vadd.f32 %v8016_v58, %v2689_v50  ;;  %v2791_v51 = vadd.f32 %v8026_v18, %v2713_v17  ;;  %v2814_v46 = vadd.f32 %v8029_v55, %v2736_v25  ;;  %v2815_v38 = vadd.f32 %v8032_v10, %v2737_v7  ;;  %v12121_v14 = vld [vmem:[#allocation228_spill] sm:$0xff]  ;;  %v12122_v50 = vld [vmem:[#allocation158_spill] sm:$0xff]  ;;  %v12123_v17 = vld [vmem:[#allocation151_spill] sm:$0xff] }
 0x49f   :  { %v2838_v53 = vadd.f32 %v8045_v2, %v2760_v12  ;;  %v2839_v31 = vadd.f32 %v8048_v39, %v2761_v11  ;;  %v2772_v20 = vadd.f32 %v8039_v24, %v2766_v42  ;;  %v2796_v27 = vadd.f32 %v8057_v62, %v2790_v21  ;;  %v12113_v62 = vld [vmem:[#allocation216_spill] sm:$0xff]  ;;  %v12114_v11 = vld [vmem:[#allocation227_spill] sm:$0xff] }
 0x4a0   :  { %v2773_v52 = vadd.f32 %v8042_v61, %v2767_v63  ;;  %v2797_v58 = vadd.f32 %v8060_v29, %v2791_v51  ;;  %v2820_v37 = vadd.f32 %v8063_v41, %v2814_v46  ;;  %v2821_v18 = vadd.f32 %v8066_v45, %v2815_v38  ;;  %v12124_v7 = vld [vmem:[#allocation232_spill] sm:$0xff]  ;;  %v12125_v38 = vld [vmem:[#allocation297_spill] sm:$0xff] }
 0x4a1   :  { %v2844_v55 = vadd.f32 %v8077_v5, %v2838_v53  ;;  %v2845_v10 = vadd.f32 %v8080_v54, %v2839_v31  ;;  %v2778_v2 = vadd.f32 %v12109_v47, %v2772_v20  ;;  %v2802_v24 = vadd.f32 %v12111_v4, %v2796_v27  ;;  %v12117_v54 = vld [vmem:[#allocation231_spill] sm:$0xff]  ;;  %v12132_v4 = vld [vmem:[#allocation293_spill] sm:$0xff] }
 0x4a2   :  { %v2779_v39 = vadd.f32 %v12110_v1, %v2773_v52  ;;  %v2803_v61 = vadd.f32 %v12112_v13, %v2797_v58  ;;  %v2826_v29 = vadd.f32 %v12113_v62, %v2820_v37  ;;  %v2827_v41 = vadd.f32 %v12114_v11, %v2821_v18  ;;  %v12126_v52 = vld [vmem:[#allocation292_spill] sm:$0xff]  ;;  %v12127_v27 = vld [vmem:[#allocation299_spill] sm:$0xff]  ;;  %v12128_v58 = vld [vmem:[#allocation298_spill] sm:$0xff] }
 0x4a3   :  { %v2850_v45 = vadd.f32 %v12115_v56, %v2844_v55  ;;  %v2851_v5 = vadd.f32 %v12116_v33, %v2845_v10  ;;  %v2784_v23 = vadd.f32 %v12117_v54, %v2778_v2  ;;  %v2808_v32 = vadd.f32 %v12119_v28, %v2802_v24  ;;  %v12129_v18 = vld [vmem:[#allocation291_spill] sm:$0xff]  ;;  %v12130_v10 = vld [vmem:[#allocation300_spill] sm:$0xff]  ;;  %v12134_v11 = vld [vmem:[#allocation305_spill] sm:$0xff] }
 0x4a4   :  { %v2785_v19 = vadd.f32 %v12118_v26, %v2779_v39  ;;  %v2809_v9 = vadd.f32 %v12120_v59, %v2803_v61  ;;  %v2832_v35 = vadd.f32 %v12121_v14, %v2826_v29  ;;  %v2833_v60 = vadd.f32 %v12122_v50, %v2827_v41  ;;  %v12131_v47 = vld [vmem:[#allocation311_spill] sm:$0xff]  ;;  %v12135_v56 = vld [vmem:[#allocation306_spill] sm:$0xff] }
 0x4a5   :  { %v2856_v25 = vadd.f32 %v12123_v17, %v2850_v45  ;;  %v2857_v12 = vadd.f32 %v12124_v7, %v2851_v5  ;;  %v2878_v42 = vadd.f32 %v9316_v3, %v2784_v23  ;;  %v2894_v21 = vmul.f32 %v2893_v43, %v9532_v40  ;;  %v12133_v13 = vld [vmem:[#allocation307_spill] sm:$0xff]  ;;  %v12136_v23 = vld [vmem:[#allocation308_spill] sm:$0xff] }
 0x4a6   :  { %v2879_v63 = vadd.f32 %v9320_v36, %v2785_v19  ;;  %v2895_v51 = vmul.f32 %v2893_v43, %v9536_v49  ;;  %v2902_v46 = vadd.f32 %v9324_v48, %v2808_v32  ;;  %v2903_v53 = vadd.f32 %v12125_v38, %v2809_v9  ;;  %v12137_v19 = vld [vmem:[#allocation312_spill] sm:$0xff]  ;;  %v12140_v50 = vld [vmem:[#allocation271_spill] sm:$0xff] }
 0x4a7   :  { %v2918_v31 = vmul.f32 %v2917_v30, %v9532_v40  ;;  %v2919_v20 = vmul.f32 %v2917_v30, %v9536_v49  ;;  %v2884_v3 = vadd.f32 %v12126_v52, %v2878_v42  ;;  %v2926_v37 = vadd.f32 %v12128_v58, %v2832_v35  ;;  %v12149_v52 = vld [vmem:[#allocation278_spill] sm:$0xff]  ;;  %v12151_v58 = vld [vmem:[#allocation281_spill] sm:$0xff] }
 0x4a8   :  { %v2885_v36 = vadd.f32 %v12127_v27, %v2879_v63  ;;  %v2927_v55 = vadd.f32 %v12129_v18, %v2833_v60  ;;  %v2908_v43 = vadd.f32 %v12130_v10, %v2902_v46  ;;  %v2909_v48 = vadd.f32 %v12131_v47, %v2903_v53  ;;  %v12141_v60 = vld [vmem:[#allocation272_spill] sm:$0xff]  ;;  %v12144_v63 = vld [vmem:[#allocation274_spill] sm:$0xff]  ;;  %v12152_v18 = vld [vmem:[#allocation283_spill] sm:$0xff] }
 0x4a9   :  { %v2942_v2 = vmul.f32 %v2941_v22, %v9532_v40  ;;  %v2943_v1 = vmul.f32 %v2941_v22, %v9536_v49  ;;  %v2890_v30 = vadd.f32 %v9486_v8, %v2884_v3  ;;  %v2932_v24 = vadd.f32 %v12132_v4, %v2926_v37  ;;  %v12146_v53 = vld [vmem:[#allocation280_spill] sm:$0xff]  ;;  %v12150_v27 = vld [vmem:[#allocation218_spill] sm:$0xff]  ;;  %v12153_v10 = vld [vmem:[#allocation219_spill] sm:$0xff] }
 0x4aa   :  { %v2891_v39 = vadd.f32 %v9488_v15, %v2885_v36  ;;  %v2933_v61 = vadd.f32 %v12133_v13, %v2927_v55  ;;  %v2914_v62 = vadd.f32 %v9490_v34, %v2908_v43  ;;  %v2915_v29 = vadd.f32 %v9492_v6, %v2909_v48  ;;  %v12154_v47 = vld [vmem:[#allocation277_spill] sm:$0xff]  ;;  %v12157_v4 = vld [vmem:[#allocation284_spill] sm:$0xff] }
 0x4ab   :  { %v2950_v41 = vadd.f32 %v12134_v11, %v2856_v25  ;;  %v2951_v45 = vadd.f32 %v12135_v56, %v2857_v12  ;;  %v2896_v33 = vadd.f32 %v2894_v21, %v2890_v30  ;;  %v2938_v8 = vadd.f32 %v9494_v57, %v2932_v24  ;;  %v12142_v25 = vld [vmem:[#allocation275_spill] sm:$0xff]  ;;  %v12143_v12 = vld [vmem:[#allocation273_spill] sm:$0xff]  ;;  %v12156_v30 = vld [vmem:[#allocation210_spill] sm:$0xff] }
 0x4ac   :  { %v2897_v22 = vadd.f32 %v2895_v51, %v2891_v39  ;;  %v2939_v15 = vadd.f32 %v9496_v44, %v2933_v61  ;;  %v2920_v5 = vadd.f32 %v2918_v31, %v2914_v62  ;;  %v2921_v54 = vadd.f32 %v2919_v20, %v2915_v29  ;;  %v12145_v51 = vld [vmem:[#allocation276_spill] sm:$0xff]  ;;  %v12147_v31 = vld [vmem:[#allocation217_spill] sm:$0xff]  ;;  %v12159_v62 = vld [vmem:[#allocation286_spill] sm:$0xff] }
 0x4ad   :  { %v2956_v26 = vadd.f32 %v12136_v23, %v2950_v41  ;;  %v2957_v28 = vadd.f32 %v12137_v19, %v2951_v45  ;;  %v2944_v32 = vadd.f32 %v2942_v2, %v2938_v8  ;;  %v12138_v6 = vstv %s9476_s15  ;;  %v12148_v20 = vld [vmem:[#allocation209_spill] sm:$0xff]  ;;  %v12155_v2 = vld [vmem:[#allocation279_spill] sm:$0xff]  ;;  %v12160_v11 = vld [vmem:[#allocation288_spill] sm:$0xff] }
 0x4ae   :  { %v2945_v34 = vadd.f32 %v2943_v1, %v2939_v15  ;;  %v2966_v59 = vmul.f32 %v12138_v6, %v9532_v40  ;;  %v12139_v9 = vmov %v12138_v6  ;;  %v2990_v44 = vadd.f32 %v12140_v50, %v2896_v33  ;;  %v12158_v13 = vld [vmem:[#allocation285_spill] sm:$0xff]  ;;  %v12161_v56 = vld [vmem:[#allocation295_spill] sm:$0xff]  ;;  %v12162_v33 = vld [vmem:[#allocation282_spill] sm:$0xff] }
 0x4af   :  { %v2967_v14 = vmul.f32 %v12139_v9, %v9536_v49  ;;  %v2962_v35 = vadd.f32 %v9498_v0, %v2956_v26  ;;  %v2963_v57 = vadd.f32 %v9500_v16, %v2957_v28  ;;  %v2991_v17 = vadd.f32 %v12141_v60, %v2897_v22  ;;  %v12163_v8 = vld [vmem:[#allocation213_spill] sm:$0xff]  ;;  %v12165_v23 = vld [vmem:[#allocation211_spill] sm:$0xff]  ;;  %v12169_v9 = vld [vmem:[#allocation214_spill] sm:$0xff] }
 0x4b0   :  { %v3014_v7 = vadd.f32 %v12142_v25, %v2920_v5  ;;  %v3015_v42 = vadd.f32 %v12143_v12, %v2921_v54  ;;  %v3038_v21 = vadd.f32 %v12144_v63, %v2944_v32  ;;  %v3039_v46 = vadd.f32 %v12145_v51, %v2945_v34  ;;  %v12164_v5 = vld [vmem:[#allocation296_spill] sm:$0xff]  ;;  %v12166_v19 = vld [vmem:[#allocation289_spill] sm:$0xff]  ;;  %v12167_v32 = vld [vmem:[#allocation303_spill] sm:$0xff] }
 0x4b1   :  { %v2968_v40 = vadd.f32 %v2966_v59, %v2962_v35  ;;  %v2969_v38 = vadd.f32 %v2967_v14, %v2963_v57  ;;  %v2996_v49 = vadd.f32 %v12146_v53, %v2990_v44  ;;  %v2997_v0 = vadd.f32 %v12147_v31, %v2991_v17  ;;  %v12168_v6 = vld [vmem:[#allocation287_spill] sm:$0xff]  ;;  %v12171_v50 = vld [vmem:[#allocation248_spill] sm:$0xff]  ;;  %v12173_v25 = vld [vmem:[#allocation241_spill] sm:$0xff] }
 0x4b2   :  { %v3020_v16 = vadd.f32 %v12148_v20, %v3014_v7  ;;  %v3021_v3 = vadd.f32 %v12149_v52, %v3015_v42  ;;  %v3044_v36 = vadd.f32 %v12150_v27, %v3038_v21  ;;  %v3045_v37 = vadd.f32 %v12151_v58, %v3039_v46  ;;  %v12170_v35 = vld [vmem:[#allocation255_spill] sm:$0xff]  ;;  %v12172_v60 = vld [vmem:[#allocation240_spill] sm:$0xff]  ;;  %v12174_v12 = vld [vmem:[#allocation249_spill] sm:$0xff] }
 0x4b3   :  { %v3002_v55 = vadd.f32 %v12152_v18, %v2996_v49  ;;  %v3003_v43 = vadd.f32 %v12153_v10, %v2997_v0  ;;  %v3062_v48 = vadd.f32 %v12154_v47, %v2968_v40  ;;  %v3063_v1 = vadd.f32 %v12155_v2, %v2969_v38  ;;  %v12175_v63 = vld [vmem:[#allocation256_spill] sm:$0xff]  ;;  %v12177_v40 = vld [vmem:[#allocation290_spill] sm:$0xff]  ;;  %v12180_v20 = vld [vmem:[#allocation263_spill] sm:$0xff] }
 0x4b4   :  { %v3026_v39 = vadd.f32 %v12156_v30, %v3020_v16  ;;  %v3027_v24 = vadd.f32 %v12157_v4, %v3021_v3  ;;  %v3050_v61 = vadd.f32 %v12158_v13, %v3044_v36  ;;  %v3051_v29 = vadd.f32 %v12159_v62, %v3045_v37  ;;  %v12176_v51 = vld [vmem:[#allocation304_spill] sm:$0xff]  ;;  %v12178_v53 = vld [vmem:[#allocation250_spill] sm:$0xff]  ;;  %v12181_v52 = vld [vmem:[#allocation259_spill] sm:$0xff] }
 0x4b5   :  { %v3008_v41 = vadd.f32 %v12160_v11, %v3002_v55  ;;  %v3009_v45 = vadd.f32 %v12161_v56, %v3003_v43  ;;  %v3068_v22 = vadd.f32 %v12162_v33, %v3062_v48  ;;  %v3069_v15 = vadd.f32 %v12163_v8, %v3063_v1  ;;  %v12179_v31 = vld [vmem:[#allocation258_spill] sm:$0xff]  ;;  %v12182_v27 = vld [vmem:[#allocation267_spill] sm:$0xff]  ;;  %v12183_v58 = vld [vmem:[#allocation189_spill] sm:$0xff] }
 0x4b6   :  { %v3032_v54 = vadd.f32 %v12164_v5, %v3026_v39  ;;  %v3033_v26 = vadd.f32 %v12165_v23, %v3027_v24  ;;  %v3056_v28 = vadd.f32 %v12166_v19, %v3050_v61  ;;  %v3057_v34 = vadd.f32 %v12167_v32, %v3051_v29  ;;  %v12184_v18 = vld [vmem:[#allocation257_spill] sm:$0xff]  ;;  %v12185_v10 = vld [vmem:[#allocation242_spill] sm:$0xff]  ;;  %v12187_v2 = vld [vmem:[#allocation260_spill] sm:$0xff] }
 0x4b7   :  { %v3074_v59 = vadd.f32 %v12168_v6, %v3068_v22  ;;  %v3075_v14 = vadd.f32 %v12169_v9, %v3069_v15  ;;  %v3102_v57 = vadd.f32 %v12170_v35, %v3008_v41  ;;  %v3103_v44 = vadd.f32 %v12171_v50, %v3009_v45  ;;  %v12186_v47 = vld [vmem:[#allocation265_spill] sm:$0xff]  ;;  %v12189_v4 = vld [vmem:[#allocation264_spill] sm:$0xff]  ;;  %v12190_v13 = vld [vmem:[#allocation262_spill] sm:$0xff] }
 0x4b8   :  { %v3126_v17 = vadd.f32 %v12172_v60, %v3032_v54  ;;  %v3127_v7 = vadd.f32 %v12173_v25, %v3033_v26  ;;  %v3150_v42 = vadd.f32 %v12174_v12, %v3056_v28  ;;  %v3151_v21 = vadd.f32 %v12175_v63, %v3057_v34  ;;  %v12188_v30 = vld [vmem:[#allocation269_spill] sm:$0xff]  ;;  %v12191_v62 = vld [vmem:[#allocation268_spill] sm:$0xff]  ;;  %v12192_v11 = vld [vmem:[#allocation190_spill] sm:$0xff] }
 0x4b9   :  { %v3080_v46 = vadd.f32 %v12176_v51, %v3074_v59  ;;  %v3081_v38 = vadd.f32 %v12177_v40, %v3075_v14  ;;  %v3108_v49 = vadd.f32 %v12178_v53, %v3102_v57  ;;  %v3109_v0 = vadd.f32 %v12179_v31, %v3103_v44  ;;  %v12193_v56 = vld [vmem:[#allocation23_spill] sm:$0xff]  ;;  %v12195_v8 = vld [vmem:[#allocation261_spill] sm:$0xff]  ;;  %v12197_v23 = vld [vmem:[#allocation29_spill] sm:$0xff] }
 0x4ba   :  { %v3132_v16 = vadd.f32 %v12180_v20, %v3126_v17  ;;  %v3133_v3 = vadd.f32 %v12181_v52, %v3127_v7  ;;  %v3156_v36 = vadd.f32 %v12182_v27, %v3150_v42  ;;  %v3157_v37 = vadd.f32 %v12183_v58, %v3151_v21  ;;  %v12194_v33 = vld [vmem:[#allocation27_spill] sm:$0xff]  ;;  %v12196_v5 = vld [vmem:[#allocation22_spill] sm:$0xff]  ;;  %v12199_v32 = vld [vmem:[#allocation25_spill] sm:$0xff] }
 0x4bb   :  { %v3174_v55 = vadd.f32 %v12184_v18, %v3080_v46  ;;  %v3175_v43 = vadd.f32 %v12185_v10, %v3081_v38  ;;  %v3114_v48 = vadd.f32 %v12186_v47, %v3108_v49  ;;  %v3115_v1 = vadd.f32 %v12187_v2, %v3109_v0  ;;  %v12198_v19 = vld [vmem:[#allocation26_spill] sm:$0xff]  ;;  %v12201_v9 = vld [vmem:[#allocation156_spill] sm:$0xff]  ;;  %v12202_v35 = vld [vmem:[#allocation266_spill] sm:$0xff] }
 0x4bc   :  { %v3138_v39 = vadd.f32 %v12188_v30, %v3132_v16  ;;  %v3139_v24 = vadd.f32 %v12189_v4, %v3133_v3  ;;  %v3162_v61 = vadd.f32 %v12190_v13, %v3156_v36  ;;  %v3163_v29 = vadd.f32 %v12191_v62, %v3157_v37  ;;  %v12200_v6 = vld [vmem:[#allocation185_spill] sm:$0xff]  ;;  %v12203_v50 = vld [vmem:[#allocation270_spill] sm:$0xff]  ;;  %v12206_v12 = vld [vmem:[#allocation149_spill] sm:$0xff] }
 0x4bd   :  { %v3120_v41 = vadd.f32 %v12192_v11, %v3114_v48  ;;  %v3121_v45 = vadd.f32 %v12193_v56, %v3115_v1  ;;  %v3180_v22 = vadd.f32 %v12194_v33, %v3174_v55  ;;  %v3181_v15 = vadd.f32 %v12195_v8, %v3175_v43  ;;  %v12204_v60 = vld [vmem:[#allocation225_spill] sm:$0xff]  ;;  %v12207_v63 = vld [vmem:[#allocation187_spill] sm:$0xff]  ;;  %v12208_v51 = vld [vmem:[#allocation157_spill] sm:$0xff] }
 0x4be   :  { %v3144_v54 = vadd.f32 %v12196_v5, %v3138_v39  ;;  %v3145_v26 = vadd.f32 %v12197_v23, %v3139_v24  ;;  %v3168_v28 = vadd.f32 %v12198_v19, %v3162_v61  ;;  %v3169_v34 = vadd.f32 %v12199_v32, %v3163_v29  ;;  %v12205_v25 = vld [vmem:[#allocation229_spill] sm:$0xff]  ;;  %v12209_v40 = vld [vmem:[#allocation226_spill] sm:$0xff]  ;;  %v12210_v53 = vld [vmem:[#allocation177_spill] sm:$0xff] }
 0x4bf   :  { %v3214_v59 = vadd.f32 %v12200_v6, %v3120_v41  ;;  %v3215_v14 = vadd.f32 %v12201_v9, %v3121_v45  ;;  %v3186_v57 = vadd.f32 %v12202_v35, %v3180_v22  ;;  %v3187_v44 = vadd.f32 %v12203_v50, %v3181_v15  ;;  %v12211_v31 = vld [vmem:[#allocation146_spill] sm:$0xff]  ;;  %v12213_v52 = vld [vmem:[#allocation150_spill] sm:$0xff]  ;;  %v12214_v27 = vld [vmem:[#allocation188_spill] sm:$0xff] }
 0x4c0   :  { %v3238_v17 = vadd.f32 %v12204_v60, %v3144_v54  ;;  %v3239_v7 = vadd.f32 %v12205_v25, %v3145_v26  ;;  %v3262_v42 = vadd.f32 %v12206_v12, %v3168_v28  ;;  %v3263_v21 = vadd.f32 %v12207_v63, %v3169_v34  ;;  %v12212_v20 = vld [vmem:[#allocation230_spill] sm:$0xff]  ;;  %v12216_v18 = vld [vmem:[#allocation235_spill] sm:$0xff]  ;;  %v12218_v47 = vld [vmem:[#allocation233_spill] sm:$0xff] }
 0x4c1   :  { %v3220_v46 = vadd.f32 %v12208_v51, %v3214_v59  ;;  %v3221_v38 = vadd.f32 %v12209_v40, %v3215_v14  ;;  %v3192_v49 = vadd.f32 %v12210_v53, %v3186_v57  ;;  %v3193_v0 = vadd.f32 %v12211_v31, %v3187_v44  ;;  %v12215_v58 = vld [vmem:[#allocation234_spill] sm:$0xff]  ;;  %v12217_v10 = vld [vmem:[#allocation243_spill] sm:$0xff]  ;;  %v12219_v2 = vld [vmem:[#allocation153_spill] sm:$0xff] }
 0x4c2   :  { %v3244_v16 = vadd.f32 %v12212_v20, %v3238_v17  ;;  %v3245_v3 = vadd.f32 %v12213_v52, %v3239_v7  ;;  %v3268_v36 = vadd.f32 %v12214_v27, %v3262_v42  ;;  %v3269_v37 = vadd.f32 %v12215_v58, %v3263_v21  ;;  %v12220_v30 = vld [vmem:[#allocation148_spill] sm:$0xff]  ;;  %v12223_v62 = vld [vmem:[#allocation236_spill] sm:$0xff]  ;;  %v12224_v11 = vld [vmem:[#allocation253_spill] sm:$0xff] }
 0x4c3   :  { %v3226_v55 = vadd.f32 %v12216_v18, %v3220_v46  ;;  %v3227_v43 = vadd.f32 %v12217_v10, %v3221_v38  ;;  %v3286_v48 = vadd.f32 %v12218_v47, %v3192_v49  ;;  %v3287_v1 = vadd.f32 %v12219_v2, %v3193_v0  ;;  %v12221_v4 = vld [vmem:[#allocation191_spill] sm:$0xff]  ;;  %v12225_v56 = vld [vmem:[#allocation238_spill] sm:$0xff]  ;;  %v12233_v63 = vld [vmem:[#allocation244_spill] sm:$0xff] }
 0x4c4   :  { %v3250_v39 = vadd.f32 %v12220_v30, %v3244_v16  ;;  %v3251_v24 = vadd.f32 %v12221_v4, %v3245_v3  ;;  %v12222_v13 = vld [vmem:[#allocation251_spill] sm:$0xff]  ;;  %v3275_v29 = vadd.f32 %v12223_v62, %v3269_v37  ;;  %v12227_v8 = vld [vmem:[#allocation155_spill] sm:$0xff]  ;;  %v12234_v21 = vstv %s12232_s1  ;;  %v12235_v46 = vld [vmem:[#allocation237_spill] sm:$0xff] }
 0x4c5   :  { %v3274_v61 = vadd.f32 %v12222_v13, %v3268_v36  ;;  %v9703_v41 = vadd.f32 %v12224_v11, %v3226_v55  ;;  %v9706_v45 = vadd.f32 %v12225_v56, %v3227_v43  ;;  %v12226_v33 = vld [vmem:[#allocation152_spill] sm:$0xff]  ;;  %v3293_v15 = vadd.f32 %v12227_v8, %v3287_v1  ;;  %v12228_v5 = vld [vmem:[#allocation246_spill] sm:$0xff]  ;;  %v12237_v53 = vld [vmem:[#allocation245_spill] sm:$0xff] }
 0x4c6   :  { %v3292_v22 = vadd.f32 %v12226_v33, %v3286_v48  ;;  %v9711_v54 = vadd.f32 %v12228_v5, %v3250_v39  ;;  %v12229_v23 = vld [vmem:[#allocation239_spill] sm:$0xff]  ;;  %v12231_v32 = vld [vmem:[#allocation254_spill] sm:$0xff]  ;;  %v3302_v51 = vmul.f32 %v12234_v21, %v12233_v63  ;;  %v12236_v40 = vmov %v12234_v21  ;;  %v12238_v31 = vld [vmem:[#allocation252_spill] sm:$0xff] }
 0x4c7   :  { %v9714_v26 = vadd.f32 %v12229_v23, %v3251_v24  ;;  %v12230_v19 = vld [vmem:[#allocation247_spill] sm:$0xff]  ;;  %v9720_v34 = vadd.f32 %v12231_v32, %v3275_v29  ;;  %v3308_v6 = vsel %vm1939_vm9, %v9703_v41, 0.0  ;;  %v3309_v59 = vsel %vm1939_vm9, %v9706_v45, 0.0 }
 0x4c8   :  { %v9717_v28 = vadd.f32 %v12230_v19, %v3274_v61  ;;  %v3320_v9 = vmul.f32 %v9703_v41, %v9703_v41  ;;  %v3321_v14 = vmul.f32 %v9706_v45, %v9706_v45  ;;  %v3390_v35 = vsel %vm1939_vm9, %v9711_v54, 0.0 }
 0x4c9   :  { %v3391_v57 = vsel %vm1939_vm9, %v9714_v26, 0.0  ;;  %v3310_v50 = vadd.f32 %v3309_v59, %v3308_v6  ;;  %v3470_v7 = vsel %vm1939_vm9, %v9720_v34, 0.0  ;;  %v3482_v42 = vmul.f32 %v9720_v34, %v9720_v34 }
 0x4ca   :  { %v3469_v44 = vsel %vm1939_vm9, %v9717_v28, 0.0  ;;  %v3392_v60 = vadd.f32 %v3391_v57, %v3390_v35  ;;  %v3322_v17 = vsel %vm1939_vm9, %v3320_v9, 0.0  ;;  %v3323_v25 = vsel %vm1939_vm9, %v3321_v14, 0.0 }
 0x4cb   :  { %3311 = vadd.xlane.f32.xlu0 %v3310_v50  ;;  %v3481_v12 = vmul.f32 %v9717_v28, %v9717_v28  ;;  %v3303_v38 = vmul.f32 %v12236_v40, %v12235_v46  ;;  %v3298_v49 = vadd.f32 %v12237_v53, %v3292_v22  ;;  %v3299_v0 = vadd.f32 %v12238_v31, %v3293_v15 }
 0x4cc   :  { %3393 = vadd.xlane.f32.xlu1 %v3392_v60  ;;  %v3324_v20 = vadd.f32 %v3323_v25, %v3322_v17  ;;  %v3471_v16 = vadd.f32 %v3470_v7, %v3469_v44  ;;  %v3402_v52 = vmul.f32 %v9711_v54, %v9711_v54  ;;  %v3403_v3 = vmul.f32 %v9714_v26, %v9714_v26 }
 0x4cd   :  { %v3483_v27 = vsel %vm1939_vm9, %v3481_v12, 0.0  ;;  %v3484_v36 = vsel %vm1939_vm9, %v3482_v42, 0.0  ;;  %v9758_v58 = vadd.f32 %v3302_v51, %v3298_v49  ;;  %v9760_v37 = vadd.f32 %v3303_v38, %v3299_v0 }
 0x4ce   :  { %v3485_v10 = vadd.f32 %v3484_v36, %v3483_v27  ;;  %v3404_v47 = vsel %vm1939_vm9, %v3402_v52, 0.0  ;;  %v3405_v48 = vsel %vm1939_vm9, %v3403_v3, 0.0 }
 0x4cf   :  { %3472 = vadd.xlane.f32.xlu0 %v3471_v16  ;;  %v3548_v18 = vsel %vm1939_vm9, %v9758_v58, 0.0  ;;  %v3549_v55 = vsel %vm1939_vm9, %v9760_v37, 0.0  ;;  %v3560_v2 = vmul.f32 %v9758_v58, %v9758_v58  ;;  %v3561_v1 = vmul.f32 %v9760_v37, %v9760_v37 }
 0x4d0   :  { %3325 = vadd.xlane.f32.xlu1 %v3324_v20  ;;  %v3550_v43 = vadd.f32 %v3549_v55, %v3548_v18  ;;  %v3406_v30 = vadd.f32 %v3405_v48, %v3404_v47 }
 0x4d1   :  { %v3562_v39 = vsel %vm1939_vm9, %v3560_v2, 0.0  ;;  %v3563_v4 = vsel %vm1939_vm9, %v3561_v1, 0.0 }
 0x4d2   :  { %v3564_v24 = vadd.f32 %v3563_v4, %v3562_v39 }
 0x4d3   :  { %3551 = vadd.xlane.f32.xlu0 %v3550_v43 }
 0x4d4   :  { %3486 = vadd.xlane.f32.xlu1 %v3485_v10 }
 0x4d7   :  { %3407 = vadd.xlane.f32.xlu0 %v3406_v30 }
 0x4db   :  { %3565 = vadd.xlane.f32.xlu0 %v3564_v24 }
 0x558   :  { %v3312_v13 = vpop.xlane.xlu0 %3311 }
 0x559   :  { %v3394_v61 = vpop.xlane.xlu1 %3393  ;;  %v3313_v62 = vsel %vm1939_vm9, %v3312_v13, 0.0 }
 0x55a   :  { %v3395_v29 = vsel %vm1939_vm9, %v3394_v61, 0.0  ;;  %v3314_v11 = vrot.slane %v3313_v62, 4 }
 0x55b   :  { %v3396_v56 = vrot.slane %v3395_v29, 4 }
 0x55c   :  { %v3315_v33 = vadd.f32 %v3314_v11, %v3313_v62  ;;  %v3473_v22 = vpop.xlane.xlu0 %3472 }
 0x55d   :  { %v3397_v8 = vadd.f32 %v3396_v56, %v3395_v29  ;;  %v3326_v15 = vpop.xlane.xlu1 %3325  ;;  %v3474_v5 = vsel %vm1939_vm9, %v3473_v22, 0.0 }
 0x55e   :  { %v3316_v23 = vrot.slane %v3315_v33, 2  ;;  %v3327_v19 = vsel %vm1939_vm9, %v3326_v15, 0.0  ;;  %v3475_v32 = vrot.slane %v3474_v5, 4 }
 0x55f   :  { %v3328_v6 = vrot.slane %v3327_v19, 4  ;;  %v3398_v35 = vrot.slane %v3397_v8, 2 }
 0x560   :  { %v3317_v59 = vadd.f32 %v3316_v23, %v3315_v33  ;;  %v3476_v9 = vadd.f32 %v3475_v32, %v3474_v5  ;;  %v3552_v14 = vpop.xlane.xlu0 %3551 }
 0x561   :  { %v3329_v57 = vadd.f32 %v3328_v6, %v3327_v19  ;;  %v3487_v50 = vpop.xlane.xlu1 %3486  ;;  %v3553_v44 = vsel %vm1939_vm9, %v3552_v14, 0.0  ;;  %v3399_v53 = vadd.f32 %v3398_v35, %v3397_v8  ;;  %v3340_v14 = vstv %s9781_s19 }
 0x562   :  { %v3318_v60 = vrot.slane %v3317_v59, 1  ;;  %v3477_v17 = vrot.slane %v3476_v9, 2  ;;  %v3488_v25 = vsel %vm1939_vm9, %v3487_v50, 0.0  ;;  %v3554_v7 = vrot.slane %v3553_v44, 4 }
 0x563   :  { %v3330_v12 = vrot.slane %v3329_v57, 2  ;;  %v3489_v42 = vrot.slane %v3488_v25, 4  ;;  %v3400_v55 = vrot.slane %v3399_v53, 1 }
 0x564   :  { %v3319_v63 = vadd.f32 %v3318_v60, %v3317_v59  ;;  %v3478_v21 = vadd.f32 %v3477_v17, %v3476_v9  ;;  %v3555_v51 = vadd.f32 %v3554_v7, %v3553_v44  ;;  %v3408_v46 = vpop.xlane.xlu0 %3407 }
 0x565   :  { %v3331_v40 = vadd.f32 %v3330_v12, %v3329_v57  ;;  %v3490_v38 = vadd.f32 %v3489_v42, %v3488_v25  ;;  %v3409_v0 = vsel %vm1939_vm9, %v3408_v46, 0.0  ;;  %v3401_v24 = vadd.f32 %v3400_v55, %v3399_v53 }
 0x566   :  { %v3479_v49 = vrot.slane %v3478_v21, 1  ;;  %v3556_v31 = vrot.slane %v3555_v51, 2  ;;  %v3334_v20 = vmul.f32 0.001953125, %v3319_v63  ;;  %v3410_v18 = vrot.slane %v3409_v0, 4 }
 0x567   :  { %v3332_v16 = vrot.slane %v3331_v40, 1  ;;  %v3491_v52 = vrot.slane %v3490_v38, 2  ;;  %v3416_v5 = vmul.f32 0.001953125, %v3401_v24  ;;  %v3347_v25 = vstv %s9784_s6  ;;  %v12241_v24 = vld [vmem:[#allocation37_spill] sm:$0xff] }
 0x568   :  { %v3480_v3 = vadd.f32 %v3479_v49, %v3478_v21  ;;  %v3557_v43 = vadd.f32 %v3556_v31, %v3555_v51  ;;  %v3336_v48 = vmul.f32 %v3334_v20, %v3334_v20  ;;  %v3566_v1 = vpop.xlane.xlu0 %3565  ;;  %v3411_v4 = vadd.f32 %v3410_v18, %v3409_v0  ;;  %v12240_v18 = vld [vmem:[#allocation33_spill] sm:$0xff] }
 0x569   :  { %v3333_v27 = vadd.f32 %v3332_v16, %v3331_v40  ;;  %v3492_v36 = vadd.f32 %v3491_v52, %v3490_v38  ;;  %v3567_v62 = vsel %vm1939_vm9, %v3566_v1, 0.0  ;;  %v3338_v35 = vsub.f32 %v9703_v41, %v3334_v20 }
 0x56a   :  { %v3495_v10 = vmul.f32 0.001953125, %v3480_v3  ;;  %v3558_v61 = vrot.slane %v3557_v43, 1  ;;  %v3412_v56 = vrot.slane %v3411_v4, 2  ;;  %v3568_v33 = vrot.slane %v3567_v62, 4 }
 0x56b   :  { %v3335_v47 = vmul.f32 0.001953125, %v3333_v27  ;;  %v3493_v2 = vrot.slane %v3492_v36, 1  ;;  %v3339_v57 = vsub.f32 %v9706_v45, %v3334_v20  ;;  %v3418_v44 = vmul.f32 %v3416_v5, %v3416_v5  ;;  %v12239_v27 = vld [vmem:[#allocation31_spill] sm:$0xff] }
 0x56c   :  { %v3497_v13 = vmul.f32 %v3495_v10, %v3495_v10  ;;  %v3413_v8 = vadd.f32 %v3412_v56, %v3411_v4  ;;  %v3569_v15 = vadd.f32 %v3568_v33, %v3567_v62  ;;  %v3559_v19 = vadd.f32 %v3558_v61, %v3557_v43  ;;  %v12242_v61 = vld [vmem:[#allocation34_spill] sm:$0xff] }
 0x56d   :  { %v3337_v30 = vsub.f32 %v3335_v47, %v3336_v48  ;;  %v3494_v39 = vadd.f32 %v3493_v2, %v3492_v36  ;;  %v3341_v42 = vmul.f32 %v3340_v14, %v3338_v35  ;;  %v3342_v63 = vmul.f32 %v3340_v14, %v3339_v57 }
 0x56e   :  { %v3414_v32 = vrot.slane %v3413_v8, 1  ;;  %v3570_v6 = vrot.slane %v3569_v15, 2  ;;  %v9793_v50 = vmul.f32 0.001953125, %v3559_v19  ;;  %v3499_v21 = vsub.f32 %v9717_v28, %v3495_v10 }
 0x56f   :  { %v3343_v29 = vadd.f32 1e-05, %v3337_v30  ;;  %v3496_v11 = vmul.f32 0.001953125, %v3494_v39  ;;  %v3500_v41 = vsub.f32 %v9720_v34, %v3495_v10  ;;  %v3501_v51 = vstv %s9786_s23 }
 0x570   :  { %v3415_v59 = vadd.f32 %v3414_v32, %v3413_v8  ;;  %v3571_v9 = vadd.f32 %v3570_v6, %v3569_v15  ;;  %v3576_v40 = vmul.f32 %v9793_v50, %v9793_v50  ;;  %v3502_v28 = vmul.f32 %v3501_v51, %v3499_v21  ;;  %v12243_v15 = vld [vmem:[#allocation30_spill] sm:$0xff] }
 0x571   :  { %3972 = vrsqrt.f32 %v3343_v29  ;;  %v3498_v22 = vsub.f32 %v3496_v11, %v3497_v13  ;;  %v3503_v16 = vmul.f32 %v3501_v51, %v3500_v41  ;;  %v3508_v52 = vstv %s9791_s5 }
 0x572   :  { %v3417_v60 = vmul.f32 0.001953125, %v3415_v59  ;;  %v3572_v17 = vrot.slane %v3571_v9, 1  ;;  %v3422_v47 = vstv %s9795_s21  ;;  %v3420_v48 = vsub.f32 %v9711_v54, %v3416_v5 }
 0x573   :  { %v3504_v23 = vadd.f32 1e-05, %v3498_v22  ;;  %v3421_v2 = vsub.f32 %v9714_v26, %v3416_v5  ;;  %v3580_v33 = vstv %s9803_s24  ;;  %v3578_v54 = vsub.f32 %v9758_v58, %v9793_v50 }
 0x574   :  { %v3419_v7 = vsub.f32 %v3417_v60, %v3418_v44  ;;  %v3573_v12 = vadd.f32 %v3572_v17, %v3571_v9  ;;  %v3423_v11 = vmul.f32 %v3422_v47, %v3420_v48  ;;  %v3579_v8 = vsub.f32 %v9760_v37, %v9793_v50 }
 0x575   :  { %3974 = vrsqrt.f32 %v3504_v23  ;;  %v3424_v56 = vmul.f32 %v3422_v47, %v3421_v2  ;;  %v3429_v19 = vstv %s9806_s22  ;;  %v12244_v32 = vlaneseq }
 0x576   :  { %v3425_v46 = vadd.f32 1e-05, %v3419_v7  ;;  %v3575_v38 = vmul.f32 0.001953125, %v3573_v12  ;;  %v3581_v35 = vmul.f32 %v3580_v33, %v3578_v54  ;;  %v3582_v44 = vmul.f32 %v3580_v33, %v3579_v8  ;;  %v12247_v12 = vld [vmem:[#allocation35_spill] sm:$0xff] }
 0x577   :  { %vm9825_vm0 = vcmp.lt.s32.totalorder %v12244_v32, 256 }
 0x578   :  { %3976 = vrsqrt.f32 %v3425_v46  ;;  %v3577_v31 = vsub.f32 %v3575_v38, %v3576_v40 }
 0x57a   :  { %v3583_v3 = vadd.f32 1e-05, %v3577_v31 }
 0x57b   :  { %v3973_v45 = vpop.eup %3972 }
 0x57c   :  { %v3345_v53 = vmul.f32 %v3973_v45, %v3341_v42  ;;  %v3346_v49 = vmul.f32 %v3973_v45, %v3342_v63  ;;  %3978 = vrsqrt.f32 %v3583_v3  ;;  %v12248_v63 = vld [vmem:[#allocation32_spill] sm:$0xff] }
 0x57e   :  { %v3348_v0 = vadd.f32 %v3347_v25, %v3345_v53  ;;  %v3349_v20 = vadd.f32 %v3347_v25, %v3346_v49  ;;  %v3587_v25 = vstv %s9813_s11 }
 0x57f   :  { %v3975_v34 = vpop.eup %3974 }
 0x580   :  { %v3350_v36 = vadd.f32 %v3348_v0, %v12239_v27  ;;  %v3351_v55 = vadd.f32 %v3349_v20, %v12240_v18  ;;  %v3506_v10 = vmul.f32 %v3975_v34, %v3502_v28  ;;  %v3507_v43 = vmul.f32 %v3975_v34, %v3503_v16  ;;  %v12249_v0 = vld [vmem:[#allocation38_spill] sm:$0xff]  ;;  %v12250_v28 = vld [vmem:[#allocation36_spill] sm:$0xff] }
 0x582   :  { %v3352_v1 = vmax.f32 %v3350_v36, 0.0  ;;  %v3353_v30 = vmax.f32 %v3351_v55, 0.0  ;;  %v3509_v39 = vadd.f32 %v3508_v52, %v3506_v10  ;;  %v3510_v4 = vadd.f32 %v3508_v52, %v3507_v43  ;;  %v3977_v23 = vpop.eup %3976 }
 0x583   :  { %v3427_v59 = vmul.f32 %v3977_v23, %v3423_v11  ;;  %v3428_v9 = vmul.f32 %v3977_v23, %v3424_v56 }
 0x584   :  { %v3511_v13 = vadd.f32 %v3509_v39, %v12241_v24  ;;  %v3512_v62 = vadd.f32 %v3510_v4, %v12242_v61  ;;  %v3356_v29 = vcombine.low %v3352_v1, %v3353_v30 }
 0x585   :  { %v3430_v60 = vadd.f32 %v3429_v19, %v3427_v59  ;;  %v3431_v37 = vadd.f32 %v3429_v19, %v3428_v9 }
 0x586   :  { %v3513_v26 = vmax.f32 %v3511_v13, 0.0  ;;  %v3514_v22 = vmax.f32 %v3512_v62, 0.0  ;;  %v3363_v5 = vrot.slane %v3356_v29, %v12243_v15  ;;  %v3979_v17 = vpop.eup %3978 }
 0x587   :  { %v3432_v42 = vadd.f32 %v3430_v60, %v12247_v12  ;;  %v3433_v21 = vadd.f32 %v3431_v37, %v12248_v63  ;;  %v3585_v41 = vmul.f32 %v3979_v17, %v3581_v35  ;;  %v3586_v45 = vmul.f32 %v3979_v17, %v3582_v44 }
 0x588   :  { %v3364_v14 = vcombine.high %v3363_v5, %v3363_v5  ;;  %v3371_v58 = vrot.slane %v3363_v5, %v12243_v15  ;;  %v3517_v57 = vcombine.low %v3513_v26, %v3514_v22 }
 0x589   :  { %v3434_v40 = vmax.f32 %v3432_v42, 0.0  ;;  %v3435_v38 = vmax.f32 %v3433_v21, 0.0  ;;  %v3588_v53 = vadd.f32 %v3587_v25, %v3585_v41  ;;  %v3589_v49 = vadd.f32 %v3587_v25, %v3586_v45 }
 0x58a   :  { %v3378_v50 = vrot.slane %v3364_v14, %v12243_v15  ;;  %3385 = vst.msk [vmem:[#allocation15] ss:$4 sm:$0x3] %vm9825_vm0, %v3371_v58  ;;  %v3524_v7 = vrot.slane %v3517_v57, %v12243_v15 }
 0x58b   :  { %v3590_v20 = vadd.f32 %v3588_v53, %v12249_v0  ;;  %v3591_v16 = vadd.f32 %v3589_v49, %v12250_v28  ;;  %v3438_v34 = vcombine.low %v3434_v40, %v3435_v38 }
 0x58c   :  { %3387 = vst.msk [vmem:[#allocation15 + $0x8] ss:$4 sm:$0x3] %vm9825_vm0, %v3378_v50  ;;  %v3525_v51 = vcombine.high %v3524_v7, %v3524_v7  ;;  %v3532_v46 = vrot.slane %v3524_v7, %v12243_v15 }
 0x58d   :  { %v3592_v52 = vmax.f32 %v3590_v20, 0.0  ;;  %v3593_v3 = vmax.f32 %v3591_v16, 0.0  ;;  %v3445_v27 = vrot.slane %v3438_v34, %v12243_v15 }
 0x58e   :  { %v3539_v31 = vrot.slane %v3525_v51, %v12243_v15  ;;  %3543 = vst.msk [vmem:[#allocation15 + $0x2] ss:$4 sm:$0x3] %vm9825_vm0, %v3532_v46 }
 0x58f   :  { %v3446_v36 = vcombine.high %v3445_v27, %v3445_v27  ;;  %v3453_v18 = vrot.slane %v3445_v27, %v12243_v15  ;;  %v3596_v55 = vcombine.low %v3592_v52, %v3593_v3 }
 0x590   :  { %3545 = vst.msk [vmem:[#allocation15 + $0xa] ss:$4 sm:$0x3] %vm9825_vm0, %v3539_v31 }
 0x591   :  { %v3460_v10 = vrot.slane %v3446_v36, %v12243_v15  ;;  %3464 = vst.msk [vmem:[#allocation15 + $0x1] ss:$4 sm:$0x3] %vm9825_vm0, %v3453_v18  ;;  %v3603_v43 = vrot.slane %v3596_v55, %v12243_v15 }
 0x593   :  { %3466 = vst.msk [vmem:[#allocation15 + $0x9] ss:$4 sm:$0x3] %vm9825_vm0, %v3460_v10  ;;  %v3604_v47 = vcombine.high %v3603_v43, %v3603_v43  ;;  %v3611_v48 = vrot.slane %v3603_v43, %v12243_v15 }
 0x595   :  { %v3618_v2 = vrot.slane %v3604_v47, %v12243_v15  ;;  %3622 = vst.msk [vmem:[#allocation15 + $0x3] ss:$4 sm:$0x3] %vm9825_vm0, %v3611_v48 }
 0x597   :  { %3624 = vst.msk [vmem:[#allocation15 + $0xb] ss:$4 sm:$0x3] %vm9825_vm0, %v3618_v2 }
 0x598   :  { %4093 = shalt.err (!%p4090_p0)
}
 0x599   :  { %s12251_s13 = sld [smem:[#allocation356_spill]] }
 0x59f   :  { %s4094_s30 = scalar_lea.hbm %s12251_s13, 256 }
 0x5a0   :  { %p4095_p1 = scmp.ne.s32.totalorder %s12251_s13, %s4094_s30  ;;  %p4098_p2 = scmp.lt.u32.totalorder %s4094_s30, %s12251_s13 }
 0x5a2   :  { %p4100_p3 = pnand %p4098_p2, %p4095_p1 }
 0x5a4   :  { %4103 = shalt.err (!%p4100_p3)
}
 0x5a5   :  { %s12252_s20 = smov 8   ;;  %s12253_s26 = smov 128  }
 0x5a6   :  { %3636 = dma.vmem_to_hbm [thread:$0]  %s3631_s2, 256, %s12251_s13, [#allocation4], %s12253_s26, %s12253_s26, %s12252_s20  }
 0x5a7   :  { %4114 = dma.done.wait [#allocation4], 256  }
 0x5a8   :  { %4115 = vsyncadd [#allocation4], 4294967040 }
 0x5a9   :  { %3640 = vsyncpa [#allocation3], 1 }
 0x5aa   :  { %3641 = vsyncpa [#allocation4], 1 }
 0x5ab   :  { %3642 = vsyncpa [#allocation5], 1 }
 0x5ac   :  { %3643 = vsyncpa [#allocation8], 1 }
 0x5ad   :  { %3644 = vsyncpa [#allocation11], 1 }
 0x5ae   :  { %3645 = vsyncpa [#allocation14], 1 }

</bundles_post_ra>
